<compile_context>
chip_gen: v7x
topology: tpu7x:2x2x1
jax: 0.10.0
libtpu: 0.0.40
codegen_flags: <defaults>
</compile_context>

<pallas_src>
import numpy as np
import jax
import jax.numpy as jnp
from jax.experimental import pallas as pl
from jax.experimental.pallas import tpu as pltpu

# ---------------- configuration (small, consistent with the module) ----------------
VOCAB_SIZE   = 100            # config.word_alphabet_size
WORD_DIM     = 32             # config.word_emb_dim
FILTER_SIZES = (2, 3, 4)      # config.filters_size
NUM_FILTERS  = (16, 16, 16)   # config.num_filters
HIDDEN_DIM   = sum(NUM_FILTERS)   # config.HP_hidden_dim (classifier input)
NUM_CLASSES  = 3

BATCH_SIZE     = 10
MAX_CLAIMS_NUM = 8
DOC_LEN        = 12
CLAIM_LEN      = 4
SEQ_LEN        = DOC_LEN + CLAIM_LEN      # doc tokens repeated per claim + claim tokens
N_ROWS         = BATCH_SIZE * MAX_CLAIMS_NUM

K_MIN, K_MAX = min(FILTER_SIZES), max(FILTER_SIZES)
T_OUT  = SEQ_LEN - K_MIN + 1                 # 15 real conv time positions (widest bank)
T_PAD  = ((T_OUT + 7) // 8) * 8              # 16 -> 8-aligned, reshapes are layout-free
L_NEED = T_PAD + K_MAX - 1                   # 19 token positions needed per row
V_PAD  = ((VOCAB_SIZE + 127) // 128) * 128   # 128 vocab rows (lane width)
F_PAD  = 128                                 # filters / classes padded to lane width
NEG    = -1e30


# ---------------------------------- Pallas kernel ----------------------------------
def _textcnn_kernel(ids_ref, wfold_ref, bm_ref, wc_ref, bc_ref, mask_ref, o_ref):
    """Fused TextCNN forward for one row tile.

    ids_ref  : (tn*T_PAD, K_MAX)    int32  windowed ids: [(row, t), j] -> token[row, t+j]
    wfold_ref: (K_MAX*V_PAD, F_PAD) bf16   embedding folded into merged im2col conv weight
    bm_ref   : (1, F_PAD)           f32    merged conv bias
    wc_ref   : (F_PAD, F_PAD)       bf16   classifier weight (rows>=HIDDEN, cols>=3 zero)
    bc_ref   : (1, F_PAD)           f32    classifier bias (-1e30 on padded classes)
    mask_ref : (T_PAD, F_PAD)       f32    additive -1e30 mask for invalid time positions
    o_ref    : (tn, F_PAD)          f32    log_softmax (first NUM_CLASSES lanes are real)
    """
    r, k_max = ids_ref.shape
    v_pad = wfold_ref.shape[0] // k_max
    t_pad, f_pad = mask_ref.shape
    tn = r // t_pad

    # ---- one-hot of the token windows from a lane-only iota (exact in bf16) ----------
    ids = ids_ref[...]                                               # (R, K_MAX) int32
    iota_v = jax.lax.broadcasted_iota(jnp.int32, (1, v_pad), 1)      # (1, V_PAD)
    onehot = jnp.concatenate(
        [(ids[:, j:j + 1] == iota_v).astype(jnp.bfloat16) for j in range(k_max)],
        axis=-1)                                                     # (R, K_MAX*V_PAD)

    # ---- embedding gather + ALL conv banks as ONE 2-D bf16 matmul, K = 512 ------------
    s = jnp.dot(onehot, wfold_ref[...],
                preferred_element_type=jnp.float32)                  # (R, F_PAD) f32
    s = s.reshape(tn, t_pad, f_pad)                                  # layout-free split

    # relu(conv + bias), mask invalid/padded time positions, max-pool over time.
    s = jnp.maximum(s + bm_ref[...], 0.0) + mask_ref[...]
    feat = jnp.max(s, axis=1)                                        # (tn, F_PAD)
    # cnn_dropout is identity at inference time.

    # ---- classifier: bf16 MXU matmul (f32 accumulate) + stable 128-lane log_softmax ---
    logits = jnp.dot(feat.astype(jnp.bfloat16), wc_ref[...],
                     preferred_element_type=jnp.float32) + bc_ref[...]
    m = jnp.max(logits, axis=-1, keepdims=True)
    z = logits - m
    lse = jnp.log(jnp.sum(jnp.exp(z), axis=-1, keepdims=True))
    o_ref[...] = z - lse


# ------------------------------ wrapper / param packing ------------------------------
def _pack_kernel_params(params):
    """Fold the embedding into the merged im2col conv weight and lane-pad everything."""
    emb32 = np.asarray(params["embedding"].astype(jnp.float32))          # (V_PAD, D)

    wfold = np.zeros((K_MAX * V_PAD, F_PAD), np.float32)
    bm = np.zeros((1, F_PAD), np.float32)
    mask = np.zeros((T_PAD, F_PAD), np.float32)
    mask[T_OUT:, :] = NEG                       # padded time rows invalid for every lane
    off = 0
    for (w, b), k in zip(params["convs"], FILTER_SIZES):
        nf = w.shape[-1]
        w32 = np.asarray(w.astype(jnp.float32))                          # (k, D, nf)
        for j in range(k):
            # fold: one-hot(token) @ (emb @ w_j) == (emb[token]) @ w_j
            wfold[j * V_PAD:(j + 1) * V_PAD, off:off + nf] = emb32 @ w32[j]
        bm[0, off:off + nf] = np.asarray(b)
        mask[SEQ_LEN - k + 1:, off:off + nf] = NEG    # invalid trailing positions, bank k
        off += nf

    wc, bc = params["classifier"]
    wc_pad = np.zeros((F_PAD, F_PAD), np.float32)
    wc_pad[:HIDDEN_DIM, :NUM_CLASSES] = np.asarray(wc.astype(jnp.float32))
    bc_pad = np.full((1, F_PAD), NEG, np.float32)
    bc_pad[0, :NUM_CLASSES] = np.asarray(bc)

    return (jnp.asarray(wfold, jnp.bfloat16), jnp.asarray(bm, jnp.float32),
            jnp.asarray(wc_pad, jnp.bfloat16), jnp.asarray(bc_pad, jnp.float32),
            jnp.asarray(mask, jnp.float32))


def _pick_row_tile(n_rows):
    """One grid step per TensorCore: v7x has 2 TCs/chip, v5e/v6e have 1."""
    try:
        kind = jax.devices()[0].device_kind.lower()
        n_cores = 2 if ("v7" in kind or "7x" in kind) else 1
    except Exception:
        n_cores = 1
    tile = -(-n_rows // n_cores)                 # ceil
    return ((tile + 7) // 8) * 8                 # sublane-align


def textcnn_forward(tokens, params, *, tn=None):
    """tokens: (N, SEQ_LEN) int32 ids. Returns log_softmax logits (N, NUM_CLASSES) f32."""
    n, l = tokens.shape
    assert l == SEQ_LEN
    if tn is None:
        tn = _pick_row_tile(n)
    assert tn % 8 == 0
    n_pad = ((n + tn - 1) // tn) * tn

    wfold, bm, wc, bc, mask = _pack_kernel_params(params)

    # ids-only streaming: pad rows / trailing positions with token 0, whose folded
    # embedding rows are all-zero; padded rows' outputs are sliced off below.
    ids = jnp.zeros((n_pad, L_NEED), jnp.int32).at[:n, :l].set(tokens)
    ids_cols = jnp.stack([ids[:, j:j + T_PAD] for j in range(K_MAX)],
                         axis=-1).reshape(n_pad * T_PAD, K_MAX)

    def resident(a):
        return pl.BlockSpec(a.shape, lambda i: (0, 0))     # constant index map

    out = pl.pallas_call(
        _textcnn_kernel,
        out_shape=jax.ShapeDtypeStruct((n_pad, F_PAD), jnp.float32),
        grid_spec=pltpu.PrefetchScalarGridSpec(
            num_scalar_prefetch=0,
            grid=(n_pad // tn,),
            in_specs=[
                pl.BlockSpec((tn * T_PAD, K_MAX), lambda i: (i, 0)),  # streamed ids
                resident(wfold), resident(bm), resident(wc),
                resident(bc), resident(mask),
            ],
            out_specs=pl.BlockSpec((tn, F_PAD), lambda i: (i, 0)),    # lane-dense output
        ),
        compiler_params=pltpu.CompilerParams(
            dimension_semantics=("parallel",),     # v7x: one step per TensorCore
        ),
    )(ids_cols, wfold, bm, wc, bc, mask)

    return out[:n, :NUM_CLASSES]


# ------------------------------ parameter construction ------------------------------
def init_params(key):
    keys = jax.random.split(key, 1 + 2 * len(FILTER_SIZES) + 2)
    it = iter(keys)

    # word embedding: uniform(-sqrt(3/D), sqrt(3/D)); padding_idx=0 row and vocab-pad rows zeroed
    scale = np.sqrt(3.0 / WORD_DIM)
    emb = jax.random.uniform(next(it), (V_PAD, WORD_DIM),
                             minval=-scale, maxval=scale, dtype=jnp.float32)
    emb = emb.at[0].set(0.0).at[VOCAB_SIZE:].set(0.0).astype(jnp.bfloat16)

    convs = []
    for k, nf in zip(FILTER_SIZES, NUM_FILTERS):
        # torch Conv2d(1, nf, (k, D)) weight is (nf, 1, k, D); stored as (k, D, nf)
        w = (0.1 * jax.random.normal(next(it), (k, WORD_DIM, nf), jnp.float32)).astype(jnp.bfloat16)
        b = 0.1 * jax.random.normal(next(it), (nf,), jnp.float32)
        convs.append((w, b))

    # torch Linear(HIDDEN_DIM, 3): weight (3, HIDDEN_DIM); stored transposed (HIDDEN_DIM, 3)
    wc = (0.1 * jax.random.normal(next(it), (HIDDEN_DIM, NUM_CLASSES), jnp.float32)).astype(jnp.bfloat16)
    bc = 0.1 * jax.random.normal(next(it), (NUM_CLASSES,), jnp.float32)
    return {"embedding": emb, "convs": tuple(convs), "classifier": (wc, bc)}


# ---------------------------------- pure-JAX reference ------------------------------
def reference_forward(tokens, params):
    """f32 reference of the original (unfolded, unmerged) TextCNN path, from token ids."""
    emb = params["embedding"].astype(jnp.float32)
    x = jnp.take(emb, tokens, axis=0)                        # (N, L, D)
    feats = []
    for (w, b), k in zip(params["convs"], FILTER_SIZES):
        w = w.astype(jnp.float32)
        t_out = x.shape[1] - k + 1
        s = sum(jnp.einsum("ntd,df->ntf", x[:, j:j + t_out, :], w[j]) for j in range(k))
        s = jax.nn.relu(s + b[None, None, :])
        feats.append(jnp.max(s, axis=1))
    feat = jnp.concatenate(feats, axis=-1)                   # (N, HIDDEN_DIM)
    wc, bc = params["classifier"]
    logits = feat @ wc.astype(jnp.float32) + bc[None, :]
    return jax.nn.log_softmax(logits, axis=-1)


# ---------------------------------------- main ---------------------------------------
if __name__ == "__main__":
    key = jax.random.PRNGKey(0)
    k_par, k_doc, k_claim, k_y = jax.random.split(key, 4)
    params = init_params(k_par)

    # deterministic synthetic inputs
    input_x = jax.random.randint(k_doc, (BATCH_SIZE, DOC_LEN), 1, VOCAB_SIZE, dtype=jnp.int32)
    batch_claim_ids = jax.random.randint(
        k_claim, (BATCH_SIZE, MAX_CLAIMS_NUM, CLAIM_LEN), 1, VOCAB_SIZE, dtype=jnp.int32)
    input_claims_y = jax.random.randint(
        k_y, (BATCH_SIZE, MAX_CLAIMS_NUM), 0, NUM_CLASSES, dtype=jnp.int32)

    # glue: repeat doc tokens per claim, concat claim tokens (ids only — gather is fused)
    doc_rep = jnp.broadcast_to(input_x[:, None, :], (BATCH_SIZE, MAX_CLAIMS_NUM, DOC_LEN))
    tokens = jnp.concatenate([doc_rep, batch_claim_ids], axis=2).reshape(N_ROWS, SEQ_LEN)

    # Pallas kernel: embedding gather + conv + relu + max-pool + linear + log_softmax
    log_probs = textcnn_forward(tokens, params)
    log_probs = jax.block_until_ready(log_probs)

    # glue: predictions + NLLLoss(ignore_index=-1) as in neg_log_likelihood_loss
    claim_predicts = jnp.argmax(log_probs, axis=-1).reshape(BATCH_SIZE, MAX_CLAIMS_NUM)
    y = input_claims_y.reshape(-1)
    valid = (y != -1)
    picked = jnp.take_along_axis(log_probs, jnp.clip(y, 0)[:, None], axis=1)[:, 0]
    loss_claim = -jnp.sum(jnp.where(valid, picked, 0.0)) / jnp.maximum(jnp.sum(valid), 1)

    # correctness check against the pure-JAX reference
    ref = reference_forward(tokens, params)
    np.testing.assert_allclose(np.asarray(log_probs), np.asarray(ref), rtol=2e-2, atol=2e-2)
    jax.block_until_ready((claim_predicts, loss_claim))

    print("KERNEL_OK")
</pallas_src>

<mosaic_0001>
module attributes {stable_mosaic.version = 11 : i64} {
  func.func @_textcnn_kernel(%arg0: i32, %arg1: memref<1280x4xi32, #tpu.memory_space<vmem>>, %arg2: memref<512x128xbf16, #tpu.memory_space<vmem>>, %arg3: memref<1x128xf32, #tpu.memory_space<vmem>>, %arg4: memref<128x128xbf16, #tpu.memory_space<vmem>>, %arg5: memref<1x128xf32, #tpu.memory_space<vmem>>, %arg6: memref<16x128xf32, #tpu.memory_space<vmem>>, %arg7: memref<80x128xf32, #tpu.memory_space<vmem>>) attributes {dimension_semantics = [#tpu.dimension_semantics<parallel>], iteration_bounds = array<i64: 1>, scalar_prefetch = 0 : i64, scratch_operands = 0 : i64, tpu.core_type = #tpu.core_type<tc>, window_params = [{transform_indices = @transform_0, window_bounds = array<i64: 1280, 4>}, {pipeline_mode = #tpu.pipeline_mode<synchronous>, transform_indices = @transform_1, window_bounds = array<i64: 512, 128>}, {pipeline_mode = #tpu.pipeline_mode<synchronous>, transform_indices = @transform_2, window_bounds = array<i64: 1, 128>}, {pipeline_mode = #tpu.pipeline_mode<synchronous>, transform_indices = @transform_3, window_bounds = array<i64: 128, 128>}, {pipeline_mode = #tpu.pipeline_mode<synchronous>, transform_indices = @transform_4, window_bounds = array<i64: 1, 128>}, {pipeline_mode = #tpu.pipeline_mode<synchronous>, transform_indices = @transform_5, window_bounds = array<i64: 16, 128>}, {transform_indices = @transform_6, window_bounds = array<i64: 80, 128>}]} {
    %c0 = arith.constant 0 : index
    %c0_0 = arith.constant 0 : index
    %0 = vector.load %arg1[%c0, %c0_0] : memref<1280x4xi32, #tpu.memory_space<vmem>>, vector<1280x4xi32>
    %1 = tpu.iota {dimensions = array<i32: 1>} : vector<1x128xi32>
    %2 = vector.extract_strided_slice %0 {offsets = [0, 0], sizes = [1280, 1], strides = [1, 1]} : vector<1280x4xi32> to vector<1280x1xi32>
    %3 = vector.broadcast %2 : vector<1280x1xi32> to vector<1280x128xi32>
    %4 = vector.broadcast %1 : vector<1x128xi32> to vector<1280x128xi32>
    %5 = arith.cmpi eq, %3, %4 : vector<1280x128xi32>
    %6 = arith.extui %5 : vector<1280x128xi1> to vector<1280x128xi32>
    %7 = arith.sitofp %6 : vector<1280x128xi32> to vector<1280x128xf32>
    %8 = arith.truncf %7 : vector<1280x128xf32> to vector<1280x128xbf16>
    %9 = vector.extract_strided_slice %0 {offsets = [0, 1], sizes = [1280, 1], strides = [1, 1]} : vector<1280x4xi32> to vector<1280x1xi32>
    %10 = vector.broadcast %9 : vector<1280x1xi32> to vector<1280x128xi32>
    %11 = vector.broadcast %1 : vector<1x128xi32> to vector<1280x128xi32>
    %12 = arith.cmpi eq, %10, %11 : vector<1280x128xi32>
    %13 = arith.extui %12 : vector<1280x128xi1> to vector<1280x128xi32>
    %14 = arith.sitofp %13 : vector<1280x128xi32> to vector<1280x128xf32>
    %15 = arith.truncf %14 : vector<1280x128xf32> to vector<1280x128xbf16>
    %16 = vector.extract_strided_slice %0 {offsets = [0, 2], sizes = [1280, 1], strides = [1, 1]} : vector<1280x4xi32> to vector<1280x1xi32>
    %17 = vector.broadcast %16 : vector<1280x1xi32> to vector<1280x128xi32>
    %18 = vector.broadcast %1 : vector<1x128xi32> to vector<1280x128xi32>
    %19 = arith.cmpi eq, %17, %18 : vector<1280x128xi32>
    %20 = arith.extui %19 : vector<1280x128xi1> to vector<1280x128xi32>
    %21 = arith.sitofp %20 : vector<1280x128xi32> to vector<1280x128xf32>
    %22 = arith.truncf %21 : vector<1280x128xf32> to vector<1280x128xbf16>
    %23 = vector.extract_strided_slice %0 {offsets = [0, 3], sizes = [1280, 1], strides = [1, 1]} : vector<1280x4xi32> to vector<1280x1xi32>
    %24 = vector.broadcast %23 : vector<1280x1xi32> to vector<1280x128xi32>
    %25 = vector.broadcast %1 : vector<1x128xi32> to vector<1280x128xi32>
    %26 = arith.cmpi eq, %24, %25 : vector<1280x128xi32>
    %27 = arith.extui %26 : vector<1280x128xi1> to vector<1280x128xi32>
    %28 = arith.sitofp %27 : vector<1280x128xi32> to vector<1280x128xf32>
    %29 = arith.truncf %28 : vector<1280x128xf32> to vector<1280x128xbf16>
    %30 = tpu.concatenate %8, %15, %22, %29 in 1 : vector<1280x128xbf16>, vector<1280x128xbf16>, vector<1280x128xbf16>, vector<1280x128xbf16> -> vector<1280x512xbf16>
    %c0_1 = arith.constant 0 : index
    %c0_2 = arith.constant 0 : index
    %31 = vector.load %arg2[%c0_1, %c0_2] : memref<512x128xbf16, #tpu.memory_space<vmem>>, vector<512x128xbf16>
    %cst = arith.constant dense<0.000000e+00> : vector<1280x128xf32>
    %32 = tpu.matmul %30, %31, %cst {dimension_numbers = #tpu.dot_dimension_numbers<[1], [0], [0], [1], [0, 0, 1, 1], [], []>} : vector<1280x512xbf16>, vector<512x128xbf16>, vector<1280x128xf32> -> vector<1280x128xf32>
    %33 = vector.shape_cast %32 : vector<1280x128xf32> to vector<80x16x128xf32>
    %c0_3 = arith.constant 0 : index
    %c0_4 = arith.constant 0 : index
    %34 = vector.load %arg3[%c0_3, %c0_4] : memref<1x128xf32, #tpu.memory_space<vmem>>, vector<1x128xf32>
    %35 = vector.shape_cast %34 : vector<1x128xf32> to vector<1x1x128xf32>
    %36 = vector.broadcast %35 : vector<1x1x128xf32> to vector<80x16x128xf32>
    %37 = arith.addf %33, %36 : vector<80x16x128xf32>
    %cst_5 = arith.constant 0.000000e+00 : f32
    %38 = vector.broadcast %cst_5 : f32 to vector<80x16x128xf32>
    %39 = arith.maximumf %37, %38 : vector<80x16x128xf32>
    %c0_6 = arith.constant 0 : index
    %c0_7 = arith.constant 0 : index
    %40 = vector.load %arg6[%c0_6, %c0_7] : memref<16x128xf32, #tpu.memory_space<vmem>>, vector<16x128xf32>
    %41 = vector.shape_cast %40 : vector<16x128xf32> to vector<1x16x128xf32>
    %42 = vector.broadcast %41 : vector<1x16x128xf32> to vector<80x16x128xf32>
    %43 = arith.addf %39, %42 : vector<80x16x128xf32>
    %cst_8 = arith.constant dense<0xFF800000> : vector<80x128xf32>
    %44 = vector.multi_reduction <maximumf>, %43, %cst_8 [1] : vector<80x16x128xf32> to vector<80x128xf32>
    %45 = arith.truncf %44 : vector<80x128xf32> to vector<80x128xbf16>
    %c0_9 = arith.constant 0 : index
    %c0_10 = arith.constant 0 : index
    %46 = vector.load %arg4[%c0_9, %c0_10] : memref<128x128xbf16, #tpu.memory_space<vmem>>, vector<128x128xbf16>
    %cst_11 = arith.constant dense<0.000000e+00> : vector<80x128xf32>
    %47 = tpu.matmul %45, %46, %cst_11 {dimension_numbers = #tpu.dot_dimension_numbers<[1], [0], [0], [1], [0, 0, 1, 1], [], []>} : vector<80x128xbf16>, vector<128x128xbf16>, vector<80x128xf32> -> vector<80x128xf32>
    %c0_12 = arith.constant 0 : index
    %c0_13 = arith.constant 0 : index
    %48 = vector.load %arg5[%c0_12, %c0_13] : memref<1x128xf32, #tpu.memory_space<vmem>>, vector<1x128xf32>
    %49 = vector.broadcast %48 : vector<1x128xf32> to vector<80x128xf32>
    %50 = arith.addf %47, %49 : vector<80x128xf32>
    %cst_14 = arith.constant dense<0xFF800000> : vector<80xf32>
    %51 = vector.multi_reduction <maximumf>, %50, %cst_14 [1] : vector<80x128xf32> to vector<80xf32>
    %52 = vector.shape_cast %51 : vector<80xf32> to vector<80x1xf32>
    %53 = vector.broadcast %52 : vector<80x1xf32> to vector<80x128xf32>
    %54 = arith.subf %50, %53 : vector<80x128xf32>
    %55 = math.exp %54 : vector<80x128xf32>
    %cst_15 = arith.constant dense<0.000000e+00> : vector<80xf32>
    %56 = vector.multi_reduction <add>, %55, %cst_15 [1] : vector<80x128xf32> to vector<80xf32>
    %57 = vector.shape_cast %56 : vector<80xf32> to vector<80x1xf32>
    %58 = math.log %57 : vector<80x1xf32>
    %59 = vector.broadcast %58 : vector<80x1xf32> to vector<80x128xf32>
    %60 = arith.subf %54, %59 : vector<80x128xf32>
    %c0_16 = arith.constant 0 : index
    %c0_17 = arith.constant 0 : index
    %61 = vector.load %arg7[%c0_16, %c0_17] : memref<80x128xf32, #tpu.memory_space<vmem>>, vector<80x128xf32>
    tpu.vector_store %arg7[%c0_16, %c0_17], %60 {strides = array<i32>} : memref<80x128xf32, #tpu.memory_space<vmem>>, vector<80x128xf32>,
    return
  }
  func.func @transform_0(%arg0: i32) -> (i32, i32) {
    %c0_i32 = arith.constant 0 : i32
    %c0_i32_0 = arith.constant 0 : i32
    return %arg0, %c0_i32 : i32, i32
  }
  func.func @transform_1(%arg0: i32) -> (i32, i32) {
    %c0_i32 = arith.constant 0 : i32
    %c0_i32_0 = arith.constant 0 : i32
    %c0_i32_1 = arith.constant 0 : i32
    return %c0_i32, %c0_i32_0 : i32, i32
  }
  func.func @transform_2(%arg0: i32) -> (i32, i32) {
    %c0_i32 = arith.constant 0 : i32
    %c0_i32_0 = arith.constant 0 : i32
    %c0_i32_1 = arith.constant 0 : i32
    return %c0_i32, %c0_i32_0 : i32, i32
  }
  func.func @transform_3(%arg0: i32) -> (i32, i32) {
    %c0_i32 = arith.constant 0 : i32
    %c0_i32_0 = arith.constant 0 : i32
    %c0_i32_1 = arith.constant 0 : i32
    return %c0_i32, %c0_i32_0 : i32, i32
  }
  func.func @transform_4(%arg0: i32) -> (i32, i32) {
    %c0_i32 = arith.constant 0 : i32
    %c0_i32_0 = arith.constant 0 : i32
    %c0_i32_1 = arith.constant 0 : i32
    return %c0_i32, %c0_i32_0 : i32, i32
  }
  func.func @transform_5(%arg0: i32) -> (i32, i32) {
    %c0_i32 = arith.constant 0 : i32
    %c0_i32_0 = arith.constant 0 : i32
    %c0_i32_1 = arith.constant 0 : i32
    return %c0_i32, %c0_i32_0 : i32, i32
  }
  func.func @transform_6(%arg0: i32) -> (i32, i32) {
    %c0_i32 = arith.constant 0 : i32
    %c0_i32_0 = arith.constant 0 : i32
    return %arg0, %c0_i32 : i32, i32
  }
}

</mosaic_0001>

<bundles_post_ra>
// kernel: tpu_custom_call.1
= control target key start
LH: loop header
LB: loop body
LE: loop exit
PB: predicated region body
PF: predicated region fallthrough
CT: control target
= control target key end

     0   :  { %v14955_v2 = vmov 0   ;;  %s14948_s0 = inlined_call_operand.vmem [shape: s32[1280,4], index: 0, kind: input, shape index: {}]   ;;  %s14949_s1 = inlined_call_operand.vmem [shape: bf16[512,128], index: 1, kind: input, shape index: {}]   ;;  %s14950_s2 = inlined_call_operand.vmem [shape: f32[1,128], index: 2, kind: input, shape index: {}]   ;;  %s14951_s3 = inlined_call_operand.vmem [shape: bf16[128,128], index: 3, kind: input, shape index: {}]   ;;  %s14952_s4 = inlined_call_operand.vmem [shape: f32[1,128], index: 4, kind: input, shape index: {}]   ;;  %s14953_s5 = inlined_call_operand.vmem [shape: f32[16,128], index: 5, kind: input, shape index: {}]   ;;  %s14954_s6 = inlined_call_operand.hbm [shape: f32[80,128], index: 6, kind: output, shape index: {}]  }
   0x1   :  { %v27_v0 = vld [vmem:[%s14948_s0 + $0x10] sm:$0xff]  ;;  %v25_v1 = vld [vmem:[%s14948_s0] sm:$0xff]  ;;  %8993 = vset.pattern.permute.xlu1 %v14955_v2  ;;  %8992 = vset.pattern.permute.xlu0 %v14955_v2  ;;  %v28_v3 = vld [vmem:[%s14948_s0 + $0x18] sm:$0xff] }
   0x2   :  { %194 = vperm.xlu1 %8993, %v27_v0   ;;  %188 = vperm.xlu0 %8992, %v25_v1   ;;  %v26_v4 = vld [vmem:[%s14948_s0 + $0x8] sm:$0xff]  ;;  %v29_v6 = vld [vmem:[%s14948_s0 + $0x20] sm:$0xff]  ;;  %v32_v7 = vld [vmem:[%s14948_s0 + $0x38] sm:$0xff] }
   0x3   :  { %4603 = vmatprep.subr.bf16.mxu0 %v14955_v2  ;;  %5276 = vmatprep.subr.bf16.mxu1 %v14955_v2  ;;  %v30_v5 = vld [vmem:[%s14948_s0 + $0x28] sm:$0xff]  ;;  %v31_v8 = vld [vmem:[%s14948_s0 + $0x30] sm:$0xff]  ;;  %v33_v10 = vld [vmem:[%s14948_s0 + $0x40] sm:$0xff] }
   0x4   :  { %v34_v9 = vld [vmem:[%s14948_s0 + $0x48] sm:$0xff]  ;;  %v36_v11 = vld [vmem:[%s14948_s0 + $0x58] sm:$0xff]  ;;  %v35_v12 = vld [vmem:[%s14948_s0 + $0x50] sm:$0xff] }
   0x5   :  { %v38_v13 = vld [vmem:[%s14948_s0 + $0x68] sm:$0xff]  ;;  %v37_v14 = vld [vmem:[%s14948_s0 + $0x60] sm:$0xff]  ;;  %v40_v15 = vld [vmem:[%s14948_s0 + $0x78] sm:$0xff] }
   0x6   :  { %197 = vperm.xlu1 %8993, %v28_v3   ;;  %191 = vperm.xlu0 %8992, %v26_v4   ;;  %v39_v16 = vld [vmem:[%s14948_s0 + $0x70] sm:$0xff]  ;;  %v42_v17 = vld [vmem:[%s14948_s0 + $0x88] sm:$0xff]  ;;  %v41_v18 = vld [vmem:[%s14948_s0 + $0x80] sm:$0xff] }
   0x7   :  { %v44_v19 = vld [vmem:[%s14948_s0 + $0x98] sm:$0xff]  ;;  %v43_v20 = vld [vmem:[%s14948_s0 + $0x90] sm:$0xff]  ;;  %v46_v21 = vld [vmem:[%s14948_s0 + $0xa8] sm:$0xff] }
   0x8   :  { %v45_v22 = vld [vmem:[%s14948_s0 + $0xa0] sm:$0xff]  ;;  %v48_v23 = vld [vmem:[%s14948_s0 + $0xb8] sm:$0xff]  ;;  %v9710_v24 = vld [vmem:[%s14948_s0 + $0xb0] sm:$0xff] }
   0x9   :  { %v9715_v25 = vld [vmem:[%s14948_s0 + $0xc8] sm:$0xff]  ;;  %v9720_v26 = vld [vmem:[%s14948_s0 + $0xc0] sm:$0xff]  ;;  %v9726_v27 = vld [vmem:[%s14948_s0 + $0xd8] sm:$0xff] }
   0xa   :  { %203 = vperm.xlu1 %8993, %v30_v5   ;;  %200 = vperm.xlu0 %8992, %v29_v6   ;;  %v9731_v28 = vld [vmem:[%s14948_s0 + $0xd0] sm:$0xff]  ;;  %v9738_v29 = vld [vmem:[%s14948_s0 + $0xe8] sm:$0xff]  ;;  %v9743_v30 = vld [vmem:[%s14948_s0 + $0xe0] sm:$0xff] }
   0xe   :  { %209 = vperm.xlu1 %8993, %v32_v7   ;;  %206 = vperm.xlu0 %8992, %v31_v8  }
  0x12   :  { %215 = vperm.xlu1 %8993, %v34_v9   ;;  %212 = vperm.xlu0 %8992, %v33_v10  }
  0x16   :  { %221 = vperm.xlu1 %8993, %v36_v11   ;;  %218 = vperm.xlu0 %8992, %v35_v12  }
  0x1a   :  { %227 = vperm.xlu1 %8993, %v38_v13   ;;  %224 = vperm.xlu0 %8992, %v37_v14  }
  0x1e   :  { %233 = vperm.xlu1 %8993, %v40_v15   ;;  %230 = vperm.xlu0 %8992, %v39_v16  }
  0x22   :  { %239 = vperm.xlu1 %8993, %v42_v17   ;;  %236 = vperm.xlu0 %8992, %v41_v18  }
  0x26   :  { %245 = vperm.xlu1 %8993, %v44_v19   ;;  %242 = vperm.xlu0 %8992, %v43_v20  }
  0x2a   :  { %251 = vperm.xlu1 %8993, %v46_v21   ;;  %248 = vperm.xlu0 %8992, %v45_v22  }
  0x2e   :  { %257 = vperm.xlu1 %8993, %v48_v23   ;;  %254 = vperm.xlu0 %8992, %v9710_v24  }
  0x32   :  { %263 = vperm.xlu1 %8993, %v9715_v25   ;;  %260 = vperm.xlu0 %8992, %v9720_v26  }
  0x36   :  { %269 = vperm.xlu1 %8993, %v9726_v27   ;;  %266 = vperm.xlu0 %8992, %v9731_v28  }
  0x3a   :  { %275 = vperm.xlu1 %8993, %v9738_v29   ;;  %272 = vperm.xlu0 %8992, %v9743_v30  }
  0x3b   :  { %11 = vsyncpa [#allocation3], 0  ;;  %v9752_v31 = vld [vmem:[%s14948_s0 + $0xf8] sm:$0xff]  ;;  %v9757_v32 = vld [vmem:[%s14948_s0 + $0xf0] sm:$0xff] }
  0x3c   :  { %v9764_v33 = vld [vmem:[%s14948_s0 + $0x108] sm:$0xff]  ;;  %v9769_v34 = vld [vmem:[%s14948_s0 + $0x100] sm:$0xff]  ;;  %v9776_v35 = vld [vmem:[%s14948_s0 + $0x118] sm:$0xff] }
  0x3d   :  { %v9781_v36 = vld [vmem:[%s14948_s0 + $0x110] sm:$0xff]  ;;  %v9788_v37 = vld [vmem:[%s14948_s0 + $0x128] sm:$0xff]  ;;  %v9793_v38 = vld [vmem:[%s14948_s0 + $0x120] sm:$0xff] }
  0x3e   :  { %281 = vperm.xlu1 %8993, %v9752_v31   ;;  %278 = vperm.xlu0 %8992, %v9757_v32   ;;  %v9800_v39 = vld [vmem:[%s14948_s0 + $0x138] sm:$0xff]  ;;  %v9805_v40 = vld [vmem:[%s14948_s0 + $0x130] sm:$0xff]  ;;  %v9812_v41 = vld [vmem:[%s14948_s0 + $0x148] sm:$0xff] }
  0x3f   :  { %v9817_v42 = vld [vmem:[%s14948_s0 + $0x140] sm:$0xff]  ;;  %v9824_v43 = vld [vmem:[%s14948_s0 + $0x158] sm:$0xff]  ;;  %v9829_v44 = vld [vmem:[%s14948_s0 + $0x150] sm:$0xff] }
  0x40   :  { %v9836_v45 = vld [vmem:[%s14948_s0 + $0x168] sm:$0xff]  ;;  %v9841_v46 = vld [vmem:[%s14948_s0 + $0x160] sm:$0xff]  ;;  %v9848_v47 = vld [vmem:[%s14948_s0 + $0x178] sm:$0xff] }
  0x41   :  { %v9853_v48 = vld [vmem:[%s14948_s0 + $0x170] sm:$0xff]  ;;  %v9860_v49 = vld [vmem:[%s14948_s0 + $0x188] sm:$0xff]  ;;  %v9865_v50 = vld [vmem:[%s14948_s0 + $0x180] sm:$0xff] }
  0x42   :  { %287 = vperm.xlu1 %8993, %v9764_v33   ;;  %284 = vperm.xlu0 %8992, %v9769_v34   ;;  %v9872_v51 = vld [vmem:[%s14948_s0 + $0x198] sm:$0xff]  ;;  %v9877_v52 = vld [vmem:[%s14948_s0 + $0x190] sm:$0xff]  ;;  %v9884_v53 = vld [vmem:[%s14948_s0 + $0x1a8] sm:$0xff] }
  0x43   :  { %v9889_v54 = vld [vmem:[%s14948_s0 + $0x1a0] sm:$0xff]  ;;  %v9896_v55 = vld [vmem:[%s14948_s0 + $0x1b8] sm:$0xff]  ;;  %v9901_v56 = vld [vmem:[%s14948_s0 + $0x1b0] sm:$0xff] }
  0x44   :  { %v9908_v57 = vld [vmem:[%s14948_s0 + $0x1c8] sm:$0xff]  ;;  %v9913_v58 = vld [vmem:[%s14948_s0 + $0x1c0] sm:$0xff]  ;;  %v9920_v59 = vld [vmem:[%s14948_s0 + $0x1d8] sm:$0xff] }
  0x45   :  { %v9925_v60 = vld [vmem:[%s14948_s0 + $0x1d0] sm:$0xff]  ;;  %v9932_v61 = vld [vmem:[%s14948_s0 + $0x1e8] sm:$0xff]  ;;  %v9937_v62 = vld [vmem:[%s14948_s0 + $0x1e0] sm:$0xff] }
  0x46   :  { %293 = vperm.xlu1 %8993, %v9776_v35   ;;  %290 = vperm.xlu0 %8992, %v9781_v36   ;;  %v9944_v63 = vld [vmem:[%s14948_s0 + $0x1f8] sm:$0xff]  ;;  %v9949_v0 = vld [vmem:[%s14948_s0 + $0x1f0] sm:$0xff]  ;;  %v9956_v1 = vld [vmem:[%s14948_s0 + $0x208] sm:$0xff] }
  0x47   :  { %v9961_v3 = vld [vmem:[%s14948_s0 + $0x200] sm:$0xff]  ;;  %v9972_v6 = vld [vmem:[%s14948_s0 + $0x218] sm:$0xff]  ;;  %v9977_v7 = vld [vmem:[%s14948_s0 + $0x210] sm:$0xff] }
  0x48   :  { %v9988_v10 = vld [vmem:[%s14948_s0 + $0x228] sm:$0xff]  ;;  %v9993_v11 = vld [vmem:[%s14948_s0 + $0x220] sm:$0xff]  ;;  %v10004_v14 = vld [vmem:[%s14948_s0 + $0x238] sm:$0xff] }
  0x49   :  { %v10009_v15 = vld [vmem:[%s14948_s0 + $0x230] sm:$0xff]  ;;  %v10020_v18 = vld [vmem:[%s14948_s0 + $0x248] sm:$0xff]  ;;  %v10025_v19 = vld [vmem:[%s14948_s0 + $0x240] sm:$0xff] }
  0x4a   :  { %299 = vperm.xlu1 %8993, %v9788_v37   ;;  %296 = vperm.xlu0 %8992, %v9793_v38   ;;  %15030 = vst [vmem:[#allocation7_spill] sm:$0xff] %v10020_v18  ;;  %15031 = vst [vmem:[#allocation8_spill] sm:$0xff] %v10025_v19  ;;  %v10036_v22 = vld [vmem:[%s14948_s0 + $0x258] sm:$0xff]  ;;  %v10041_v23 = vld [vmem:[%s14948_s0 + $0x250] sm:$0xff] }
  0x4b   :  { %15034 = vst [vmem:[#allocation11_spill] sm:$0xff] %v10036_v22  ;;  %15035 = vst [vmem:[#allocation12_spill] sm:$0xff] %v10041_v23 }
  0x4e   :  { %305 = vperm.xlu1 %8993, %v9800_v39   ;;  %302 = vperm.xlu0 %8992, %v9805_v40  }
  0x52   :  { %311 = vperm.xlu1 %8993, %v9812_v41   ;;  %308 = vperm.xlu0 %8992, %v9817_v42  }
  0x56   :  { %317 = vperm.xlu1 %8993, %v9824_v43   ;;  %314 = vperm.xlu0 %8992, %v9829_v44  }
  0x5a   :  { %323 = vperm.xlu1 %8993, %v9836_v45   ;;  %320 = vperm.xlu0 %8992, %v9841_v46  }
  0x5e   :  { %329 = vperm.xlu1 %8993, %v9848_v47   ;;  %326 = vperm.xlu0 %8992, %v9853_v48  }
  0x62   :  { %335 = vperm.xlu1 %8993, %v9860_v49   ;;  %332 = vperm.xlu0 %8992, %v9865_v50  }
  0x66   :  { %341 = vperm.xlu1 %8993, %v9872_v51   ;;  %338 = vperm.xlu0 %8992, %v9877_v52  }
  0x6a   :  { %347 = vperm.xlu1 %8993, %v9884_v53   ;;  %344 = vperm.xlu0 %8992, %v9889_v54  }
  0x6e   :  { %353 = vperm.xlu1 %8993, %v9896_v55   ;;  %350 = vperm.xlu0 %8992, %v9901_v56  }
  0x72   :  { %359 = vperm.xlu1 %8993, %v9908_v57   ;;  %356 = vperm.xlu0 %8992, %v9913_v58  }
  0x76   :  { %365 = vperm.xlu1 %8993, %v9920_v59   ;;  %362 = vperm.xlu0 %8992, %v9925_v60  }
  0x7a   :  { %371 = vperm.xlu1 %8993, %v9932_v61   ;;  %368 = vperm.xlu0 %8992, %v9937_v62  }
  0x7e   :  { %377 = vperm.xlu1 %8993, %v9944_v63   ;;  %374 = vperm.xlu0 %8992, %v9949_v0  }
  0x81   :  { %v9963_v4 = vpop.permute.xlu1 %194  ;;  %v9965_v5 = vpop.permute.xlu0 %188 }
  0x82   :  { %383 = vperm.xlu1 %8993, %v9956_v1   ;;  %380 = vperm.xlu0 %8992, %v9961_v3  }
  0x85   :  { %v9979_v8 = vpop.permute.xlu1 %197  ;;  %v9981_v9 = vpop.permute.xlu0 %191 }
  0x86   :  { %389 = vperm.xlu1 %8993, %v9972_v6   ;;  %386 = vperm.xlu0 %8992, %v9977_v7  }
  0x89   :  { %v9995_v12 = vpop.permute.xlu1 %203  ;;  %v9997_v13 = vpop.permute.xlu0 %200 }
  0x8a   :  { %395 = vperm.xlu1 %8993, %v9988_v10   ;;  %392 = vperm.xlu0 %8992, %v9993_v11  }
  0x8d   :  { %v10011_v16 = vpop.permute.xlu1 %209  ;;  %v10013_v17 = vpop.permute.xlu0 %206 }
  0x8e   :  { %15028 = vst [vmem:[#allocation5_spill] sm:$0xff] %v10011_v16  ;;  %15029 = vst [vmem:[#allocation6_spill] sm:$0xff] %v10013_v17  ;;  %401 = vperm.xlu1 %8993, %v10004_v14   ;;  %398 = vperm.xlu0 %8992, %v10009_v15  }
  0x91   :  { %v10027_v20 = vpop.permute.xlu1 %215  ;;  %v10029_v21 = vpop.permute.xlu0 %212 }
  0x92   :  { %15032 = vst [vmem:[#allocation9_spill] sm:$0xff] %v10027_v20  ;;  %15033 = vst [vmem:[#allocation10_spill] sm:$0xff] %v10029_v21  ;;  %407 = vperm.xlu1 %8993, %v10020_v18   ;;  %404 = vperm.xlu0 %8992, %v10025_v19   ;;  %v10052_v21 = vld [vmem:[%s14948_s0 + $0x268] sm:$0xff]  ;;  %v10057_v20 = vld [vmem:[%s14948_s0 + $0x260] sm:$0xff] }
  0x93   :  { %15038 = vst [vmem:[#allocation15_spill] sm:$0xff] %v10052_v21  ;;  %15039 = vst [vmem:[#allocation16_spill] sm:$0xff] %v10057_v20 }
  0x95   :  { %v10043_v2 = vpop.permute.xlu1 %221  ;;  %v10045_v17 = vpop.permute.xlu0 %218 }
  0x96   :  { %15036 = vst [vmem:[#allocation13_spill] sm:$0xff] %v10043_v2  ;;  %15037 = vst [vmem:[#allocation14_spill] sm:$0xff] %v10045_v17  ;;  %413 = vperm.xlu1 %8993, %v10036_v22   ;;  %410 = vperm.xlu0 %8992, %v10041_v23   ;;  %v10068_v17 = vld [vmem:[%s14948_s0 + $0x278] sm:$0xff]  ;;  %v10073_v2 = vld [vmem:[%s14948_s0 + $0x270] sm:$0xff] }
  0x97   :  { %15042 = vst [vmem:[#allocation19_spill] sm:$0xff] %v10068_v17  ;;  %15043 = vst [vmem:[#allocation20_spill] sm:$0xff] %v10073_v2 }
  0x99   :  { %v10059_v16 = vpop.permute.xlu1 %227  ;;  %v10061_v18 = vpop.permute.xlu0 %224 }
  0x9a   :  { %15040 = vst [vmem:[#allocation17_spill] sm:$0xff] %v10059_v16  ;;  %15041 = vst [vmem:[#allocation18_spill] sm:$0xff] %v10061_v18  ;;  %419 = vperm.xlu1 %8993, %v10052_v21   ;;  %416 = vperm.xlu0 %8992, %v10057_v20   ;;  %v10084_v18 = vld [vmem:[%s14948_s0 + $0x288] sm:$0xff]  ;;  %v10089_v16 = vld [vmem:[%s14948_s0 + $0x280] sm:$0xff] }
  0x9b   :  { %15046 = vst [vmem:[#allocation23_spill] sm:$0xff] %v10084_v18  ;;  %15047 = vst [vmem:[#allocation24_spill] sm:$0xff] %v10089_v16 }
  0x9d   :  { %v10075_v22 = vpop.permute.xlu1 %233  ;;  %v10077_v23 = vpop.permute.xlu0 %230 }
  0x9e   :  { %15044 = vst [vmem:[#allocation21_spill] sm:$0xff] %v10075_v22  ;;  %15045 = vst [vmem:[#allocation22_spill] sm:$0xff] %v10077_v23  ;;  %425 = vperm.xlu1 %8993, %v10068_v17   ;;  %422 = vperm.xlu0 %8992, %v10073_v2   ;;  %v10100_v23 = vld [vmem:[%s14948_s0 + $0x298] sm:$0xff]  ;;  %v10105_v22 = vld [vmem:[%s14948_s0 + $0x290] sm:$0xff] }
  0x9f   :  { %15050 = vst [vmem:[#allocation27_spill] sm:$0xff] %v10100_v23  ;;  %15051 = vst [vmem:[#allocation28_spill] sm:$0xff] %v10105_v22 }
  0xa1   :  { %v10091_v21 = vpop.permute.xlu1 %239  ;;  %v10093_v20 = vpop.permute.xlu0 %236 }
  0xa2   :  { %15048 = vst [vmem:[#allocation25_spill] sm:$0xff] %v10091_v21  ;;  %15049 = vst [vmem:[#allocation26_spill] sm:$0xff] %v10093_v20  ;;  %431 = vperm.xlu1 %8993, %v10084_v18   ;;  %428 = vperm.xlu0 %8992, %v10089_v16   ;;  %v10116_v20 = vld [vmem:[%s14948_s0 + $0x2a8] sm:$0xff]  ;;  %v10121_v21 = vld [vmem:[%s14948_s0 + $0x2a0] sm:$0xff] }
  0xa3   :  { %15054 = vst [vmem:[#allocation31_spill] sm:$0xff] %v10116_v20  ;;  %15055 = vst [vmem:[#allocation32_spill] sm:$0xff] %v10121_v21 }
  0xa5   :  { %v10107_v17 = vpop.permute.xlu1 %245  ;;  %v10109_v2 = vpop.permute.xlu0 %242 }
  0xa6   :  { %15052 = vst [vmem:[#allocation29_spill] sm:$0xff] %v10107_v17  ;;  %15053 = vst [vmem:[#allocation30_spill] sm:$0xff] %v10109_v2  ;;  %437 = vperm.xlu1 %8993, %v10100_v23   ;;  %434 = vperm.xlu0 %8992, %v10105_v22   ;;  %v10132_v2 = vld [vmem:[%s14948_s0 + $0x2b8] sm:$0xff]  ;;  %v10137_v17 = vld [vmem:[%s14948_s0 + $0x2b0] sm:$0xff] }
  0xa7   :  { %15058 = vst [vmem:[#allocation35_spill] sm:$0xff] %v10132_v2  ;;  %15059 = vst [vmem:[#allocation36_spill] sm:$0xff] %v10137_v17 }
  0xa9   :  { %v10123_v18 = vpop.permute.xlu1 %251  ;;  %v10125_v16 = vpop.permute.xlu0 %248 }
  0xaa   :  { %15056 = vst [vmem:[#allocation33_spill] sm:$0xff] %v10123_v18  ;;  %15057 = vst [vmem:[#allocation34_spill] sm:$0xff] %v10125_v16  ;;  %443 = vperm.xlu1 %8993, %v10116_v20   ;;  %440 = vperm.xlu0 %8992, %v10121_v21   ;;  %v10148_v16 = vld [vmem:[%s14948_s0 + $0x2c8] sm:$0xff]  ;;  %v10153_v18 = vld [vmem:[%s14948_s0 + $0x2c0] sm:$0xff] }
  0xab   :  { %15062 = vst [vmem:[#allocation39_spill] sm:$0xff] %v10148_v16  ;;  %15063 = vst [vmem:[#allocation40_spill] sm:$0xff] %v10153_v18 }
  0xad   :  { %v10139_v23 = vpop.permute.xlu1 %257  ;;  %v10141_v22 = vpop.permute.xlu0 %254 }
  0xae   :  { %15060 = vst [vmem:[#allocation37_spill] sm:$0xff] %v10139_v23  ;;  %15061 = vst [vmem:[#allocation38_spill] sm:$0xff] %v10141_v22  ;;  %449 = vperm.xlu1 %8993, %v10132_v2   ;;  %446 = vperm.xlu0 %8992, %v10137_v17   ;;  %v10164_v22 = vld [vmem:[%s14948_s0 + $0x2d8] sm:$0xff]  ;;  %v10169_v23 = vld [vmem:[%s14948_s0 + $0x2d0] sm:$0xff] }
  0xaf   :  { %15066 = vst [vmem:[#allocation43_spill] sm:$0xff] %v10164_v22  ;;  %15067 = vst [vmem:[#allocation44_spill] sm:$0xff] %v10169_v23 }
  0xb1   :  { %v10155_v20 = vpop.permute.xlu1 %263  ;;  %v10157_v21 = vpop.permute.xlu0 %260 }
  0xb2   :  { %15064 = vst [vmem:[#allocation41_spill] sm:$0xff] %v10155_v20  ;;  %15065 = vst [vmem:[#allocation42_spill] sm:$0xff] %v10157_v21  ;;  %455 = vperm.xlu1 %8993, %v10148_v16   ;;  %452 = vperm.xlu0 %8992, %v10153_v18   ;;  %v10180_v21 = vld [vmem:[%s14948_s0 + $0x2e8] sm:$0xff]  ;;  %v10185_v20 = vld [vmem:[%s14948_s0 + $0x2e0] sm:$0xff] }
  0xb3   :  { %15070 = vst [vmem:[#allocation47_spill] sm:$0xff] %v10180_v21  ;;  %15071 = vst [vmem:[#allocation48_spill] sm:$0xff] %v10185_v20 }
  0xb5   :  { %v10171_v2 = vpop.permute.xlu1 %269  ;;  %v10173_v17 = vpop.permute.xlu0 %266 }
  0xb6   :  { %15068 = vst [vmem:[#allocation45_spill] sm:$0xff] %v10171_v2  ;;  %15069 = vst [vmem:[#allocation46_spill] sm:$0xff] %v10173_v17  ;;  %461 = vperm.xlu1 %8993, %v10164_v22   ;;  %458 = vperm.xlu0 %8992, %v10169_v23   ;;  %v10196_v17 = vld [vmem:[%s14948_s0 + $0x2f8] sm:$0xff]  ;;  %v10201_v2 = vld [vmem:[%s14948_s0 + $0x2f0] sm:$0xff] }
  0xb7   :  { %15074 = vst [vmem:[#allocation51_spill] sm:$0xff] %v10196_v17  ;;  %15075 = vst [vmem:[#allocation52_spill] sm:$0xff] %v10201_v2 }
  0xb9   :  { %v10187_v16 = vpop.permute.xlu1 %275  ;;  %v10189_v18 = vpop.permute.xlu0 %272 }
  0xba   :  { %15072 = vst [vmem:[#allocation49_spill] sm:$0xff] %v10187_v16  ;;  %15073 = vst [vmem:[#allocation50_spill] sm:$0xff] %v10189_v18  ;;  %467 = vperm.xlu1 %8993, %v10180_v21   ;;  %464 = vperm.xlu0 %8992, %v10185_v20   ;;  %v10212_v18 = vld [vmem:[%s14948_s0 + $0x308] sm:$0xff]  ;;  %v10217_v16 = vld [vmem:[%s14948_s0 + $0x300] sm:$0xff] }
  0xbb   :  { %15078 = vst [vmem:[#allocation55_spill] sm:$0xff] %v10212_v18  ;;  %15079 = vst [vmem:[#allocation56_spill] sm:$0xff] %v10217_v16 }
  0xbd   :  { %v10203_v22 = vpop.permute.xlu1 %281  ;;  %v10205_v23 = vpop.permute.xlu0 %278 }
  0xbe   :  { %15076 = vst [vmem:[#allocation53_spill] sm:$0xff] %v10203_v22  ;;  %15077 = vst [vmem:[#allocation54_spill] sm:$0xff] %v10205_v23  ;;  %473 = vperm.xlu1 %8993, %v10196_v17   ;;  %470 = vperm.xlu0 %8992, %v10201_v2   ;;  %v124_v23 = vld [vmem:[%s14948_s0 + $0x318] sm:$0xff]  ;;  %v10231_v22 = vld [vmem:[%s14948_s0 + $0x310] sm:$0xff] }
  0xbf   :  { %15082 = vst [vmem:[#allocation59_spill] sm:$0xff] %v10231_v22 }
  0xc1   :  { %v10219_v21 = vpop.permute.xlu1 %287  ;;  %v10221_v20 = vpop.permute.xlu0 %284 }
  0xc2   :  { %15080 = vst [vmem:[#allocation57_spill] sm:$0xff] %v10219_v21  ;;  %15081 = vst [vmem:[#allocation58_spill] sm:$0xff] %v10221_v20  ;;  %479 = vperm.xlu1 %8993, %v10212_v18   ;;  %476 = vperm.xlu0 %8992, %v10217_v16   ;;  %v126_v20 = vld [vmem:[%s14948_s0 + $0x328] sm:$0xff]  ;;  %v125_v21 = vld [vmem:[%s14948_s0 + $0x320] sm:$0xff] }
  0xc5   :  { %v10233_v17 = vpop.permute.xlu1 %293  ;;  %v10235_v2 = vpop.permute.xlu0 %290 }
  0xc6   :  { %15083 = vst [vmem:[#allocation60_spill] sm:$0xff] %v10233_v17  ;;  %15084 = vst [vmem:[#allocation61_spill] sm:$0xff] %v10235_v2  ;;  %485 = vperm.xlu1 %8993, %v124_v23   ;;  %482 = vperm.xlu0 %8992, %v10231_v22   ;;  %v128_v23 = vld [vmem:[%s14948_s0 + $0x338] sm:$0xff]  ;;  %v127_v2 = vld [vmem:[%s14948_s0 + $0x330] sm:$0xff] }
  0xc9   :  { %v10244_v18 = vpop.permute.xlu1 %299  ;;  %v10246_v16 = vpop.permute.xlu0 %296 }
  0xca   :  { %15085 = vst [vmem:[#allocation62_spill] sm:$0xff] %v10244_v18  ;;  %15086 = vst [vmem:[#allocation63_spill] sm:$0xff] %v10246_v16  ;;  %491 = vperm.xlu1 %8993, %v126_v20   ;;  %488 = vperm.xlu0 %8992, %v125_v21   ;;  %v130_v16 = vld [vmem:[%s14948_s0 + $0x348] sm:$0xff]  ;;  %v129_v20 = vld [vmem:[%s14948_s0 + $0x340] sm:$0xff] }
  0xcd   :  { %v10254_v17 = vpop.permute.xlu1 %305  ;;  %v10256_v22 = vpop.permute.xlu0 %302 }
  0xce   :  { %15087 = vst [vmem:[#allocation64_spill] sm:$0xff] %v10254_v17  ;;  %15088 = vst [vmem:[#allocation65_spill] sm:$0xff] %v10256_v22  ;;  %497 = vperm.xlu1 %8993, %v128_v23   ;;  %494 = vperm.xlu0 %8992, %v127_v2   ;;  %v132_v22 = vld [vmem:[%s14948_s0 + $0x358] sm:$0xff]  ;;  %v131_v2 = vld [vmem:[%s14948_s0 + $0x350] sm:$0xff] }
  0xd1   :  { %v10264_v21 = vpop.permute.xlu1 %311  ;;  %v10266_v18 = vpop.permute.xlu0 %308 }
  0xd2   :  { %15089 = vst [vmem:[#allocation66_spill] sm:$0xff] %v10264_v21  ;;  %15090 = vst [vmem:[#allocation67_spill] sm:$0xff] %v10266_v18  ;;  %503 = vperm.xlu1 %8993, %v130_v16   ;;  %500 = vperm.xlu0 %8992, %v129_v20   ;;  %v134_v18 = vld [vmem:[%s14948_s0 + $0x368] sm:$0xff]  ;;  %v133_v16 = vld [vmem:[%s14948_s0 + $0x360] sm:$0xff] }
  0xd5   :  { %v10274_v23 = vpop.permute.xlu1 %317  ;;  %v10276_v17 = vpop.permute.xlu0 %314 }
  0xd6   :  { %15091 = vst [vmem:[#allocation68_spill] sm:$0xff] %v10274_v23  ;;  %15092 = vst [vmem:[#allocation69_spill] sm:$0xff] %v10276_v17  ;;  %509 = vperm.xlu1 %8993, %v132_v22   ;;  %506 = vperm.xlu0 %8992, %v131_v2   ;;  %v136_v17 = vld [vmem:[%s14948_s0 + $0x378] sm:$0xff]  ;;  %v135_v22 = vld [vmem:[%s14948_s0 + $0x370] sm:$0xff] }
  0xd9   :  { %v10284_v20 = vpop.permute.xlu1 %323  ;;  %v10286_v21 = vpop.permute.xlu0 %320 }
  0xda   :  { %15093 = vst [vmem:[#allocation70_spill] sm:$0xff] %v10284_v20  ;;  %15094 = vst [vmem:[#allocation71_spill] sm:$0xff] %v10286_v21  ;;  %515 = vperm.xlu1 %8993, %v134_v18   ;;  %512 = vperm.xlu0 %8992, %v133_v16   ;;  %v138_v21 = vld [vmem:[%s14948_s0 + $0x388] sm:$0xff]  ;;  %v137_v18 = vld [vmem:[%s14948_s0 + $0x380] sm:$0xff] }
  0xdd   :  { %v10294_v2 = vpop.permute.xlu1 %329  ;;  %v10296_v23 = vpop.permute.xlu0 %326 }
  0xde   :  { %15095 = vst [vmem:[#allocation72_spill] sm:$0xff] %v10294_v2  ;;  %15096 = vst [vmem:[#allocation73_spill] sm:$0xff] %v10296_v23  ;;  %521 = vperm.xlu1 %8993, %v136_v17   ;;  %518 = vperm.xlu0 %8992, %v135_v22   ;;  %v140_v23 = vld [vmem:[%s14948_s0 + $0x398] sm:$0xff]  ;;  %v139_v17 = vld [vmem:[%s14948_s0 + $0x390] sm:$0xff] }
  0xe1   :  { %v10304_v16 = vpop.permute.xlu1 %335  ;;  %v10306_v20 = vpop.permute.xlu0 %332 }
  0xe2   :  { %15097 = vst [vmem:[#allocation74_spill] sm:$0xff] %v10304_v16  ;;  %15098 = vst [vmem:[#allocation75_spill] sm:$0xff] %v10306_v20  ;;  %527 = vperm.xlu1 %8993, %v138_v21   ;;  %524 = vperm.xlu0 %8992, %v137_v18   ;;  %v142_v20 = vld [vmem:[%s14948_s0 + $0x3a8] sm:$0xff]  ;;  %v141_v21 = vld [vmem:[%s14948_s0 + $0x3a0] sm:$0xff] }
  0xe5   :  { %v10314_v22 = vpop.permute.xlu1 %341  ;;  %v10316_v2 = vpop.permute.xlu0 %338 }
  0xe6   :  { %15099 = vst [vmem:[#allocation76_spill] sm:$0xff] %v10314_v22  ;;  %15100 = vst [vmem:[#allocation77_spill] sm:$0xff] %v10316_v2  ;;  %533 = vperm.xlu1 %8993, %v140_v23   ;;  %530 = vperm.xlu0 %8992, %v139_v17   ;;  %v144_v2 = vld [vmem:[%s14948_s0 + $0x3b8] sm:$0xff]  ;;  %v143_v23 = vld [vmem:[%s14948_s0 + $0x3b0] sm:$0xff] }
  0xe9   :  { %v10324_v18 = vpop.permute.xlu1 %347  ;;  %v10326_v16 = vpop.permute.xlu0 %344 }
  0xea   :  { %15101 = vst [vmem:[#allocation78_spill] sm:$0xff] %v10324_v18  ;;  %15102 = vst [vmem:[#allocation79_spill] sm:$0xff] %v10326_v16  ;;  %539 = vperm.xlu1 %8993, %v142_v20   ;;  %536 = vperm.xlu0 %8992, %v141_v21   ;;  %v146_v16 = vld [vmem:[%s14948_s0 + $0x3c8] sm:$0xff]  ;;  %v145_v20 = vld [vmem:[%s14948_s0 + $0x3c0] sm:$0xff] }
  0xed   :  { %v10334_v17 = vpop.permute.xlu1 %353  ;;  %v10336_v22 = vpop.permute.xlu0 %350 }
  0xee   :  { %15103 = vst [vmem:[#allocation80_spill] sm:$0xff] %v10334_v17  ;;  %15104 = vst [vmem:[#allocation81_spill] sm:$0xff] %v10336_v22  ;;  %545 = vperm.xlu1 %8993, %v144_v2   ;;  %542 = vperm.xlu0 %8992, %v143_v23   ;;  %v148_v22 = vld [vmem:[%s14948_s0 + $0x3d8] sm:$0xff]  ;;  %v147_v2 = vld [vmem:[%s14948_s0 + $0x3d0] sm:$0xff] }
  0xf1   :  { %v10344_v21 = vpop.permute.xlu1 %359  ;;  %v10346_v18 = vpop.permute.xlu0 %356 }
  0xf2   :  { %15105 = vst [vmem:[#allocation82_spill] sm:$0xff] %v10344_v21  ;;  %15106 = vst [vmem:[#allocation83_spill] sm:$0xff] %v10346_v18  ;;  %551 = vperm.xlu1 %8993, %v146_v16   ;;  %548 = vperm.xlu0 %8992, %v145_v20   ;;  %v150_v18 = vld [vmem:[%s14948_s0 + $0x3e8] sm:$0xff]  ;;  %v149_v16 = vld [vmem:[%s14948_s0 + $0x3e0] sm:$0xff] }
  0xf5   :  { %v10354_v23 = vpop.permute.xlu1 %365  ;;  %v10356_v17 = vpop.permute.xlu0 %362 }
  0xf6   :  { %15107 = vst [vmem:[#allocation84_spill] sm:$0xff] %v10354_v23  ;;  %15108 = vst [vmem:[#allocation85_spill] sm:$0xff] %v10356_v17  ;;  %557 = vperm.xlu1 %8993, %v148_v22   ;;  %554 = vperm.xlu0 %8992, %v147_v2   ;;  %v152_v17 = vld [vmem:[%s14948_s0 + $0x3f8] sm:$0xff]  ;;  %v151_v22 = vld [vmem:[%s14948_s0 + $0x3f0] sm:$0xff] }
  0xf9   :  { %v10364_v20 = vpop.permute.xlu1 %371  ;;  %v10366_v21 = vpop.permute.xlu0 %368 }
  0xfa   :  { %15109 = vst [vmem:[#allocation86_spill] sm:$0xff] %v10364_v20  ;;  %15110 = vst [vmem:[#allocation87_spill] sm:$0xff] %v10366_v21  ;;  %563 = vperm.xlu1 %8993, %v150_v18   ;;  %560 = vperm.xlu0 %8992, %v149_v16   ;;  %v154_v21 = vld [vmem:[%s14948_s0 + $0x408] sm:$0xff]  ;;  %v153_v18 = vld [vmem:[%s14948_s0 + $0x400] sm:$0xff] }
  0xfd   :  { %v10374_v2 = vpop.permute.xlu1 %377  ;;  %v10376_v23 = vpop.permute.xlu0 %374 }
  0xfe   :  { %15111 = vst [vmem:[#allocation88_spill] sm:$0xff] %v10374_v2  ;;  %15112 = vst [vmem:[#allocation89_spill] sm:$0xff] %v10376_v23  ;;  %569 = vperm.xlu1 %8993, %v152_v17   ;;  %566 = vperm.xlu0 %8992, %v151_v22   ;;  %v156_v23 = vld [vmem:[%s14948_s0 + $0x418] sm:$0xff]  ;;  %v155_v17 = vld [vmem:[%s14948_s0 + $0x410] sm:$0xff] }
 0x101   :  { %v10384_v16 = vpop.permute.xlu1 %383  ;;  %v10386_v20 = vpop.permute.xlu0 %380 }
 0x102   :  { %15113 = vst [vmem:[#allocation90_spill] sm:$0xff] %v10384_v16  ;;  %15114 = vst [vmem:[#allocation91_spill] sm:$0xff] %v10386_v20  ;;  %575 = vperm.xlu1 %8993, %v154_v21   ;;  %572 = vperm.xlu0 %8992, %v153_v18   ;;  %v9199_v16 = vld [vmem:[%s14949_s1] sm:$0xff]   ;;  %v158_v21 = vld [vmem:[%s14948_s0 + $0x428] sm:$0xff]  ;;  %v15117_v20 = vmov 0  }
 0x103   :  { %v157_v18 = vld [vmem:[%s14948_s0 + $0x420] sm:$0xff]  ;;  %4604 = vmatpush1.bf16.msra.mxu0 %v9199_v16  ;;  %v159_v16 = vld [vmem:[%s14948_s0 + $0x430] sm:$0xff] }
 0x104   :  { %4605 = vmatprep.subr.bf16.mxu0 %v15117_v20 }
 0x105   :  { %v10394_v22 = vpop.permute.xlu1 %389  ;;  %v10396_v2 = vpop.permute.xlu0 %386 }
 0x106   :  { %15115 = vst [vmem:[#allocation92_spill] sm:$0xff] %v10394_v22  ;;  %15116 = vst [vmem:[#allocation93_spill] sm:$0xff] %v10396_v2  ;;  %581 = vperm.xlu1 %8993, %v156_v23   ;;  %578 = vperm.xlu0 %8992, %v155_v17   ;;  %v9200_v23 = vld [vmem:[%s14949_s1 + $0x8] sm:$0xff]   ;;  %v160_v17 = vld [vmem:[%s14948_s0 + $0x438] sm:$0xff] }
 0x107   :  { %4606 = vmatpush1.bf16.msra.mxu0 %v9200_v23  ;;  %v161_v23 = vld [vmem:[%s14948_s0 + $0x440] sm:$0xff] }
 0x108   :  { %4607 = vmatprep.subr.bf16.mxu0 %v15117_v20 }
 0x109   :  { %v10408_v22 = vpop.permute.xlu1 %395  ;;  %v10410_v2 = vpop.permute.xlu0 %392 }
 0x10a   :  { %15118 = vst [vmem:[#allocation94_spill] sm:$0xff] %v10408_v22  ;;  %15119 = vst [vmem:[#allocation95_spill] sm:$0xff] %v10410_v2  ;;  %587 = vperm.xlu1 %8993, %v158_v21   ;;  %584 = vperm.xlu0 %8992, %v157_v18   ;;  %v9201_v21 = vld [vmem:[%s14949_s1 + $0x10] sm:$0xff]   ;;  %v162_v18 = vld [vmem:[%s14948_s0 + $0x448] sm:$0xff] }
 0x10b   :  { %4608 = vmatpush1.bf16.msra.mxu0 %v9201_v21  ;;  %v163_v21 = vld [vmem:[%s14948_s0 + $0x450] sm:$0xff] }
 0x10c   :  { %4609 = vmatprep.subr.bf16.mxu0 %v15117_v20 }
 0x10d   :  { %v10422_v22 = vpop.permute.xlu1 %401  ;;  %v10424_v2 = vpop.permute.xlu0 %398 }
 0x10e   :  { %15120 = vst [vmem:[#allocation96_spill] sm:$0xff] %v10422_v22  ;;  %15121 = vst [vmem:[#allocation97_spill] sm:$0xff] %v10424_v2  ;;  %593 = vperm.xlu1 %8993, %v160_v17   ;;  %590 = vperm.xlu0 %8992, %v159_v16   ;;  %v9202_v17 = vld [vmem:[%s14949_s1 + $0x18] sm:$0xff]  }
 0x10f   :  { %v164_v16 = vld [vmem:[%s14948_s0 + $0x458] sm:$0xff]  ;;  %4610 = vmatpush1.bf16.msra.mxu0 %v9202_v17  ;;  %v165_v17 = vld [vmem:[%s14948_s0 + $0x460] sm:$0xff] }
 0x110   :  { %4611 = vmatprep.subr.bf16.mxu0 %v15117_v20 }
 0x111   :  { %v10436_v22 = vpop.permute.xlu1 %407  ;;  %v10438_v2 = vpop.permute.xlu0 %404 }
 0x112   :  { %15122 = vst [vmem:[#allocation98_spill] sm:$0xff] %v10436_v22  ;;  %15123 = vst [vmem:[#allocation99_spill] sm:$0xff] %v10438_v2  ;;  %599 = vperm.xlu1 %8993, %v162_v18   ;;  %596 = vperm.xlu0 %8992, %v161_v23   ;;  %v9203_v18 = vld [vmem:[%s14949_s1 + $0x20] sm:$0xff]   ;;  %v166_v23 = vld [vmem:[%s14948_s0 + $0x468] sm:$0xff] }
 0x113   :  { %4612 = vmatpush1.bf16.msra.mxu0 %v9203_v18  ;;  %v167_v18 = vld [vmem:[%s14948_s0 + $0x470] sm:$0xff] }
 0x114   :  { %4613 = vmatprep.subr.bf16.mxu0 %v15117_v20 }
 0x115   :  { %v10450_v22 = vpop.permute.xlu1 %413  ;;  %v10452_v2 = vpop.permute.xlu0 %410 }
 0x116   :  { %15124 = vst [vmem:[#allocation100_spill] sm:$0xff] %v10450_v22  ;;  %15125 = vst [vmem:[#allocation101_spill] sm:$0xff] %v10452_v2  ;;  %605 = vperm.xlu1 %8993, %v164_v16   ;;  %602 = vperm.xlu0 %8992, %v163_v21   ;;  %v9204_v16 = vld [vmem:[%s14949_s1 + $0x28] sm:$0xff]   ;;  %v168_v21 = vld [vmem:[%s14948_s0 + $0x478] sm:$0xff] }
 0x117   :  { %4614 = vmatpush1.bf16.msra.mxu0 %v9204_v16  ;;  %v169_v16 = vld [vmem:[%s14948_s0 + $0x480] sm:$0xff] }
 0x118   :  { %4615 = vmatprep.subr.bf16.mxu0 %v15117_v20 }
 0x119   :  { %v10464_v22 = vpop.permute.xlu1 %419  ;;  %v10466_v2 = vpop.permute.xlu0 %416 }
 0x11a   :  { %15126 = vst [vmem:[#allocation102_spill] sm:$0xff] %v10464_v22  ;;  %15127 = vst [vmem:[#allocation103_spill] sm:$0xff] %v10466_v2  ;;  %611 = vperm.xlu1 %8993, %v166_v23   ;;  %608 = vperm.xlu0 %8992, %v165_v17   ;;  %v9205_v23 = vld [vmem:[%s14949_s1 + $0x30] sm:$0xff]   ;;  %v170_v17 = vld [vmem:[%s14948_s0 + $0x488] sm:$0xff] }
 0x11b   :  { %4616 = vmatpush1.bf16.msra.mxu0 %v9205_v23  ;;  %v171_v23 = vld [vmem:[%s14948_s0 + $0x490] sm:$0xff] }
 0x11c   :  { %4617 = vmatprep.subr.bf16.mxu0 %v15117_v20 }
 0x11d   :  { %v10478_v22 = vpop.permute.xlu1 %425  ;;  %v10480_v2 = vpop.permute.xlu0 %422 }
 0x11e   :  { %15128 = vst [vmem:[#allocation104_spill] sm:$0xff] %v10478_v22  ;;  %15129 = vst [vmem:[#allocation105_spill] sm:$0xff] %v10480_v2  ;;  %617 = vperm.xlu1 %8993, %v168_v21   ;;  %614 = vperm.xlu0 %8992, %v167_v18   ;;  %v9206_v21 = vld [vmem:[%s14949_s1 + $0x38] sm:$0xff]  }
 0x11f   :  { %v172_v18 = vld [vmem:[%s14948_s0 + $0x498] sm:$0xff]  ;;  %4618 = vmatpush1.bf16.msra.mxu0 %v9206_v21  ;;  %v173_v21 = vld [vmem:[%s14948_s0 + $0x4a0] sm:$0xff] }
 0x120   :  { %4619 = vmatprep.subr.bf16.mxu0 %v15117_v20 }
 0x121   :  { %v10492_v22 = vpop.permute.xlu1 %431  ;;  %v10494_v2 = vpop.permute.xlu0 %428 }
 0x122   :  { %15130 = vst [vmem:[#allocation106_spill] sm:$0xff] %v10492_v22  ;;  %15131 = vst [vmem:[#allocation107_spill] sm:$0xff] %v10494_v2  ;;  %623 = vperm.xlu1 %8993, %v170_v17   ;;  %620 = vperm.xlu0 %8992, %v169_v16   ;;  %v9207_v17 = vld [vmem:[%s14949_s1 + $0x40] sm:$0xff]   ;;  %v174_v16 = vld [vmem:[%s14948_s0 + $0x4a8] sm:$0xff] }
 0x123   :  { %4620 = vmatpush1.bf16.msra.mxu0 %v9207_v17  ;;  %v175_v17 = vld [vmem:[%s14948_s0 + $0x4b0] sm:$0xff] }
 0x124   :  { %4621 = vmatprep.subr.bf16.mxu0 %v15117_v20 }
 0x125   :  { %v10506_v22 = vpop.permute.xlu1 %437  ;;  %v10508_v2 = vpop.permute.xlu0 %434 }
 0x126   :  { %15132 = vst [vmem:[#allocation108_spill] sm:$0xff] %v10506_v22  ;;  %15133 = vst [vmem:[#allocation109_spill] sm:$0xff] %v10508_v2  ;;  %629 = vperm.xlu1 %8993, %v172_v18   ;;  %626 = vperm.xlu0 %8992, %v171_v23   ;;  %v9208_v18 = vld [vmem:[%s14949_s1 + $0x48] sm:$0xff]   ;;  %v176_v23 = vld [vmem:[%s14948_s0 + $0x4b8] sm:$0xff] }
 0x127   :  { %4622 = vmatpush1.bf16.msra.mxu0 %v9208_v18  ;;  %v177_v18 = vld [vmem:[%s14948_s0 + $0x4c0] sm:$0xff] }
 0x128   :  { %4623 = vmatprep.subr.bf16.mxu0 %v15117_v20 }
 0x129   :  { %v10520_v22 = vpop.permute.xlu1 %443  ;;  %v10522_v2 = vpop.permute.xlu0 %440 }
 0x12a   :  { %15134 = vst [vmem:[#allocation110_spill] sm:$0xff] %v10520_v22  ;;  %15135 = vst [vmem:[#allocation111_spill] sm:$0xff] %v10522_v2  ;;  %635 = vperm.xlu1 %8993, %v174_v16   ;;  %632 = vperm.xlu0 %8992, %v173_v21   ;;  %v9209_v16 = vld [vmem:[%s14949_s1 + $0x50] sm:$0xff]   ;;  %v178_v21 = vld [vmem:[%s14948_s0 + $0x4c8] sm:$0xff] }
 0x12b   :  { %4624 = vmatpush1.bf16.msra.mxu0 %v9209_v16  ;;  %v179_v16 = vld [vmem:[%s14948_s0 + $0x4d0] sm:$0xff] }
 0x12c   :  { %4625 = vmatprep.subr.bf16.mxu0 %v15117_v20 }
 0x12d   :  { %v10534_v22 = vpop.permute.xlu1 %449  ;;  %v10536_v2 = vpop.permute.xlu0 %446 }
 0x12e   :  { %15136 = vst [vmem:[#allocation112_spill] sm:$0xff] %v10534_v22  ;;  %15137 = vst [vmem:[#allocation113_spill] sm:$0xff] %v10536_v2  ;;  %641 = vperm.xlu1 %8993, %v176_v23   ;;  %638 = vperm.xlu0 %8992, %v175_v17   ;;  %v9210_v23 = vld [vmem:[%s14949_s1 + $0x58] sm:$0xff]  }
 0x12f   :  { %v180_v17 = vld [vmem:[%s14948_s0 + $0x4d8] sm:$0xff]  ;;  %4626 = vmatpush1.bf16.msra.mxu0 %v9210_v23  ;;  %v181_v23 = vld [vmem:[%s14948_s0 + $0x4e0] sm:$0xff] }
 0x130   :  { %4627 = vmatprep.subr.bf16.mxu0 %v15117_v20 }
 0x131   :  { %v10548_v22 = vpop.permute.xlu1 %455  ;;  %v10550_v2 = vpop.permute.xlu0 %452 }
 0x132   :  { %15138 = vst [vmem:[#allocation114_spill] sm:$0xff] %v10548_v22  ;;  %15139 = vst [vmem:[#allocation115_spill] sm:$0xff] %v10550_v2  ;;  %647 = vperm.xlu1 %8993, %v178_v21   ;;  %644 = vperm.xlu0 %8992, %v177_v18   ;;  %v9211_v21 = vld [vmem:[%s14949_s1 + $0x60] sm:$0xff]   ;;  %v182_v18 = vld [vmem:[%s14948_s0 + $0x4e8] sm:$0xff] }
 0x133   :  { %4628 = vmatpush1.bf16.msra.mxu0 %v9211_v21  ;;  %v183_v21 = vld [vmem:[%s14948_s0 + $0x4f0] sm:$0xff] }
 0x134   :  { %4629 = vmatprep.subr.bf16.mxu0 %v15117_v20 }
 0x135   :  { %v10562_v22 = vpop.permute.xlu1 %461  ;;  %v10564_v2 = vpop.permute.xlu0 %458 }
 0x136   :  { %15140 = vst [vmem:[#allocation116_spill] sm:$0xff] %v10562_v22  ;;  %15141 = vst [vmem:[#allocation117_spill] sm:$0xff] %v10564_v2  ;;  %653 = vperm.xlu1 %8993, %v180_v17   ;;  %650 = vperm.xlu0 %8992, %v179_v16   ;;  %v9212_v17 = vld [vmem:[%s14949_s1 + $0x68] sm:$0xff]   ;;  %v184_v16 = vld [vmem:[%s14948_s0 + $0x4f8] sm:$0xff] }
 0x137   :  { %4630 = vmatpush1.bf16.msra.mxu0 %v9212_v17  ;;  %v9214_v17 = vld [vmem:[%s14949_s1 + $0x78] sm:$0xff]  }
 0x138   :  { %4631 = vmatprep.subr.bf16.mxu0 %v15117_v20 }
 0x139   :  { %v10576_v22 = vpop.permute.xlu1 %467  ;;  %v10578_v2 = vpop.permute.xlu0 %464 }
 0x13a   :  { %15142 = vst [vmem:[#allocation118_spill] sm:$0xff] %v10576_v22  ;;  %15143 = vst [vmem:[#allocation119_spill] sm:$0xff] %v10578_v2  ;;  %659 = vperm.xlu1 %8993, %v182_v18   ;;  %656 = vperm.xlu0 %8992, %v181_v23   ;;  %v9213_v18 = vld [vmem:[%s14949_s1 + $0x70] sm:$0xff]  }
 0x13b   :  { %4632 = vmatpush1.bf16.msra.mxu0 %v9213_v18 }
 0x13c   :  { %4633 = vmatprep.subr.bf16.mxu0 %v15117_v20 }
 0x13d   :  { %v10590_v22 = vpop.permute.xlu1 %473  ;;  %v10592_v2 = vpop.permute.xlu0 %470 }
 0x13e   :  { %15144 = vst [vmem:[#allocation120_spill] sm:$0xff] %v10590_v22  ;;  %15145 = vst [vmem:[#allocation121_spill] sm:$0xff] %v10592_v2  ;;  %665 = vperm.xlu1 %8993, %v184_v16   ;;  %662 = vperm.xlu0 %8992, %v183_v21   ;;  %v9590_v22 = vmov 1   ;;  %v9279_v2 = vld [vmem:[%s14948_s0 + $0x8] sm:$0xff]  ;;  %v9280_v16 = vld [vmem:[%s14948_s0] sm:$0xff] }
 0x13f   :  { %4634 = vmatpush1.bf16.msra.mxu0 %v9214_v17  ;;  %v9283_v17 = vld [vmem:[%s14948_s0 + $0x20] sm:$0xff] }
 0x141   :  { %v10598_v23 = vpop.permute.xlu1 %479  ;;  %v10600_v19 = vpop.permute.xlu0 %476 }
 0x142   :  { %15146 = vst [vmem:[#allocation122_spill] sm:$0xff] %v10598_v23  ;;  %15147 = vst [vmem:[#allocation123_spill] sm:$0xff] %v10600_v19  ;;  %8995 = vset.pattern.permute.xlu1 %v9590_v22  ;;  %8994 = vset.pattern.permute.xlu0 %v9590_v22  ;;  %v9281_v19 = vld [vmem:[%s14948_s0 + $0x10] sm:$0xff]  ;;  %v9282_v22 = vld [vmem:[%s14948_s0 + $0x18] sm:$0xff] }
 0x143   :  { %1231 = vperm.xlu1 %8995, %v9279_v2   ;;  %1228 = vperm.xlu0 %8994, %v9280_v16   ;;  %v9284_v16 = vld [vmem:[%s14948_s0 + $0x28] sm:$0xff] }
 0x145   :  { %v10611_v21 = vpop.permute.xlu1 %485  ;;  %v10613_v18 = vpop.permute.xlu0 %482 }
 0x146   :  { %15148 = vst [vmem:[#allocation124_spill] sm:$0xff] %v10613_v18 }
 0x147   :  { %1234 = vperm.xlu1 %8995, %v9281_v19   ;;  %1237 = vperm.xlu0 %8994, %v9282_v22   ;;  %v9285_v22 = vld [vmem:[%s14948_s0 + $0x30] sm:$0xff] }
 0x149   :  { %v10621_v2 = vpop.permute.xlu1 %491  ;;  %v10623_v23 = vpop.permute.xlu0 %488 }
 0x14a   :  { %15149 = vst [vmem:[#allocation125_spill] sm:$0xff] %v10621_v2  ;;  %15150 = vst [vmem:[#allocation126_spill] sm:$0xff] %v10623_v23  ;;  %v9286_v23 = vld [vmem:[%s14948_s0 + $0x38] sm:$0xff] }
 0x14b   :  { %1240 = vperm.xlu1 %8995, %v9283_v17   ;;  %1243 = vperm.xlu0 %8994, %v9284_v16   ;;  %v9287_v16 = vld [vmem:[%s14948_s0 + $0x40] sm:$0xff] }
 0x14d   :  { %v10631_v19 = vpop.permute.xlu1 %497  ;;  %v10633_v18 = vpop.permute.xlu0 %494 }
 0x14e   :  { %15151 = vst [vmem:[#allocation127_spill] sm:$0xff] %v10631_v19  ;;  %15152 = vst [vmem:[#allocation128_spill] sm:$0xff] %v10633_v18  ;;  %v9288_v18 = vld [vmem:[%s14948_s0 + $0x48] sm:$0xff] }
 0x14f   :  { %1246 = vperm.xlu1 %8995, %v9285_v22   ;;  %1249 = vperm.xlu0 %8994, %v9286_v23   ;;  %v9289_v23 = vld [vmem:[%s14948_s0 + $0x50] sm:$0xff] }
 0x151   :  { %v10641_v17 = vpop.permute.xlu1 %503  ;;  %v10643_v2 = vpop.permute.xlu0 %500 }
 0x152   :  { %15153 = vst [vmem:[#allocation129_spill] sm:$0xff] %v10641_v17  ;;  %15154 = vst [vmem:[#allocation130_spill] sm:$0xff] %v10643_v2  ;;  %v9290_v2 = vld [vmem:[%s14948_s0 + $0x58] sm:$0xff] }
 0x153   :  { %1252 = vperm.xlu1 %8995, %v9287_v16   ;;  %1255 = vperm.xlu0 %8994, %v9288_v18   ;;  %v9291_v18 = vld [vmem:[%s14948_s0 + $0x60] sm:$0xff] }
 0x155   :  { %v10651_v22 = vpop.permute.xlu1 %509  ;;  %v10653_v19 = vpop.permute.xlu0 %506 }
 0x156   :  { %15155 = vst [vmem:[#allocation131_spill] sm:$0xff] %v10651_v22  ;;  %15156 = vst [vmem:[#allocation132_spill] sm:$0xff] %v10653_v19  ;;  %v9292_v19 = vld [vmem:[%s14948_s0 + $0x68] sm:$0xff] }
 0x157   :  { %1258 = vperm.xlu1 %8995, %v9289_v23   ;;  %1261 = vperm.xlu0 %8994, %v9290_v2   ;;  %v9293_v2 = vld [vmem:[%s14948_s0 + $0x70] sm:$0xff] }
 0x159   :  { %v10661_v16 = vpop.permute.xlu1 %515  ;;  %v10663_v17 = vpop.permute.xlu0 %512 }
 0x15a   :  { %15157 = vst [vmem:[#allocation133_spill] sm:$0xff] %v10661_v16  ;;  %15158 = vst [vmem:[#allocation134_spill] sm:$0xff] %v10663_v17  ;;  %v9294_v17 = vld [vmem:[%s14948_s0 + $0x78] sm:$0xff] }
 0x15b   :  { %1264 = vperm.xlu1 %8995, %v9291_v18   ;;  %1267 = vperm.xlu0 %8994, %v9292_v19   ;;  %v9295_v19 = vld [vmem:[%s14948_s0 + $0x80] sm:$0xff] }
 0x15d   :  { %v10671_v23 = vpop.permute.xlu1 %521  ;;  %v10673_v22 = vpop.permute.xlu0 %518 }
 0x15e   :  { %15159 = vst [vmem:[#allocation135_spill] sm:$0xff] %v10671_v23  ;;  %15160 = vst [vmem:[#allocation136_spill] sm:$0xff] %v10673_v22  ;;  %v9296_v22 = vld [vmem:[%s14948_s0 + $0x88] sm:$0xff] }
 0x15f   :  { %1270 = vperm.xlu1 %8995, %v9293_v2   ;;  %1273 = vperm.xlu0 %8994, %v9294_v17   ;;  %v9297_v17 = vld [vmem:[%s14948_s0 + $0x90] sm:$0xff] }
 0x161   :  { %v10681_v18 = vpop.permute.xlu1 %527  ;;  %v10683_v16 = vpop.permute.xlu0 %524 }
 0x162   :  { %15161 = vst [vmem:[#allocation137_spill] sm:$0xff] %v10681_v18  ;;  %15162 = vst [vmem:[#allocation138_spill] sm:$0xff] %v10683_v16  ;;  %v9298_v16 = vld [vmem:[%s14948_s0 + $0x98] sm:$0xff] }
 0x163   :  { %1276 = vperm.xlu1 %8995, %v9295_v19   ;;  %1279 = vperm.xlu0 %8994, %v9296_v22   ;;  %v9299_v22 = vld [vmem:[%s14948_s0 + $0xa0] sm:$0xff] }
 0x165   :  { %v10691_v2 = vpop.permute.xlu1 %533  ;;  %v10693_v23 = vpop.permute.xlu0 %530 }
 0x166   :  { %15163 = vst [vmem:[#allocation139_spill] sm:$0xff] %v10691_v2  ;;  %15164 = vst [vmem:[#allocation140_spill] sm:$0xff] %v10693_v23  ;;  %v9300_v23 = vld [vmem:[%s14948_s0 + $0xa8] sm:$0xff] }
 0x167   :  { %1282 = vperm.xlu1 %8995, %v9297_v17   ;;  %1285 = vperm.xlu0 %8994, %v9298_v16   ;;  %v9301_v16 = vld [vmem:[%s14948_s0 + $0xb8] sm:$0xff] }
 0x169   :  { %v10701_v19 = vpop.permute.xlu1 %539  ;;  %v10703_v18 = vpop.permute.xlu0 %536 }
 0x16a   :  { %15165 = vst [vmem:[#allocation141_spill] sm:$0xff] %v10701_v19  ;;  %15166 = vst [vmem:[#allocation142_spill] sm:$0xff] %v10703_v18 }
 0x16b   :  { %1288 = vperm.xlu1 %8995, %v9299_v22   ;;  %1291 = vperm.xlu0 %8994, %v9300_v23  }
 0x16d   :  { %v10711_v17 = vpop.permute.xlu1 %545  ;;  %v10713_v2 = vpop.permute.xlu0 %542 }
 0x16e   :  { %15167 = vst [vmem:[#allocation143_spill] sm:$0xff] %v10711_v17  ;;  %15168 = vst [vmem:[#allocation144_spill] sm:$0xff] %v10713_v2 }
 0x16f   :  { %1294 = vperm.xlu1 %8995, %v9710_v24   ;;  %1297 = vperm.xlu0 %8994, %v9301_v16  }
 0x171   :  { %v10719_v18 = vpop.permute.xlu1 %551  ;;  %v10721_v19 = vpop.permute.xlu0 %548 }
 0x172   :  { %15169 = vst [vmem:[#allocation145_spill] sm:$0xff] %v10719_v18  ;;  %15170 = vst [vmem:[#allocation146_spill] sm:$0xff] %v10721_v19  ;;  %v9367_v19 = vld [vmem:[%s14948_s0 + $0x18] sm:$0xff]  ;;  %v15290_v18 = vld [vmem:[#allocation81_spill] sm:$0xff] }
 0x173   :  { %1300 = vperm.xlu1 %8995, %v9720_v26   ;;  %1303 = vperm.xlu0 %8994, %v9715_v25  }
 0x175   :  { %v10725_v23 = vpop.permute.xlu1 %557  ;;  %v10727_v22 = vpop.permute.xlu0 %554 }
 0x176   :  { %15171 = vst [vmem:[#allocation147_spill] sm:$0xff] %v10725_v23  ;;  %15172 = vst [vmem:[#allocation148_spill] sm:$0xff] %v10727_v22 }
 0x177   :  { %1306 = vperm.xlu1 %8995, %v9731_v28   ;;  %1309 = vperm.xlu0 %8994, %v9726_v27  }
 0x179   :  { %v10731_v24 = vpop.permute.xlu1 %563  ;;  %v10733_v2 = vpop.permute.xlu0 %560 }
 0x17a   :  { %15173 = vst [vmem:[#allocation149_spill] sm:$0xff] %v10731_v24  ;;  %15174 = vst [vmem:[#allocation150_spill] sm:$0xff] %v10733_v2  ;;  %v15283_v2 = vld [vmem:[#allocation76_spill] sm:$0xff]  ;;  %v15284_v24 = vld [vmem:[#allocation77_spill] sm:$0xff] }
 0x17b   :  { %1312 = vperm.xlu1 %8995, %v9743_v30   ;;  %1315 = vperm.xlu0 %8994, %v9738_v29  }
 0x17d   :  { %v10737_v16 = vpop.permute.xlu1 %569  ;;  %v10739_v26 = vpop.permute.xlu0 %566 }
 0x17e   :  { %15175 = vst [vmem:[#allocation151_spill] sm:$0xff] %v10737_v16  ;;  %15176 = vst [vmem:[#allocation152_spill] sm:$0xff] %v10739_v26  ;;  %v15010_v16 = vmov 2  }
 0x17f   :  { %1318 = vperm.xlu1 %8995, %v9757_v32   ;;  %1321 = vperm.xlu0 %8994, %v9752_v31  }
 0x181   :  { %v10743_v25 = vpop.permute.xlu1 %575  ;;  %v10745_v28 = vpop.permute.xlu0 %572 }
 0x182   :  { %15177 = vst [vmem:[#allocation153_spill] sm:$0xff] %v10743_v25  ;;  %15178 = vst [vmem:[#allocation154_spill] sm:$0xff] %v10745_v28  ;;  %v15282_v25 = vld [vmem:[#allocation75_spill] sm:$0xff] }
 0x183   :  { %1324 = vperm.xlu1 %8995, %v9769_v34   ;;  %1327 = vperm.xlu0 %8994, %v9764_v33  }
 0x185   :  { %v10749_v27 = vpop.permute.xlu1 %581  ;;  %v10751_v30 = vpop.permute.xlu0 %578 }
 0x186   :  { %15179 = vst [vmem:[#allocation155_spill] sm:$0xff] %v10749_v27  ;;  %15180 = vst [vmem:[#allocation156_spill] sm:$0xff] %v10751_v30  ;;  %v15280_v27 = vld [vmem:[#allocation73_spill] sm:$0xff] }
 0x187   :  { %1330 = vperm.xlu1 %8995, %v9781_v36   ;;  %1333 = vperm.xlu0 %8994, %v9776_v35  }
 0x189   :  { %v10755_v29 = vpop.permute.xlu1 %587  ;;  %v10757_v32 = vpop.permute.xlu0 %584 }
 0x18a   :  { %15181 = vst [vmem:[#allocation157_spill] sm:$0xff] %v10755_v29  ;;  %15182 = vst [vmem:[#allocation158_spill] sm:$0xff] %v10757_v32  ;;  %v15278_v29 = vld [vmem:[#allocation71_spill] sm:$0xff] }
 0x18b   :  { %1336 = vperm.xlu1 %8995, %v9793_v38   ;;  %1339 = vperm.xlu0 %8994, %v9788_v37  }
 0x18d   :  { %v10761_v31 = vpop.permute.xlu1 %593  ;;  %v10763_v34 = vpop.permute.xlu0 %590 }
 0x18e   :  { %15183 = vst [vmem:[#allocation159_spill] sm:$0xff] %v10761_v31  ;;  %15184 = vst [vmem:[#allocation160_spill] sm:$0xff] %v10763_v34  ;;  %v15276_v31 = vld [vmem:[#allocation69_spill] sm:$0xff] }
 0x18f   :  { %1342 = vperm.xlu1 %8995, %v9805_v40   ;;  %1345 = vperm.xlu0 %8994, %v9800_v39  }
 0x191   :  { %v10767_v33 = vpop.permute.xlu1 %599  ;;  %v10769_v36 = vpop.permute.xlu0 %596 }
 0x192   :  { %15185 = vst [vmem:[#allocation161_spill] sm:$0xff] %v10767_v33  ;;  %15186 = vst [vmem:[#allocation162_spill] sm:$0xff] %v10769_v36  ;;  %v15274_v33 = vld [vmem:[#allocation67_spill] sm:$0xff] }
 0x193   :  { %1348 = vperm.xlu1 %8995, %v9817_v42   ;;  %1351 = vperm.xlu0 %8994, %v9812_v41  }
 0x195   :  { %v10773_v35 = vpop.permute.xlu1 %605  ;;  %v10775_v38 = vpop.permute.xlu0 %602 }
 0x196   :  { %15187 = vst [vmem:[#allocation163_spill] sm:$0xff] %v10773_v35  ;;  %15188 = vst [vmem:[#allocation164_spill] sm:$0xff] %v10775_v38  ;;  %v15270_v38 = vld [vmem:[#allocation63_spill] sm:$0xff]  ;;  %v15272_v35 = vld [vmem:[#allocation65_spill] sm:$0xff] }
 0x197   :  { %1354 = vperm.xlu1 %8995, %v9829_v44   ;;  %1357 = vperm.xlu0 %8994, %v9824_v43  }
 0x199   :  { %v10779_v37 = vpop.permute.xlu1 %611  ;;  %v10781_v40 = vpop.permute.xlu0 %608 }
 0x19a   :  { %15189 = vst [vmem:[#allocation165_spill] sm:$0xff] %v10779_v37  ;;  %15190 = vst [vmem:[#allocation166_spill] sm:$0xff] %v10781_v40  ;;  %v9337_v40 = vld [vmem:[%s14948_s0 + $0x430] sm:$0xff]  ;;  %v15269_v37 = vld [vmem:[#allocation62_spill] sm:$0xff] }
 0x19b   :  { %1360 = vperm.xlu1 %8995, %v9841_v46   ;;  %1363 = vperm.xlu0 %8994, %v9836_v45  }
 0x19d   :  { %v10785_v39 = vpop.permute.xlu1 %617  ;;  %v10787_v42 = vpop.permute.xlu0 %614 }
 0x19e   :  { %15191 = vst [vmem:[#allocation167_spill] sm:$0xff] %v10785_v39  ;;  %15192 = vst [vmem:[#allocation168_spill] sm:$0xff] %v10787_v42 }
 0x19f   :  { %1366 = vperm.xlu1 %8995, %v9853_v48   ;;  %1369 = vperm.xlu0 %8994, %v9848_v47  }
 0x1a1   :  { %v10791_v41 = vpop.permute.xlu1 %623  ;;  %v10793_v44 = vpop.permute.xlu0 %620 }
 0x1a2   :  { %15193 = vst [vmem:[#allocation169_spill] sm:$0xff] %v10791_v41  ;;  %15194 = vst [vmem:[#allocation170_spill] sm:$0xff] %v10793_v44 }
 0x1a3   :  { %1372 = vperm.xlu1 %8995, %v9865_v50   ;;  %1375 = vperm.xlu0 %8994, %v9860_v49  }
 0x1a5   :  { %v10797_v43 = vpop.permute.xlu1 %629  ;;  %v10799_v46 = vpop.permute.xlu0 %626 }
 0x1a6   :  { %15195 = vst [vmem:[#allocation171_spill] sm:$0xff] %v10797_v43  ;;  %15196 = vst [vmem:[#allocation172_spill] sm:$0xff] %v10799_v46 }
 0x1a7   :  { %1378 = vperm.xlu1 %8995, %v9877_v52   ;;  %1381 = vperm.xlu0 %8994, %v9872_v51  }
 0x1a9   :  { %v10803_v45 = vpop.permute.xlu1 %635  ;;  %v10805_v48 = vpop.permute.xlu0 %632 }
 0x1aa   :  { %15197 = vst [vmem:[#allocation173_spill] sm:$0xff] %v10803_v45  ;;  %15198 = vst [vmem:[#allocation174_spill] sm:$0xff] %v10805_v48 }
 0x1ab   :  { %1384 = vperm.xlu1 %8995, %v9889_v54   ;;  %1387 = vperm.xlu0 %8994, %v9884_v53  }
 0x1ad   :  { %v10809_v47 = vpop.permute.xlu1 %641  ;;  %v10811_v50 = vpop.permute.xlu0 %638 }
 0x1ae   :  { %15199 = vst [vmem:[#allocation175_spill] sm:$0xff] %v10809_v47  ;;  %15200 = vst [vmem:[#allocation176_spill] sm:$0xff] %v10811_v50 }
 0x1af   :  { %1390 = vperm.xlu1 %8995, %v9901_v56   ;;  %1393 = vperm.xlu0 %8994, %v9896_v55   ;;  %v185_v55 = vlaneseq }
 0x1b1   :  { %v10815_v49 = vpop.permute.xlu1 %647  ;;  %v10817_v52 = vpop.permute.xlu0 %644 }
 0x1b2   :  { %15201 = vst [vmem:[#allocation177_spill] sm:$0xff] %v10815_v49  ;;  %15202 = vst [vmem:[#allocation178_spill] sm:$0xff] %v10817_v52 }
 0x1b3   :  { %1396 = vperm.xlu1 %8995, %v9913_v58   ;;  %1399 = vperm.xlu0 %8994, %v9908_v57  }
 0x1b5   :  { %v10821_v51 = vpop.permute.xlu1 %653  ;;  %v10823_v54 = vpop.permute.xlu0 %650 }
 0x1b6   :  { %15203 = vst [vmem:[#allocation179_spill] sm:$0xff] %v10821_v51  ;;  %15204 = vst [vmem:[#allocation180_spill] sm:$0xff] %v10823_v54 }
 0x1b7   :  { %1402 = vperm.xlu1 %8995, %v9925_v60   ;;  %1405 = vperm.xlu0 %8994, %v9920_v59   ;;  %v10839_v60 = vand.u32 127, %v185_v55 }
 0x1b9   :  { %v10827_v53 = vpop.permute.xlu1 %659  ;;  %v10829_v56 = vpop.permute.xlu0 %656  ;;  %vm667_vm0 = vcmp.eq.s32.totalorder %v9965_v5, %v10839_v60  ;;  %vm668_vm1 = vcmp.eq.s32.totalorder %v9981_v9, %v10839_v60  ;;  %vm670_vm9 = vcmp.eq.s32.totalorder %v9979_v8, %v10839_v60  ;;  %vm669_vm10 = vcmp.eq.s32.totalorder %v9963_v4, %v10839_v60  ;;  %v15209_v8 = vld [vmem:[#allocation8_spill] sm:$0xff]  ;;  %v15210_v9 = vld [vmem:[#allocation7_spill] sm:$0xff] }
 0x1ba   :  { %15205 = vst [vmem:[#allocation181_spill] sm:$0xff] %v10827_v53  ;;  %15206 = vst [vmem:[#allocation182_spill] sm:$0xff] %v10829_v56  ;;  %vm672_vm15 = vcmp.eq.s32.totalorder %v9995_v12, %v10839_v60  ;;  %v15211_v12 = vld [vmem:[#allocation12_spill] sm:$0xff]  ;;  %v15246_v56 = vld [vmem:[#allocation55_spill] sm:$0xff] }
 0x1bb   :  { %1408 = vperm.xlu1 %8995, %v9937_v62   ;;  %1411 = vperm.xlu0 %8994, %v9932_v61   ;;  %vm8269_vm5 = vmpackc.low %vm668_vm1, %vm667_vm0  ;;  %v15001_v61 = vmov 1.0|1.0   ;;  %vm671_vm0 = vcmp.eq.s32.totalorder %v9997_v13, %v10839_v60  ;;  %v15213_v13 = vld [vmem:[#allocation5_spill] sm:$0xff] }
 0x1bc   :  { %vm8273_vm13 = vmpackc.low %vm670_vm9, %vm669_vm10 }
 0x1bd   :  { %v10833_v58 = vpop.permute.xlu1 %665  ;;  %v10835_v57 = vpop.permute.xlu0 %662 }
 0x1be   :  { %15207 = vst [vmem:[#allocation183_spill] sm:$0xff] %v10833_v58  ;;  %15208 = vst [vmem:[#allocation184_spill] sm:$0xff] %v10835_v57  ;;  %v15240_v57 = vld [vmem:[#allocation47_spill] sm:$0xff]  ;;  %v15245_v58 = vld [vmem:[#allocation56_spill] sm:$0xff] }
 0x1bf   :  { %1414 = vperm.xlu1 %8995, %v9949_v0   ;;  %1417 = vperm.xlu0 %8994, %v9944_v63  }
 0x1c2   :  { %v1232_v59 = vpop.permute.xlu1 %1231  ;;  %v1229_v62 = vpop.permute.xlu0 %1228 }
 0x1c3   :  { %1420 = vperm.xlu1 %8995, %v9961_v3   ;;  %1423 = vperm.xlu0 %8994, %v9956_v1   ;;  %vm1707_vm2 = vcmp.eq.s32.totalorder %v1229_v62, %v10839_v60  ;;  %vm1708_vm3 = vcmp.eq.s32.totalorder %v1232_v59, %v10839_v60  ;;  %v15215_v62 = vld [vmem:[#allocation16_spill] sm:$0xff] }
 0x1c4   :  { %vm8267_vm4 = vmpackc.low %vm1708_vm3, %vm1707_vm2 }
 0x1c5   :  { %8268 = vmatprep.mubr.msk.bf16.mxu0 %vm8267_vm4, %v15001_v61  ;;  %vm8277_vm3 = vmpackc.low %vm672_vm15, %vm671_vm0 }
 0x1c6   :  { %v1235_v63 = vpop.permute.xlu1 %1234  ;;  %8270 = vmatmul.mubr.msk.bf16.vlgmr.msra.gmra.mrb[0].mxu0 %vm8269_vm5, %v15001_v61  ;;  %v1238_v0 = vpop.permute.xlu0 %1237  ;;  %vm674_vm5 = vcmp.eq.s32.totalorder %v15213_v13, %v10839_v60 }
 0x1c7   :  { %vm1709_vm6 = vcmp.eq.s32.totalorder %v1235_v63, %v10839_v60  ;;  %vm1710_vm7 = vcmp.eq.s32.totalorder %v1238_v0, %v10839_v60  ;;  %1426 = vperm.xlu1 %8995, %v9977_v7   ;;  %1429 = vperm.xlu0 %8994, %v9972_v6   ;;  %v15216_v63 = vld [vmem:[#allocation15_spill] sm:$0xff] }
 0x1c8   :  { %vm8271_vm8 = vmpackc.low %vm1710_vm7, %vm1709_vm6 }
 0x1c9   :  { %8272 = vmatprep.mubr.msk.bf16.mxu0 %vm8271_vm8, %v15001_v61 }
 0x1ca   :  { %v1241_v1 = vpop.permute.xlu1 %1240  ;;  %v1244_v3 = vpop.permute.xlu0 %1243 }
 0x1cb   :  { %1432 = vperm.xlu1 %8995, %v9993_v11   ;;  %1435 = vperm.xlu0 %8994, %v9988_v10   ;;  %vm1711_vm11 = vcmp.eq.s32.totalorder %v1241_v1, %v10839_v60  ;;  %vm1712_vm12 = vcmp.eq.s32.totalorder %v1244_v3, %v10839_v60  ;;  %v15217_v3 = vld [vmem:[#allocation20_spill] sm:$0xff] }
 0x1cc   :  { %vm8275_vm14 = vmpackc.low %vm1712_vm12, %vm1711_vm11 }
 0x1ce   :  { %v1247_v5 = vpop.permute.xlu1 %1246  ;;  %8274 = vmatmul.mubr.msk.bf16.gmra.mrb[4].mxu0 %vm8273_vm13, %v15001_v61  ;;  %v1250_v6 = vpop.permute.xlu0 %1249 }
 0x1cf   :  { %1438 = vperm.xlu1 %8995, %v10009_v15   ;;  %1441 = vperm.xlu0 %8994, %v10004_v14   ;;  %vm1713_vm1 = vcmp.eq.s32.totalorder %v1247_v5, %v10839_v60  ;;  %vm1714_vm2 = vcmp.eq.s32.totalorder %v1250_v6, %v10839_v60  ;;  %v15212_v14 = vld [vmem:[#allocation11_spill] sm:$0xff]  ;;  %v15214_v15 = vld [vmem:[#allocation6_spill] sm:$0xff]  ;;  %v15219_v6 = vld [vmem:[#allocation9_spill] sm:$0xff] }
 0x1d0   :  { %8276 = vmatprep.mubr.msk.bf16.mxu0 %vm8275_vm14, %v15001_v61  ;;  %vm8279_vm4 = vmpackc.low %vm1714_vm2, %vm1713_vm1  ;;  %vm673_vm6 = vcmp.eq.s32.totalorder %v15214_v15, %v10839_v60  ;;  %v15218_v5 = vld [vmem:[#allocation19_spill] sm:$0xff]  ;;  %vm676_vm11 = vcmp.eq.s32.totalorder %v15219_v6, %v10839_v60  ;;  %v15223_v15 = vld [vmem:[#allocation28_spill] sm:$0xff] }
 0x1d1   :  { %vm8281_vm9 = vmpackc.low %vm674_vm5, %vm673_vm6  ;;  %v15228_v6 = vld [vmem:[#allocation31_spill] sm:$0xff] }
 0x1d2   :  { %v1253_v4 = vpop.permute.xlu1 %1252  ;;  %v1256_v7 = vpop.permute.xlu0 %1255 }
 0x1d3   :  { %1444 = vperm.xlu1 %8995, %v15209_v8   ;;  %1447 = vperm.xlu0 %8994, %v15210_v9   ;;  %vm1715_vm7 = vcmp.eq.s32.totalorder %v1253_v4, %v10839_v60  ;;  %vm1716_vm8 = vcmp.eq.s32.totalorder %v1256_v7, %v10839_v60  ;;  %v15220_v8 = vld [vmem:[#allocation10_spill] sm:$0xff]  ;;  %v15221_v9 = vld [vmem:[#allocation24_spill] sm:$0xff] }
 0x1d4   :  { %vm8283_vm10 = vmpackc.low %vm1716_vm8, %vm1715_vm7  ;;  %vm675_vm12 = vcmp.eq.s32.totalorder %v15220_v8, %v10839_v60 }
 0x1d5   :  { %vm8285_vm15 = vmpackc.low %vm676_vm11, %vm675_vm12 }
 0x1d6   :  { %v1259_v10 = vpop.permute.xlu1 %1258  ;;  %8278 = vmatmul.mubr.msk.bf16.gmra.mrb[8].mxu0 %vm8277_vm3, %v15001_v61  ;;  %v1262_v11 = vpop.permute.xlu0 %1261 }
 0x1d7   :  { %1450 = vperm.xlu1 %8995, %v15211_v12   ;;  %1453 = vperm.xlu0 %8994, %v15212_v14   ;;  %v15222_v12 = vld [vmem:[#allocation23_spill] sm:$0xff]  ;;  %vm1717_vm13 = vcmp.eq.s32.totalorder %v1259_v10, %v10839_v60  ;;  %vm1718_vm14 = vcmp.eq.s32.totalorder %v1262_v11, %v10839_v60  ;;  %v15226_v10 = vld [vmem:[#allocation14_spill] sm:$0xff] }
 0x1d8   :  { %8280 = vmatprep.mubr.msk.bf16.mxu0 %vm8279_vm4, %v15001_v61  ;;  %vm8287_vm0 = vmpackc.low %vm1718_vm14, %vm1717_vm13  ;;  %vm677_vm2 = vcmp.eq.s32.totalorder %v15226_v10, %v10839_v60  ;;  %v15233_v10 = vld [vmem:[#allocation40_spill] sm:$0xff] }
 0x1da   :  { %v1265_v55 = vpop.permute.xlu1 %1264  ;;  %v1268_v59 = vpop.permute.xlu0 %1267 }
 0x1db   :  { %1456 = vperm.xlu1 %8995, %v15215_v62   ;;  %1459 = vperm.xlu0 %8994, %v15216_v63   ;;  %v15224_v62 = vld [vmem:[#allocation27_spill] sm:$0xff]  ;;  %v15225_v63 = vld [vmem:[#allocation13_spill] sm:$0xff]  ;;  %vm1719_vm3 = vcmp.eq.s32.totalorder %v1265_v55, %v10839_v60  ;;  %vm1720_vm4 = vcmp.eq.s32.totalorder %v1268_v59, %v10839_v60  ;;  %v15232_v55 = vld [vmem:[#allocation18_spill] sm:$0xff] }
 0x1dc   :  { %vm678_vm1 = vcmp.eq.s32.totalorder %v15225_v63, %v10839_v60  ;;  %vm8291_vm6 = vmpackc.low %vm1720_vm4, %vm1719_vm3  ;;  %vm679_vm8 = vcmp.eq.s32.totalorder %v15232_v55, %v10839_v60  ;;  %v15237_v55 = vld [vmem:[#allocation21_spill] sm:$0xff] }
 0x1dd   :  { %vm8289_vm5 = vmpackc.low %vm678_vm1, %vm677_vm2  ;;  %vm682_vm13 = vcmp.eq.s32.totalorder %v15237_v55, %v10839_v60  ;;  %v15241_v55 = vld [vmem:[#allocation52_spill] sm:$0xff] }
 0x1de   :  { %v1271_v0 = vpop.permute.xlu1 %1270  ;;  %8282 = vmatmul.mubr.msk.bf16.gmra.mrb[12].mxu0 %vm8281_vm9, %v15001_v61  ;;  %v1274_v1 = vpop.permute.xlu0 %1273 }
 0x1df   :  { %1462 = vperm.xlu1 %8995, %v15217_v3   ;;  %1465 = vperm.xlu0 %8994, %v15218_v5   ;;  %v15227_v5 = vld [vmem:[#allocation32_spill] sm:$0xff]  ;;  %vm1721_vm9 = vcmp.eq.s32.totalorder %v1271_v0, %v10839_v60  ;;  %v15238_v0 = vld [vmem:[#allocation22_spill] sm:$0xff] }
 0x1e0   :  { %8284 = vmatprep.mubr.msk.bf16.mxu0 %vm8283_vm10, %v15001_v61  ;;  %vm1722_vm10 = vcmp.eq.s32.totalorder %v1274_v1, %v10839_v60  ;;  %vm681_vm14 = vcmp.eq.s32.totalorder %v15238_v0, %v10839_v60  ;;  %v15242_v0 = vld [vmem:[#allocation51_spill] sm:$0xff] }
 0x1e1   :  { %vm8295_vm12 = vmpackc.low %vm1722_vm10, %vm1721_vm9 }
 0x1e2   :  { %v1277_v4 = vpop.permute.xlu1 %1276  ;;  %v1280_v7 = vpop.permute.xlu0 %1279  ;;  %vm8297_vm1 = vmpackc.low %vm682_vm13, %vm681_vm14 }
 0x1e3   :  { %1468 = vperm.xlu1 %8995, %v15221_v9   ;;  %1471 = vperm.xlu0 %8994, %v15222_v12   ;;  %v15229_v12 = vld [vmem:[#allocation36_spill] sm:$0xff] }
 0x1e6   :  { %v10900_v14 = vpop.permute.xlu1 %1282  ;;  %8286 = vmatmul.mubr.msk.bf16.gmra.mrb[16].mxu0 %vm8285_vm15, %v15001_v61  ;;  %v10903_v13 = vpop.permute.xlu0 %1285  ;;  %vm1723_vm15 = vcmp.eq.s32.totalorder %v1277_v4, %v10839_v60  ;;  %v15244_v4 = vld [vmem:[#allocation26_spill] sm:$0xff] }
 0x1e7   :  { %1474 = vperm.xlu1 %8995, %v15223_v15   ;;  %1477 = vperm.xlu0 %8994, %v15224_v62   ;;  %v15230_v15 = vld [vmem:[#allocation35_spill] sm:$0xff]  ;;  %v15231_v62 = vld [vmem:[#allocation17_spill] sm:$0xff]  ;;  %vm683_vm4 = vcmp.eq.s32.totalorder %v15244_v4, %v10839_v60 }
 0x1e8   :  { %8288 = vmatprep.mubr.msk.bf16.mxu0 %vm8287_vm0, %v15001_v61  ;;  %vm680_vm7 = vcmp.eq.s32.totalorder %v15231_v62, %v10839_v60  ;;  %v15236_v62 = vld [vmem:[#allocation43_spill] sm:$0xff]  ;;  %vm1724_vm0 = vcmp.eq.s32.totalorder %v1280_v7, %v10839_v60 }
 0x1e9   :  { %vm8293_vm11 = vmpackc.low %vm680_vm7, %vm679_vm8 }
 0x1ea   :  { %v10912_v11 = vpop.permute.xlu1 %1288  ;;  %v10914_v3 = vpop.permute.xlu0 %1291  ;;  %vm8299_vm2 = vmpackc.low %vm1724_vm0, %vm1723_vm15 }
 0x1eb   :  { %1480 = vperm.xlu1 %8995, %v15227_v5   ;;  %1483 = vperm.xlu0 %8994, %v15228_v6   ;;  %v15234_v5 = vld [vmem:[#allocation39_spill] sm:$0xff]  ;;  %vm1727_vm13 = vcmp.eq.s32.totalorder %v10912_v11, %v10839_v60  ;;  %vm1728_vm14 = vcmp.eq.s32.totalorder %v10914_v3, %v10839_v60  ;;  %v9306_v11 = vld [vmem:[%s14948_s0 + $0x338] sm:$0xff]  ;;  %v15252_v3 = vld [vmem:[#allocation33_spill] sm:$0xff] }
 0x1ee   :  { %v10920_v8 = vpop.permute.xlu1 %1294  ;;  %8290 = vmatmul.mubr.msk.bf16.gmra.mrb[20].mxu0 %vm8289_vm5, %v15001_v61  ;;  %v10923_v9 = vpop.permute.xlu0 %1297  ;;  %vm1725_vm5 = vcmp.eq.s32.totalorder %v10900_v14, %v10839_v60  ;;  %v15249_v14 = vld [vmem:[#allocation30_spill] sm:$0xff] }
 0x1ef   :  { %1486 = vperm.xlu1 %8995, %v15229_v12   ;;  %1489 = vperm.xlu0 %8994, %v15230_v15   ;;  %v15235_v15 = vld [vmem:[#allocation44_spill] sm:$0xff]  ;;  %vm685_vm10 = vcmp.eq.s32.totalorder %v15249_v14, %v10839_v60 }
 0x1f0   :  { %8292 = vmatprep.mubr.msk.bf16.mxu0 %vm8291_vm6, %v15001_v61  ;;  %vm1726_vm6 = vcmp.eq.s32.totalorder %v10903_v13, %v10839_v60 }
 0x1f1   :  { %vm8303_vm8 = vmpackc.low %vm1726_vm6, %vm1725_vm5  ;;  %vm1730_vm5 = vcmp.eq.s32.totalorder %v10923_v9, %v10839_v60  ;;  %v15254_v9 = vld [vmem:[#allocation37_spill] sm:$0xff] }
 0x1f2   :  { %v10932_v59 = vpop.permute.xlu1 %1300  ;;  %v10934_v63 = vpop.permute.xlu0 %1303 }
 0x1f3   :  { %1492 = vperm.xlu1 %8995, %v15233_v10   ;;  %1495 = vperm.xlu0 %8994, %v15234_v5   ;;  %v15239_v5 = vld [vmem:[#allocation48_spill] sm:$0xff] }
 0x1f6   :  { %v10940_v6 = vpop.permute.xlu1 %1306  ;;  %8294 = vmatmul.mubr.msk.bf16.gmra.mrb[24].mxu0 %vm8293_vm11, %v15001_v61  ;;  %v10943_v12 = vpop.permute.xlu0 %1309 }
 0x1f7   :  { %1498 = vperm.xlu1 %8995, %v15235_v15   ;;  %1501 = vperm.xlu0 %8994, %v15236_v62  }
 0x1f8   :  { %8296 = vmatprep.mubr.msk.bf16.mxu0 %vm8295_vm12, %v15001_v61 }
 0x1fa   :  { %v10952_v1 = vpop.permute.xlu1 %1312  ;;  %v10954_v10 = vpop.permute.xlu0 %1315 }
 0x1fb   :  { %1504 = vperm.xlu1 %8995, %v15239_v5   ;;  %1507 = vperm.xlu0 %8994, %v15240_v57   ;;  %v15243_v57 = vld [vmem:[#allocation25_spill] sm:$0xff] }
 0x1fc   :  { %vm684_vm3 = vcmp.eq.s32.totalorder %v15243_v57, %v10839_v60  ;;  %v15247_v57 = vld [vmem:[#allocation59_spill] sm:$0xff] }
 0x1fd   :  { %vm8301_vm7 = vmpackc.low %vm684_vm3, %vm683_vm4  ;;  %vm1729_vm4 = vcmp.eq.s32.totalorder %v10920_v8, %v10839_v60  ;;  %v9310_v8 = vld [vmem:[%s14948_s0 + $0x358] sm:$0xff] }
 0x1fe   :  { %v10960_v15 = vpop.permute.xlu1 %1318  ;;  %8298 = vmatmul.mubr.msk.bf16.gmra.mrb[28].mxu0 %vm8297_vm1, %v15001_v61  ;;  %v10963_v62 = vpop.permute.xlu0 %1321  ;;  %vm8307_vm1 = vmpackc.low %vm1728_vm14, %vm1727_vm13 }
 0x1ff   :  { %1510 = vperm.xlu1 %8995, %v15241_v55   ;;  %1513 = vperm.xlu0 %8994, %v15242_v0  }
 0x200   :  { %8300 = vmatprep.mubr.msk.bf16.mxu0 %vm8299_vm2, %v15001_v61  ;;  %vm688_vm2 = vcmp.eq.s32.totalorder %v15252_v3, %v10839_v60 }
 0x202   :  { %v10972_v7 = vpop.permute.xlu1 %1324  ;;  %v10974_v5 = vpop.permute.xlu0 %1327 }
 0x203   :  { %1516 = vperm.xlu1 %8995, %v15245_v58   ;;  %1519 = vperm.xlu0 %8994, %v15246_v56   ;;  %v9302_v56 = vld [vmem:[%s14948_s0 + $0x318] sm:$0xff]  ;;  %v15248_v58 = vld [vmem:[#allocation29_spill] sm:$0xff] }
 0x204   :  { %vm686_vm9 = vcmp.eq.s32.totalorder %v15248_v58, %v10839_v60 }
 0x205   :  { %vm8305_vm0 = vmpackc.low %vm686_vm9, %vm685_vm10  ;;  %vm1731_vm10 = vcmp.eq.s32.totalorder %v10932_v59, %v10839_v60  ;;  %v9314_v59 = vld [vmem:[%s14948_s0 + $0x378] sm:$0xff] }
 0x206   :  { %v10982_v55 = vpop.permute.xlu1 %1330  ;;  %8302 = vmatmul.mubr.msk.bf16.gmra.mrb[32].mxu0 %vm8301_vm7, %v15001_v61  ;;  %v10985_v0 = vpop.permute.xlu0 %1333  ;;  %vm8311_vm7 = vmpackc.low %vm1730_vm5, %vm1729_vm4 }
 0x207   :  { %1522 = vperm.xlu1 %8995, %v15247_v57   ;;  %1525 = vperm.xlu0 %8994, %v9302_v56   ;;  %v9303_v57 = vld [vmem:[%s14948_s0 + $0x320] sm:$0xff]  ;;  %v9304_v56 = vld [vmem:[%s14948_s0 + $0x328] sm:$0xff] }
 0x208   :  { %8304 = vmatprep.mubr.msk.bf16.mxu0 %vm8303_vm8, %v15001_v61  ;;  %vm690_vm8 = vcmp.eq.s32.totalorder %v15254_v9, %v10839_v60 }
 0x20a   :  { %v1337_v13 = vpop.permute.xlu1 %1336  ;;  %v1340_v4 = vpop.permute.xlu0 %1339 }
 0x20b   :  { %vm1743_vm11 = vcmp.eq.s32.totalorder %v1337_v13, %v10839_v60  ;;  %vm1744_vm12 = vcmp.eq.s32.totalorder %v1340_v4, %v10839_v60  ;;  %1528 = vperm.xlu1 %8995, %v9303_v57   ;;  %1531 = vperm.xlu0 %8994, %v9304_v56   ;;  %v9305_v4 = vld [vmem:[%s14948_s0 + $0x330] sm:$0xff]  ;;  %v15253_v57 = vld [vmem:[#allocation34_spill] sm:$0xff] }
 0x20c   :  { %vm11008_vm15 = vmpackc.low %vm1744_vm12, %vm1743_vm11  ;;  %vm687_vm3 = vcmp.eq.s32.totalorder %v15253_v57, %v10839_v60  ;;  %vm1732_vm11 = vcmp.eq.s32.totalorder %v10934_v63, %v10839_v60  ;;  %v15256_v63 = vld [vmem:[#allocation41_spill] sm:$0xff] }
 0x20d   :  { %vm8309_vm6 = vmpackc.low %vm688_vm2, %vm687_vm3  ;;  %vm692_vm14 = vcmp.eq.s32.totalorder %v15256_v63, %v10839_v60  ;;  %vm1734_vm2 = vcmp.eq.s32.totalorder %v10943_v12, %v10839_v60  ;;  %v15258_v12 = vld [vmem:[#allocation45_spill] sm:$0xff] }
 0x20e   :  { %v11012_v14 = vpop.permute.xlu1 %1342  ;;  %8306 = vmatmul.mubr.msk.bf16.gmra.mrb[36].mxu0 %vm8305_vm0, %v15001_v61  ;;  %v11015_v13 = vpop.permute.xlu0 %1345  ;;  %vm8315_vm13 = vmpackc.low %vm1732_vm11, %vm1731_vm10  ;;  %vm694_vm5 = vcmp.eq.s32.totalorder %v15258_v12, %v10839_v60 }
 0x20f   :  { %1534 = vperm.xlu1 %8995, %v9305_v4   ;;  %1537 = vperm.xlu0 %8994, %v9306_v11   ;;  %v9307_v4 = vld [vmem:[%s14948_s0 + $0x340] sm:$0xff]  ;;  %v9308_v11 = vld [vmem:[%s14948_s0 + $0x348] sm:$0xff] }
 0x210   :  { %8308 = vmatprep.mubr.msk.bf16.mxu0 %vm8307_vm1, %v15001_v61  ;;  %vm1733_vm1 = vcmp.eq.s32.totalorder %v10940_v6, %v10839_v60  ;;  %v9318_v6 = vld [vmem:[%s14948_s0 + $0x398] sm:$0xff] }
 0x211   :  { %vm8319_vm4 = vmpackc.low %vm1734_vm2, %vm1733_vm1 }
 0x212   :  { %v11028_v56 = vpop.permute.xlu1 %1348  ;;  %v11030_v53 = vpop.permute.xlu0 %1351 }
 0x213   :  { %1540 = vperm.xlu1 %8995, %v9307_v4   ;;  %1543 = vperm.xlu0 %8994, %v9308_v11   ;;  %v9309_v4 = vld [vmem:[%s14948_s0 + $0x350] sm:$0xff]  ;;  %v15255_v11 = vld [vmem:[#allocation38_spill] sm:$0xff] }
 0x214   :  { %vm689_vm9 = vcmp.eq.s32.totalorder %v15255_v11, %v10839_v60 }
 0x215   :  { %vm8313_vm12 = vmpackc.low %vm690_vm8, %vm689_vm9  ;;  %vm1736_vm8 = vcmp.eq.s32.totalorder %v10954_v10, %v10839_v60  ;;  %v15260_v10 = vld [vmem:[#allocation49_spill] sm:$0xff] }
 0x216   :  { %v11042_v3 = vpop.permute.xlu1 %1354  ;;  %8310 = vmatmul.mubr.msk.bf16.gmra.mrb[40].mxu0 %vm8309_vm6, %v15001_v61  ;;  %v11045_v57 = vpop.permute.xlu0 %1357  ;;  %vm696_vm11 = vcmp.eq.s32.totalorder %v15260_v10, %v10839_v60 }
 0x217   :  { %1546 = vperm.xlu1 %8995, %v9309_v4   ;;  %1549 = vperm.xlu0 %8994, %v9310_v8   ;;  %v9311_v4 = vld [vmem:[%s14948_s0 + $0x360] sm:$0xff]  ;;  %v9312_v8 = vld [vmem:[%s14948_s0 + $0x368] sm:$0xff] }
 0x218   :  { %8312 = vmatprep.mubr.msk.bf16.mxu0 %vm8311_vm7, %v15001_v61  ;;  %vm1735_vm7 = vcmp.eq.s32.totalorder %v10952_v1, %v10839_v60  ;;  %v9322_v1 = vld [vmem:[%s14948_s0 + $0x3b8] sm:$0xff] }
 0x219   :  { %vm8323_vm10 = vmpackc.low %vm1736_vm8, %vm1735_vm7 }
 0x21a   :  { %v11058_v54 = vpop.permute.xlu1 %1360  ;;  %v11060_v51 = vpop.permute.xlu0 %1363 }
 0x21b   :  { %1552 = vperm.xlu1 %8995, %v9311_v4   ;;  %1555 = vperm.xlu0 %8994, %v9312_v8   ;;  %v9313_v4 = vld [vmem:[%s14948_s0 + $0x370] sm:$0xff]  ;;  %v15257_v8 = vld [vmem:[#allocation42_spill] sm:$0xff] }
 0x21c   :  { %vm691_vm0 = vcmp.eq.s32.totalorder %v15257_v8, %v10839_v60 }
 0x21d   :  { %vm8317_vm3 = vmpackc.low %vm692_vm14, %vm691_vm0  ;;  %vm1738_vm14 = vcmp.eq.s32.totalorder %v10963_v62, %v10839_v60  ;;  %v15262_v62 = vld [vmem:[#allocation53_spill] sm:$0xff] }
 0x21e   :  { %v11072_v9 = vpop.permute.xlu1 %1366  ;;  %8314 = vmatmul.mubr.msk.bf16.gmra.mrb[44].mxu0 %vm8313_vm12, %v15001_v61  ;;  %v11075_v11 = vpop.permute.xlu0 %1369  ;;  %vm698_vm2 = vcmp.eq.s32.totalorder %v15262_v62, %v10839_v60 }
 0x21f   :  { %1558 = vperm.xlu1 %8995, %v9313_v4   ;;  %1561 = vperm.xlu0 %8994, %v9314_v59   ;;  %v9315_v4 = vld [vmem:[%s14948_s0 + $0x380] sm:$0xff]  ;;  %v9316_v59 = vld [vmem:[%s14948_s0 + $0x388] sm:$0xff] }
 0x220   :  { %8316 = vmatprep.mubr.msk.bf16.mxu0 %vm8315_vm13, %v15001_v61  ;;  %vm1737_vm13 = vcmp.eq.s32.totalorder %v10960_v15, %v10839_v60  ;;  %v9326_v15 = vld [vmem:[%s14948_s0 + $0x3d8] sm:$0xff] }
 0x221   :  { %vm8327_vm1 = vmpackc.low %vm1738_vm14, %vm1737_vm13 }
 0x222   :  { %v11088_v52 = vpop.permute.xlu1 %1372  ;;  %v11090_v49 = vpop.permute.xlu0 %1375 }
 0x223   :  { %1564 = vperm.xlu1 %8995, %v9315_v4   ;;  %1567 = vperm.xlu0 %8994, %v9316_v59   ;;  %v9317_v4 = vld [vmem:[%s14948_s0 + $0x390] sm:$0xff]  ;;  %v15259_v59 = vld [vmem:[#allocation46_spill] sm:$0xff] }
 0x224   :  { %vm693_vm6 = vcmp.eq.s32.totalorder %v15259_v59, %v10839_v60 }
 0x225   :  { %vm8321_vm9 = vmpackc.low %vm694_vm5, %vm693_vm6  ;;  %vm1740_vm5 = vcmp.eq.s32.totalorder %v10974_v5, %v10839_v60  ;;  %v15264_v5 = vld [vmem:[#allocation57_spill] sm:$0xff] }
 0x226   :  { %v11102_v63 = vpop.permute.xlu1 %1378  ;;  %8318 = vmatmul.mubr.msk.bf16.gmra.mrb[48].mxu0 %vm8317_vm3, %v15001_v61  ;;  %v11105_v8 = vpop.permute.xlu0 %1381  ;;  %vm700_vm8 = vcmp.eq.s32.totalorder %v15264_v5, %v10839_v60 }
 0x227   :  { %1570 = vperm.xlu1 %8995, %v9317_v4   ;;  %1573 = vperm.xlu0 %8994, %v9318_v6   ;;  %v9319_v4 = vld [vmem:[%s14948_s0 + $0x3a0] sm:$0xff]  ;;  %v9320_v6 = vld [vmem:[%s14948_s0 + $0x3a8] sm:$0xff] }
 0x228   :  { %8320 = vmatprep.mubr.msk.bf16.mxu0 %vm8319_vm4, %v15001_v61  ;;  %vm1739_vm4 = vcmp.eq.s32.totalorder %v10972_v7, %v10839_v60  ;;  %v9330_v7 = vld [vmem:[%s14948_s0 + $0x3f8] sm:$0xff] }
 0x229   :  { %vm8331_vm7 = vmpackc.low %vm1740_vm5, %vm1739_vm4  ;;  %vm1746_vm4 = vcmp.eq.s32.totalorder %v11015_v13, %v10839_v60 }
 0x22a   :  { %v11118_v50 = vpop.permute.xlu1 %1384  ;;  %v11120_v47 = vpop.permute.xlu0 %1387 }
 0x22b   :  { %1576 = vperm.xlu1 %8995, %v9319_v4   ;;  %1579 = vperm.xlu0 %8994, %v9320_v6   ;;  %v9321_v4 = vld [vmem:[%s14948_s0 + $0x3b0] sm:$0xff]  ;;  %v15261_v6 = vld [vmem:[#allocation50_spill] sm:$0xff] }
 0x22c   :  { %vm695_vm12 = vcmp.eq.s32.totalorder %v15261_v6, %v10839_v60 }
 0x22d   :  { %vm8325_vm0 = vmpackc.low %vm696_vm11, %vm695_vm12  ;;  %vm1742_vm11 = vcmp.eq.s32.totalorder %v10985_v0, %v10839_v60  ;;  %v15266_v0 = vld [vmem:[#allocation60_spill] sm:$0xff] }
 0x22e   :  { %v11132_v12 = vpop.permute.xlu1 %1390  ;;  %8322 = vmatmul.mubr.msk.bf16.gmra.mrb[52].mxu0 %vm8321_vm9, %v15001_v61  ;;  %v11135_v59 = vpop.permute.xlu0 %1393  ;;  %vm702_vm14 = vcmp.eq.s32.totalorder %v15266_v0, %v10839_v60  ;;  %v15268_v0 = vmov 1.0|1.0  }
 0x22f   :  { %1582 = vperm.xlu1 %8995, %v9321_v4   ;;  %1585 = vperm.xlu0 %8994, %v9322_v1   ;;  %v9323_v4 = vld [vmem:[%s14948_s0 + $0x3c0] sm:$0xff]  ;;  %v9324_v1 = vld [vmem:[%s14948_s0 + $0x3c8] sm:$0xff] }
 0x230   :  { %8324 = vmatprep.mubr.msk.bf16.mxu0 %vm8323_vm10, %v15001_v61  ;;  %vm1741_vm10 = vcmp.eq.s32.totalorder %v10982_v55, %v10839_v60  ;;  %v9334_v55 = vld [vmem:[%s14948_s0 + $0x418] sm:$0xff] }
 0x231   :  { %vm8335_vm13 = vmpackc.low %vm1742_vm11, %vm1741_vm10  ;;  %vm1748_vm10 = vcmp.eq.s32.totalorder %v11030_v53, %v10839_v60 }
 0x232   :  { %v11148_v48 = vpop.permute.xlu1 %1396  ;;  %v11150_v45 = vpop.permute.xlu0 %1399 }
 0x233   :  { %1588 = vperm.xlu1 %8995, %v9323_v4   ;;  %1591 = vperm.xlu0 %8994, %v9324_v1   ;;  %v9325_v4 = vld [vmem:[%s14948_s0 + $0x3d0] sm:$0xff]  ;;  %v15263_v1 = vld [vmem:[#allocation54_spill] sm:$0xff] }
 0x234   :  { %vm697_vm3 = vcmp.eq.s32.totalorder %v15263_v1, %v10839_v60 }
 0x235   :  { %vm8329_vm6 = vmpackc.low %vm698_vm2, %vm697_vm3  ;;  %vm704_vm2 = vcmp.eq.s32.totalorder %v15269_v37, %v10839_v60  ;;  %vm703_vm3 = vcmp.eq.s32.totalorder %v15270_v38, %v10839_v60  ;;  %v9216_v38 = vld [vmem:[%s14949_s1 + $0x88] sm:$0xff]  }
 0x236   :  { %v11162_v10 = vpop.permute.xlu1 %1402  ;;  %8326 = vmatmul.mubr.msk.bf16.gmra.mrb[56].mxu0 %vm8325_vm0, %v15001_v61  ;;  %v11165_v6 = vpop.permute.xlu0 %1405  ;;  %v9340_v37 = vld [vmem:[%s14948_s0 + $0x448] sm:$0xff]  ;;  %vm8341_vm5 = vmpackc.low %vm704_vm2, %vm703_vm3 }
 0x237   :  { %1594 = vperm.xlu1 %8995, %v9325_v4   ;;  %1597 = vperm.xlu0 %8994, %v9326_v15   ;;  %v9327_v4 = vld [vmem:[%s14948_s0 + $0x3e0] sm:$0xff]  ;;  %v9328_v15 = vld [vmem:[%s14948_s0 + $0x3e8] sm:$0xff] }
 0x238   :  { %8328 = vmatprep.mubr.msk.bf16.mxu0 %vm8327_vm1, %v15001_v61 }
 0x23a   :  { %v11178_v46 = vpop.permute.xlu1 %1408  ;;  %v11180_v43 = vpop.permute.xlu0 %1411 }
 0x23b   :  { %1600 = vperm.xlu1 %8995, %v9327_v4   ;;  %1603 = vperm.xlu0 %8994, %v9328_v15   ;;  %v9329_v4 = vld [vmem:[%s14948_s0 + $0x3f0] sm:$0xff]  ;;  %v15265_v15 = vld [vmem:[#allocation58_spill] sm:$0xff] }
 0x23c   :  { %vm699_vm9 = vcmp.eq.s32.totalorder %v15265_v15, %v10839_v60 }
 0x23d   :  { %vm8333_vm12 = vmpackc.low %vm700_vm8, %vm699_vm9  ;;  %vm705_vm8 = vcmp.eq.s32.totalorder %v15272_v35, %v10839_v60  ;;  %vm1747_vm9 = vcmp.eq.s32.totalorder %v11028_v56, %v10839_v60  ;;  %v9218_v35 = vld [vmem:[%s14949_s1 + $0x98] sm:$0xff]  }
 0x23e   :  { %v11192_v62 = vpop.permute.xlu1 %1414  ;;  %8330 = vmatmul.mubr.msk.bf16.gmra.mrb[60].mxu0 %vm8329_vm6, %v15001_v61  ;;  %v11195_v1 = vpop.permute.xlu0 %1417 }
 0x23f   :  { %1606 = vperm.xlu1 %8995, %v9329_v4   ;;  %1609 = vperm.xlu0 %8994, %v9330_v7   ;;  %v9331_v4 = vld [vmem:[%s14948_s0 + $0x400] sm:$0xff]  ;;  %v9332_v7 = vld [vmem:[%s14948_s0 + $0x408] sm:$0xff] }
 0x240   :  { %8332 = vmatprep.mubr.msk.bf16.mxu0 %vm8331_vm7, %v15001_v61 }
 0x242   :  { %v11208_v44 = vpop.permute.xlu1 %1420  ;;  %v11210_v41 = vpop.permute.xlu0 %1423 }
 0x243   :  { %1612 = vperm.xlu1 %8995, %v9331_v4   ;;  %1615 = vperm.xlu0 %8994, %v9332_v7   ;;  %v9333_v4 = vld [vmem:[%s14948_s0 + $0x410] sm:$0xff] }
 0x244   :  { %v15267_v7 = vld [vmem:[#allocation61_spill] sm:$0xff] }
 0x245   :  { %vm701_vm0 = vcmp.eq.s32.totalorder %v15267_v7, %v10839_v60 }
 0x246   :  { %v11222_v5 = vpop.permute.xlu1 %1426  ;;  %8334 = vmatmul.mubr.msk.bf16.gmra.mrb[64].mxu0 %vm8333_vm12, %v15001_v61  ;;  %v11225_v15 = vpop.permute.xlu0 %1429  ;;  %vm8337_vm1 = vmpackc.low %vm702_vm14, %vm701_vm0  ;;  %vm707_vm14 = vcmp.eq.s32.totalorder %v15274_v33, %v10839_v60  ;;  %vm1749_vm0 = vcmp.eq.s32.totalorder %v11042_v3, %v10839_v60  ;;  %v9220_v33 = vld [vmem:[%s14949_s1 + $0xa8] sm:$0xff]  }
 0x247   :  { %1618 = vperm.xlu1 %8995, %v9333_v4   ;;  %1621 = vperm.xlu0 %8994, %v9334_v55   ;;  %v9335_v4 = vld [vmem:[%s14948_s0 + $0x420] sm:$0xff]  ;;  %v9336_v55 = vld [vmem:[%s14948_s0 + $0x428] sm:$0xff]  ;;  %vm8347_vm12 = vmpackc.low %vm1748_vm10, %vm1747_vm9  ;;  %vm711_vm10 = vcmp.eq.s32.totalorder %v15278_v29, %v10839_v60 }
 0x248   :  { %8336 = vmatprep.mubr.msk.bf16.mxu0 %vm8335_vm13, %v15001_v61  ;;  %v9224_v29 = vld [vmem:[%s14949_s1 + $0xc8] sm:$0xff]  }
 0x24a   :  { %v11238_v42 = vpop.permute.xlu1 %1432  ;;  %v11240_v39 = vpop.permute.xlu0 %1435 }
 0x24b   :  { %1624 = vperm.xlu1 %8995, %v9335_v4   ;;  %1627 = vperm.xlu0 %8994, %v9336_v55   ;;  %v9215_v4 = vld [vmem:[%s14949_s1 + $0x80] sm:$0xff]   ;;  %v9338_v55 = vld [vmem:[%s14948_s0 + $0x438] sm:$0xff] }
 0x24c   :  { %5277 = vmatpush1.bf16.msra.mxu1 %v9215_v4  ;;  %v9339_v4 = vld [vmem:[%s14948_s0 + $0x440] sm:$0xff] }
 0x24d   :  { %5278 = vmatprep.subr.bf16.mxu1 %v15117_v20 }
 0x24e   :  { %v11248_v61 = vpop.permute.xlu1 %1438  ;;  %8338 = vmatmul.mubr.msk.bf16.gmra.mrb[68].mxu0 %vm8337_vm1, %v15268_v0  ;;  %v11251_v7 = vpop.permute.xlu0 %1441  ;;  %vm1750_vm1 = vcmp.eq.s32.totalorder %v11045_v57, %v10839_v60 }
 0x24f   :  { %1630 = vperm.xlu1 %8995, %v9337_v40   ;;  %8340 = vmatprep.mubr.msk.bf16.mxu0 %vm11008_vm15, %v15268_v0  ;;  %vm1745_vm15 = vcmp.eq.s32.totalorder %v11012_v14, %v10839_v60  ;;  %vm8351_vm3 = vmpackc.low %vm1750_vm1, %vm1749_vm0  ;;  %vm713_vm1 = vcmp.eq.s32.totalorder %v15280_v27, %v10839_v60  ;;  %v9226_v27 = vld [vmem:[%s14949_s1 + $0xd8] sm:$0xff]  }
 0x250   :  { %1633 = vperm.xlu0 %8994, %v9338_v55   ;;  %5279 = vmatpush1.bf16.msra.mxu1 %v9216_v38  ;;  %vm8343_vm6 = vmpackc.low %vm1746_vm4, %vm1745_vm15  ;;  %v9341_v55 = vld [vmem:[%s14948_s0 + $0x450] sm:$0xff]  ;;  %v9342_v38 = vld [vmem:[%s14948_s0 + $0x458] sm:$0xff]  ;;  %vm709_vm4 = vcmp.eq.s32.totalorder %v15276_v31, %v10839_v60 }
 0x251   :  { %5280 = vmatprep.subr.bf16.mxu1 %v15117_v20  ;;  %v9222_v31 = vld [vmem:[%s14949_s1 + $0xb8] sm:$0xff]  }
 0x252   :  { %v11269_v40 = vpop.permute.xlu1 %1444  ;;  %v11271_v58 = vpop.permute.xlu0 %1447 }
 0x253   :  { %1636 = vperm.xlu1 %8995, %v9339_v4   ;;  %v9217_v4 = vld [vmem:[%s14949_s1 + $0x90] sm:$0xff]  }
 0x254   :  { %1639 = vperm.xlu0 %8994, %v9340_v37   ;;  %5281 = vmatpush1.bf16.msra.mxu1 %v9217_v4  ;;  %v15271_v37 = vld [vmem:[#allocation64_spill] sm:$0xff]  ;;  %v9343_v4 = vld [vmem:[%s14948_s0 + $0x460] sm:$0xff] }
 0x255   :  { %vm706_vm7 = vcmp.eq.s32.totalorder %v15271_v37, %v10839_v60  ;;  %5282 = vmatprep.subr.bf16.mxu1 %v15117_v20  ;;  %v9345_v37 = vld [vmem:[%s14948_s0 + $0x470] sm:$0xff] }
 0x256   :  { %v11287_v14 = vpop.permute.xlu1 %1450  ;;  %8342 = vmatmul.mubr.msk.bf16.gmra.mrb[72].mxu0 %vm8341_vm5, %v15268_v0  ;;  %v11290_v13 = vpop.permute.xlu0 %1453  ;;  %vm8345_vm11 = vmpackc.low %vm706_vm7, %vm705_vm8  ;;  %vm1751_vm5 = vcmp.eq.s32.totalorder %v11058_v54, %v10839_v60 }
 0x257   :  { %1642 = vperm.xlu1 %8995, %v9341_v55   ;;  %8344 = vmatprep.mubr.msk.bf16.mxu0 %vm8343_vm6, %v15268_v0  ;;  %vm1752_vm6 = vcmp.eq.s32.totalorder %v11060_v51, %v10839_v60 }
 0x258   :  { %1645 = vperm.xlu0 %8994, %v9342_v38   ;;  %v9344_v38 = vld [vmem:[%s14948_s0 + $0x468] sm:$0xff]  ;;  %5283 = vmatpush1.bf16.msra.mxu1 %v9218_v35  ;;  %v9346_v35 = vld [vmem:[%s14948_s0 + $0x478] sm:$0xff]  ;;  %vm8355_vm8 = vmpackc.low %vm1752_vm6, %vm1751_vm5  ;;  %vm715_vm6 = vcmp.eq.s32.totalorder %v15282_v25, %v10839_v60 }
 0x259   :  { %5284 = vmatprep.subr.bf16.mxu1 %v15117_v20  ;;  %v9363_v25 = vld [vmem:[%s14948_s0] sm:$0xff] }
 0x25a   :  { %v11307_v36 = vpop.permute.xlu1 %1456  ;;  %v11309_v55 = vpop.permute.xlu0 %1459 }
 0x25b   :  { %1648 = vperm.xlu1 %8995, %v9343_v4   ;;  %v9219_v4 = vld [vmem:[%s14949_s1 + $0xa0] sm:$0xff]  }
 0x25c   :  { %1651 = vperm.xlu0 %8994, %v9344_v38   ;;  %5285 = vmatpush1.bf16.msra.mxu1 %v9219_v4  ;;  %v15273_v38 = vld [vmem:[#allocation66_spill] sm:$0xff]  ;;  %v9347_v4 = vld [vmem:[%s14948_s0 + $0x480] sm:$0xff] }
 0x25d   :  { %vm708_vm13 = vcmp.eq.s32.totalorder %v15273_v38, %v10839_v60  ;;  %5286 = vmatprep.subr.bf16.mxu1 %v15117_v20  ;;  %v9349_v38 = vld [vmem:[%s14948_s0 + $0x490] sm:$0xff] }
 0x25e   :  { %v11325_v56 = vpop.permute.xlu1 %1462  ;;  %8346 = vmatmul.mubr.msk.bf16.gmra.mrb[76].mxu0 %vm8345_vm11, %v15268_v0  ;;  %v11328_v53 = vpop.permute.xlu0 %1465  ;;  %vm8349_vm2 = vmpackc.low %vm708_vm13, %vm707_vm14  ;;  %vm1753_vm11 = vcmp.eq.s32.totalorder %v11072_v9, %v10839_v60 }
 0x25f   :  { %1654 = vperm.xlu1 %8995, %v9345_v37   ;;  %8348 = vmatprep.mubr.msk.bf16.mxu0 %vm8347_vm12, %v15268_v0  ;;  %vm1754_vm12 = vcmp.eq.s32.totalorder %v11075_v11, %v10839_v60 }
 0x260   :  { %1657 = vperm.xlu0 %8994, %v9346_v35   ;;  %v9348_v35 = vld [vmem:[%s14948_s0 + $0x488] sm:$0xff]  ;;  %5287 = vmatpush1.bf16.msra.mxu1 %v9220_v33  ;;  %v9350_v33 = vld [vmem:[%s14948_s0 + $0x498] sm:$0xff]  ;;  %vm8359_vm14 = vmpackc.low %vm1754_vm12, %vm1753_vm11  ;;  %vm718_vm11 = vcmp.eq.s32.totalorder %v15283_v2, %v10839_v60  ;;  %vm717_vm12 = vcmp.eq.s32.totalorder %v15284_v24, %v10839_v60 }
 0x261   :  { %5288 = vmatprep.subr.bf16.mxu1 %v15117_v20  ;;  %v9230_v2 = vld [vmem:[%s14949_s1 + $0xf8] sm:$0xff]   ;;  %v11550_v24 = vld [vmem:[%s14948_s0 + $0x28] sm:$0xff] }
 0x262   :  { %v11345_v34 = vpop.permute.xlu1 %1468  ;;  %v11347_v37 = vpop.permute.xlu0 %1471 }
 0x263   :  { %1660 = vperm.xlu1 %8995, %v9347_v4   ;;  %v9221_v4 = vld [vmem:[%s14949_s1 + $0xb0] sm:$0xff]  }
 0x264   :  { %1663 = vperm.xlu0 %8994, %v9348_v35   ;;  %5289 = vmatpush1.bf16.msra.mxu1 %v9221_v4  ;;  %v15275_v35 = vld [vmem:[#allocation68_spill] sm:$0xff]  ;;  %v9351_v4 = vld [vmem:[%s14948_s0 + $0x4a0] sm:$0xff] }
 0x265   :  { %vm710_vm15 = vcmp.eq.s32.totalorder %v15275_v35, %v10839_v60  ;;  %5290 = vmatprep.subr.bf16.mxu1 %v15117_v20  ;;  %v9353_v35 = vld [vmem:[%s14948_s0 + $0x4b0] sm:$0xff] }
 0x266   :  { %v11363_v3 = vpop.permute.xlu1 %1474  ;;  %8350 = vmatmul.mubr.msk.bf16.gmra.mrb[80].mxu0 %vm8349_vm2, %v15268_v0  ;;  %v11366_v57 = vpop.permute.xlu0 %1477  ;;  %vm8353_vm7 = vmpackc.low %vm710_vm15, %vm709_vm4  ;;  %vm1755_vm2 = vcmp.eq.s32.totalorder %v11088_v52, %v10839_v60 }
 0x267   :  { %1666 = vperm.xlu1 %8995, %v9349_v38   ;;  %8352 = vmatprep.mubr.msk.bf16.mxu0 %vm8351_vm3, %v15268_v0  ;;  %vm1756_vm3 = vcmp.eq.s32.totalorder %v11090_v49, %v10839_v60 }
 0x268   :  { %1669 = vperm.xlu0 %8994, %v9350_v33   ;;  %v9352_v33 = vld [vmem:[%s14948_s0 + $0x4a8] sm:$0xff]  ;;  %5291 = vmatpush1.bf16.msra.mxu1 %v9222_v31  ;;  %v9354_v31 = vld [vmem:[%s14948_s0 + $0x4b8] sm:$0xff]  ;;  %vm8363_vm4 = vmpackc.low %vm1756_vm3, %vm1755_vm2 }
 0x269   :  { %5292 = vmatprep.subr.bf16.mxu1 %v15117_v20 }
 0x26a   :  { %v11383_v32 = vpop.permute.xlu1 %1480  ;;  %v11385_v38 = vpop.permute.xlu0 %1483 }
 0x26b   :  { %1672 = vperm.xlu1 %8995, %v9351_v4   ;;  %v9223_v4 = vld [vmem:[%s14949_s1 + $0xc0] sm:$0xff]  }
 0x26c   :  { %1675 = vperm.xlu0 %8994, %v9352_v33   ;;  %5293 = vmatpush1.bf16.msra.mxu1 %v9223_v4  ;;  %v15277_v33 = vld [vmem:[#allocation70_spill] sm:$0xff]  ;;  %v9355_v4 = vld [vmem:[%s14948_s0 + $0x4c0] sm:$0xff] }
 0x26d   :  { %vm712_vm9 = vcmp.eq.s32.totalorder %v15277_v33, %v10839_v60  ;;  %5294 = vmatprep.subr.bf16.mxu1 %v15117_v20  ;;  %v9357_v33 = vld [vmem:[%s14948_s0 + $0x4d0] sm:$0xff] }
 0x26e   :  { %v11401_v54 = vpop.permute.xlu1 %1486  ;;  %8354 = vmatmul.mubr.msk.bf16.gmra.mrb[84].mxu0 %vm8353_vm7, %v15268_v0  ;;  %v11404_v51 = vpop.permute.xlu0 %1489  ;;  %vm8357_vm13 = vmpackc.low %vm712_vm9, %vm711_vm10  ;;  %vm1757_vm7 = vcmp.eq.s32.totalorder %v11102_v63, %v10839_v60  ;;  %v9364_v63 = vld [vmem:[%s14948_s0 + $0x8] sm:$0xff] }
 0x26f   :  { %1678 = vperm.xlu1 %8995, %v9353_v35   ;;  %8356 = vmatprep.mubr.msk.bf16.mxu0 %vm8355_vm8, %v15268_v0  ;;  %vm1758_vm8 = vcmp.eq.s32.totalorder %v11105_v8, %v10839_v60 }
 0x270   :  { %1681 = vperm.xlu0 %8994, %v9354_v31   ;;  %v9356_v31 = vld [vmem:[%s14948_s0 + $0x4c8] sm:$0xff]  ;;  %5295 = vmatpush1.bf16.msra.mxu1 %v9224_v29  ;;  %v9358_v29 = vld [vmem:[%s14948_s0 + $0x4d8] sm:$0xff]  ;;  %vm8367_vm10 = vmpackc.low %vm1758_vm8, %vm1757_vm7  ;;  %vm721_vm8 = vcmp.eq.s32.totalorder %v15290_v18, %v10839_v60 }
 0x271   :  { %5296 = vmatprep.subr.bf16.mxu1 %v15117_v20 }
 0x272   :  { %v11421_v30 = vpop.permute.xlu1 %1492  ;;  %v11423_v35 = vpop.permute.xlu0 %1495 }
 0x273   :  { %1684 = vperm.xlu1 %8995, %v9355_v4   ;;  %v9225_v4 = vld [vmem:[%s14949_s1 + $0xd0] sm:$0xff]  }
 0x274   :  { %1687 = vperm.xlu0 %8994, %v9356_v31   ;;  %5297 = vmatpush1.bf16.msra.mxu1 %v9225_v4  ;;  %v15279_v31 = vld [vmem:[#allocation72_spill] sm:$0xff]  ;;  %v9359_v4 = vld [vmem:[%s14948_s0 + $0x4e0] sm:$0xff] }
 0x275   :  { %vm714_vm0 = vcmp.eq.s32.totalorder %v15279_v31, %v10839_v60  ;;  %5298 = vmatprep.subr.bf16.mxu1 %v15117_v20  ;;  %v9361_v31 = vld [vmem:[%s14948_s0 + $0x4f0] sm:$0xff] }
 0x276   :  { %v11439_v9 = vpop.permute.xlu1 %1498  ;;  %8358 = vmatmul.mubr.msk.bf16.gmra.mrb[88].mxu0 %vm8357_vm13, %v15268_v0  ;;  %v11442_v11 = vpop.permute.xlu0 %1501  ;;  %vm8361_vm15 = vmpackc.low %vm714_vm0, %vm713_vm1  ;;  %vm1759_vm13 = vcmp.eq.s32.totalorder %v11118_v50, %v10839_v60 }
 0x277   :  { %1690 = vperm.xlu1 %8995, %v9357_v33   ;;  %8360 = vmatprep.mubr.msk.bf16.mxu0 %vm8359_vm14, %v15268_v0  ;;  %vm1760_vm14 = vcmp.eq.s32.totalorder %v11120_v47, %v10839_v60  ;;  %vm8369_vm0 = vmpackc.low %vm718_vm11, %vm717_vm12 }
 0x278   :  { %1693 = vperm.xlu0 %8994, %v9358_v29   ;;  %v9360_v29 = vld [vmem:[%s14948_s0 + $0x4e8] sm:$0xff]  ;;  %5299 = vmatpush1.bf16.msra.mxu1 %v9226_v27  ;;  %v9362_v27 = vld [vmem:[%s14948_s0 + $0x4f8] sm:$0xff]  ;;  %vm8371_vm1 = vmpackc.low %vm1760_vm14, %vm1759_vm13 }
 0x279   :  { %5300 = vmatprep.subr.bf16.mxu1 %v15117_v20 }
 0x27a   :  { %v11459_v28 = vpop.permute.xlu1 %1504  ;;  %v11461_v33 = vpop.permute.xlu0 %1507 }
 0x27b   :  { %1696 = vperm.xlu1 %8995, %v9359_v4   ;;  %v9227_v4 = vld [vmem:[%s14949_s1 + $0xe0] sm:$0xff]  }
 0x27c   :  { %1699 = vperm.xlu0 %8994, %v9360_v29   ;;  %5301 = vmatpush1.bf16.msra.mxu1 %v9227_v4  ;;  %v15281_v29 = vld [vmem:[#allocation74_spill] sm:$0xff]  ;;  %v9228_v4 = vld [vmem:[%s14949_s1 + $0xe8] sm:$0xff]  }
 0x27d   :  { %vm716_vm5 = vcmp.eq.s32.totalorder %v15281_v29, %v10839_v60  ;;  %5302 = vmatprep.subr.bf16.mxu1 %v15117_v20 }
 0x27e   :  { %v11477_v52 = vpop.permute.xlu1 %1510  ;;  %8362 = vmatmul.mubr.msk.bf16.gmra.mrb[92].mxu0 %vm8361_vm15, %v15268_v0  ;;  %v11480_v49 = vpop.permute.xlu0 %1513  ;;  %vm8365_vm9 = vmpackc.low %vm716_vm5, %vm715_vm6  ;;  %vm1761_vm15 = vcmp.eq.s32.totalorder %v11132_v12, %v10839_v60  ;;  %v9368_v12 = vld [vmem:[%s14948_s0 + $0x30] sm:$0xff] }
 0x27f   :  { %1702 = vperm.xlu1 %8995, %v9361_v31   ;;  %8364 = vmatprep.mubr.msk.bf16.mxu0 %vm8363_vm4, %v15268_v0  ;;  %vm1762_vm4 = vcmp.eq.s32.totalorder %v11135_v59, %v10839_v60  ;;  %v15289_v59 = vld [vmem:[#allocation80_spill] sm:$0xff] }
 0x280   :  { %1705 = vperm.xlu0 %8994, %v9362_v27   ;;  %v15008_v27 = vmov 3   ;;  %5303 = vmatpush1.bf16.msra.mxu1 %v9228_v4  ;;  %v9365_v4 = vld [vmem:[%s14948_s0 + $0x10] sm:$0xff]  ;;  %vm8375_vm6 = vmpackc.low %vm1762_vm4, %vm1761_vm15  ;;  %vm722_vm7 = vcmp.eq.s32.totalorder %v15289_v59, %v10839_v60  ;;  %v9369_v59 = vld [vmem:[%s14948_s0 + $0x20] sm:$0xff] }
 0x281   :  { %5304 = vmatprep.subr.bf16.mxu1 %v15117_v20  ;;  %vm8377_vm11 = vmpackc.low %vm722_vm7, %vm721_vm8 }
 0x282   :  { %v11497_v26 = vpop.permute.xlu1 %1516  ;;  %v11499_v31 = vpop.permute.xlu0 %1519 }
 0x283   :  { %8996 = vset.pattern.permute.xlu1 %v15008_v27 }
 0x284   :  { %8997 = vset.pattern.permute.xlu0 %v15008_v27  ;;  %3308 = vperm.xlu1 %8996, %v9363_v25   ;;  %v9229_v27 = vld [vmem:[%s14949_s1 + $0xf0] sm:$0xff]  }
 0x285   :  { %3311 = vperm.xlu0 %8997, %v9364_v63   ;;  %5305 = vmatpush1.bf16.msra.mxu1 %v9229_v27  ;;  %v15286_v27 = vld [vmem:[#allocation78_spill] sm:$0xff] }
 0x286   :  { %v11517_v8 = vpop.permute.xlu1 %1522  ;;  %8366 = vmatmul.mubr.msk.bf16.gmra.mrb[96].mxu0 %vm8365_vm9, %v15268_v0  ;;  %v11520_v29 = vpop.permute.xlu0 %1525  ;;  %5306 = vmatprep.subr.bf16.mxu1 %v15117_v20  ;;  %v15285_v20 = vmov 3   ;;  %vm720_vm2 = vcmp.eq.s32.totalorder %v15286_v27, %v10839_v60  ;;  %vm1763_vm9 = vcmp.eq.s32.totalorder %v11148_v48, %v10839_v60  ;;  %v15296_v48 = vmov 2  }
 0x287   :  { %8368 = vmatprep.mubr.msk.bf16.mxu0 %vm8367_vm10, %v15268_v0  ;;  %vm1764_vm10 = vcmp.eq.s32.totalorder %v11150_v45, %v10839_v60 }
 0x288   :  { %8998 = vset.pattern.permute.xlu1 %v15010_v16  ;;  %vm8379_vm12 = vmpackc.low %vm1764_vm10, %vm1763_vm9 }
 0x289   :  { %2268 = vperm.xlu1 %8998, %v9363_v25   ;;  %3314 = vperm.xlu0 %8997, %v9365_v4   ;;  %v15287_v25 = vld [vmem:[#allocation79_spill] sm:$0xff] }
 0x28a   :  { %v11535_v22 = vpop.permute.xlu1 %1528  ;;  %v11537_v23 = vpop.permute.xlu0 %1531  ;;  %5307 = vmatpush1.bf16.msra.mxu1 %v9230_v2  ;;  %vm719_vm3 = vcmp.eq.s32.totalorder %v15287_v25, %v10839_v60 }
 0x28b   :  { %vm8373_vm5 = vmpackc.low %vm720_vm2, %vm719_vm3 }
 0x28d   :  { %2271 = vperm.xlu1 %8998, %v9364_v63   ;;  %3323 = vperm.xlu0 %8997, %v11550_v24  }
 0x28e   :  { %v11553_v50 = vpop.permute.xlu1 %1534  ;;  %8370 = vmatmul.mubr.msk.bf16.gmra.mrb[100].mxu0 %vm8369_vm0, %v15268_v0  ;;  %v11556_v47 = vpop.permute.xlu0 %1537  ;;  %vm1765_vm0 = vcmp.eq.s32.totalorder %v11162_v10, %v10839_v60 }
 0x28f   :  { %8372 = vmatprep.mubr.msk.bf16.mxu0 %vm8371_vm1, %v15268_v0  ;;  %vm1766_vm1 = vcmp.eq.s32.totalorder %v11165_v6, %v10839_v60  ;;  %v11652_v6 = vld [vmem:[%s14948_s0 + $0x68] sm:$0xff] }
 0x290   :  { %vm8383_vm3 = vmpackc.low %vm1766_vm1, %vm1765_vm0 }
 0x291   :  { %8999 = vset.pattern.permute.xlu1 %v15285_v20  ;;  %9002 = vset.pattern.permute.xlu0 %v15010_v16 }
 0x292   :  { %v11565_v63 = vpop.permute.xlu1 %1540  ;;  %3317 = vperm.xlu1 %8999, %v9367_v19   ;;  %v11570_v2 = vpop.permute.xlu0 %1543  ;;  %2274 = vperm.xlu0 %9002, %v9365_v4  }
 0x296   :  { %v11576_v27 = vpop.permute.xlu1 %1546  ;;  %9000 = vset.pattern.permute.xlu1 %v15010_v16  ;;  %8374 = vmatmul.mubr.msk.bf16.gmra.mrb[104].mxu0 %vm8373_vm5, %v15268_v0  ;;  %v11580_v25 = vpop.permute.xlu0 %1549  ;;  %vm1767_vm5 = vcmp.eq.s32.totalorder %v11178_v46, %v10839_v60  ;;  %v15310_v46 = vld [vmem:[#allocation86_spill] sm:$0xff] }
 0x297   :  { %2277 = vperm.xlu1 %9000, %v9367_v19   ;;  %8376 = vmatprep.mubr.msk.bf16.mxu0 %vm8375_vm6, %v15268_v0  ;;  %vm1768_vm6 = vcmp.eq.s32.totalorder %v11180_v43, %v10839_v60  ;;  %vm728_vm9 = vcmp.eq.s32.totalorder %v15310_v46, %v10839_v60  ;;  %v9374_v46 = vld [vmem:[%s14948_s0 + $0x40] sm:$0xff] }
 0x298   :  { %2286 = vperm.xlu0 %9002, %v9368_v12   ;;  %vm8387_vm8 = vmpackc.low %vm1768_vm6, %vm1767_vm5 }
 0x299   :  { %v11586_v4 = vpop.f32.mrb[0].mxu0 }
 0x29a   :  { %15288 = vst [vmem:[#allocation8_spill] sm:$0xff] %v11586_v4  ;;  %v11592_v16 = vpop.permute.xlu1 %1552  ;;  %v4639_v17 = vpop.f32.mrb[1].mxu0 }
 0x29b   :  { %15291 = vst [vmem:[#allocation7_spill] sm:$0xff] %v11592_v16  ;;  %v11598_v19 = vpop.permute.xlu0 %1555  ;;  %9001 = vset.pattern.permute.xlu1 %v15285_v20  ;;  %v11601_v4 = vpop.f32.mrb[2].mxu0 }
 0x29c   :  { %15292 = vst [vmem:[#allocation12_spill] sm:$0xff] %v11598_v19  ;;  %15293 = vst [vmem:[#allocation11_spill] sm:$0xff] %v11601_v4  ;;  %3320 = vperm.xlu1 %9001, %v9369_v59   ;;  %v4642_v18 = vpop.f32.mrb[3].mxu0  ;;  %9005 = vset.pattern.permute.xlu0 %v15285_v20 }
 0x29d   :  { %3326 = vperm.xlu0 %9005, %v9368_v12   ;;  %v11619_v18 = vld [vmem:[%s14948_s0 + $0x48] sm:$0xff]  ;;  %v15298_v12 = vld [vmem:[#allocation82_spill] sm:$0xff] }
 0x29e   :  { %v11607_v17 = vpop.permute.xlu1 %1558  ;;  %8378 = vmatmul.mubr.msk.bf16.gmra.mrb[108].mxu0 %vm8377_vm11, %v15268_v0  ;;  %vm724_vm13 = vcmp.eq.s32.totalorder %v15298_v12, %v10839_v60  ;;  %v15306_v12 = vld [vmem:[#allocation85_spill] sm:$0xff]  ;;  %vm1769_vm11 = vcmp.eq.s32.totalorder %v11192_v62, %v10839_v60 }
 0x29f   :  { %15294 = vst [vmem:[#allocation5_spill] sm:$0xff] %v11607_v17  ;;  %v11610_v45 = vpop.permute.xlu0 %1561  ;;  %8380 = vmatprep.mubr.msk.bf16.mxu0 %vm8379_vm12, %v15268_v0  ;;  %v15299_v17 = vld [vmem:[#allocation83_spill] sm:$0xff]  ;;  %vm725_vm4 = vcmp.eq.s32.totalorder %v15306_v12, %v10839_v60  ;;  %vm1770_vm12 = vcmp.eq.s32.totalorder %v11195_v1, %v10839_v60 }
 0x2a0   :  { %15295 = vst [vmem:[#allocation6_spill] sm:$0xff] %v11610_v45  ;;  %9003 = vset.pattern.permute.xlu1 %v15296_v48  ;;  %vm723_vm14 = vcmp.eq.s32.totalorder %v15299_v17, %v10839_v60  ;;  %v9371_v17 = vld [vmem:[%s14948_s0 + $0x50] sm:$0xff] }
 0x2a1   :  { %2280 = vperm.xlu1 %9003, %v9369_v59   ;;  %v11614_v4 = vpop.f32.mrb[4].mxu0  ;;  %3335 = vperm.xlu0 %9005, %v11619_v18   ;;  %vm8381_vm2 = vmpackc.low %vm724_vm13, %vm723_vm14 }
 0x2a2   :  { %15297 = vst [vmem:[#allocation16_spill] sm:$0xff] %v11614_v4  ;;  %v11626_v45 = vpop.permute.xlu1 %1564  ;;  %v4647_v19 = vpop.f32.mrb[5].mxu0  ;;  %vm8391_vm14 = vmpackc.low %vm1770_vm12, %vm1769_vm11 }
 0x2a3   :  { %v11632_v59 = vpop.permute.xlu0 %1567  ;;  %v11634_v4 = vpop.f32.mrb[6].mxu0 }
 0x2a4   :  { %15300 = vst [vmem:[#allocation15_spill] sm:$0xff] %v11632_v59  ;;  %15301 = vst [vmem:[#allocation20_spill] sm:$0xff] %v11634_v4  ;;  %v4650_v16 = vpop.f32.mrb[7].mxu0 }
 0x2a5   :  { %2283 = vperm.xlu1 %9003, %v11550_v24   ;;  %3338 = vperm.xlu0 %9005, %v9371_v17   ;;  %v15305_v24 = vld [vmem:[#allocation84_spill] sm:$0xff] }
 0x2a6   :  { %v11640_v19 = vpop.permute.xlu1 %1570  ;;  %8382 = vmatmul.mubr.msk.bf16.gmra.mrb[112].mxu0 %vm8381_vm2, %v15268_v0  ;;  %vm726_vm15 = vcmp.eq.s32.totalorder %v15305_v24, %v10839_v60  ;;  %vm1771_vm2 = vcmp.eq.s32.totalorder %v11208_v44, %v10839_v60 }
 0x2a7   :  { %15302 = vst [vmem:[#allocation19_spill] sm:$0xff] %v11640_v19  ;;  %v11643_v10 = vpop.permute.xlu0 %1573  ;;  %8384 = vmatprep.mubr.msk.bf16.mxu0 %vm8383_vm3, %v15268_v0  ;;  %vm8385_vm7 = vmpackc.low %vm726_vm15, %vm725_vm4  ;;  %vm1772_vm3 = vcmp.eq.s32.totalorder %v11210_v41, %v10839_v60 }
 0x2a8   :  { %15303 = vst [vmem:[#allocation9_spill] sm:$0xff] %v11643_v10  ;;  %v9373_v10 = vld [vmem:[%s14948_s0 + $0x38] sm:$0xff]  ;;  %vm8395_vm4 = vmpackc.low %vm1772_vm3, %vm1771_vm2 }
 0x2a9   :  { %9004 = vset.pattern.permute.xlu1 %v15285_v20  ;;  %v11647_v16 = vpop.f32.mrb[8].mxu0  ;;  %3347 = vperm.xlu0 %9005, %v11652_v6  }
 0x2aa   :  { %15304 = vst [vmem:[#allocation10_spill] sm:$0xff] %v11647_v16  ;;  %v11659_v4 = vpop.permute.xlu1 %1576  ;;  %3329 = vperm.xlu1 %9004, %v9373_v10   ;;  %v4655_v16 = vpop.f32.mrb[9].mxu0 }
 0x2ab   :  { %v11668_v19 = vpop.permute.xlu0 %1579  ;;  %v11670_v24 = vpop.f32.mrb[10].mxu0 }
 0x2ac   :  { %15307 = vst [vmem:[#allocation24_spill] sm:$0xff] %v11670_v24  ;;  %v4658_v59 = vpop.f32.mrb[11].mxu0 }
 0x2ad   :  { %9012 = vset.pattern.permute.xlu0 %v15296_v48  ;;  %v15311_v59 = vld [vmem:[#allocation87_spill] sm:$0xff] }
 0x2ae   :  { %v11673_v12 = vpop.permute.xlu1 %1582  ;;  %9006 = vset.pattern.permute.xlu1 %v15296_v48  ;;  %8386 = vmatmul.mubr.msk.bf16.gmra.mrb[116].mxu0 %vm8385_vm7, %v15268_v0  ;;  %vm727_vm10 = vcmp.eq.s32.totalorder %v15311_v59, %v10839_v60  ;;  %vm1773_vm7 = vcmp.eq.s32.totalorder %v11222_v5, %v10839_v60 }
 0x2af   :  { %15308 = vst [vmem:[#allocation23_spill] sm:$0xff] %v11673_v12  ;;  %v11677_v16 = vpop.permute.xlu0 %1585  ;;  %2289 = vperm.xlu1 %9006, %v9373_v10   ;;  %8388 = vmatprep.mubr.msk.bf16.mxu0 %vm8387_vm8, %v15268_v0  ;;  %vm8389_vm13 = vmpackc.low %vm728_vm9, %vm727_vm10  ;;  %vm1774_vm8 = vcmp.eq.s32.totalorder %v11225_v15, %v10839_v60 }
 0x2b0   :  { %2298 = vperm.xlu0 %9012, %v9371_v17   ;;  %vm8399_vm10 = vmpackc.low %vm1774_vm8, %vm1773_vm7 }
 0x2b1   :  { %v11680_v43 = vpop.f32.mrb[12].mxu0 }
 0x2b2   :  { %15309 = vst [vmem:[#allocation28_spill] sm:$0xff] %v11680_v43  ;;  %v11686_v24 = vpop.permute.xlu1 %1588  ;;  %v4663_v12 = vpop.f32.mrb[13].mxu0  ;;  %v15318_v43 = vld [vmem:[#allocation89_spill] sm:$0xff] }
 0x2b3   :  { %v11692_v10 = vpop.permute.xlu0 %1591  ;;  %9007 = vset.pattern.permute.xlu1 %v15285_v20  ;;  %v11695_v17 = vpop.f32.mrb[14].mxu0  ;;  %v9375_v12 = vld [vmem:[%s14948_s0 + $0x70] sm:$0xff]  ;;  %vm729_vm1 = vcmp.eq.s32.totalorder %v15318_v43, %v10839_v60  ;;  %v11731_v43 = vld [vmem:[%s14948_s0 + $0x88] sm:$0xff] }
 0x2b4   :  { %15312 = vst [vmem:[#allocation27_spill] sm:$0xff] %v11692_v10  ;;  %15313 = vst [vmem:[#allocation13_spill] sm:$0xff] %v11695_v17  ;;  %3332 = vperm.xlu1 %9007, %v9374_v46   ;;  %v4666_v59 = vpop.f32.mrb[15].mxu0  ;;  %2310 = vperm.xlu0 %9012, %v9375_v12   ;;  %v15317_v17 = vld [vmem:[#allocation88_spill] sm:$0xff] }
 0x2b5   :  { %vm730_vm0 = vcmp.eq.s32.totalorder %v15317_v17, %v10839_v60  ;;  %v15323_v17 = vld [vmem:[#allocation90_spill] sm:$0xff] }
 0x2b6   :  { %v11703_v62 = vpop.permute.xlu1 %1594  ;;  %8390 = vmatmul.mubr.msk.bf16.gmra.mrb[120].mxu0 %vm8389_vm13, %v15268_v0  ;;  %vm8393_vm15 = vmpackc.low %vm730_vm0, %vm729_vm1  ;;  %vm732_vm5 = vcmp.eq.s32.totalorder %v15323_v17, %v10839_v60  ;;  %vm1775_vm13 = vcmp.eq.s32.totalorder %v11238_v42, %v10839_v60 }
 0x2b7   :  { %15314 = vst [vmem:[#allocation14_spill] sm:$0xff] %v11703_v62  ;;  %v11706_v1 = vpop.permute.xlu0 %1597  ;;  %8392 = vmatprep.mubr.msk.bf16.mxu0 %vm8391_vm14, %v15268_v0  ;;  %vm1776_vm14 = vcmp.eq.s32.totalorder %v11240_v39, %v10839_v60  ;;  %v9381_v39 = vld [vmem:[%s14948_s0 + $0xb0] sm:$0xff] }
 0x2b8   :  { %15315 = vst [vmem:[#allocation32_spill] sm:$0xff] %v11706_v1  ;;  %9008 = vset.pattern.permute.xlu1 %v15296_v48  ;;  %9015 = vset.pattern.permute.xlu0 %v15285_v20  ;;  %vm8403_vm1 = vmpackc.low %vm1776_vm14, %vm1775_vm13 }
 0x2b9   :  { %2292 = vperm.xlu1 %9008, %v9374_v46   ;;  %v11711_v59 = vpop.f32.mrb[16].mxu0  ;;  %3350 = vperm.xlu0 %9015, %v9375_v12  }
 0x2ba   :  { %15316 = vst [vmem:[#allocation31_spill] sm:$0xff] %v11711_v59  ;;  %v11717_v62 = vpop.permute.xlu1 %1600  ;;  %v4671_v10 = vpop.f32.mrb[17].mxu0  ;;  %v9378_v59 = vld [vmem:[%s14948_s0 + $0x58] sm:$0xff] }
 0x2bb   :  { %v11723_v1 = vpop.permute.xlu0 %1603  ;;  %v11725_v46 = vpop.f32.mrb[18].mxu0 }
 0x2bc   :  { %15319 = vst [vmem:[#allocation36_spill] sm:$0xff] %v11725_v46  ;;  %v4674_v12 = vpop.f32.mrb[19].mxu0 }
 0x2bd   :  { %2295 = vperm.xlu1 %9008, %v11619_v18   ;;  %3359 = vperm.xlu0 %9015, %v11731_v43   ;;  %v9377_v18 = vld [vmem:[%s14948_s0 + $0x90] sm:$0xff]  ;;  %v15324_v12 = vld [vmem:[#allocation91_spill] sm:$0xff] }
 0x2be   :  { %v11734_v44 = vpop.permute.xlu1 %1606  ;;  %8394 = vmatmul.mubr.msk.bf16.gmra.mrb[124].mxu0 %vm8393_vm15, %v15268_v0  ;;  %vm731_vm6 = vcmp.eq.s32.totalorder %v15324_v12, %v10839_v60  ;;  %v11766_v12 = vld [vmem:[%s14948_s0 + $0xa8] sm:$0xff]  ;;  %vm1777_vm15 = vcmp.eq.s32.totalorder %v11248_v61, %v10839_v60 }
 0x2bf   :  { %15320 = vst [vmem:[#allocation35_spill] sm:$0xff] %v11734_v44  ;;  %v11737_v41 = vpop.permute.xlu0 %1609  ;;  %8396 = vmatprep.mubr.msk.bf16.mxu0 %vm8395_vm4, %v15268_v0  ;;  %vm8397_vm9 = vmpackc.low %vm732_vm5, %vm731_vm6  ;;  %vm1778_vm4 = vcmp.eq.s32.totalorder %v11251_v7, %v10839_v60  ;;  %v11834_v61 = vld [vmem:[%s14948_s0 + $0xc8] sm:$0xff] }
 0x2c0   :  { %15321 = vst [vmem:[#allocation17_spill] sm:$0xff] %v11737_v41  ;;  %vm8407_vm6 = vmpackc.low %vm1778_vm4, %vm1777_vm15 }
 0x2c1   :  { %9009 = vset.pattern.permute.xlu1 %v15285_v20  ;;  %v11741_v10 = vpop.f32.mrb[20].mxu0  ;;  %3362 = vperm.xlu0 %9015, %v9377_v18  }
 0x2c2   :  { %15322 = vst [vmem:[#allocation18_spill] sm:$0xff] %v11741_v10  ;;  %v11750_v46 = vpop.permute.xlu1 %1612  ;;  %3341 = vperm.xlu1 %9009, %v9378_v59   ;;  %v4679_v41 = vpop.f32.mrb[21].mxu0 }
 0x2c3   :  { %v11759_v10 = vpop.permute.xlu0 %1615  ;;  %v11761_v17 = vpop.f32.mrb[22].mxu0 }
 0x2c4   :  { %15325 = vst [vmem:[#allocation40_spill] sm:$0xff] %v11759_v10  ;;  %15326 = vst [vmem:[#allocation39_spill] sm:$0xff] %v11761_v17  ;;  %v4682_v44 = vpop.f32.mrb[23].mxu0  ;;  %v15330_v17 = vld [vmem:[#allocation93_spill] sm:$0xff] }
 0x2c5   :  { %3371 = vperm.xlu0 %9015, %v11766_v12   ;;  %v15329_v44 = vld [vmem:[#allocation92_spill] sm:$0xff]  ;;  %vm733_vm12 = vcmp.eq.s32.totalorder %v15330_v17, %v10839_v60  ;;  %v9380_v17 = vld [vmem:[%s14948_s0 + $0x60] sm:$0xff] }
 0x2c6   :  { %v11769_v41 = vpop.permute.xlu1 %1618  ;;  %9010 = vset.pattern.permute.xlu1 %v15296_v48  ;;  %8398 = vmatmul.mubr.msk.bf16.gmra.mrb[128].mxu0 %vm8397_vm9, %v15268_v0  ;;  %vm734_vm11 = vcmp.eq.s32.totalorder %v15329_v44, %v10839_v60  ;;  %vm1779_vm9 = vcmp.eq.s32.totalorder %v11269_v40, %v10839_v60 }
 0x2c7   :  { %15327 = vst [vmem:[#allocation44_spill] sm:$0xff] %v11769_v41  ;;  %v11773_v5 = vpop.permute.xlu0 %1621  ;;  %2301 = vperm.xlu1 %9010, %v9378_v59   ;;  %8400 = vmatprep.mubr.msk.bf16.mxu0 %vm8399_vm10, %v15268_v0  ;;  %vm8401_vm0 = vmpackc.low %vm734_vm11, %vm733_vm12  ;;  %vm1780_vm10 = vcmp.eq.s32.totalorder %v11271_v58, %v10839_v60  ;;  %v11870_v58 = vld [vmem:[%s14948_s0 + $0xe8] sm:$0xff] }
 0x2c8   :  { %vm8411_vm12 = vmpackc.low %vm1780_vm10, %vm1779_vm9 }
 0x2c9   :  { %v11776_v15 = vpop.f32.mrb[24].mxu0  ;;  %9022 = vset.pattern.permute.xlu0 %v15296_v48 }
 0x2ca   :  { %15328 = vst [vmem:[#allocation43_spill] sm:$0xff] %v11776_v15  ;;  %v11783_v41 = vpop.permute.xlu1 %1624  ;;  %v4687_v10 = vpop.f32.mrb[25].mxu0  ;;  %2322 = vperm.xlu0 %9022, %v9377_v18  }
 0x2cb   :  { %v11789_v59 = vpop.permute.xlu0 %1627  ;;  %9011 = vset.pattern.permute.xlu1 %v15285_v20  ;;  %v11792_v15 = vpop.f32.mrb[26].mxu0 }
 0x2cc   :  { %15331 = vst [vmem:[#allocation21_spill] sm:$0xff] %v11789_v59  ;;  %15332 = vst [vmem:[#allocation22_spill] sm:$0xff] %v11792_v15  ;;  %3344 = vperm.xlu1 %9011, %v9380_v17   ;;  %v4690_v44 = vpop.f32.mrb[27].mxu0  ;;  %v15336_v15 = vld [vmem:[#allocation95_spill] sm:$0xff] }
 0x2cd   :  { %v15335_v44 = vld [vmem:[#allocation94_spill] sm:$0xff]  ;;  %vm735_vm3 = vcmp.eq.s32.totalorder %v15336_v15, %v10839_v60 }
 0x2ce   :  { %v11797_v10 = vpop.permute.xlu1 %1630  ;;  %8402 = vmatmul.mubr.msk.bf16.gmra.mrb[132].mxu0 %vm8401_vm0, %v15268_v0  ;;  %2334 = vperm.xlu0 %9022, %v9381_v39   ;;  %vm736_vm2 = vcmp.eq.s32.totalorder %v15335_v44, %v10839_v60  ;;  %vm1781_vm0 = vcmp.eq.s32.totalorder %v11287_v14, %v10839_v60 }
 0x2cf   :  { %15333 = vst [vmem:[#allocation48_spill] sm:$0xff] %v11797_v10  ;;  %v11803_v42 = vpop.permute.xlu0 %1633  ;;  %8404 = vmatprep.mubr.msk.bf16.mxu0 %vm8403_vm1, %v15268_v0  ;;  %vm8405_vm5 = vmpackc.low %vm736_vm2, %vm735_vm3  ;;  %vm1782_vm1 = vcmp.eq.s32.totalorder %v11290_v13, %v10839_v60 }
 0x2d0   :  { %9013 = vset.pattern.permute.xlu1 %v15296_v48  ;;  %vm8415_vm3 = vmpackc.low %vm1782_vm1, %vm1781_vm0 }
 0x2d1   :  { %2304 = vperm.xlu1 %9013, %v9380_v17   ;;  %v11807_v18 = vpop.f32.mrb[28].mxu0 }
 0x2d2   :  { %15334 = vst [vmem:[#allocation47_spill] sm:$0xff] %v11807_v18  ;;  %v11813_v10 = vpop.permute.xlu1 %1636  ;;  %v4695_v59 = vpop.f32.mrb[29].mxu0  ;;  %9025 = vset.pattern.permute.xlu0 %v15285_v20 }
 0x2d3   :  { %v11820_v17 = vpop.permute.xlu0 %1639  ;;  %v11822_v18 = vpop.f32.mrb[30].mxu0  ;;  %3374 = vperm.xlu0 %9025, %v9381_v39   ;;  %v15342_v39 = vld [vmem:[#allocation97_spill] sm:$0xff] }
 0x2d4   :  { %15337 = vst [vmem:[#allocation52_spill] sm:$0xff] %v11822_v18  ;;  %v4698_v44 = vpop.f32.mrb[31].mxu0  ;;  %vm737_vm8 = vcmp.eq.s32.totalorder %v15342_v39, %v10839_v60  ;;  %v9383_v18 = vld [vmem:[%s14948_s0 + $0x78] sm:$0xff]  ;;  %v9384_v39 = vld [vmem:[%s14948_s0 + $0xd0] sm:$0xff] }
 0x2d5   :  { %2307 = vperm.xlu1 %9013, %v11652_v6   ;;  %v15341_v6 = vld [vmem:[#allocation96_spill] sm:$0xff] }
 0x2d6   :  { %v11825_v15 = vpop.permute.xlu1 %1642  ;;  %8406 = vmatmul.mubr.msk.bf16.gmra.mrb[136].mxu0 %vm8405_vm5, %v15268_v0  ;;  %vm738_vm7 = vcmp.eq.s32.totalorder %v15341_v6, %v10839_v60  ;;  %vm1783_vm5 = vcmp.eq.s32.totalorder %v11307_v36, %v10839_v60 }
 0x2d7   :  { %15338 = vst [vmem:[#allocation51_spill] sm:$0xff] %v11825_v15  ;;  %v11828_v59 = vpop.permute.xlu0 %1645  ;;  %8408 = vmatprep.mubr.msk.bf16.mxu0 %vm8407_vm6, %v15268_v0  ;;  %3383 = vperm.xlu0 %9025, %v11834_v61   ;;  %vm8409_vm11 = vmpackc.low %vm738_vm7, %vm737_vm8  ;;  %vm1784_vm6 = vcmp.eq.s32.totalorder %v11309_v55, %v10839_v60 }
 0x2d8   :  { %15339 = vst [vmem:[#allocation25_spill] sm:$0xff] %v11828_v59  ;;  %vm8419_vm8 = vmpackc.low %vm1784_vm6, %vm1783_vm5 }
 0x2d9   :  { %9014 = vset.pattern.permute.xlu1 %v15285_v20  ;;  %v11838_v7 = vpop.f32.mrb[32].mxu0 }
 0x2da   :  { %15340 = vst [vmem:[#allocation26_spill] sm:$0xff] %v11838_v7  ;;  %v11844_v44 = vpop.permute.xlu1 %1648  ;;  %3353 = vperm.xlu1 %9014, %v9383_v18   ;;  %v4703_v59 = vpop.f32.mrb[33].mxu0 }
 0x2db   :  { %15343 = vst [vmem:[#allocation56_spill] sm:$0xff] %v11844_v44  ;;  %v11853_v7 = vpop.permute.xlu0 %1651  ;;  %v11855_v6 = vpop.f32.mrb[34].mxu0  ;;  %3386 = vperm.xlu0 %9025, %v9384_v39  }
 0x2dc   :  { %15344 = vst [vmem:[#allocation55_spill] sm:$0xff] %v11855_v6  ;;  %v4706_v44 = vpop.f32.mrb[35].mxu0  ;;  %v15349_v6 = vld [vmem:[#allocation99_spill] sm:$0xff] }
 0x2dd   :  { %v15348_v44 = vld [vmem:[#allocation98_spill] sm:$0xff]  ;;  %vm739_vm14 = vcmp.eq.s32.totalorder %v15349_v6, %v10839_v60 }
 0x2de   :  { %v11860_v15 = vpop.permute.xlu1 %1654  ;;  %9016 = vset.pattern.permute.xlu1 %v15296_v48  ;;  %8410 = vmatmul.mubr.msk.bf16.gmra.mrb[140].mxu0 %vm8409_vm11, %v15268_v0  ;;  %vm740_vm13 = vcmp.eq.s32.totalorder %v15348_v44, %v10839_v60  ;;  %v9386_v44 = vld [vmem:[%s14948_s0 + $0x80] sm:$0xff]  ;;  %vm1785_vm11 = vcmp.eq.s32.totalorder %v11325_v56, %v10839_v60  ;;  %v9390_v56 = vld [vmem:[%s14948_s0 + $0x110] sm:$0xff] }
 0x2df   :  { %15345 = vst [vmem:[#allocation59_spill] sm:$0xff] %v11860_v15  ;;  %v11864_v40 = vpop.permute.xlu0 %1657  ;;  %2313 = vperm.xlu1 %9016, %v9383_v18   ;;  %8412 = vmatprep.mubr.msk.bf16.mxu0 %vm8411_vm12, %v15268_v0  ;;  %vm8413_vm2 = vmpackc.low %vm740_vm13, %vm739_vm14  ;;  %vm1786_vm12 = vcmp.eq.s32.totalorder %v11328_v53, %v10839_v60 }
 0x2e0   :  { %15346 = vst [vmem:[#allocation29_spill] sm:$0xff] %v11864_v40  ;;  %3395 = vperm.xlu0 %9025, %v11870_v58   ;;  %vm8423_vm14 = vmpackc.low %vm1786_vm12, %vm1785_vm11 }
 0x2e1   :  { %v11873_v59 = vpop.f32.mrb[36].mxu0 }
 0x2e2   :  { %15347 = vst [vmem:[#allocation30_spill] sm:$0xff] %v11873_v59  ;;  %v11879_v15 = vpop.permute.xlu1 %1660  ;;  %v4711_v18 = vpop.f32.mrb[37].mxu0 }
 0x2e3   :  { %v11885_v40 = vpop.permute.xlu0 %1663  ;;  %9017 = vset.pattern.permute.xlu1 %v15285_v20  ;;  %v11888_v59 = vpop.f32.mrb[38].mxu0 }
 0x2e4   :  { %15350 = vst [vmem:[#allocation33_spill] sm:$0xff] %v11885_v40  ;;  %15351 = vst [vmem:[#allocation34_spill] sm:$0xff] %v11888_v59  ;;  %3356 = vperm.xlu1 %9017, %v9386_v44   ;;  %v4714_v6 = vpop.f32.mrb[39].mxu0  ;;  %9032 = vset.pattern.permute.xlu0 %v15296_v48  ;;  %v15356_v59 = vld [vmem:[#allocation101_spill] sm:$0xff] }
 0x2e5   :  { %2346 = vperm.xlu0 %9032, %v9384_v39   ;;  %v9387_v6 = vld [vmem:[%s14948_s0 + $0xf0] sm:$0xff]  ;;  %v15355_v39 = vld [vmem:[#allocation100_spill] sm:$0xff]  ;;  %vm741_vm4 = vcmp.eq.s32.totalorder %v15356_v59, %v10839_v60 }
 0x2e6   :  { %v11894_v14 = vpop.permute.xlu1 %1666  ;;  %8414 = vmatmul.mubr.msk.bf16.gmra.mrb[144].mxu0 %vm8413_vm2, %v15268_v0  ;;  %vm742_vm15 = vcmp.eq.s32.totalorder %v15355_v39, %v10839_v60  ;;  %vm1787_vm2 = vcmp.eq.s32.totalorder %v11345_v34, %v10839_v60 }
 0x2e7   :  { %15352 = vst [vmem:[#allocation37_spill] sm:$0xff] %v11894_v14  ;;  %v11897_v13 = vpop.permute.xlu0 %1669  ;;  %8416 = vmatprep.mubr.msk.bf16.mxu0 %vm8415_vm3, %v15268_v0  ;;  %vm8417_vm7 = vmpackc.low %vm742_vm15, %vm741_vm4  ;;  %vm1788_vm3 = vcmp.eq.s32.totalorder %v11347_v37, %v10839_v60 }
 0x2e8   :  { %15353 = vst [vmem:[#allocation38_spill] sm:$0xff] %v11897_v13  ;;  %9018 = vset.pattern.permute.xlu1 %v15296_v48  ;;  %vm8427_vm4 = vmpackc.low %vm1788_vm3, %vm1787_vm2  ;;  %vm1792_vm2 = vcmp.eq.s32.totalorder %v11385_v38, %v10839_v60  ;;  %v12046_v38 = vld [vmem:[%s14948_s0 + $0x148] sm:$0xff] }
 0x2e9   :  { %2316 = vperm.xlu1 %9018, %v9386_v44   ;;  %v11901_v18 = vpop.f32.mrb[40].mxu0  ;;  %2358 = vperm.xlu0 %9032, %v9387_v6  }
 0x2ea   :  { %15354 = vst [vmem:[#allocation41_spill] sm:$0xff] %v11901_v18  ;;  %v11910_v14 = vpop.permute.xlu1 %1672  ;;  %v4719_v13 = vpop.f32.mrb[41].mxu0 }
 0x2eb   :  { %v11916_v44 = vpop.permute.xlu0 %1675  ;;  %v11918_v18 = vpop.f32.mrb[42].mxu0 }
 0x2ec   :  { %15357 = vst [vmem:[#allocation42_spill] sm:$0xff] %v11918_v18  ;;  %v4722_v40 = vpop.f32.mrb[43].mxu0  ;;  %v11943_v18 = vld [vmem:[%s14948_s0 + $0x108] sm:$0xff] }
 0x2ed   :  { %2319 = vperm.xlu1 %9018, %v11731_v43   ;;  %9035 = vset.pattern.permute.xlu0 %v15285_v20  ;;  %v15359_v40 = vld [vmem:[#allocation102_spill] sm:$0xff]  ;;  %v15360_v43 = vld [vmem:[#allocation103_spill] sm:$0xff] }
 0x2ee   :  { %v11922_v59 = vpop.permute.xlu1 %1678  ;;  %8418 = vmatmul.mubr.msk.bf16.gmra.mrb[148].mxu0 %vm8417_vm7, %v15268_v0  ;;  %3398 = vperm.xlu0 %9035, %v9387_v6   ;;  %vm744_vm9 = vcmp.eq.s32.totalorder %v15359_v40, %v10839_v60  ;;  %vm743_vm10 = vcmp.eq.s32.totalorder %v15360_v43, %v10839_v60  ;;  %v9388_v6 = vld [vmem:[%s14948_s0 + $0x98] sm:$0xff]  ;;  %vm1789_vm7 = vcmp.eq.s32.totalorder %v11363_v3, %v10839_v60  ;;  %v9393_v3 = vld [vmem:[%s14948_s0 + $0x130] sm:$0xff] }
 0x2ef   :  { %v11925_v36 = vpop.permute.xlu0 %1681  ;;  %8420 = vmatprep.mubr.msk.bf16.mxu0 %vm8419_vm8, %v15268_v0  ;;  %vm8421_vm13 = vmpackc.low %vm744_vm9, %vm743_vm10  ;;  %vm1790_vm8 = vcmp.eq.s32.totalorder %v11366_v57, %v10839_v60 }
 0x2f0   :  { %vm8431_vm11 = vmpackc.low %vm1790_vm8, %vm1789_vm7 }
 0x2f1   :  { %9019 = vset.pattern.permute.xlu1 %v15285_v20  ;;  %v11929_v55 = vpop.f32.mrb[44].mxu0 }
 0x2f2   :  { %15358 = vst [vmem:[#allocation45_spill] sm:$0xff] %v11929_v55  ;;  %v11935_v13 = vpop.permute.xlu1 %1684  ;;  %3365 = vperm.xlu1 %9019, %v9388_v6   ;;  %v4727_v39 = vpop.f32.mrb[45].mxu0  ;;  %3407 = vperm.xlu0 %9035, %v11943_v18  }
 0x2f3   :  { %15361 = vst [vmem:[#allocation46_spill] sm:$0xff] %v11935_v13  ;;  %v11950_v40 = vpop.permute.xlu0 %1687  ;;  %v11952_v43 = vpop.f32.mrb[46].mxu0 }
 0x2f4   :  { %15362 = vst [vmem:[#allocation49_spill] sm:$0xff] %v11950_v40  ;;  %15363 = vst [vmem:[#allocation50_spill] sm:$0xff] %v11952_v43  ;;  %v4730_v55 = vpop.f32.mrb[47].mxu0  ;;  %v15368_v43 = vld [vmem:[#allocation105_spill] sm:$0xff] }
 0x2f5   :  { %v15367_v55 = vld [vmem:[#allocation104_spill] sm:$0xff]  ;;  %vm745_vm1 = vcmp.eq.s32.totalorder %v15368_v43, %v10839_v60 }
 0x2f6   :  { %v11954_v39 = vpop.permute.xlu1 %1690  ;;  %9020 = vset.pattern.permute.xlu1 %v15296_v48  ;;  %8422 = vmatmul.mubr.msk.bf16.gmra.mrb[152].mxu0 %vm8421_vm13, %v15268_v0  ;;  %vm746_vm0 = vcmp.eq.s32.totalorder %v15367_v55, %v10839_v60  ;;  %v9391_v55 = vld [vmem:[%s14948_s0 + $0xa0] sm:$0xff] }
 0x2f7   :  { %15364 = vst [vmem:[#allocation53_spill] sm:$0xff] %v11954_v39  ;;  %v11958_v13 = vpop.permute.xlu0 %1693  ;;  %2325 = vperm.xlu1 %9020, %v9388_v6   ;;  %8424 = vmatprep.mubr.msk.bf16.mxu0 %vm8423_vm14, %v15268_v0  ;;  %vm8425_vm15 = vmpackc.low %vm746_vm0, %vm745_vm1  ;;  %vm1791_vm1 = vcmp.eq.s32.totalorder %v11383_v32, %v10839_v60 }
 0x2f8   :  { %15365 = vst [vmem:[#allocation54_spill] sm:$0xff] %v11958_v13  ;;  %3410 = vperm.xlu0 %9035, %v9390_v56  }
 0x2f9   :  { %v11964_v53 = vpop.f32.mrb[48].mxu0 }
 0x2fa   :  { %15366 = vst [vmem:[#allocation57_spill] sm:$0xff] %v11964_v53  ;;  %v11970_v39 = vpop.permute.xlu1 %1696  ;;  %v4735_v40 = vpop.f32.mrb[49].mxu0 }
 0x2fb   :  { %15369 = vst [vmem:[#allocation58_spill] sm:$0xff] %v11970_v39  ;;  %v11976_v6 = vpop.permute.xlu0 %1699  ;;  %9021 = vset.pattern.permute.xlu1 %v15285_v20  ;;  %v11979_v53 = vpop.f32.mrb[50].mxu0  ;;  %v11987_v40 = vld [vmem:[%s14948_s0 + $0x128] sm:$0xff] }
 0x2fc   :  { %15370 = vst [vmem:[#allocation60_spill] sm:$0xff] %v11976_v6  ;;  %15371 = vst [vmem:[#allocation61_spill] sm:$0xff] %v11979_v53  ;;  %3368 = vperm.xlu1 %9021, %v9391_v55   ;;  %v4738_v43 = vpop.f32.mrb[51].mxu0  ;;  %3419 = vperm.xlu0 %9035, %v11987_v40   ;;  %v15375_v53 = vld [vmem:[#allocation107_spill] sm:$0xff] }
 0x2fd   :  { %v15374_v43 = vld [vmem:[#allocation106_spill] sm:$0xff]  ;;  %vm747_vm6 = vcmp.eq.s32.totalorder %v15375_v53, %v10839_v60  ;;  %v15376_v53 = vld [vmem:[#allocation108_spill] sm:$0xff] }
 0x2fe   :  { %v11990_v34 = vpop.permute.xlu1 %1702  ;;  %8426 = vmatmul.mubr.msk.bf16.gmra.mrb[156].mxu0 %vm8425_vm15, %v15268_v0  ;;  %vm748_vm5 = vcmp.eq.s32.totalorder %v15374_v43, %v10839_v60  ;;  %vm750_vm14 = vcmp.eq.s32.totalorder %v15376_v53, %v10839_v60  ;;  %vm8435_vm15 = vmpackc.low %vm1792_vm2, %vm1791_vm1 }
 0x2ff   :  { %15372 = vst [vmem:[#allocation62_spill] sm:$0xff] %v11990_v34  ;;  %v11993_v37 = vpop.permute.xlu0 %1705  ;;  %8428 = vmatprep.mubr.msk.bf16.mxu0 %vm8427_vm4, %v15268_v0  ;;  %vm8429_vm9 = vmpackc.low %vm748_vm5, %vm747_vm6 }
 0x300   :  { %15373 = vst [vmem:[#allocation63_spill] sm:$0xff] %v11993_v37  ;;  %9023 = vset.pattern.permute.xlu1 %v15296_v48  ;;  %9042 = vset.pattern.permute.xlu0 %v15296_v48 }
 0x301   :  { %2328 = vperm.xlu1 %9023, %v9391_v55   ;;  %v12002_v6 = vpop.f32.mrb[52].mxu0  ;;  %2370 = vperm.xlu0 %9042, %v9390_v56   ;;  %v9394_v55 = vld [vmem:[%s14948_s0 + $0xb8] sm:$0xff] }
 0x302   :  { %v4743_v37 = vpop.f32.mrb[53].mxu0 }
 0x303   :  { %v3309_v34 = vpop.permute.xlu1 %3308  ;;  %v12008_v39 = vpop.f32.mrb[54].mxu0 }
 0x304   :  { %v3312_v13 = vpop.permute.xlu0 %3311  ;;  %v4746_v43 = vpop.f32.mrb[55].mxu0  ;;  %vm3787_vm10 = vcmp.eq.s32.totalorder %v3309_v34, %v10839_v60 }
 0x305   :  { %2331 = vperm.xlu1 %9023, %v11766_v12   ;;  %vm3788_vm12 = vcmp.eq.s32.totalorder %v3312_v13, %v10839_v60  ;;  %2382 = vperm.xlu0 %9042, %v9393_v3   ;;  %v15377_v12 = vld [vmem:[#allocation109_spill] sm:$0xff] }
 0x306   :  { %8430 = vmatmul.mubr.msk.bf16.gmra.mrb[160].mxu0 %vm8429_vm9, %v15268_v0  ;;  %vm8587_vm13 = vmpackc.low %vm3788_vm12, %vm3787_vm10  ;;  %vm749_vm0 = vcmp.eq.s32.totalorder %v15377_v12, %v10839_v60  ;;  %v15378_v12 = vld [vmem:[#allocation110_spill] sm:$0xff]  ;;  %vm1794_vm12 = vcmp.eq.s32.totalorder %v11404_v51, %v10839_v60 }
 0x307   :  { %8588 = vmatprep.mubr.msk.bf16.mxu1 %vm8587_vm13, %v15268_v0  ;;  %8432 = vmatprep.mubr.msk.bf16.mxu0 %vm8431_vm11, %v15268_v0  ;;  %vm8433_vm3 = vmpackc.low %vm750_vm14, %vm749_vm0  ;;  %vm752_vm8 = vcmp.eq.s32.totalorder %v15378_v12, %v10839_v60  ;;  %vm1793_vm11 = vcmp.eq.s32.totalorder %v11401_v54, %v10839_v60  ;;  %v9397_v54 = vld [vmem:[%s14948_s0 + $0x150] sm:$0xff] }
 0x308   :  { %v2269_v57 = vpop.permute.xlu1 %2268  ;;  %v3315_v56 = vpop.permute.xlu0 %3314  ;;  %vm8439_vm1 = vmpackc.low %vm1794_vm12, %vm1793_vm11 }
 0x309   :  { %9024 = vset.pattern.permute.xlu1 %v15285_v20  ;;  %v12024_v13 = vpop.f32.mrb[56].mxu0  ;;  %9045 = vset.pattern.permute.xlu0 %v15285_v20  ;;  %vm2747_vm4 = vcmp.eq.s32.totalorder %v2269_v57, %v10839_v60  ;;  %vm3789_vm7 = vcmp.eq.s32.totalorder %v3315_v56, %v10839_v60 }
 0x30a   :  { %3377 = vperm.xlu1 %9024, %v9394_v55   ;;  %v4751_v34 = vpop.f32.mrb[57].mxu0  ;;  %3422 = vperm.xlu0 %9045, %v9393_v3  }
 0x30b   :  { %v12034_v37 = vpop.f32.mrb[58].mxu0 }
 0x30c   :  { %v2272_v43 = vpop.permute.xlu1 %2271  ;;  %v4754_v53 = vpop.f32.mrb[59].mxu0 }
 0x30d   :  { %vm2748_vm5 = vcmp.eq.s32.totalorder %v2272_v43, %v10839_v60  ;;  %v3324_v32 = vpop.permute.xlu0 %3323  ;;  %v9396_v53 = vld [vmem:[%s14948_s0 + $0xc0] sm:$0xff] }
 0x30e   :  { %vm8589_vm6 = vmpackc.low %vm2748_vm5, %vm2747_vm4  ;;  %9026 = vset.pattern.permute.xlu1 %v15296_v48  ;;  %8434 = vmatmul.mubr.msk.bf16.gmra.mrb[164].mxu0 %vm8433_vm3, %v15268_v0  ;;  %vm3792_vm5 = vcmp.eq.s32.totalorder %v3324_v32, %v10839_v60 }
 0x30f   :  { %2337 = vperm.xlu1 %9026, %v9394_v55   ;;  %8436 = vmatprep.mubr.msk.bf16.mxu0 %vm8435_vm15, %v15268_v0  ;;  %v15379_v55 = vld [vmem:[#allocation111_spill] sm:$0xff] }
 0x310   :  { %8590 = vmatmul.mubr.msk.bf16.vlgmr.msra.gmra.mrb[0].mxu1 %vm8589_vm6, %v15268_v0  ;;  %3431 = vperm.xlu0 %9045, %v12046_v38   ;;  %vm751_vm9 = vcmp.eq.s32.totalorder %v15379_v55, %v10839_v60  ;;  %v15381_v55 = vld [vmem:[#allocation113_spill] sm:$0xff]  ;;  %vm1795_vm6 = vcmp.eq.s32.totalorder %v11421_v30, %v10839_v60 }
 0x311   :  { %v3318_v3 = vpop.permute.xlu1 %3317  ;;  %v12049_v57 = vpop.f32.mrb[60].mxu0  ;;  %vm8437_vm14 = vmpackc.low %vm752_vm8, %vm751_vm9  ;;  %vm753_vm4 = vcmp.eq.s32.totalorder %v15381_v55, %v10839_v60  ;;  %v15383_v55 = vld [vmem:[#allocation115_spill] sm:$0xff] }
 0x312   :  { %vm3790_vm10 = vcmp.eq.s32.totalorder %v3318_v3, %v10839_v60  ;;  %v4759_v56 = vpop.f32.mrb[61].mxu0  ;;  %v2275_v34 = vpop.permute.xlu0 %2274  ;;  %v15380_v3 = vld [vmem:[#allocation112_spill] sm:$0xff] }
 0x313   :  { %vm8591_vm13 = vmpackc.low %vm3790_vm10, %vm3789_vm7  ;;  %9027 = vset.pattern.permute.xlu1 %v15285_v20  ;;  %v12061_v43 = vpop.f32.mrb[62].mxu0  ;;  %vm2749_vm0 = vcmp.eq.s32.totalorder %v2275_v34, %v10839_v60  ;;  %vm754_vm15 = vcmp.eq.s32.totalorder %v15380_v3, %v10839_v60  ;;  %vm1796_vm7 = vcmp.eq.s32.totalorder %v11423_v35, %v10839_v60  ;;  %v15382_v3 = vld [vmem:[#allocation114_spill] sm:$0xff] }
 0x314   :  { %3380 = vperm.xlu1 %9027, %v9396_v53   ;;  %v4762_v12 = vpop.f32.mrb[63].mxu0  ;;  %8592 = vmatprep.mubr.msk.bf16.mxu1 %vm8591_vm13, %v15268_v0  ;;  %vm8441_vm8 = vmpackc.low %vm754_vm15, %vm753_vm4  ;;  %vm756_vm12 = vcmp.eq.s32.totalorder %v15382_v3, %v10839_v60  ;;  %vm755_vm13 = vcmp.eq.s32.totalorder %v15383_v55, %v10839_v60  ;;  %v9400_v55 = vld [vmem:[%s14948_s0 + $0x170] sm:$0xff] }
 0x315   :  { %3434 = vperm.xlu0 %9045, %v9397_v54   ;;  %v12086_v12 = vld [vmem:[%s14948_s0 + $0x168] sm:$0xff]  ;;  %vm8443_vm11 = vmpackc.low %vm1796_vm7, %vm1795_vm6 }
 0x316   :  { %v2278_v51 = vpop.permute.xlu1 %2277  ;;  %8438 = vmatmul.mubr.msk.bf16.gmra.mrb[168].mxu0 %vm8437_vm14, %v15268_v0  ;;  %vm1797_vm14 = vcmp.eq.s32.totalorder %v11439_v9, %v10839_v60 }
 0x317   :  { %vm2750_vm2 = vcmp.eq.s32.totalorder %v2278_v51, %v10839_v60  ;;  %8440 = vmatprep.mubr.msk.bf16.mxu0 %vm8439_vm1, %v15268_v0  ;;  %v2287_v30 = vpop.permute.xlu0 %2286  ;;  %vm8445_vm1 = vmpackc.low %vm756_vm12, %vm755_vm13 }
 0x318   :  { %vm8593_vm3 = vmpackc.low %vm2750_vm2, %vm2749_vm0  ;;  %9028 = vset.pattern.permute.xlu1 %v15296_v48  ;;  %vm1798_vm0 = vcmp.eq.s32.totalorder %v11442_v11, %v10839_v60  ;;  %vm2753_vm13 = vcmp.eq.s32.totalorder %v2287_v30, %v10839_v60  ;;  %v15386_v30 = vld [vmem:[#allocation118_spill] sm:$0xff] }
 0x319   :  { %2340 = vperm.xlu1 %9028, %v9396_v53   ;;  %v12079_v56 = vpop.f32.mrb[64].mxu0  ;;  %8594 = vmatmul.mubr.msk.bf16.gmra.mrb[4].mxu1 %vm8593_vm3, %v15268_v0  ;;  %vm8447_vm2 = vmpackc.low %vm1798_vm0, %vm1797_vm14 }
 0x31a   :  { %v4767_v34 = vpop.f32.mrb[65].mxu0  ;;  %3443 = vperm.xlu0 %9045, %v12086_v12  }
 0x31b   :  { %v3321_v53 = vpop.permute.xlu1 %3320  ;;  %v12093_v51 = vpop.f32.mrb[66].mxu0 }
 0x31c   :  { %vm3791_vm9 = vcmp.eq.s32.totalorder %v3321_v53, %v10839_v60  ;;  %v4770_v32 = vpop.f32.mrb[67].mxu0  ;;  %v3327_v9 = vpop.permute.xlu0 %3326 }
 0x31d   :  { %vm8595_vm10 = vmpackc.low %vm3792_vm5, %vm3791_vm9  ;;  %2343 = vperm.xlu1 %9028, %v11834_v61   ;;  %vm3793_vm5 = vcmp.eq.s32.totalorder %v3327_v9, %v10839_v60  ;;  %vm1799_vm9 = vcmp.eq.s32.totalorder %v11459_v28, %v10839_v60  ;;  %v12150_v28 = vld [vmem:[%s14948_s0 + $0x188] sm:$0xff] }
 0x31e   :  { %8442 = vmatmul.mubr.msk.bf16.gmra.mrb[172].mxu0 %vm8441_vm8, %v15268_v0  ;;  %8596 = vmatprep.mubr.msk.bf16.mxu1 %vm8595_vm10, %v15268_v0  ;;  %vm1800_vm10 = vcmp.eq.s32.totalorder %v11461_v33, %v10839_v60 }
 0x31f   :  { %8444 = vmatprep.mubr.msk.bf16.mxu0 %vm8443_vm11, %v15268_v0  ;;  %9052 = vset.pattern.permute.xlu0 %v15296_v48  ;;  %vm8451_vm14 = vmpackc.low %vm1800_vm10, %vm1799_vm9 }
 0x320   :  { %v2281_v35 = vpop.permute.xlu1 %2280  ;;  %2394 = vperm.xlu0 %9052, %v9397_v54   ;;  %v9399_v54 = vld [vmem:[%s14948_s0 + $0xd8] sm:$0xff] }
 0x321   :  { %9029 = vset.pattern.permute.xlu1 %v15285_v20  ;;  %v12106_v61 = vpop.f32.mrb[68].mxu0  ;;  %vm2751_vm3 = vcmp.eq.s32.totalorder %v2281_v35, %v10839_v60  ;;  %v15384_v35 = vld [vmem:[#allocation116_spill] sm:$0xff] }
 0x322   :  { %3389 = vperm.xlu1 %9029, %v9399_v54   ;;  %v4775_v34 = vpop.f32.mrb[69].mxu0  ;;  %vm758_vm6 = vcmp.eq.s32.totalorder %v15384_v35, %v10839_v60  ;;  %v15387_v35 = vld [vmem:[#allocation119_spill] sm:$0xff] }
 0x323   :  { %v12115_v53 = vpop.f32.mrb[70].mxu0 }
 0x324   :  { %v2284_v32 = vpop.permute.xlu1 %2283  ;;  %v4778_v3 = vpop.f32.mrb[71].mxu0  ;;  %2406 = vperm.xlu0 %9052, %v9400_v55  }
 0x325   :  { %vm2752_vm15 = vcmp.eq.s32.totalorder %v2284_v32, %v10839_v60  ;;  %v15385_v32 = vld [vmem:[#allocation117_spill] sm:$0xff] }
 0x326   :  { %vm8597_vm4 = vmpackc.low %vm2752_vm15, %vm2751_vm3  ;;  %9030 = vset.pattern.permute.xlu1 %v15296_v48  ;;  %8446 = vmatmul.mubr.msk.bf16.gmra.mrb[176].mxu0 %vm8445_vm1, %v15268_v0  ;;  %vm757_vm7 = vcmp.eq.s32.totalorder %v15385_v32, %v10839_v60  ;;  %vm759_vm3 = vcmp.eq.s32.totalorder %v15387_v35, %v10839_v60  ;;  %v15389_v35 = vld [vmem:[#allocation120_spill] sm:$0xff] }
 0x327   :  { %2349 = vperm.xlu1 %9030, %v9399_v54   ;;  %8448 = vmatprep.mubr.msk.bf16.mxu0 %vm8447_vm2, %v15268_v0  ;;  %vm8449_vm12 = vmpackc.low %vm758_vm6, %vm757_vm7  ;;  %vm760_vm2 = vcmp.eq.s32.totalorder %v15386_v30, %v10839_v60  ;;  %vm762_vm10 = vcmp.eq.s32.totalorder %v15389_v35, %v10839_v60 }
 0x328   :  { %8598 = vmatmul.mubr.msk.bf16.gmra.mrb[8].mxu1 %vm8597_vm4, %v15268_v0  ;;  %9055 = vset.pattern.permute.xlu0 %v15285_v20  ;;  %vm1801_vm4 = vcmp.eq.s32.totalorder %v11477_v52, %v10839_v60  ;;  %vm8453_vm6 = vmpackc.low %vm760_vm2, %vm759_vm3  ;;  %v12182_v52 = vld [vmem:[%s14948_s0 + $0x1a8] sm:$0xff] }
 0x329   :  { %v3330_v11 = vpop.permute.xlu1 %3329  ;;  %v12128_v34 = vpop.f32.mrb[72].mxu0  ;;  %3446 = vperm.xlu0 %9055, %v9400_v55   ;;  %v9401_v55 = vld [vmem:[%s14948_s0 + $0xe0] sm:$0xff] }
 0x32a   :  { %vm3794_vm8 = vcmp.eq.s32.totalorder %v3330_v11, %v10839_v60  ;;  %v4783_v54 = vpop.f32.mrb[73].mxu0  ;;  %v3336_v11 = vpop.permute.xlu0 %3335 }
 0x32b   :  { %vm8599_vm11 = vmpackc.low %vm3794_vm8, %vm3793_vm5  ;;  %9031 = vset.pattern.permute.xlu1 %v15285_v20  ;;  %v12140_v3 = vpop.f32.mrb[74].mxu0  ;;  %vm3796_vm15 = vcmp.eq.s32.totalorder %v3336_v11, %v10839_v60  ;;  %vm1802_vm5 = vcmp.eq.s32.totalorder %v11480_v49, %v10839_v60 }
 0x32c   :  { %3392 = vperm.xlu1 %9031, %v9401_v55   ;;  %v4786_v9 = vpop.f32.mrb[75].mxu0  ;;  %8600 = vmatprep.mubr.msk.bf16.mxu1 %vm8599_vm11, %v15268_v0  ;;  %vm8455_vm9 = vmpackc.low %vm1802_vm5, %vm1801_vm4 }
 0x32d   :  { %3455 = vperm.xlu0 %9055, %v12150_v28   ;;  %v9403_v9 = vld [vmem:[%s14948_s0 + $0x190] sm:$0xff] }
 0x32e   :  { %v2290_v33 = vpop.permute.xlu1 %2289  ;;  %8450 = vmatmul.mubr.msk.bf16.gmra.mrb[180].mxu0 %vm8449_vm12, %v15268_v0  ;;  %v3339_v11 = vpop.permute.xlu0 %3338  ;;  %vm1803_vm12 = vcmp.eq.s32.totalorder %v11497_v26, %v10839_v60  ;;  %v9406_v26 = vld [vmem:[%s14948_s0 + $0x1b0] sm:$0xff] }
 0x32f   :  { %vm2754_vm0 = vcmp.eq.s32.totalorder %v2290_v33, %v10839_v60  ;;  %8452 = vmatprep.mubr.msk.bf16.mxu0 %vm8451_vm14, %v15268_v0 }
 0x330   :  { %vm8601_vm1 = vmpackc.low %vm2754_vm0, %vm2753_vm13  ;;  %9033 = vset.pattern.permute.xlu1 %v15296_v48  ;;  %vm1804_vm13 = vcmp.eq.s32.totalorder %v11499_v31, %v10839_v60 }
 0x331   :  { %2352 = vperm.xlu1 %9033, %v9401_v55   ;;  %v12161_v32 = vpop.f32.mrb[76].mxu0  ;;  %8602 = vmatmul.mubr.msk.bf16.gmra.mrb[12].mxu1 %vm8601_vm1, %v15268_v0  ;;  %vm8459_vm0 = vmpackc.low %vm1804_vm13, %vm1803_vm12 }
 0x332   :  { %v4791_v54 = vpop.f32.mrb[77].mxu0  ;;  %3458 = vperm.xlu0 %9055, %v9403_v9  }
 0x333   :  { %v3333_v33 = vpop.permute.xlu1 %3332  ;;  %v12172_v55 = vpop.f32.mrb[78].mxu0 }
 0x334   :  { %15388 = vst [vmem:[#allocation64_spill] sm:$0xff] %v12172_v55  ;;  %vm3795_vm7 = vcmp.eq.s32.totalorder %v3333_v33, %v10839_v60  ;;  %v4794_v30 = vpop.f32.mrb[79].mxu0  ;;  %v9405_v33 = vld [vmem:[%s14948_s0 + $0xf8] sm:$0xff]  ;;  %v3348_v55 = vpop.permute.xlu0 %3347 }
 0x335   :  { %vm8603_vm8 = vmpackc.low %vm3796_vm15, %vm3795_vm7  ;;  %2355 = vperm.xlu1 %9033, %v11870_v58   ;;  %v15390_v58 = vld [vmem:[#allocation121_spill] sm:$0xff]  ;;  %vm3797_vm15 = vcmp.eq.s32.totalorder %v3339_v11, %v10839_v60  ;;  %vm1805_vm7 = vcmp.eq.s32.totalorder %v11517_v8, %v10839_v60 }
 0x336   :  { %8454 = vmatmul.mubr.msk.bf16.gmra.mrb[184].mxu0 %vm8453_vm6, %v15268_v0  ;;  %8604 = vmatprep.mubr.msk.bf16.mxu1 %vm8603_vm8, %v15268_v0  ;;  %vm761_vm11 = vcmp.eq.s32.totalorder %v15390_v58, %v10839_v60  ;;  %vm1806_vm8 = vcmp.eq.s32.totalorder %v11520_v29, %v10839_v60  ;;  %v15394_v29 = vld [vmem:[#allocation124_spill] sm:$0xff] }
 0x337   :  { %8456 = vmatprep.mubr.msk.bf16.mxu0 %vm8455_vm9, %v15268_v0  ;;  %3467 = vperm.xlu0 %9055, %v12182_v52   ;;  %vm8457_vm14 = vmpackc.low %vm762_vm10, %vm761_vm11 }
 0x338   :  { %v2293_v49 = vpop.permute.xlu1 %2292  ;;  %v2299_v11 = vpop.permute.xlu0 %2298  ;;  %vm8463_vm12 = vmpackc.low %vm1806_vm8, %vm1805_vm7 }
 0x339   :  { %9034 = vset.pattern.permute.xlu1 %v15285_v20  ;;  %v12190_v54 = vpop.f32.mrb[80].mxu0  ;;  %vm2755_vm1 = vcmp.eq.s32.totalorder %v2293_v49, %v10839_v60  ;;  %v15392_v49 = vld [vmem:[#allocation122_spill] sm:$0xff]  ;;  %vm2757_vm11 = vcmp.eq.s32.totalorder %v2299_v11, %v10839_v60 }
 0x33a   :  { %15391 = vst [vmem:[#allocation65_spill] sm:$0xff] %v12190_v54  ;;  %3401 = vperm.xlu1 %9034, %v9405_v33   ;;  %v4799_v30 = vpop.f32.mrb[81].mxu0  ;;  %vm764_vm4 = vcmp.eq.s32.totalorder %v15392_v49, %v10839_v60 }
 0x33b   :  { %v12199_v35 = vpop.f32.mrb[82].mxu0  ;;  %9062 = vset.pattern.permute.xlu0 %v15296_v48 }
 0x33c   :  { %v2296_v58 = vpop.permute.xlu1 %2295  ;;  %v4802_v54 = vpop.f32.mrb[83].mxu0  ;;  %2418 = vperm.xlu0 %9062, %v9403_v9  }
 0x33d   :  { %vm2756_vm2 = vcmp.eq.s32.totalorder %v2296_v58, %v10839_v60  ;;  %v15393_v54 = vld [vmem:[#allocation123_spill] sm:$0xff] }
 0x33e   :  { %vm8605_vm3 = vmpackc.low %vm2756_vm2, %vm2755_vm1  ;;  %9036 = vset.pattern.permute.xlu1 %v15296_v48  ;;  %8458 = vmatmul.mubr.msk.bf16.gmra.mrb[188].mxu0 %vm8457_vm14, %v15268_v0  ;;  %vm763_vm5 = vcmp.eq.s32.totalorder %v15393_v54, %v10839_v60  ;;  %v9407_v58 = vld [vmem:[%s14948_s0 + $0x100] sm:$0xff]  ;;  %vm765_vm1 = vcmp.eq.s32.totalorder %v15394_v29, %v10839_v60  ;;  %vm3800_vm2 = vcmp.eq.s32.totalorder %v3348_v55, %v10839_v60  ;;  %v12247_v54 = vld [vmem:[%s14948_s0 + $0x1c8] sm:$0xff] }
 0x33f   :  { %2361 = vperm.xlu1 %9036, %v9405_v33   ;;  %8460 = vmatprep.mubr.msk.bf16.mxu0 %vm8459_vm0, %v15268_v0  ;;  %vm8461_vm10 = vmpackc.low %vm764_vm4, %vm763_vm5  ;;  %vm766_vm0 = vcmp.eq.s32.totalorder %v10611_v21, %v10839_v60 }
 0x340   :  { %8606 = vmatmul.mubr.msk.bf16.gmra.mrb[16].mxu1 %vm8605_vm3, %v15268_v0  ;;  %2430 = vperm.xlu0 %9062, %v9406_v26   ;;  %vm1807_vm3 = vcmp.eq.s32.totalorder %v11535_v22, %v10839_v60  ;;  %vm8465_vm4 = vmpackc.low %vm766_vm0, %vm765_vm1  ;;  %v2311_v22 = vpop.permute.xlu0 %2310 }
 0x341   :  { %v3342_v31 = vpop.permute.xlu1 %3341  ;;  %v12212_v9 = vpop.f32.mrb[84].mxu0 }
 0x342   :  { %vm3798_vm6 = vcmp.eq.s32.totalorder %v3342_v31, %v10839_v60  ;;  %v4807_v33 = vpop.f32.mrb[85].mxu0 }
 0x343   :  { %vm8607_vm9 = vmpackc.low %vm3798_vm6, %vm3797_vm15  ;;  %9037 = vset.pattern.permute.xlu1 %v15285_v20  ;;  %v12224_v30 = vpop.f32.mrb[86].mxu0  ;;  %vm1808_vm15 = vcmp.eq.s32.totalorder %v11537_v23, %v10839_v60  ;;  %v9409_v23 = vld [vmem:[%s14948_s0 + $0x1d0] sm:$0xff] }
 0x344   :  { %3404 = vperm.xlu1 %9037, %v9407_v58   ;;  %v4810_v49 = vpop.f32.mrb[87].mxu0  ;;  %8608 = vmatprep.mubr.msk.bf16.mxu1 %vm8607_vm9, %v15268_v0  ;;  %vm8467_vm7 = vmpackc.low %vm1808_vm15, %vm1807_vm3 }
 0x345   :  { %9065 = vset.pattern.permute.xlu0 %v15285_v20  ;;  %v15396_v49 = vld [vmem:[#allocation126_spill] sm:$0xff] }
 0x346   :  { %v2302_v8 = vpop.permute.xlu1 %2301  ;;  %8462 = vmatmul.mubr.msk.bf16.gmra.mrb[192].mxu0 %vm8461_vm10, %v15268_v0  ;;  %3470 = vperm.xlu0 %9065, %v9406_v26   ;;  %vm767_vm9 = vcmp.eq.s32.totalorder %v15396_v49, %v10839_v60  ;;  %vm1809_vm10 = vcmp.eq.s32.totalorder %v11553_v50, %v10839_v60  ;;  %v3351_v50 = vpop.permute.xlu0 %3350 }
 0x347   :  { %vm2758_vm13 = vcmp.eq.s32.totalorder %v2302_v8, %v10839_v60  ;;  %8464 = vmatprep.mubr.msk.bf16.mxu0 %vm8463_vm12, %v15268_v0  ;;  %v9410_v8 = vld [vmem:[%s14948_s0 + $0x118] sm:$0xff] }
 0x348   :  { %vm8609_vm14 = vmpackc.low %vm2758_vm13, %vm2757_vm11  ;;  %9038 = vset.pattern.permute.xlu1 %v15296_v48  ;;  %vm1810_vm11 = vcmp.eq.s32.totalorder %v11556_v47, %v10839_v60 }
 0x349   :  { %2364 = vperm.xlu1 %9038, %v9407_v58   ;;  %v12240_v31 = vpop.f32.mrb[88].mxu0  ;;  %8610 = vmatmul.mubr.msk.bf16.gmra.mrb[20].mxu1 %vm8609_vm14, %v15268_v0  ;;  %v15395_v58 = vld [vmem:[#allocation125_spill] sm:$0xff]  ;;  %vm8471_vm13 = vmpackc.low %vm1810_vm11, %vm1809_vm10 }
 0x34a   :  { %v4815_v26 = vpop.f32.mrb[89].mxu0  ;;  %3479 = vperm.xlu0 %9065, %v12247_v54   ;;  %vm768_vm8 = vcmp.eq.s32.totalorder %v15395_v58, %v10839_v60 }
 0x34b   :  { %v3345_v21 = vpop.permute.xlu1 %3344  ;;  %v12254_v33 = vpop.f32.mrb[90].mxu0  ;;  %vm8469_vm12 = vmpackc.low %vm768_vm8, %vm767_vm9  ;;  %vm2761_vm9 = vcmp.eq.s32.totalorder %v2311_v22, %v10839_v60  ;;  %v15400_v22 = vld [vmem:[#allocation130_spill] sm:$0xff] }
 0x34c   :  { %vm3799_vm5 = vcmp.eq.s32.totalorder %v3345_v21, %v10839_v60  ;;  %v4818_v55 = vpop.f32.mrb[91].mxu0  ;;  %v9411_v21 = vld [vmem:[%s14948_s0 + $0x1e8] sm:$0xff] }
 0x34d   :  { %vm8611_vm6 = vmpackc.low %vm3800_vm2, %vm3799_vm5  ;;  %2367 = vperm.xlu1 %9038, %v11943_v18   ;;  %vm3801_vm2 = vcmp.eq.s32.totalorder %v3351_v50, %v10839_v60  ;;  %vm1811_vm5 = vcmp.eq.s32.totalorder %v11565_v63, %v10839_v60  ;;  %v9413_v63 = vld [vmem:[%s14948_s0 + $0x1f0] sm:$0xff] }
 0x34e   :  { %8466 = vmatmul.mubr.msk.bf16.gmra.mrb[196].mxu0 %vm8465_vm4, %v15268_v0  ;;  %8612 = vmatprep.mubr.msk.bf16.mxu1 %vm8611_vm6, %v15268_v0  ;;  %vm1812_vm6 = vcmp.eq.s32.totalorder %v11570_v2, %v10839_v60  ;;  %v15399_v50 = vld [vmem:[#allocation129_spill] sm:$0xff] }
 0x34f   :  { %8468 = vmatprep.mubr.msk.bf16.mxu0 %vm8467_vm7, %v15268_v0  ;;  %3482 = vperm.xlu0 %9065, %v9409_v23   ;;  %vm8475_vm10 = vmpackc.low %vm1812_vm6, %vm1811_vm5 }
 0x350   :  { %v2305_v11 = vpop.permute.xlu1 %2304 }
 0x351   :  { %9039 = vset.pattern.permute.xlu1 %v15285_v20  ;;  %v12269_v18 = vpop.f32.mrb[92].mxu0  ;;  %vm2759_vm14 = vcmp.eq.s32.totalorder %v2305_v11, %v10839_v60  ;;  %v15397_v11 = vld [vmem:[#allocation127_spill] sm:$0xff] }
 0x352   :  { %3413 = vperm.xlu1 %9039, %v9410_v8   ;;  %v4823_v29 = vpop.f32.mrb[93].mxu0  ;;  %vm770_vm3 = vcmp.eq.s32.totalorder %v15397_v11, %v10839_v60 }
 0x353   :  { %v12278_v26 = vpop.f32.mrb[94].mxu0  ;;  %3491 = vperm.xlu0 %9065, %v9411_v21   ;;  %v15398_v29 = vld [vmem:[#allocation128_spill] sm:$0xff] }
 0x354   :  { %v2308_v55 = vpop.permute.xlu1 %2307  ;;  %v4826_v58 = vpop.f32.mrb[95].mxu0  ;;  %vm769_vm15 = vcmp.eq.s32.totalorder %v15398_v29, %v10839_v60 }
 0x355   :  { %vm2760_vm0 = vcmp.eq.s32.totalorder %v2308_v55, %v10839_v60  ;;  %vm8473_vm8 = vmpackc.low %vm770_vm3, %vm769_vm15  ;;  %v3360_v58 = vpop.permute.xlu0 %3359 }
 0x356   :  { %vm8613_vm1 = vmpackc.low %vm2760_vm0, %vm2759_vm14  ;;  %9040 = vset.pattern.permute.xlu1 %v15296_v48  ;;  %8470 = vmatmul.mubr.msk.bf16.gmra.mrb[200].mxu0 %vm8469_vm12, %v15268_v0  ;;  %vm771_vm14 = vcmp.eq.s32.totalorder %v15400_v22, %v10839_v60  ;;  %vm3804_vm0 = vcmp.eq.s32.totalorder %v3360_v58, %v10839_v60  ;;  %v15405_v58 = vld [vmem:[#allocation7_spill] sm:$0xff]  ;;  %v9415_v22 = vld [vmem:[%s14948_s0 + $0x138] sm:$0xff] }
 0x357   :  { %2373 = vperm.xlu1 %9040, %v9410_v8   ;;  %8472 = vmatprep.mubr.msk.bf16.mxu0 %vm8471_vm13, %v15268_v0  ;;  %vm772_vm13 = vcmp.eq.s32.totalorder %v15399_v50, %v10839_v60  ;;  %v15406_v50 = vld [vmem:[#allocation12_spill] sm:$0xff] }
 0x358   :  { %8614 = vmatmul.mubr.msk.bf16.gmra.mrb[24].mxu1 %vm8613_vm1, %v15268_v0  ;;  %9072 = vset.pattern.permute.xlu0 %v15296_v48  ;;  %vm1813_vm1 = vcmp.eq.s32.totalorder %v11576_v27, %v10839_v60  ;;  %vm8477_vm3 = vmpackc.low %vm772_vm13, %vm771_vm14  ;;  %v9414_v27 = vld [vmem:[%s14948_s0 + $0x208] sm:$0xff] }
 0x359   :  { %v3354_v47 = vpop.permute.xlu1 %3353  ;;  %v12291_v49 = vpop.f32.mrb[96].mxu0  ;;  %2442 = vperm.xlu0 %9072, %v9409_v23   ;;  %v9412_v23 = vld [vmem:[%s14948_s0 + $0x120] sm:$0xff] }
 0x35a   :  { %vm3802_vm4 = vcmp.eq.s32.totalorder %v3354_v47, %v10839_v60  ;;  %v4831_v8 = vpop.f32.mrb[97].mxu0 }
 0x35b   :  { %vm8615_vm7 = vmpackc.low %vm3802_vm4, %vm3801_vm2  ;;  %9041 = vset.pattern.permute.xlu1 %v15285_v20  ;;  %v12303_v21 = vpop.f32.mrb[98].mxu0  ;;  %vm1814_vm2 = vcmp.eq.s32.totalorder %v11580_v25, %v10839_v60 }
 0x35c   :  { %3416 = vperm.xlu1 %9041, %v9412_v23   ;;  %v4834_v55 = vpop.f32.mrb[99].mxu0  ;;  %8616 = vmatprep.mubr.msk.bf16.mxu1 %vm8615_vm7, %v15268_v0  ;;  %vm8479_vm5 = vmpackc.low %vm1814_vm2, %vm1813_vm1 }
 0x35d   :  { %2454 = vperm.xlu0 %9072, %v9413_v63   ;;  %v3363_v55 = vpop.permute.xlu0 %3362 }
 0x35e   :  { %v2314_v2 = vpop.permute.xlu1 %2313  ;;  %8474 = vmatmul.mubr.msk.bf16.gmra.mrb[204].mxu0 %vm8473_vm8, %v15268_v0  ;;  %vm1815_vm8 = vcmp.eq.s32.totalorder %v15405_v58, %v10839_v60  ;;  %v9417_v58 = vld [vmem:[%s14948_s0 + $0x228] sm:$0xff] }
 0x35f   :  { %vm2762_vm11 = vcmp.eq.s32.totalorder %v2314_v2, %v10839_v60  ;;  %8476 = vmatprep.mubr.msk.bf16.mxu0 %vm8475_vm10, %v15268_v0  ;;  %v15403_v2 = vld [vmem:[#allocation132_spill] sm:$0xff] }
 0x360   :  { %vm8617_vm12 = vmpackc.low %vm2762_vm11, %vm2761_vm9  ;;  %9043 = vset.pattern.permute.xlu1 %v15296_v48  ;;  %vm773_vm7 = vcmp.eq.s32.totalorder %v15403_v2, %v10839_v60  ;;  %vm1816_vm9 = vcmp.eq.s32.totalorder %v15406_v50, %v10839_v60 }
 0x361   :  { %2376 = vperm.xlu1 %9043, %v9412_v23   ;;  %v12321_v47 = vpop.f32.mrb[100].mxu0  ;;  %8618 = vmatmul.mubr.msk.bf16.gmra.mrb[28].mxu1 %vm8617_vm12, %v15268_v0  ;;  %vm8483_vm11 = vmpackc.low %vm1816_vm9, %vm1815_vm8 }
 0x362   :  { %v4839_v11 = vpop.f32.mrb[101].mxu0  ;;  %9075 = vset.pattern.permute.xlu0 %v15285_v20 }
 0x363   :  { %v3357_v29 = vpop.permute.xlu1 %3356  ;;  %v12330_v8 = vpop.f32.mrb[102].mxu0  ;;  %3494 = vperm.xlu0 %9075, %v9413_v63   ;;  %v15402_v63 = vld [vmem:[#allocation131_spill] sm:$0xff] }
 0x364   :  { %15401 = vst [vmem:[#allocation66_spill] sm:$0xff] %v12330_v8  ;;  %vm3803_vm15 = vcmp.eq.s32.totalorder %v3357_v29, %v10839_v60  ;;  %v4842_v23 = vpop.f32.mrb[103].mxu0  ;;  %vm774_vm6 = vcmp.eq.s32.totalorder %v15402_v63, %v10839_v60 }
 0x365   :  { %vm8619_vm4 = vmpackc.low %vm3804_vm0, %vm3803_vm15  ;;  %2379 = vperm.xlu1 %9043, %v11987_v40   ;;  %v3372_v23 = vpop.permute.xlu0 %3371  ;;  %vm3805_vm0 = vcmp.eq.s32.totalorder %v3363_v55, %v10839_v60 }
 0x366   :  { %8478 = vmatmul.mubr.msk.bf16.gmra.mrb[208].mxu0 %vm8477_vm3, %v15268_v0  ;;  %8620 = vmatprep.mubr.msk.bf16.mxu1 %vm8619_vm4, %v15268_v0  ;;  %vm8481_vm10 = vmpackc.low %vm774_vm6, %vm773_vm7 }
 0x367   :  { %8480 = vmatprep.mubr.msk.bf16.mxu0 %vm8479_vm5, %v15268_v0  ;;  %3503 = vperm.xlu0 %9075, %v9414_v27   ;;  %v9416_v27 = vld [vmem:[%s14948_s0 + $0x210] sm:$0xff] }
 0x368   :  { %v2317_v25 = vpop.permute.xlu1 %2316 }
 0x369   :  { %9044 = vset.pattern.permute.xlu1 %v15285_v20  ;;  %v12345_v40 = vpop.f32.mrb[104].mxu0  ;;  %vm2763_vm12 = vcmp.eq.s32.totalorder %v2317_v25, %v10839_v60  ;;  %v2323_v55 = vpop.permute.xlu0 %2322 }
 0x36a   :  { %15404 = vst [vmem:[#allocation67_spill] sm:$0xff] %v12345_v40  ;;  %3425 = vperm.xlu1 %9044, %v9415_v22   ;;  %v4847_v11 = vpop.f32.mrb[105].mxu0  ;;  %vm2765_vm7 = vcmp.eq.s32.totalorder %v2323_v55, %v10839_v60 }
 0x36b   :  { %v12354_v29 = vpop.f32.mrb[106].mxu0  ;;  %3506 = vperm.xlu0 %9075, %v9416_v27   ;;  %v15409_v11 = vld [vmem:[#allocation133_spill] sm:$0xff] }
 0x36c   :  { %15407 = vst [vmem:[#allocation68_spill] sm:$0xff] %v12354_v29  ;;  %v2320_v63 = vpop.permute.xlu1 %2319  ;;  %v4850_v2 = vpop.f32.mrb[107].mxu0  ;;  %vm776_vm1 = vcmp.eq.s32.totalorder %v15409_v11, %v10839_v60  ;;  %v15412_v29 = vld [vmem:[#allocation6_spill] sm:$0xff]  ;;  %v9418_v11 = vld [vmem:[%s14948_s0 + $0x140] sm:$0xff] }
 0x36d   :  { %vm2764_vm13 = vcmp.eq.s32.totalorder %v2320_v63, %v10839_v60  ;;  %v15410_v63 = vld [vmem:[#allocation134_spill] sm:$0xff]  ;;  %v15411_v2 = vld [vmem:[#allocation5_spill] sm:$0xff]  ;;  %vm1818_vm4 = vcmp.eq.s32.totalorder %v15412_v29, %v10839_v60 }
 0x36e   :  { %vm8621_vm14 = vmpackc.low %vm2764_vm13, %vm2763_vm12  ;;  %9046 = vset.pattern.permute.xlu1 %v15296_v48  ;;  %8482 = vmatmul.mubr.msk.bf16.gmra.mrb[212].mxu0 %vm8481_vm10, %v15268_v0  ;;  %vm775_vm2 = vcmp.eq.s32.totalorder %v15410_v63, %v10839_v60  ;;  %vm1817_vm15 = vcmp.eq.s32.totalorder %v15411_v2, %v10839_v60  ;;  %vm3808_vm13 = vcmp.eq.s32.totalorder %v3372_v23, %v10839_v60  ;;  %v9419_v2 = vld [vmem:[%s14948_s0 + $0x230] sm:$0xff] }
 0x36f   :  { %2385 = vperm.xlu1 %9046, %v9415_v22   ;;  %8484 = vmatprep.mubr.msk.bf16.mxu0 %vm8483_vm11, %v15268_v0  ;;  %vm8485_vm6 = vmpackc.low %vm776_vm1, %vm775_vm2 }
 0x370   :  { %8622 = vmatmul.mubr.msk.bf16.gmra.mrb[32].mxu1 %vm8621_vm14, %v15268_v0  ;;  %3515 = vperm.xlu0 %9075, %v9417_v58   ;;  %vm8487_vm8 = vmpackc.low %vm1818_vm4, %vm1817_vm15  ;;  %vm1819_vm14 = vcmp.eq.s32.totalorder %v11626_v45, %v10839_v60  ;;  %v2335_v45 = vpop.permute.xlu0 %2334 }
 0x371   :  { %v3366_v25 = vpop.permute.xlu1 %3365  ;;  %v12369_v50 = vpop.f32.mrb[108].mxu0 }
 0x372   :  { %15408 = vst [vmem:[#allocation69_spill] sm:$0xff] %v12369_v50  ;;  %vm3806_vm3 = vcmp.eq.s32.totalorder %v3366_v25, %v10839_v60  ;;  %v4855_v22 = vpop.f32.mrb[109].mxu0  ;;  %v15414_v25 = vld [vmem:[#allocation135_spill] sm:$0xff] }
 0x373   :  { %vm8623_vm5 = vmpackc.low %vm3806_vm3, %vm3805_vm0  ;;  %9047 = vset.pattern.permute.xlu1 %v15285_v20  ;;  %v12381_v58 = vpop.f32.mrb[110].mxu0  ;;  %vm778_vm11 = vcmp.eq.s32.totalorder %v15414_v25, %v10839_v60  ;;  %v15415_v22 = vld [vmem:[#allocation136_spill] sm:$0xff] }
 0x374   :  { %15413 = vst [vmem:[#allocation70_spill] sm:$0xff] %v12381_v58  ;;  %3428 = vperm.xlu1 %9047, %v9418_v11   ;;  %v4858_v63 = vpop.f32.mrb[111].mxu0  ;;  %8624 = vmatprep.mubr.msk.bf16.mxu1 %vm8623_vm5, %v15268_v0  ;;  %vm777_vm12 = vcmp.eq.s32.totalorder %v15415_v22, %v10839_v60  ;;  %v15419_v22 = vld [vmem:[#allocation137_spill] sm:$0xff] }
 0x375   :  { %9082 = vset.pattern.permute.xlu0 %v15296_v48  ;;  %v15417_v63 = vld [vmem:[#allocation15_spill] sm:$0xff]  ;;  %vm8489_vm1 = vmpackc.low %vm778_vm11, %vm777_vm12  ;;  %vm780_vm4 = vcmp.eq.s32.totalorder %v15419_v22, %v10839_v60 }
 0x376   :  { %v2326_v29 = vpop.permute.xlu1 %2325  ;;  %8486 = vmatmul.mubr.msk.bf16.gmra.mrb[216].mxu0 %vm8485_vm6, %v15268_v0  ;;  %2466 = vperm.xlu0 %9082, %v9416_v27   ;;  %vm1820_vm0 = vcmp.eq.s32.totalorder %v15417_v63, %v10839_v60  ;;  %v15422_v63 = vld [vmem:[#allocation19_spill] sm:$0xff] }
 0x377   :  { %vm2766_vm9 = vcmp.eq.s32.totalorder %v2326_v29, %v10839_v60  ;;  %8488 = vmatprep.mubr.msk.bf16.mxu0 %vm8487_vm8, %v15268_v0  ;;  %vm8491_vm15 = vmpackc.low %vm1820_vm0, %vm1819_vm14  ;;  %vm1821_vm6 = vcmp.eq.s32.totalorder %v15422_v63, %v10839_v60  ;;  %v3375_v63 = vpop.permute.xlu0 %3374 }
 0x378   :  { %vm8625_vm10 = vmpackc.low %vm2766_vm9, %vm2765_vm7  ;;  %9048 = vset.pattern.permute.xlu1 %v15296_v48 }
 0x379   :  { %2388 = vperm.xlu1 %9048, %v9418_v11   ;;  %v12397_v55 = vpop.f32.mrb[112].mxu0  ;;  %8626 = vmatmul.mubr.msk.bf16.gmra.mrb[36].mxu1 %vm8625_vm10, %v15268_v0 }
 0x37a   :  { %15416 = vst [vmem:[#allocation71_spill] sm:$0xff] %v12397_v55  ;;  %v4863_v27 = vpop.f32.mrb[113].mxu0  ;;  %2478 = vperm.xlu0 %9082, %v9419_v2  }
 0x37b   :  { %v3369_v29 = vpop.permute.xlu1 %3368  ;;  %v12408_v11 = vpop.f32.mrb[114].mxu0  ;;  %v15420_v27 = vld [vmem:[#allocation138_spill] sm:$0xff] }
 0x37c   :  { %15418 = vst [vmem:[#allocation72_spill] sm:$0xff] %v12408_v11  ;;  %vm3807_vm2 = vcmp.eq.s32.totalorder %v3369_v29, %v10839_v60  ;;  %v4866_v25 = vpop.f32.mrb[115].mxu0  ;;  %vm779_vm5 = vcmp.eq.s32.totalorder %v15420_v27, %v10839_v60  ;;  %v15423_v29 = vld [vmem:[#allocation9_spill] sm:$0xff] }
 0x37d   :  { %vm8627_vm3 = vmpackc.low %vm3808_vm13, %vm3807_vm2  ;;  %2391 = vperm.xlu1 %9048, %v12046_v38   ;;  %vm1822_vm7 = vcmp.eq.s32.totalorder %v15423_v29, %v10839_v60  ;;  %vm3809_vm13 = vcmp.eq.s32.totalorder %v3375_v63, %v10839_v60  ;;  %v15426_v29 = vld [vmem:[#allocation139_spill] sm:$0xff]  ;;  %vm1823_vm2 = vcmp.eq.s32.totalorder %v11659_v4, %v10839_v60  ;;  %v9424_v4 = vld [vmem:[%s14948_s0 + $0x268] sm:$0xff] }
 0x37e   :  { %8490 = vmatmul.mubr.msk.bf16.gmra.mrb[220].mxu0 %vm8489_vm1, %v15268_v0  ;;  %8628 = vmatprep.mubr.msk.bf16.mxu1 %vm8627_vm3, %v15268_v0  ;;  %vm8493_vm8 = vmpackc.low %vm780_vm4, %vm779_vm5  ;;  %vm782_vm14 = vcmp.eq.s32.totalorder %v15426_v29, %v10839_v60  ;;  %vm1824_vm3 = vcmp.eq.s32.totalorder %v11668_v19, %v10839_v60  ;;  %v9423_v63 = vld [vmem:[%s14948_s0 + $0x160] sm:$0xff]  ;;  %vm2769_vm5 = vcmp.eq.s32.totalorder %v2335_v45, %v10839_v60  ;;  %v15430_v45 = vld [vmem:[#allocation142_spill] sm:$0xff] }
 0x37f   :  { %8492 = vmatprep.mubr.msk.bf16.mxu0 %vm8491_vm15, %v15268_v0  ;;  %9085 = vset.pattern.permute.xlu0 %v15285_v20  ;;  %vm8495_vm9 = vmpackc.low %vm1822_vm7, %vm1821_vm6 }
 0x380   :  { %v2329_v23 = vpop.permute.xlu1 %2328  ;;  %3518 = vperm.xlu0 %9085, %v9419_v2   ;;  %v9420_v2 = vld [vmem:[%s14948_s0 + $0x158] sm:$0xff]  ;;  %vm8499_vm6 = vmpackc.low %vm1824_vm3, %vm1823_vm2 }
 0x381   :  { %9049 = vset.pattern.permute.xlu1 %v15285_v20  ;;  %v12421_v38 = vpop.f32.mrb[116].mxu0  ;;  %vm2767_vm10 = vcmp.eq.s32.totalorder %v2329_v23, %v10839_v60 }
 0x382   :  { %15421 = vst [vmem:[#allocation73_spill] sm:$0xff] %v12421_v38  ;;  %3437 = vperm.xlu1 %9049, %v9420_v2   ;;  %v4871_v25 = vpop.f32.mrb[117].mxu0  ;;  %v9421_v38 = vld [vmem:[%s14948_s0 + $0x248] sm:$0xff] }
 0x383   :  { %v12430_v22 = vpop.f32.mrb[118].mxu0  ;;  %v15427_v25 = vld [vmem:[#allocation140_spill] sm:$0xff] }
 0x384   :  { %15424 = vst [vmem:[#allocation74_spill] sm:$0xff] %v12430_v22  ;;  %v2332_v27 = vpop.permute.xlu1 %2331  ;;  %v4874_v11 = vpop.f32.mrb[119].mxu0  ;;  %3527 = vperm.xlu0 %9085, %v9421_v38   ;;  %vm781_vm0 = vcmp.eq.s32.totalorder %v15427_v25, %v10839_v60  ;;  %v15429_v25 = vld [vmem:[#allocation141_spill] sm:$0xff] }
 0x385   :  { %vm2768_vm11 = vcmp.eq.s32.totalorder %v2332_v27, %v10839_v60  ;;  %v9422_v11 = vld [vmem:[%s14948_s0 + $0x250] sm:$0xff]  ;;  %vm8497_vm4 = vmpackc.low %vm782_vm14, %vm781_vm0 }
 0x386   :  { %vm8629_vm12 = vmpackc.low %vm2768_vm11, %vm2767_vm10  ;;  %9050 = vset.pattern.permute.xlu1 %v15296_v48  ;;  %8494 = vmatmul.mubr.msk.bf16.gmra.mrb[224].mxu0 %vm8493_vm8, %v15268_v0  ;;  %vm783_vm10 = vcmp.eq.s32.totalorder %v15430_v45, %v10839_v60  ;;  %v15434_v45 = vld [vmem:[#allocation143_spill] sm:$0xff] }
 0x387   :  { %2397 = vperm.xlu1 %9050, %v9420_v2   ;;  %8496 = vmatprep.mubr.msk.bf16.mxu0 %vm8495_vm9, %v15268_v0  ;;  %vm784_vm9 = vcmp.eq.s32.totalorder %v15429_v25, %v10839_v60  ;;  %vm786_vm3 = vcmp.eq.s32.totalorder %v15434_v45, %v10839_v60 }
 0x388   :  { %8630 = vmatmul.mubr.msk.bf16.gmra.mrb[40].mxu1 %vm8629_vm12, %v15268_v0  ;;  %3530 = vperm.xlu0 %9085, %v9422_v11   ;;  %vm8501_vm14 = vmpackc.low %vm784_vm9, %vm783_vm10 }
 0x389   :  { %v3378_v23 = vpop.permute.xlu1 %3377  ;;  %v12445_v38 = vpop.f32.mrb[120].mxu0 }
 0x38a   :  { %15425 = vst [vmem:[#allocation75_spill] sm:$0xff] %v12445_v38  ;;  %vm3810_vm1 = vcmp.eq.s32.totalorder %v3378_v23, %v10839_v60  ;;  %v4879_v2 = vpop.f32.mrb[121].mxu0  ;;  %v3384_v23 = vpop.permute.xlu0 %3383 }
 0x38b   :  { %vm8631_vm15 = vmpackc.low %vm3810_vm1, %vm3809_vm13  ;;  %9051 = vset.pattern.permute.xlu1 %v15285_v20  ;;  %v12457_v27 = vpop.f32.mrb[122].mxu0  ;;  %vm3812_vm11 = vcmp.eq.s32.totalorder %v3384_v23, %v10839_v60  ;;  %vm1826_vm13 = vcmp.eq.s32.totalorder %v11677_v16, %v10839_v60  ;;  %v9425_v16 = vld [vmem:[%s14948_s0 + $0x270] sm:$0xff] }
 0x38c   :  { %15428 = vst [vmem:[#allocation76_spill] sm:$0xff] %v12457_v27  ;;  %3440 = vperm.xlu1 %9051, %v9423_v63   ;;  %v4882_v29 = vpop.f32.mrb[123].mxu0  ;;  %8632 = vmatprep.mubr.msk.bf16.mxu1 %vm8631_vm15, %v15268_v0 }
 0x38d   :  { %3539 = vperm.xlu0 %9085, %v9424_v4   ;;  %v15432_v4 = vld [vmem:[#allocation23_spill] sm:$0xff] }
 0x38e   :  { %v2338_v19 = vpop.permute.xlu1 %2337  ;;  %8498 = vmatmul.mubr.msk.bf16.gmra.mrb[228].mxu0 %vm8497_vm4, %v15268_v0  ;;  %vm1825_vm12 = vcmp.eq.s32.totalorder %v15432_v4, %v10839_v60  ;;  %v3387_v23 = vpop.permute.xlu0 %3386  ;;  %vm1827_vm4 = vcmp.eq.s32.totalorder %v11686_v24, %v10839_v60  ;;  %v15437_v4 = vld [vmem:[#allocation27_spill] sm:$0xff]  ;;  %v9427_v24 = vld [vmem:[%s14948_s0 + $0x288] sm:$0xff] }
 0x38f   :  { %vm2770_vm7 = vcmp.eq.s32.totalorder %v2338_v19, %v10839_v60  ;;  %8500 = vmatprep.mubr.msk.bf16.mxu0 %vm8499_vm6, %v15268_v0  ;;  %vm8503_vm2 = vmpackc.low %vm1826_vm13, %vm1825_vm12 }
 0x390   :  { %vm8633_vm8 = vmpackc.low %vm2770_vm7, %vm2769_vm5  ;;  %9053 = vset.pattern.permute.xlu1 %v15296_v48  ;;  %vm1828_vm5 = vcmp.eq.s32.totalorder %v15437_v4, %v10839_v60  ;;  %v15441_v4 = vld [vmem:[#allocation146_spill] sm:$0xff] }
 0x391   :  { %2400 = vperm.xlu1 %9053, %v9423_v63   ;;  %v12475_v2 = vpop.f32.mrb[124].mxu0  ;;  %8634 = vmatmul.mubr.msk.bf16.gmra.mrb[44].mxu1 %vm8633_vm8, %v15268_v0  ;;  %vm8507_vm7 = vmpackc.low %vm1828_vm5, %vm1827_vm4  ;;  %vm787_vm13 = vcmp.eq.s32.totalorder %v15441_v4, %v10839_v60 }
 0x392   :  { %15431 = vst [vmem:[#allocation77_spill] sm:$0xff] %v12475_v2  ;;  %v4887_v29 = vpop.f32.mrb[125].mxu0  ;;  %9092 = vset.pattern.permute.xlu0 %v15296_v48 }
 0x393   :  { %v3381_v19 = vpop.permute.xlu1 %3380  ;;  %v12484_v25 = vpop.f32.mrb[126].mxu0  ;;  %2490 = vperm.xlu0 %9092, %v9422_v11   ;;  %v15435_v29 = vld [vmem:[#allocation144_spill] sm:$0xff] }
 0x394   :  { %15433 = vst [vmem:[#allocation78_spill] sm:$0xff] %v12484_v25  ;;  %vm3811_vm0 = vcmp.eq.s32.totalorder %v3381_v19, %v10839_v60  ;;  %v4890_v63 = vpop.f32.mrb[127].mxu0  ;;  %vm785_vm15 = vcmp.eq.s32.totalorder %v15435_v29, %v10839_v60  ;;  %v9426_v19 = vld [vmem:[%s14948_s0 + $0x178] sm:$0xff]  ;;  %v3396_v25 = vpop.permute.xlu0 %3395 }
 0x395   :  { %vm8635_vm1 = vmpackc.low %vm3812_vm11, %vm3811_vm0  ;;  %2403 = vperm.xlu1 %9053, %v12086_v12   ;;  %vm3813_vm11 = vcmp.eq.s32.totalorder %v3387_v23, %v10839_v60 }
 0x396   :  { %8502 = vmatmul.mubr.msk.bf16.gmra.mrb[232].mxu0 %vm8501_vm14, %v15268_v0  ;;  %8636 = vmatprep.mubr.msk.bf16.mxu1 %vm8635_vm1, %v15268_v0  ;;  %vm8505_vm6 = vmpackc.low %vm786_vm3, %vm785_vm15 }
 0x397   :  { %8504 = vmatprep.mubr.msk.bf16.mxu0 %vm8503_vm2, %v15268_v0  ;;  %2502 = vperm.xlu0 %9092, %v9425_v16  }
 0x398   :  { %v2341_v11 = vpop.permute.xlu1 %2340  ;;  %v2347_v23 = vpop.permute.xlu0 %2346 }
 0x399   :  { %9054 = vset.pattern.permute.xlu1 %v15285_v20  ;;  %v12499_v12 = vpop.f32.mrb[128].mxu0  ;;  %vm2771_vm8 = vcmp.eq.s32.totalorder %v2341_v11, %v10839_v60  ;;  %vm2773_vm15 = vcmp.eq.s32.totalorder %v2347_v23, %v10839_v60  ;;  %v15446_v23 = vld [vmem:[#allocation148_spill] sm:$0xff] }
 0x39a   :  { %15436 = vst [vmem:[#allocation79_spill] sm:$0xff] %v12499_v12  ;;  %3449 = vperm.xlu1 %9054, %v9426_v19   ;;  %v4895_v63 = vpop.f32.mrb[129].mxu0 }
 0x39b   :  { %v12508_v45 = vpop.f32.mrb[130].mxu0  ;;  %9095 = vset.pattern.permute.xlu0 %v15285_v20  ;;  %v15442_v63 = vld [vmem:[#allocation14_spill] sm:$0xff] }
 0x39c   :  { %15438 = vst [vmem:[#allocation80_spill] sm:$0xff] %v12508_v45  ;;  %v2344_v29 = vpop.permute.xlu1 %2343  ;;  %v4898_v12 = vpop.f32.mrb[131].mxu0  ;;  %3542 = vperm.xlu0 %9095, %v9425_v16   ;;  %vm1829_vm0 = vcmp.eq.s32.totalorder %v15442_v63, %v10839_v60  ;;  %v15445_v63 = vld [vmem:[#allocation147_spill] sm:$0xff] }
 0x39d   :  { %vm2772_vm9 = vcmp.eq.s32.totalorder %v2344_v29, %v10839_v60  ;;  %v15440_v12 = vld [vmem:[#allocation145_spill] sm:$0xff]  ;;  %v15443_v29 = vld [vmem:[#allocation32_spill] sm:$0xff] }
 0x39e   :  { %vm8637_vm10 = vmpackc.low %vm2772_vm9, %vm2771_vm8  ;;  %9056 = vset.pattern.permute.xlu1 %v15296_v48  ;;  %8506 = vmatmul.mubr.msk.bf16.gmra.mrb[236].mxu0 %vm8505_vm6, %v15268_v0  ;;  %vm788_vm12 = vcmp.eq.s32.totalorder %v15440_v12, %v10839_v60  ;;  %vm1830_vm1 = vcmp.eq.s32.totalorder %v15443_v29, %v10839_v60  ;;  %v9428_v12 = vld [vmem:[%s14948_s0 + $0x180] sm:$0xff]  ;;  %vm789_vm8 = vcmp.eq.s32.totalorder %v15446_v23, %v10839_v60 }
 0x39f   :  { %2409 = vperm.xlu1 %9056, %v9426_v19   ;;  %8508 = vmatprep.mubr.msk.bf16.mxu0 %vm8507_vm7, %v15268_v0  ;;  %vm8509_vm3 = vmpackc.low %vm788_vm12, %vm787_vm13  ;;  %vm790_vm7 = vcmp.eq.s32.totalorder %v15445_v63, %v10839_v60  ;;  %vm3816_vm9 = vcmp.eq.s32.totalorder %v3396_v25, %v10839_v60  ;;  %v15449_v25 = vld [vmem:[#allocation149_spill] sm:$0xff] }
 0x3a0   :  { %8638 = vmatmul.mubr.msk.bf16.gmra.mrb[48].mxu1 %vm8637_vm10, %v15268_v0  ;;  %3551 = vperm.xlu0 %9095, %v9427_v24   ;;  %vm8511_vm4 = vmpackc.low %vm1830_vm1, %vm1829_vm0  ;;  %vm1831_vm10 = vcmp.eq.s32.totalorder %v11717_v62, %v10839_v60  ;;  %v2359_v62 = vpop.permute.xlu0 %2358  ;;  %vm792_vm1 = vcmp.eq.s32.totalorder %v15449_v25, %v10839_v60 }
 0x3a1   :  { %v3390_v16 = vpop.permute.xlu1 %3389  ;;  %v12521_v11 = vpop.f32.mrb[132].mxu0  ;;  %vm8513_vm12 = vmpackc.low %vm790_vm7, %vm789_vm8 }
 0x3a2   :  { %15439 = vst [vmem:[#allocation81_spill] sm:$0xff] %v12521_v11  ;;  %vm3814_vm14 = vcmp.eq.s32.totalorder %v3390_v16, %v10839_v60  ;;  %v4903_v19 = vpop.f32.mrb[133].mxu0  ;;  %v9429_v16 = vld [vmem:[%s14948_s0 + $0x290] sm:$0xff] }
 0x3a3   :  { %vm8639_vm2 = vmpackc.low %vm3814_vm14, %vm3813_vm11  ;;  %9057 = vset.pattern.permute.xlu1 %v15285_v20  ;;  %v12533_v24 = vpop.f32.mrb[134].mxu0  ;;  %vm1832_vm11 = vcmp.eq.s32.totalorder %v11723_v1, %v10839_v60 }
 0x3a4   :  { %15444 = vst [vmem:[#allocation82_spill] sm:$0xff] %v12533_v24  ;;  %3452 = vperm.xlu1 %9057, %v9428_v12   ;;  %v4906_v4 = vpop.f32.mrb[135].mxu0  ;;  %8640 = vmatprep.mubr.msk.bf16.mxu1 %vm8639_vm2, %v15268_v0  ;;  %vm8515_vm0 = vmpackc.low %vm1832_vm11, %vm1831_vm10 }
 0x3a5   :  { %3554 = vperm.xlu0 %9095, %v9429_v16  }
 0x3a6   :  { %v2350_v19 = vpop.permute.xlu1 %2349  ;;  %8510 = vmatmul.mubr.msk.bf16.gmra.mrb[240].mxu0 %vm8509_vm3, %v15268_v0 }
 0x3a7   :  { %vm2774_vm5 = vcmp.eq.s32.totalorder %v2350_v19, %v10839_v60  ;;  %8512 = vmatprep.mubr.msk.bf16.mxu0 %vm8511_vm4, %v15268_v0  ;;  %v9430_v19 = vld [vmem:[%s14948_s0 + $0x2a8] sm:$0xff] }
 0x3a8   :  { %vm8641_vm6 = vmpackc.low %vm2774_vm5, %vm2773_vm15  ;;  %9058 = vset.pattern.permute.xlu1 %v15296_v48 }
 0x3a9   :  { %2412 = vperm.xlu1 %9058, %v9428_v12   ;;  %v12551_v29 = vpop.f32.mrb[136].mxu0  ;;  %8642 = vmatmul.mubr.msk.bf16.gmra.mrb[52].mxu1 %vm8641_vm6, %v15268_v0 }
 0x3aa   :  { %15447 = vst [vmem:[#allocation83_spill] sm:$0xff] %v12551_v29  ;;  %v4911_v4 = vpop.f32.mrb[137].mxu0  ;;  %3563 = vperm.xlu0 %9095, %v9430_v19   ;;  %v15452_v19 = vld [vmem:[#allocation35_spill] sm:$0xff] }
 0x3ab   :  { %v3393_v63 = vpop.permute.xlu1 %3392  ;;  %v12562_v12 = vpop.f32.mrb[138].mxu0  ;;  %v15450_v4 = vld [vmem:[#allocation150_spill] sm:$0xff]  ;;  %vm1833_vm3 = vcmp.eq.s32.totalorder %v15452_v19, %v10839_v60 }
 0x3ac   :  { %15448 = vst [vmem:[#allocation84_spill] sm:$0xff] %v12562_v12  ;;  %vm3815_vm13 = vcmp.eq.s32.totalorder %v3393_v63, %v10839_v60  ;;  %v4914_v23 = vpop.f32.mrb[139].mxu0  ;;  %vm791_vm2 = vcmp.eq.s32.totalorder %v15450_v4, %v10839_v60  ;;  %v15453_v63 = vld [vmem:[#allocation17_spill] sm:$0xff]  ;;  %v3399_v19 = vpop.permute.xlu0 %3398 }
 0x3ad   :  { %vm8643_vm14 = vmpackc.low %vm3816_vm9, %vm3815_vm13  ;;  %2415 = vperm.xlu1 %9058, %v12150_v28   ;;  %vm1834_vm15 = vcmp.eq.s32.totalorder %v15453_v63, %v10839_v60  ;;  %vm3817_vm9 = vcmp.eq.s32.totalorder %v3399_v19, %v10839_v60  ;;  %vm1835_vm13 = vcmp.eq.s32.totalorder %v11750_v46, %v10839_v60  ;;  %v9434_v46 = vld [vmem:[%s14948_s0 + $0x2c8] sm:$0xff] }
 0x3ae   :  { %8514 = vmatmul.mubr.msk.bf16.gmra.mrb[244].mxu0 %vm8513_vm12, %v15268_v0  ;;  %8644 = vmatprep.mubr.msk.bf16.mxu1 %vm8643_vm14, %v15268_v0  ;;  %vm8517_vm4 = vmpackc.low %vm792_vm1, %vm791_vm2  ;;  %vm2777_vm2 = vcmp.eq.s32.totalorder %v2359_v62, %v10839_v60  ;;  %v15461_v62 = vld [vmem:[#allocation154_spill] sm:$0xff] }
 0x3af   :  { %8516 = vmatprep.mubr.msk.bf16.mxu0 %vm8515_vm0, %v15268_v0  ;;  %9102 = vset.pattern.permute.xlu0 %v15296_v48  ;;  %vm8519_vm5 = vmpackc.low %vm1834_vm15, %vm1833_vm3 }
 0x3b0   :  { %v2353_v1 = vpop.permute.xlu1 %2352  ;;  %2514 = vperm.xlu0 %9102, %v9429_v16   ;;  %v9431_v16 = vld [vmem:[%s14948_s0 + $0x198] sm:$0xff] }
 0x3b1   :  { %9059 = vset.pattern.permute.xlu1 %v15285_v20  ;;  %v12575_v28 = vpop.f32.mrb[140].mxu0  ;;  %vm2775_vm6 = vcmp.eq.s32.totalorder %v2353_v1, %v10839_v60  ;;  %v15456_v1 = vld [vmem:[#allocation151_spill] sm:$0xff] }
 0x3b2   :  { %15451 = vst [vmem:[#allocation85_spill] sm:$0xff] %v12575_v28  ;;  %3461 = vperm.xlu1 %9059, %v9431_v16   ;;  %v4919_v23 = vpop.f32.mrb[141].mxu0  ;;  %v9432_v28 = vld [vmem:[%s14948_s0 + $0x2b0] sm:$0xff]  ;;  %vm794_vm10 = vcmp.eq.s32.totalorder %v15456_v1, %v10839_v60 }
 0x3b3   :  { %v12584_v25 = vpop.f32.mrb[142].mxu0  ;;  %v15457_v23 = vld [vmem:[#allocation152_spill] sm:$0xff] }
 0x3b4   :  { %15454 = vst [vmem:[#allocation86_spill] sm:$0xff] %v12584_v25  ;;  %v2356_v4 = vpop.permute.xlu1 %2355  ;;  %v4922_v12 = vpop.f32.mrb[143].mxu0  ;;  %2526 = vperm.xlu0 %9102, %v9432_v28   ;;  %vm793_vm11 = vcmp.eq.s32.totalorder %v15457_v23, %v10839_v60 }
 0x3b5   :  { %vm2776_vm7 = vcmp.eq.s32.totalorder %v2356_v4, %v10839_v60  ;;  %v15458_v4 = vld [vmem:[#allocation40_spill] sm:$0xff]  ;;  %vm8521_vm1 = vmpackc.low %vm794_vm10, %vm793_vm11  ;;  %v3408_v23 = vpop.permute.xlu0 %3407 }
 0x3b6   :  { %vm8645_vm8 = vmpackc.low %vm2776_vm7, %vm2775_vm6  ;;  %9060 = vset.pattern.permute.xlu1 %v15296_v48  ;;  %8518 = vmatmul.mubr.msk.bf16.gmra.mrb[248].mxu0 %vm8517_vm4, %v15268_v0  ;;  %vm1836_vm14 = vcmp.eq.s32.totalorder %v15458_v4, %v10839_v60  ;;  %vm795_vm6 = vcmp.eq.s32.totalorder %v15461_v62, %v10839_v60  ;;  %vm3820_vm7 = vcmp.eq.s32.totalorder %v3408_v23, %v10839_v60 }
 0x3b7   :  { %2421 = vperm.xlu1 %9060, %v9431_v16   ;;  %8520 = vmatprep.mubr.msk.bf16.mxu0 %vm8519_vm5, %v15268_v0  ;;  %vm8523_vm3 = vmpackc.low %vm1836_vm14, %vm1835_vm13 }
 0x3b8   :  { %8646 = vmatmul.mubr.msk.bf16.gmra.mrb[56].mxu1 %vm8645_vm8, %v15268_v0  ;;  %9105 = vset.pattern.permute.xlu0 %v15285_v20 }
 0x3b9   :  { %v3402_v12 = vpop.permute.xlu1 %3401  ;;  %v12597_v63 = vpop.f32.mrb[144].mxu0  ;;  %3566 = vperm.xlu0 %9105, %v9432_v28   ;;  %v9433_v28 = vld [vmem:[%s14948_s0 + $0x1a0] sm:$0xff] }
 0x3ba   :  { %15455 = vst [vmem:[#allocation87_spill] sm:$0xff] %v12597_v63  ;;  %vm3818_vm12 = vcmp.eq.s32.totalorder %v3402_v12, %v10839_v60  ;;  %v4927_v16 = vpop.f32.mrb[145].mxu0  ;;  %v3411_v23 = vpop.permute.xlu0 %3410  ;;  %v15486_v63 = vld [vmem:[#allocation11_spill] sm:$0xff] }
 0x3bb   :  { %vm8647_vm0 = vmpackc.low %vm3818_vm12, %vm3817_vm9  ;;  %9061 = vset.pattern.permute.xlu1 %v15285_v20  ;;  %v12609_v19 = vpop.f32.mrb[146].mxu0  ;;  %v15460_v16 = vld [vmem:[#allocation153_spill] sm:$0xff]  ;;  %vm1838_vm9 = vcmp.eq.s32.totalorder %v11773_v5, %v10839_v60  ;;  %v9436_v5 = vld [vmem:[%s14948_s0 + $0x2e8] sm:$0xff] }
 0x3bc   :  { %15459 = vst [vmem:[#allocation88_spill] sm:$0xff] %v12609_v19  ;;  %3464 = vperm.xlu1 %9061, %v9433_v28   ;;  %v4930_v1 = vpop.f32.mrb[147].mxu0  ;;  %8648 = vmatprep.mubr.msk.bf16.mxu1 %vm8647_vm0, %v15268_v0  ;;  %vm796_vm5 = vcmp.eq.s32.totalorder %v15460_v16, %v10839_v60 }
 0x3bd   :  { %3575 = vperm.xlu0 %9105, %v9434_v46   ;;  %v9435_v46 = vld [vmem:[%s14948_s0 + $0x2d0] sm:$0xff]  ;;  %vm8525_vm10 = vmpackc.low %vm796_vm5, %vm795_vm6 }
 0x3be   :  { %v2362_v12 = vpop.permute.xlu1 %2361  ;;  %8522 = vmatmul.mubr.msk.bf16.gmra.mrb[252].mxu0 %vm8521_vm1, %v15268_v0  ;;  %vm1839_vm1 = vcmp.eq.s32.totalorder %v11783_v41, %v10839_v60  ;;  %v9438_v41 = vld [vmem:[%s14948_s0 + $0x2f0] sm:$0xff] }
 0x3bf   :  { %vm2778_vm15 = vcmp.eq.s32.totalorder %v2362_v12, %v10839_v60  ;;  %8524 = vmatprep.mubr.msk.bf16.mxu0 %vm8523_vm3, %v15268_v0  ;;  %v15463_v12 = vld [vmem:[#allocation44_spill] sm:$0xff] }
 0x3c0   :  { %vm8649_vm4 = vmpackc.low %vm2778_vm15, %vm2777_vm2  ;;  %9063 = vset.pattern.permute.xlu1 %v15296_v48  ;;  %vm1837_vm8 = vcmp.eq.s32.totalorder %v15463_v12, %v10839_v60  ;;  %v15465_v12 = vld [vmem:[#allocation155_spill] sm:$0xff] }
 0x3c1   :  { %2424 = vperm.xlu1 %9063, %v9433_v28   ;;  %v12627_v4 = vpop.f32.mrb[148].mxu0  ;;  %8650 = vmatmul.mubr.msk.bf16.gmra.mrb[60].mxu1 %vm8649_vm4, %v15268_v0  ;;  %vm8527_vm13 = vmpackc.low %vm1838_vm9, %vm1837_vm8  ;;  %vm798_vm14 = vcmp.eq.s32.totalorder %v15465_v12, %v10839_v60 }
 0x3c2   :  { %15462 = vst [vmem:[#allocation89_spill] sm:$0xff] %v12627_v4  ;;  %v4935_v1 = vpop.f32.mrb[149].mxu0  ;;  %3578 = vperm.xlu0 %9105, %v9435_v46   ;;  %v3420_v4 = vpop.permute.xlu0 %3419 }
 0x3c3   :  { %v3405_v16 = vpop.permute.xlu1 %3404  ;;  %v12638_v28 = vpop.f32.mrb[150].mxu0 }
 0x3c4   :  { %15464 = vst [vmem:[#allocation90_spill] sm:$0xff] %v12638_v28  ;;  %vm3819_vm11 = vcmp.eq.s32.totalorder %v3405_v16, %v10839_v60  ;;  %v4938_v62 = vpop.f32.mrb[151].mxu0  ;;  %v15466_v16 = vld [vmem:[#allocation156_spill] sm:$0xff] }
 0x3c5   :  { %vm8651_vm12 = vmpackc.low %vm3820_vm7, %vm3819_vm11  ;;  %2427 = vperm.xlu1 %9063, %v12182_v52   ;;  %vm797_vm0 = vcmp.eq.s32.totalorder %v15466_v16, %v10839_v60  ;;  %v15468_v62 = vld [vmem:[#allocation21_spill] sm:$0xff]  ;;  %vm3821_vm7 = vcmp.eq.s32.totalorder %v3411_v23, %v10839_v60 }
 0x3c6   :  { %8526 = vmatmul.mubr.msk.bf16.gmra.mrb[0].mxu0 %vm8525_vm10, %v15268_v0  ;;  %8652 = vmatprep.mubr.msk.bf16.mxu1 %vm8651_vm12, %v15268_v0  ;;  %vm1840_vm2 = vcmp.eq.s32.totalorder %v15468_v62, %v10839_v60  ;;  %vm8529_vm3 = vmpackc.low %vm798_vm14, %vm797_vm0  ;;  %v2371_v23 = vpop.permute.xlu0 %2370  ;;  %vm1842_vm12 = vcmp.eq.s32.totalorder %v11803_v42, %v10839_v60 }
 0x3c7   :  { %8528 = vmatprep.mubr.msk.bf16.mxu0 %vm8527_vm13, %v15268_v0  ;;  %3587 = vperm.xlu0 %9105, %v9436_v5   ;;  %v9437_v5 = vld [vmem:[%s14948_s0 + $0x1b8] sm:$0xff]  ;;  %vm8531_vm15 = vmpackc.low %vm1840_vm2, %vm1839_vm1  ;;  %vm2781_vm0 = vcmp.eq.s32.totalorder %v2371_v23, %v10839_v60 }
 0x3c8   :  { %v2365_v1 = vpop.permute.xlu1 %2364 }
 0x3c9   :  { %9064 = vset.pattern.permute.xlu1 %v15285_v20  ;;  %v12653_v52 = vpop.f32.mrb[152].mxu0  ;;  %vm2779_vm4 = vcmp.eq.s32.totalorder %v2365_v1, %v10839_v60  ;;  %v15471_v1 = vld [vmem:[#allocation157_spill] sm:$0xff] }
 0x3ca   :  { %15467 = vst [vmem:[#allocation91_spill] sm:$0xff] %v12653_v52  ;;  %3473 = vperm.xlu1 %9064, %v9437_v5   ;;  %v4943_v28 = vpop.f32.mrb[153].mxu0  ;;  %vm800_vm8 = vcmp.eq.s32.totalorder %v15471_v1, %v10839_v60  ;;  %v9439_v1 = vld [vmem:[%s14948_s0 + $0x1c0] sm:$0xff] }
 0x3cb   :  { %v12662_v12 = vpop.f32.mrb[154].mxu0  ;;  %9112 = vset.pattern.permute.xlu0 %v15296_v48 }
 0x3cc   :  { %15469 = vst [vmem:[#allocation92_spill] sm:$0xff] %v12662_v12  ;;  %v2368_v16 = vpop.permute.xlu1 %2367  ;;  %v4946_v52 = vpop.f32.mrb[155].mxu0  ;;  %2538 = vperm.xlu0 %9112, %v9435_v46  }
 0x3cd   :  { %vm2780_vm5 = vcmp.eq.s32.totalorder %v2368_v16, %v10839_v60  ;;  %v15472_v52 = vld [vmem:[#allocation158_spill] sm:$0xff] }
 0x3ce   :  { %vm8653_vm6 = vmpackc.low %vm2780_vm5, %vm2779_vm4  ;;  %9066 = vset.pattern.permute.xlu1 %v15296_v48  ;;  %8530 = vmatmul.mubr.msk.bf16.gmra.mrb[4].mxu0 %vm8529_vm3, %v15268_v0  ;;  %vm799_vm9 = vcmp.eq.s32.totalorder %v15472_v52, %v10839_v60  ;;  %vm3824_vm5 = vcmp.eq.s32.totalorder %v3420_v4, %v10839_v60  ;;  %v12717_v4 = vpop.permute.xlu0 %2382 }
 0x3cf   :  { %2433 = vperm.xlu1 %9066, %v9437_v5   ;;  %8532 = vmatprep.mubr.msk.bf16.mxu0 %vm8531_vm15, %v15268_v0  ;;  %v15473_v5 = vld [vmem:[#allocation48_spill] sm:$0xff]  ;;  %vm8533_vm14 = vmpackc.low %vm800_vm8, %vm799_vm9 }
 0x3d0   :  { %8654 = vmatmul.mubr.msk.bf16.gmra.mrb[64].mxu1 %vm8653_vm6, %v15268_v0  ;;  %2550 = vperm.xlu0 %9112, %v9438_v41   ;;  %vm1841_vm11 = vcmp.eq.s32.totalorder %v15473_v5, %v10839_v60  ;;  %v9440_v5 = vld [vmem:[%s14948_s0 + $0x308] sm:$0xff]  ;;  %vm1843_vm6 = vcmp.eq.s32.totalorder %v11813_v10, %v10839_v60  ;;  %v9441_v10 = vld [vmem:[%s14948_s0 + $0x310] sm:$0xff] }
 0x3d1   :  { %v3414_v46 = vpop.permute.xlu1 %3413  ;;  %v12675_v28 = vpop.f32.mrb[156].mxu0  ;;  %vm8535_vm1 = vmpackc.low %vm1842_vm12, %vm1841_vm11 }
 0x3d2   :  { %15470 = vst [vmem:[#allocation93_spill] sm:$0xff] %v12675_v28  ;;  %vm3822_vm10 = vcmp.eq.s32.totalorder %v3414_v46, %v10839_v60  ;;  %v4951_v62 = vpop.f32.mrb[157].mxu0  ;;  %v15475_v46 = vld [vmem:[#allocation159_spill] sm:$0xff] }
 0x3d3   :  { %vm8655_vm13 = vmpackc.low %vm3822_vm10, %vm3821_vm7  ;;  %9067 = vset.pattern.permute.xlu1 %v15285_v20  ;;  %v12687_v16 = vpop.f32.mrb[158].mxu0  ;;  %vm802_vm15 = vcmp.eq.s32.totalorder %v15475_v46, %v10839_v60  ;;  %v15476_v62 = vld [vmem:[#allocation160_spill] sm:$0xff]  ;;  %vm1844_vm7 = vcmp.eq.s32.totalorder %v11820_v17, %v10839_v60  ;;  %v15479_v46 = vld [vmem:[#allocation161_spill] sm:$0xff] }
 0x3d4   :  { %15474 = vst [vmem:[#allocation94_spill] sm:$0xff] %v12687_v16  ;;  %3476 = vperm.xlu1 %9067, %v9439_v1   ;;  %v4954_v52 = vpop.f32.mrb[159].mxu0  ;;  %8656 = vmatprep.mubr.msk.bf16.mxu1 %vm8655_vm13, %v15268_v0  ;;  %vm801_vm4 = vcmp.eq.s32.totalorder %v15476_v62, %v10839_v60  ;;  %vm8539_vm11 = vmpackc.low %vm1844_vm7, %vm1843_vm6  ;;  %vm804_vm12 = vcmp.eq.s32.totalorder %v15479_v46, %v10839_v60  ;;  %v15480_v62 = vld [vmem:[#allocation162_spill] sm:$0xff]  ;;  %v9443_v16 = vld [vmem:[%s14948_s0 + $0x328] sm:$0xff] }
 0x3d5   :  { %9115 = vset.pattern.permute.xlu0 %v15285_v20  ;;  %vm8537_vm8 = vmpackc.low %vm802_vm15, %vm801_vm4  ;;  %vm803_vm13 = vcmp.eq.s32.totalorder %v15480_v62, %v10839_v60  ;;  %v12743_v62 = vld [vmem:[%s14950_s2] ss:$0 sm:$0xff] }
 0x3d6   :  { %v2374_v42 = vpop.permute.xlu1 %2373  ;;  %8534 = vmatmul.mubr.msk.bf16.gmra.mrb[8].mxu0 %vm8533_vm14, %v15268_v0  ;;  %3590 = vperm.xlu0 %9115, %v9438_v41  }
 0x3d7   :  { %vm2782_vm2 = vcmp.eq.s32.totalorder %v2374_v42, %v10839_v60  ;;  %8536 = vmatprep.mubr.msk.bf16.mxu0 %vm8535_vm1, %v15268_v0  ;;  %vm8541_vm1 = vmpackc.low %vm804_vm12, %vm803_vm13  ;;  %vm2785_vm13 = vcmp.eq.s32.totalorder %v12717_v4, %v10839_v60 }
 0x3d8   :  { %vm8657_vm3 = vmpackc.low %vm2782_vm2, %vm2781_vm0  ;;  %9068 = vset.pattern.permute.xlu1 %v15296_v48 }
 0x3d9   :  { %2436 = vperm.xlu1 %9068, %v9439_v1   ;;  %v12703_v23 = vpop.f32.mrb[160].mxu0  ;;  %8658 = vmatmul.mubr.msk.bf16.gmra.mrb[68].mxu1 %vm8657_vm3, %v15268_v0 }
 0x3da   :  { %15477 = vst [vmem:[#allocation95_spill] sm:$0xff] %v12703_v23  ;;  %v4959_v41 = vpop.f32.mrb[161].mxu0  ;;  %3599 = vperm.xlu0 %9115, %v9440_v5   ;;  %v15483_v5 = vld [vmem:[#allocation25_spill] sm:$0xff] }
 0x3db   :  { %v3417_v52 = vpop.permute.xlu1 %3416  ;;  %v12714_v1 = vpop.f32.mrb[162].mxu0  ;;  %v15482_v41 = vld [vmem:[#allocation51_spill] sm:$0xff]  ;;  %vm1846_vm0 = vcmp.eq.s32.totalorder %v15483_v5, %v10839_v60  ;;  %v15485_v5 = vld [vmem:[#allocation8_spill] sm:$0xff] }
 0x3dc   :  { %15478 = vst [vmem:[#allocation96_spill] sm:$0xff] %v12714_v1  ;;  %vm3823_vm9 = vcmp.eq.s32.totalorder %v3417_v52, %v10839_v60  ;;  %v4962_v42 = vpop.f32.mrb[163].mxu0  ;;  %vm1845_vm14 = vcmp.eq.s32.totalorder %v15482_v41, %v10839_v60  ;;  %v9442_v52 = vld [vmem:[%s14948_s0 + $0x1d8] sm:$0xff]  ;;  %v3423_v1 = vpop.permute.xlu0 %3422  ;;  %v15489_v41 = vld [vmem:[#allocation164_spill] sm:$0xff] }
 0x3dd   :  { %vm8659_vm10 = vmpackc.low %vm3824_vm5, %vm3823_vm9  ;;  %2439 = vperm.xlu1 %9068, %v12247_v54   ;;  %vm3825_vm5 = vcmp.eq.s32.totalorder %v3423_v1, %v10839_v60  ;;  %vm805_vm7 = vcmp.eq.s32.totalorder %v15489_v41, %v10839_v60  ;;  %v15492_v1 = vld [vmem:[#allocation16_spill] sm:$0xff] }
 0x3de   :  { %8538 = vmatmul.mubr.msk.bf16.gmra.mrb[12].mxu0 %vm8537_vm8, %v15268_v0  ;;  %8660 = vmatprep.mubr.msk.bf16.mxu1 %vm8659_vm10, %v15268_v0  ;;  %vm8543_vm2 = vmpackc.low %vm1846_vm0, %vm1845_vm14  ;;  %vm1848_vm10 = vcmp.eq.s32.totalorder %v11853_v7, %v10839_v60 }
 0x3df   :  { %8540 = vmatprep.mubr.msk.bf16.mxu0 %vm8539_vm11, %v15268_v0  ;;  %3602 = vperm.xlu0 %9115, %v9441_v10  }
 0x3e0   :  { %v2377_v17 = vpop.permute.xlu1 %2376 }
 0x3e1   :  { %9069 = vset.pattern.permute.xlu1 %v15285_v20  ;;  %v12731_v54 = vpop.f32.mrb[164].mxu0  ;;  %vm2783_vm3 = vcmp.eq.s32.totalorder %v2377_v17, %v10839_v60 }
 0x3e2   :  { %15481 = vst [vmem:[#allocation97_spill] sm:$0xff] %v12731_v54  ;;  %3485 = vperm.xlu1 %9069, %v9442_v52   ;;  %v4967_v42 = vpop.f32.mrb[165].mxu0 }
 0x3e3   :  { %v5310_v23 = vpop.f32.mrb[0].mxu1  ;;  %v12745_v54 = vpop.f32.mrb[166].mxu0  ;;  %3611 = vperm.xlu0 %9115, %v9443_v16  }
 0x3e4   :  { %15484 = vst [vmem:[#allocation98_spill] sm:$0xff] %v12745_v54  ;;  %v5311_v42 = vadd.f32 %v5310_v23, %v15485_v5  ;;  %v5312_v28 = vpop.f32.mrb[1].mxu1  ;;  %v2380_v12 = vpop.permute.xlu1 %2379 }
 0x3e5   :  { %vm2784_vm15 = vcmp.eq.s32.totalorder %v2380_v12, %v10839_v60  ;;  %v4970_v54 = vpop.f32.mrb[167].mxu0  ;;  %v5313_v19 = vpop.f32.mrb[2].mxu1 }
 0x3e6   :  { %v5956_v16 = vadd.f32 %v12743_v62, %v5311_v42  ;;  %vm8661_vm4 = vmpackc.low %vm2784_vm15, %vm2783_vm3  ;;  %v5314_v46 = vadd.f32 %v5313_v19, %v15486_v63  ;;  %v5315_v25 = vpop.f32.mrb[3].mxu1  ;;  %9070 = vset.pattern.permute.xlu1 %v15296_v48  ;;  %8542 = vmatmul.mubr.msk.bf16.gmra.mrb[16].mxu0 %vm8541_vm1, %v15268_v0  ;;  %v12763_v28 = vpop.permute.xlu0 %3431  ;;  %v12778_v63 = vld [vmem:[%s14953_s5 + $0x8] sm:$0xff]  ;;  %v15488_v54 = vld [vmem:[#allocation163_spill] sm:$0xff] }
 0x3e7   :  { %2445 = vperm.xlu1 %9070, %v9442_v52   ;;  %8544 = vmatprep.mubr.msk.bf16.mxu0 %vm8543_vm2, %v15268_v0  ;;  %v12773_v25 = vld [vmem:[%s14953_s5] sm:$0xff]  ;;  %vm806_vm6 = vcmp.eq.s32.totalorder %v15488_v54, %v10839_v60  ;;  %vm3828_vm15 = vcmp.eq.s32.totalorder %v12763_v28, %v10839_v60 }
 0x3e8   :  { %v6116_v23 = vmax.f32 %v5956_v16, 0.0  ;;  %v5957_v12 = vadd.f32 %v12743_v62, %v5314_v46  ;;  %8662 = vmatmul.mubr.msk.bf16.gmra.mrb[72].mxu1 %vm8661_vm4, %v15268_v0  ;;  %9122 = vset.pattern.permute.xlu0 %v15296_v48  ;;  %v15490_v16 = vld [vmem:[#allocation56_spill] sm:$0xff]  ;;  %vm8545_vm12 = vmpackc.low %vm806_vm6, %vm805_vm7 }
 0x3e9   :  { %v3426_v19 = vpop.permute.xlu1 %3425  ;;  %v12780_v17 = vpop.f32.mrb[168].mxu0  ;;  %2562 = vperm.xlu0 %9122, %v9441_v10   ;;  %vm1847_vm9 = vcmp.eq.s32.totalorder %v15490_v16, %v10839_v60  ;;  %v15494_v16 = vld [vmem:[#allocation165_spill] sm:$0xff] }
 0x3ea   :  { %15487 = vst [vmem:[#allocation99_spill] sm:$0xff] %v12780_v17  ;;  %v6117_v52 = vmax.f32 %v5957_v12, 0.0  ;;  %vm3826_vm8 = vcmp.eq.s32.totalorder %v3426_v19, %v10839_v60  ;;  %v4975_v5 = vpop.f32.mrb[169].mxu0  ;;  %v12787_v42 = vpop.permute.xlu0 %3434  ;;  %v6278_v46 = vadd.f32 %v12773_v25, %v6116_v23  ;;  %v9444_v19 = vld [vmem:[%s14948_s0 + $0x1e0] sm:$0xff]  ;;  %vm8547_vm14 = vmpackc.low %vm1848_vm10, %vm1847_vm9  ;;  %vm808_vm2 = vcmp.eq.s32.totalorder %v15494_v16, %v10839_v60 }
 0x3eb   :  { %vm8663_vm11 = vmpackc.low %vm3826_vm8, %vm3825_vm5  ;;  %9071 = vset.pattern.permute.xlu1 %v15285_v20  ;;  %v12796_v10 = vpop.f32.mrb[170].mxu0 }
 0x3ec   :  { %15491 = vst [vmem:[#allocation100_spill] sm:$0xff] %v12796_v10  ;;  %v6279_v12 = vadd.f32 %v12778_v63, %v6117_v52  ;;  %3488 = vperm.xlu1 %9071, %v9444_v19   ;;  %v4978_v5 = vpop.f32.mrb[171].mxu0  ;;  %v5318_v17 = vpop.f32.mrb[4].mxu1  ;;  %8664 = vmatprep.mubr.msk.bf16.mxu1 %vm8663_vm11, %v15268_v0 }
 0x3ed   :  { %v5319_v23 = vadd.f32 %v5318_v17, %v15492_v1  ;;  %v5320_v52 = vpop.f32.mrb[5].mxu1  ;;  %v9445_v5 = vld [vmem:[%s14948_s0 + $0x330] sm:$0xff]  ;;  %v15493_v1 = vld [vmem:[#allocation20_spill] sm:$0xff] }
 0x3ee   :  { %2574 = vperm.xlu0 %9122, %v9445_v5   ;;  %v6438_v54 = vmax.f32 %v6278_v46, %v6279_v12  ;;  %v2386_v41 = vpop.permute.xlu1 %2385  ;;  %8546 = vmatmul.mubr.msk.bf16.gmra.mrb[20].mxu0 %vm8545_vm12, %v15268_v0  ;;  %v5321_v10 = vpop.f32.mrb[6].mxu1  ;;  %v15495_v46 = vld [vmem:[#allocation166_spill] sm:$0xff]  ;;  %vm1851_vm12 = vcmp.eq.s32.totalorder %v11879_v15, %v10839_v60 }
 0x3ef   :  { %v5958_v17 = vadd.f32 %v12743_v62, %v5319_v23  ;;  %vm2786_vm0 = vcmp.eq.s32.totalorder %v2386_v41, %v10839_v60  ;;  %v5322_v52 = vadd.f32 %v5321_v10, %v15493_v1  ;;  %8548 = vmatprep.mubr.msk.bf16.mxu0 %vm8547_vm14, %v15268_v0  ;;  %v5323_v29 = vpop.f32.mrb[7].mxu1  ;;  %v12831_v7 = vpop.permute.xlu0 %3443  ;;  %vm807_vm3 = vcmp.eq.s32.totalorder %v15495_v46, %v10839_v60  ;;  %v15497_v41 = vld [vmem:[#allocation59_spill] sm:$0xff]  ;;  %v15498_v1 = vld [vmem:[#allocation29_spill] sm:$0xff] }
 0x3f0   :  { %v6439_v24 = vrot.slane %v6438_v54, 4  ;;  %vm8665_vm1 = vmpackc.low %vm2786_vm0, %vm2785_vm13  ;;  %9073 = vset.pattern.permute.xlu1 %v15296_v48  ;;  %vm1849_vm4 = vcmp.eq.s32.totalorder %v15497_v41, %v10839_v60  ;;  %vm1850_vm5 = vcmp.eq.s32.totalorder %v15498_v1, %v10839_v60 }
 0x3f1   :  { %v6118_v12 = vmax.f32 %v5958_v17, 0.0  ;;  %v5959_v10 = vadd.f32 %v12743_v62, %v5322_v52  ;;  %2448 = vperm.xlu1 %9073, %v9444_v19   ;;  %v12838_v29 = vpop.f32.mrb[172].mxu0  ;;  %8666 = vmatmul.mubr.msk.bf16.gmra.mrb[76].mxu1 %vm8665_vm1, %v15268_v0  ;;  %vm8549_vm6 = vmpackc.low %vm808_vm2, %vm807_vm3 }
 0x3f2   :  { %15496 = vst [vmem:[#allocation101_spill] sm:$0xff] %v12838_v29  ;;  %v6440_v4 = vmax.f32 %v6438_v54, %v6439_v24  ;;  %v4983_v23 = vpop.f32.mrb[173].mxu0  ;;  %9125 = vset.pattern.permute.xlu0 %v15285_v20  ;;  %vm8551_vm9 = vmpackc.low %vm1850_vm5, %vm1849_vm4 }
 0x3f3   :  { %v6119_v17 = vmax.f32 %v5959_v10, 0.0  ;;  %v3429_v52 = vpop.permute.xlu1 %3428  ;;  %v12848_v19 = vpop.f32.mrb[174].mxu0  ;;  %3614 = vperm.xlu0 %9125, %v9445_v5   ;;  %v6280_v54 = vadd.f32 %v12773_v25, %v6118_v12  ;;  %v9446_v5 = vld [vmem:[%s14948_s0 + $0x1e8] sm:$0xff] }
 0x3f4   :  { %15499 = vst [vmem:[#allocation102_spill] sm:$0xff] %v12848_v19  ;;  %v6441_v24 = vrot.slane %v6440_v4, 2  ;;  %vm3827_vm7 = vcmp.eq.s32.totalorder %v3429_v52, %v10839_v60  ;;  %v4986_v28 = vpop.f32.mrb[175].mxu0  ;;  %v12867_v46 = vpop.permute.xlu0 %2394  ;;  %v9447_v10 = vld [vmem:[%s14948_s0 + $0x348] sm:$0xff] }
 0x3f5   :  { %v6281_v23 = vadd.f32 %v12778_v63, %v6119_v17  ;;  %vm8667_vm8 = vmpackc.low %vm3828_vm15, %vm3827_vm7  ;;  %2451 = vperm.xlu1 %9073, %v9446_v5   ;;  %v15500_v17 = vld [vmem:[#allocation167_spill] sm:$0xff]  ;;  %vm3829_vm15 = vcmp.eq.s32.totalorder %v12787_v42, %v10839_v60 }
 0x3f6   :  { %v6442_v16 = vmax.f32 %v6440_v4, %v6441_v24  ;;  %8550 = vmatmul.mubr.msk.bf16.gmra.mrb[24].mxu0 %vm8549_vm6, %v15268_v0  ;;  %8668 = vmatprep.mubr.msk.bf16.mxu1 %vm8667_vm8, %v15268_v0  ;;  %vm810_vm10 = vcmp.eq.s32.totalorder %v15500_v17, %v10839_v60  ;;  %v15501_v4 = vld [vmem:[#allocation168_spill] sm:$0xff]  ;;  %v15503_v24 = vld [vmem:[#allocation33_spill] sm:$0xff] }
 0x3f7   :  { %v6445_v12 = vmax.f32 %v6280_v54, %v6281_v23  ;;  %8552 = vmatprep.mubr.msk.bf16.mxu0 %vm8551_vm9, %v15268_v0  ;;  %3623 = vperm.xlu0 %9125, %v9447_v10   ;;  %vm809_vm11 = vcmp.eq.s32.totalorder %v15501_v4, %v10839_v60  ;;  %vm1852_vm13 = vcmp.eq.s32.totalorder %v15503_v24, %v10839_v60  ;;  %v9448_v54 = vld [vmem:[%s14948_s0 + $0x1f8] sm:$0xff]  ;;  %v9450_v24 = vld [vmem:[%s14948_s0 + $0x368] sm:$0xff] }
 0x3f8   :  { %v2389_v1 = vpop.permute.xlu1 %2388  ;;  %v6443_v28 = vrot.slane %v6442_v16, 1  ;;  %v12887_v5 = vpop.permute.xlu0 %2406  ;;  %vm12903_vm14 = vmpackc.low %vm810_vm10, %vm809_vm11  ;;  %vm2789_vm11 = vcmp.eq.s32.totalorder %v12867_v46, %v10839_v60 }
 0x3f9   :  { %v6446_v41 = vrot.slane %v6445_v12, 4  ;;  %9074 = vset.pattern.permute.xlu1 %v15285_v20  ;;  %v12878_v52 = vpop.f32.mrb[176].mxu0  ;;  %vm8555_vm0 = vmpackc.low %vm1852_vm13, %vm1851_vm12  ;;  %vm2787_vm1 = vcmp.eq.s32.totalorder %v2389_v1, %v10839_v60  ;;  %vm7261_vm13 = vcmask 1041409  }
 0x3fa   :  { %15502 = vst [vmem:[#allocation103_spill] sm:$0xff] %v12878_v52  ;;  %3497 = vperm.xlu1 %9074, %v9448_v54   ;;  %v4991_v23 = vpop.f32.mrb[177].mxu0  ;;  %v12894_v52 = vld [vmem:[%s14948_s0 + $0x350] sm:$0xff]  ;;  %v6444_v2 = vmax.f32 %v6442_v16, %v6443_v28 }
 0x3fb   :  { %v6447_v10 = vmax.f32 %v6445_v12, %v6446_v41  ;;  %v5326_v19 = vpop.f32.mrb[8].mxu1  ;;  %v12889_v29 = vpop.f32.mrb[178].mxu0  ;;  %3626 = vperm.xlu0 %9125, %v12894_v52   ;;  %v15507_v12 = vld [vmem:[#allocation10_spill] sm:$0xff] }
 0x3fc   :  { %15504 = vst [vmem:[#allocation104_spill] sm:$0xff] %v12889_v29  ;;  %v5327_v41 = vadd.f32 %v5326_v19, %v15507_v12  ;;  %v5328_v29 = vpop.f32.mrb[9].mxu1  ;;  %v2392_v11 = vpop.permute.xlu1 %2391  ;;  %v6998_v23 = vpack.c.bf16 %v6444_v2, %v6444_v2 }
 0x3fd   :  { %v6448_v45 = vrot.slane %v6447_v10, 2  ;;  %vm2788_vm2 = vcmp.eq.s32.totalorder %v2392_v11, %v10839_v60  ;;  %v4994_v17 = vpop.f32.mrb[179].mxu0  ;;  %v5329_v4 = vpop.f32.mrb[10].mxu1  ;;  %v15508_v29 = vld [vmem:[#allocation24_spill] sm:$0xff] }
 0x3fe   :  { %v5960_v27 = vadd.f32 %v12743_v62, %v5327_v41  ;;  %vm8669_vm3 = vmpackc.low %vm2788_vm2, %vm2787_vm1  ;;  %v5330_v19 = vadd.f32 %v5329_v4, %v15508_v29  ;;  %v5331_v12 = vpop.f32.mrb[11].mxu1  ;;  %9076 = vset.pattern.permute.xlu1 %v15296_v48  ;;  %8554 = vmatmul.mubr.msk.bf16.gmra.mrb[28].mxu0 %vm12903_vm14, %v15268_v0  ;;  %v12927_v16 = vpop.permute.xlu0 %3446  ;;  %v15512_v4 = vld [vmem:[#allocation37_spill] sm:$0xff]  ;;  %v15513_v29 = vld [vmem:[#allocation38_spill] sm:$0xff] }
 0x3ff   :  { %v6449_v15 = vmax.f32 %v6447_v10, %v6448_v45  ;;  %2457 = vperm.xlu1 %9076, %v9448_v54   ;;  %8556 = vmatprep.mubr.msk.bf16.mxu0 %vm8555_vm0, %v15268_v0  ;;  %v15509_v45 = vld [vmem:[#allocation169_spill] sm:$0xff]  ;;  %v15511_v10 = vld [vmem:[#allocation170_spill] sm:$0xff]  ;;  %vm1853_vm7 = vcmp.eq.s32.totalorder %v15512_v4, %v10839_v60  ;;  %vm1854_vm8 = vcmp.eq.s32.totalorder %v15513_v29, %v10839_v60 }
 0x400   :  { %v6120_v11 = vmax.f32 %v5960_v27, 0.0  ;;  %v5961_v1 = vadd.f32 %v12743_v62, %v5330_v19  ;;  %8670 = vmatmul.mubr.msk.bf16.gmra.mrb[80].mxu1 %vm8669_vm3, %v15268_v0  ;;  %3635 = vperm.xlu0 %9125, %v9450_v24   ;;  %vm812_vm4 = vcmp.eq.s32.totalorder %v15509_v45, %v10839_v60  ;;  %vm811_vm5 = vcmp.eq.s32.totalorder %v15511_v10, %v10839_v60  ;;  %v9451_v24 = vld [vmem:[%s14948_s0 + $0x200] sm:$0xff]  ;;  %vm8559_vm12 = vmpackc.low %vm1854_vm8, %vm1853_vm7 }
 0x401   :  { %v6450_v28 = vrot.slane %v6449_v15, 1  ;;  %v3438_v54 = vpop.permute.xlu1 %3437  ;;  %v12934_v27 = vpop.f32.mrb[180].mxu0  ;;  %vm8557_vm10 = vmpackc.low %vm812_vm4, %vm811_vm5  ;;  %v7181_v45 = vunpack.c.l.b16 %v6998_v23  ;;  %v15517_v23 = vld [vmem:[#allocation171_spill] sm:$0xff]  ;;  %vm3832_vm3 = vcmp.eq.s32.totalorder %v12831_v7, %v10839_v60  ;;  %vm1856_vm4 = vcmp.eq.s32.totalorder %v11916_v44, %v10839_v60  ;;  %v9453_v44 = vld [vmem:[%s14948_s0 + $0x208] sm:$0xff] }
 0x402   :  { %15510 = vst [vmem:[#allocation105_spill] sm:$0xff] %v12934_v27  ;;  %v6121_v41 = vmax.f32 %v5961_v1, 0.0  ;;  %vm3830_vm6 = vcmp.eq.s32.totalorder %v3438_v54, %v10839_v60  ;;  %v4999_v17 = vpop.f32.mrb[181].mxu0  ;;  %v6282_v2 = vadd.f32 %v12773_v25, %v6120_v11  ;;  %vm814_vm0 = vcmp.eq.s32.totalorder %v15517_v23, %v10839_v60  ;;  %v15521_v7 = vld [vmem:[#allocation173_spill] sm:$0xff] }
 0x403   :  { %v6451_v19 = vmax.f32 %v6449_v15, %v6450_v28  ;;  %vm8671_vm9 = vmpackc.low %vm3830_vm6, %vm3829_vm15  ;;  %9077 = vset.pattern.permute.xlu1 %v15285_v20  ;;  %v12947_v12 = vpop.f32.mrb[182].mxu0  ;;  %v15515_v15 = vld [vmem:[#allocation28_spill] sm:$0xff]  ;;  %vm1855_vm15 = vcmp.eq.s32.totalorder %v11910_v14, %v10839_v60 }
 0x404   :  { %15514 = vst [vmem:[#allocation106_spill] sm:$0xff] %v12947_v12  ;;  %v6283_v1 = vadd.f32 %v12778_v63, %v6121_v41  ;;  %3500 = vperm.xlu1 %9077, %v9451_v24   ;;  %v5002_v54 = vpop.f32.mrb[183].mxu0  ;;  %v5334_v17 = vpop.f32.mrb[12].mxu1  ;;  %8672 = vmatprep.mubr.msk.bf16.mxu1 %vm8671_vm9, %v15268_v0  ;;  %vm8563_vm8 = vmpackc.low %vm1856_vm4, %vm1855_vm15  ;;  %vm816_vm9 = vcmp.eq.s32.totalorder %v15521_v7, %v10839_v60  ;;  %v13100_v7 = vld [vmem:[%s14948_s0 + $0x390] sm:$0xff] }
 0x405   :  { %v6999_v42 = vpack.c.bf16 %v6451_v19, %v6451_v19  ;;  %v5335_v11 = vadd.f32 %v5334_v17, %v15515_v15  ;;  %v5336_v28 = vpop.f32.mrb[13].mxu1  ;;  %v12964_v41 = vpop.permute.xlu0 %3455  ;;  %9132 = vset.pattern.permute.xlu0 %v15296_v48  ;;  %vm3833_vm4 = vcmp.eq.s32.totalorder %v12927_v16, %v10839_v60 }
 0x406   :  { %v6452_v10 = vmax.f32 %v6282_v2, %v6283_v1  ;;  %v2398_v19 = vpop.permute.xlu1 %2397  ;;  %8558 = vmatmul.mubr.msk.bf16.gmra.mrb[32].mxu0 %vm8557_vm10, %v15268_v0  ;;  %v5337_v54 = vpop.f32.mrb[14].mxu1  ;;  %2586 = vperm.xlu0 %9132, %v12894_v52   ;;  %v15516_v28 = vld [vmem:[#allocation13_spill] sm:$0xff]  ;;  %v15518_v52 = vld [vmem:[#allocation172_spill] sm:$0xff] }
 0x407   :  { %v7182_v17 = vunpack.c.l.b16 %v6999_v42  ;;  %v5962_v15 = vadd.f32 %v12743_v62, %v5335_v11  ;;  %vm2790_vm14 = vcmp.eq.s32.totalorder %v2398_v19, %v10839_v60  ;;  %v5338_v4 = vadd.f32 %v5337_v54, %v15516_v28  ;;  %8560 = vmatprep.mubr.msk.bf16.mxu0 %vm8559_vm12, %v15268_v0  ;;  %v5339_v29 = vpop.f32.mrb[15].mxu1 }
 0x408   :  { %v6453_v2 = vrot.slane %v6452_v10, 4  ;;  %vm8673_vm1 = vmpackc.low %vm2790_vm14, %vm2789_vm11  ;;  %9078 = vset.pattern.permute.xlu1 %v15296_v48  ;;  %vm813_vm2 = vcmp.eq.s32.totalorder %v15518_v52, %v10839_v60  ;;  %vm1857_vm11 = vcmp.eq.s32.totalorder %v11922_v59, %v10839_v60  ;;  %vm1858_vm12 = vcmp.eq.s32.totalorder %v11925_v36, %v10839_v60 }
 0x409   :  { %v12988_v1 = vsel %vm7261_vm13, %v7182_v17, %v7181_v45  ;;  %v6122_v42 = vmax.f32 %v5962_v15, 0.0  ;;  %v5963_v11 = vadd.f32 %v12743_v62, %v5338_v4  ;;  %2460 = vperm.xlu1 %9078, %v9451_v24   ;;  %v12991_v19 = vpop.f32.mrb[184].mxu0  ;;  %8674 = vmatmul.mubr.msk.bf16.gmra.mrb[84].mxu1 %vm8673_vm1, %v15268_v0  ;;  %v12996_v28 = vpop.permute.xlu0 %3458  ;;  %v9452_v45 = vld [vmem:[%s14948_s0 + $0x370] sm:$0xff]  ;;  %vm8561_vm5 = vmpackc.low %vm814_vm0, %vm813_vm2  ;;  %vm7263_vm1 = vcmask 1042434  }
 0x40a   :  { %15519 = vst [vmem:[#allocation107_spill] sm:$0xff] %v12991_v19  ;;  %v6454_v54 = vmax.f32 %v6452_v10, %v6453_v2  ;;  %v5007_v46 = vpop.f32.mrb[185].mxu0  ;;  %2598 = vperm.xlu0 %9132, %v9452_v45   ;;  %vm13064_vm0 = vmpackc.low %vm1858_vm12, %vm1857_vm11  ;;  %vm2793_vm12 = vcmp.eq.s32.totalorder %v12887_v5, %v10839_v60 }
 0x40b   :  { %v6123_v24 = vmax.f32 %v5963_v11, 0.0  ;;  %v3441_v17 = vpop.permute.xlu1 %3440  ;;  %v13005_v10 = vpop.f32.mrb[186].mxu0  ;;  %v6284_v14 = vadd.f32 %v12773_v25, %v6122_v42  ;;  %v15522_v11 = vld [vmem:[#allocation174_spill] sm:$0xff] }
 0x40c   :  { %15520 = vst [vmem:[#allocation108_spill] sm:$0xff] %v13005_v10  ;;  %v6455_v15 = vrot.slane %v6454_v54, 2  ;;  %vm3831_vm6 = vcmp.eq.s32.totalorder %v3441_v17, %v10839_v60  ;;  %v5010_v4 = vpop.f32.mrb[187].mxu0  ;;  %vm815_vm10 = vcmp.eq.s32.totalorder %v15522_v11, %v10839_v60  ;;  %v9454_v17 = vld [vmem:[%s14948_s0 + $0x218] sm:$0xff] }
 0x40d   :  { %v6285_v29 = vadd.f32 %v12778_v63, %v6123_v24  ;;  %vm8675_vm7 = vmpackc.low %vm3832_vm3, %vm3831_vm6  ;;  %2463 = vperm.xlu1 %9078, %v9453_v44   ;;  %v13033_v24 = vpop.permute.xlu0 %3467 }
 0x40e   :  { %v6456_v23 = vmax.f32 %v6454_v54, %v6455_v15  ;;  %8562 = vmatmul.mubr.msk.bf16.gmra.mrb[36].mxu0 %vm8561_vm5, %v15268_v0  ;;  %8676 = vmatprep.mubr.msk.bf16.mxu1 %vm8675_vm7, %v15268_v0  ;;  %vm13047_vm14 = vmpackc.low %vm816_vm9, %vm815_vm10 }
 0x40f   :  { %v6459_v2 = vmax.f32 %v6284_v14, %v6285_v29  ;;  %8564 = vmatprep.mubr.msk.bf16.mxu0 %vm8563_vm8, %v15268_v0  ;;  %9135 = vset.pattern.permute.xlu0 %v15285_v20 }
 0x410   :  { %v6457_v52 = vrot.slane %v6456_v23, 1  ;;  %v2401_v42 = vpop.permute.xlu1 %2400  ;;  %3638 = vperm.xlu0 %9135, %v9452_v45  }
 0x411   :  { %v6460_v46 = vrot.slane %v6459_v2, 4  ;;  %9079 = vset.pattern.permute.xlu1 %v15285_v20  ;;  %v13031_v54 = vpop.f32.mrb[188].mxu0  ;;  %vm2791_vm2 = vcmp.eq.s32.totalorder %v2401_v42, %v10839_v60  ;;  %v13081_v42 = vpop.permute.xlu0 %2418 }
 0x412   :  { %15523 = vst [vmem:[#allocation109_spill] sm:$0xff] %v13031_v54  ;;  %v6458_v45 = vmax.f32 %v6456_v23, %v6457_v52  ;;  %3509 = vperm.xlu1 %9079, %v9454_v17   ;;  %v5015_v15 = vpop.f32.mrb[189].mxu0  ;;  %v15527_v54 = vld [vmem:[#allocation31_spill] sm:$0xff] }
 0x413   :  { %v6461_v4 = vmax.f32 %v6459_v2, %v6460_v46  ;;  %v5342_v14 = vpop.f32.mrb[16].mxu1  ;;  %v13042_v29 = vpop.f32.mrb[190].mxu0  ;;  %v9231_v15 = vld [vmem:[%s14951_s3] sm:$0xff]   ;;  %v9455_v2 = vld [vmem:[%s14948_s0 + $0x388] sm:$0xff] }
 0x414   :  { %15524 = vst [vmem:[#allocation110_spill] sm:$0xff] %v13042_v29  ;;  %v7000_v11 = vpack.c.bf16 %v6458_v45, %v6458_v45  ;;  %v5343_v23 = vadd.f32 %v5342_v14, %v15527_v54  ;;  %v5344_v52 = vpop.f32.mrb[17].mxu1  ;;  %v2404_v10 = vpop.permute.xlu1 %2403  ;;  %3647 = vperm.xlu0 %9135, %v9455_v2   ;;  %v15026_v14 = vmov 0.0  }
 0x415   :  { %v6462_v46 = vrot.slane %v6461_v4, 2  ;;  %vm2792_vm3 = vcmp.eq.s32.totalorder %v2404_v10, %v10839_v60  ;;  %v5018_v54 = vpop.f32.mrb[191].mxu0  ;;  %v5345_v45 = vpop.f32.mrb[18].mxu1  ;;  %8930 = vmatprep.subr.bf16.mxu0 %v15026_v14  ;;  %8966 = vmatprep.subr.bf16.mxu1 %v15026_v14  ;;  %v15530_v52 = vld [vmem:[#allocation36_spill] sm:$0xff] }
 0x416   :  { %v7183_v59 = vunpack.c.l.b16 %v7000_v11  ;;  %v5964_v36 = vadd.f32 %v12743_v62, %v5343_v23  ;;  %vm8677_vm15 = vmpackc.low %vm2792_vm3, %vm2791_vm2  ;;  %v5346_v2 = vadd.f32 %v5345_v45, %v15530_v52  ;;  %v5347_v29 = vpop.f32.mrb[19].mxu1  ;;  %9080 = vset.pattern.permute.xlu1 %v15296_v48  ;;  %8566 = vmatmul.mubr.msk.bf16.gmra.mrb[40].mxu0 %vm13047_vm14, %v15268_v0  ;;  %v15533_v54 = vld [vmem:[#allocation176_spill] sm:$0xff]  ;;  %v15535_v52 = vld [vmem:[#allocation49_spill] sm:$0xff] }
 0x417   :  { %v6463_v10 = vmax.f32 %v6461_v4, %v6462_v46  ;;  %2469 = vperm.xlu1 %9080, %v9454_v17   ;;  %8568 = vmatprep.mubr.msk.bf16.mxu0 %vm13064_vm0, %v15268_v0  ;;  %v15532_v46 = vld [vmem:[#allocation175_spill] sm:$0xff]  ;;  %vm817_vm6 = vcmp.eq.s32.totalorder %v15533_v54, %v10839_v60  ;;  %vm1860_vm9 = vcmp.eq.s32.totalorder %v15535_v52, %v10839_v60  ;;  %vm7265_vm0 = vcmask 1043459  }
 0x418   :  { %v13085_v11 = vsel %vm7263_vm1, %v7183_v59, %v12988_v1  ;;  %v6124_v23 = vmax.f32 %v5964_v36, 0.0  ;;  %v5965_v29 = vadd.f32 %v12743_v62, %v5346_v2  ;;  %8678 = vmatmul.mubr.msk.bf16.gmra.mrb[88].mxu1 %vm8677_vm15, %v15268_v0  ;;  %8931 = vmatpush3.bf16.msra.mxu0 %v9231_v15  ;;  %v9232_v1 = vld [vmem:[%s14951_s3 + $0x8] sm:$0xff]   ;;  %vm818_vm5 = vcmp.eq.s32.totalorder %v15532_v46, %v10839_v60  ;;  %v15534_v36 = vld [vmem:[#allocation46_spill] sm:$0xff] }
 0x419   :  { %v6464_v17 = vrot.slane %v6463_v10, 1  ;;  %v3450_v4 = vpop.permute.xlu1 %3449  ;;  %v13091_v44 = vpop.f32.mrb[192].mxu0  ;;  %8932 = vmatprep.subr.bf16.mxu0 %v15026_v14  ;;  %3650 = vperm.xlu0 %9135, %v13100_v7   ;;  %vm1859_vm8 = vcmp.eq.s32.totalorder %v15534_v36, %v10839_v60  ;;  %vm8569_vm11 = vmpackc.low %vm818_vm5, %vm817_vm6  ;;  %v15539_v36 = vld [vmem:[#allocation39_spill] sm:$0xff]  ;;  %vm3836_vm5 = vcmp.eq.s32.totalorder %v12964_v41, %v10839_v60 }
 0x41a   :  { %15531 = vst [vmem:[#allocation111_spill] sm:$0xff] %v13091_v44  ;;  %v6125_v45 = vmax.f32 %v5965_v29, 0.0  ;;  %vm3834_vm7 = vcmp.eq.s32.totalorder %v3450_v4, %v10839_v60  ;;  %v5023_v59 = vpop.f32.mrb[193].mxu0  ;;  %8974 = vmatpush3.bf16.msra.mxu1 %v9231_v15  ;;  %v13118_v29 = vpop.permute.xlu0 %2430  ;;  %v15537_v4 = vmov 0.0   ;;  %v6286_v15 = vadd.f32 %v12773_v25, %v6124_v23  ;;  %v15538_v23 = vld [vmem:[#allocation18_spill] sm:$0xff]  ;;  %vm8571_vm14 = vmpackc.low %vm1860_vm9, %vm1859_vm8 }
 0x41b   :  { %v6465_v2 = vmax.f32 %v6463_v10, %v6464_v17  ;;  %vm8679_vm10 = vmpackc.low %vm3834_vm7, %vm3833_vm4  ;;  %9081 = vset.pattern.permute.xlu1 %v15285_v20  ;;  %v13116_v14 = vpop.f32.mrb[194].mxu0  ;;  %8967 = vmatprep.subr.bf16.mxu1 %v15537_v4  ;;  %v9457_v10 = vld [vmem:[%s14948_s0 + $0x220] sm:$0xff] }
 0x41c   :  { %15536 = vst [vmem:[#allocation112_spill] sm:$0xff] %v13116_v14  ;;  %v6287_v59 = vadd.f32 %v12778_v63, %v6125_v45  ;;  %3512 = vperm.xlu1 %9081, %v9457_v10   ;;  %v5026_v17 = vpop.f32.mrb[195].mxu0  ;;  %v5350_v16 = vpop.f32.mrb[20].mxu1  ;;  %8680 = vmatprep.mubr.msk.bf16.mxu1 %vm8679_vm10, %v15268_v0 }
 0x41d   :  { %v7001_v14 = vpack.c.bf16 %v6465_v2, %v6465_v2  ;;  %v5351_v45 = vadd.f32 %v5350_v16, %v15538_v23  ;;  %v5352_v44 = vpop.f32.mrb[21].mxu1  ;;  %8933 = vmatpush3.bf16.msra.mxu0 %v9232_v1  ;;  %v9458_v17 = vld [vmem:[%s14948_s0 + $0x3a8] sm:$0xff] }
 0x41e   :  { %3659 = vperm.xlu0 %9135, %v9458_v17   ;;  %v6466_v46 = vmax.f32 %v6286_v15, %v6287_v59  ;;  %v2410_v54 = vpop.permute.xlu1 %2409  ;;  %8570 = vmatmul.mubr.msk.bf16.gmra.mrb[44].mxu0 %vm8569_vm11, %v15268_v0  ;;  %v5353_v2 = vpop.f32.mrb[22].mxu1  ;;  %v9233_v44 = vld [vmem:[%s14951_s3 + $0x10] sm:$0xff]  }
 0x41f   :  { %8934 = vmatprep.subr.bf16.mxu0 %v15537_v4  ;;  %v7184_v16 = vunpack.c.l.b16 %v7001_v14  ;;  %v5966_v23 = vadd.f32 %v12743_v62, %v5351_v45  ;;  %vm2794_vm2 = vcmp.eq.s32.totalorder %v2410_v54, %v10839_v60  ;;  %v5354_v52 = vadd.f32 %v5353_v2, %v15539_v36  ;;  %8572 = vmatprep.mubr.msk.bf16.mxu0 %vm8571_vm14, %v15268_v0  ;;  %v5355_v15 = vpop.f32.mrb[23].mxu1  ;;  %v15540_v59 = vld [vmem:[#allocation177_spill] sm:$0xff]  ;;  %v15541_v14 = vld [vmem:[#allocation178_spill] sm:$0xff] }
 0x420   :  { %8975 = vmatpush3.bf16.msra.mxu1 %v9232_v1  ;;  %vm820_vm3 = vcmp.eq.s32.totalorder %v15540_v59, %v10839_v60  ;;  %v6467_v17 = vrot.slane %v6466_v46, 4  ;;  %vm8681_vm15 = vmpackc.low %vm2794_vm2, %vm2793_vm12  ;;  %9083 = vset.pattern.permute.xlu1 %v15296_v48  ;;  %vm819_vm4 = vcmp.eq.s32.totalorder %v15541_v14, %v10839_v60  ;;  %v13173_v15 = vpop.permute.xlu0 %3470  ;;  %v9235_v14 = vld [vmem:[%s14951_s3 + $0x20] sm:$0xff]  }
 0x421   :  { %8968 = vmatprep.subr.bf16.mxu1 %v15537_v4  ;;  %v13165_v45 = vsel %vm7265_vm0, %v7184_v16, %v13085_v11  ;;  %v6126_v1 = vmax.f32 %v5966_v23, 0.0  ;;  %v5967_v54 = vadd.f32 %v12743_v62, %v5354_v52  ;;  %2472 = vperm.xlu1 %9083, %v9457_v10   ;;  %v13168_v2 = vpop.f32.mrb[196].mxu0  ;;  %v15543_v11 = vld [vmem:[#allocation53_spill] sm:$0xff]  ;;  %v15544_v16 = vld [vmem:[#allocation54_spill] sm:$0xff]  ;;  %vm8573_vm8 = vmpackc.low %vm820_vm3, %vm819_vm4 }
 0x422   :  { %15542 = vst [vmem:[#allocation113_spill] sm:$0xff] %v13168_v2  ;;  %8682 = vmatmul.mubr.msk.bf16.gmra.mrb[92].mxu1 %vm8681_vm15, %v15268_v0  ;;  %v6468_v5 = vmax.f32 %v6466_v46, %v6467_v17  ;;  %v5031_v36 = vpop.f32.mrb[197].mxu0  ;;  %8935 = vmatpush3.bf16.msra.mxu0 %v9233_v44  ;;  %vm1861_vm6 = vcmp.eq.s32.totalorder %v15543_v11, %v10839_v60  ;;  %v9234_v46 = vld [vmem:[%s14951_s3 + $0x18] sm:$0xff]  }
 0x423   :  { %9142 = vset.pattern.permute.xlu0 %v15296_v48  ;;  %vm1862_vm7 = vcmp.eq.s32.totalorder %v15544_v16, %v10839_v60  ;;  %v6127_v10 = vmax.f32 %v5967_v54, 0.0  ;;  %v3453_v23 = vpop.permute.xlu1 %3452  ;;  %v13180_v52 = vpop.f32.mrb[198].mxu0  ;;  %8936 = vmatprep.subr.bf16.mxu0 %v15537_v4  ;;  %v6288_v36 = vadd.f32 %v12773_v25, %v6126_v1  ;;  %v15546_v16 = vld [vmem:[#allocation179_spill] sm:$0xff] }
 0x424   :  { %15545 = vst [vmem:[#allocation114_spill] sm:$0xff] %v13180_v52  ;;  %2610 = vperm.xlu0 %9142, %v13100_v7   ;;  %v6469_v17 = vrot.slane %v6468_v5, 2  ;;  %vm3835_vm9 = vcmp.eq.s32.totalorder %v3453_v23, %v10839_v60  ;;  %v5034_v54 = vpop.f32.mrb[199].mxu0  ;;  %8976 = vmatpush3.bf16.msra.mxu1 %v9233_v44  ;;  %v9459_v7 = vld [vmem:[%s14948_s0 + $0x228] sm:$0xff]  ;;  %vm8575_vm11 = vmpackc.low %vm1862_vm7, %vm1861_vm6  ;;  %v13211_v41 = vpop.permute.xlu0 %3479  ;;  %vm822_vm12 = vcmp.eq.s32.totalorder %v15546_v16, %v10839_v60  ;;  %v15560_v16 = vld [vmem:[#allocation182_spill] sm:$0xff] }
 0x425   :  { %v6289_v52 = vadd.f32 %v12778_v63, %v6127_v10  ;;  %vm8683_vm10 = vmpackc.low %vm3836_vm5, %vm3835_vm9  ;;  %2475 = vperm.xlu1 %9083, %v9459_v7   ;;  %8969 = vmatprep.subr.bf16.mxu1 %v15537_v4  ;;  %v15547_v10 = vld [vmem:[#allocation180_spill] sm:$0xff]  ;;  %v9461_v7 = vld [vmem:[%s14948_s0 + $0x238] sm:$0xff]  ;;  %vm7267_vm5 = vcmask 1044484   ;;  %vm3837_vm9 = vcmp.eq.s32.totalorder %v12996_v28, %v10839_v60 }
 0x426   :  { %v6470_v44 = vmax.f32 %v6468_v5, %v6469_v17  ;;  %8574 = vmatmul.mubr.msk.bf16.gmra.mrb[48].mxu0 %vm8573_vm8, %v15268_v0  ;;  %8684 = vmatprep.mubr.msk.bf16.mxu1 %vm8683_vm10, %v15268_v0  ;;  %v9460_v5 = vld [vmem:[%s14948_s0 + $0x3b0] sm:$0xff]  ;;  %vm821_vm14 = vcmp.eq.s32.totalorder %v15547_v10, %v10839_v60  ;;  %v15549_v17 = vld [vmem:[#allocation58_spill] sm:$0xff]  ;;  %v15550_v54 = vld [vmem:[#allocation60_spill] sm:$0xff] }
 0x427   :  { %v6473_v59 = vmax.f32 %v6288_v36, %v6289_v52  ;;  %8576 = vmatprep.mubr.msk.bf16.mxu0 %vm8575_vm11, %v15268_v0  ;;  %8937 = vmatpush3.bf16.msra.mxu0 %v9234_v46  ;;  %vm1863_vm2 = vcmp.eq.s32.totalorder %v15549_v17, %v10839_v60  ;;  %vm1864_vm3 = vcmp.eq.s32.totalorder %v15550_v54, %v10839_v60  ;;  %vm13246_vm15 = vmpackc.low %vm822_vm12, %vm821_vm14 }
 0x428   :  { %v6471_v1 = vrot.slane %v6470_v44, 1  ;;  %v2413_v11 = vpop.permute.xlu1 %2412  ;;  %8938 = vmatprep.subr.bf16.mxu0 %v15537_v4  ;;  %2622 = vperm.xlu0 %9142, %v9460_v5   ;;  %v13235_v19 = vpop.permute.xlu0 %3482  ;;  %vm13262_vm4 = vmpackc.low %vm1864_vm3, %vm1863_vm2  ;;  %vm823_vm11 = vcmp.eq.s32.totalorder %v15560_v16, %v10839_v60 }
 0x429   :  { %v6474_v23 = vrot.slane %v6473_v59, 4  ;;  %9084 = vset.pattern.permute.xlu1 %v15285_v20  ;;  %v13226_v52 = vpop.f32.mrb[200].mxu0  ;;  %8977 = vmatpush3.bf16.msra.mxu1 %v9234_v46  ;;  %vm2795_vm6 = vcmp.eq.s32.totalorder %v2413_v11, %v10839_v60 }
 0x42a   :  { %15548 = vst [vmem:[#allocation115_spill] sm:$0xff] %v13226_v52  ;;  %v6472_v36 = vmax.f32 %v6470_v44, %v6471_v1  ;;  %3521 = vperm.xlu1 %9084, %v9461_v7   ;;  %v5039_v2 = vpop.f32.mrb[201].mxu0  ;;  %8970 = vmatprep.subr.bf16.mxu1 %v15537_v4  ;;  %v15554_v1 = vld [vmem:[#allocation43_spill] sm:$0xff]  ;;  %v9462_v44 = vld [vmem:[%s14948_s0 + $0x3c8] sm:$0xff] }
 0x42b   :  { %v6475_v12 = vmax.f32 %v6473_v59, %v6474_v23  ;;  %v5358_v52 = vpop.f32.mrb[24].mxu1  ;;  %v13238_v46 = vpop.f32.mrb[202].mxu0  ;;  %8939 = vmatpush3.bf16.msra.mxu0 %v9235_v14  ;;  %v9236_v59 = vld [vmem:[%s14951_s3 + $0x28] sm:$0xff]  }
 0x42c   :  { %15551 = vst [vmem:[#allocation116_spill] sm:$0xff] %v13238_v46  ;;  %v7002_v2 = vpack.c.bf16 %v6472_v36, %v6472_v36  ;;  %v5359_v27 = vadd.f32 %v5358_v52, %v15554_v1  ;;  %v5360_v38 = vpop.f32.mrb[25].mxu1  ;;  %v2416_v22 = vpop.permute.xlu1 %2415  ;;  %8940 = vmatprep.subr.bf16.mxu0 %v15537_v4  ;;  %9145 = vset.pattern.permute.xlu0 %v15285_v20  ;;  %v15557_v36 = vld [vmem:[#allocation22_spill] sm:$0xff] }
 0x42d   :  { %v6476_v38 = vrot.slane %v6475_v12, 2  ;;  %vm2796_vm7 = vcmp.eq.s32.totalorder %v2416_v22, %v10839_v60  ;;  %v5042_v10 = vpop.f32.mrb[203].mxu0  ;;  %v5361_v23 = vpop.f32.mrb[26].mxu1  ;;  %3662 = vperm.xlu0 %9145, %v9460_v5   ;;  %8978 = vmatpush3.bf16.msra.mxu1 %v9235_v14 }
 0x42e   :  { %v7185_v52 = vunpack.c.l.b16 %v7002_v2  ;;  %v5968_v17 = vadd.f32 %v12743_v62, %v5359_v27  ;;  %vm8685_vm8 = vmpackc.low %vm2796_vm7, %vm2795_vm6  ;;  %v5362_v54 = vadd.f32 %v5361_v23, %v15557_v36  ;;  %v5363_v1 = vpop.f32.mrb[27].mxu1  ;;  %9086 = vset.pattern.permute.xlu1 %v15296_v48  ;;  %8578 = vmatmul.mubr.msk.bf16.gmra.mrb[52].mxu0 %vm13246_vm15, %v15268_v0  ;;  %v15559_v2 = vld [vmem:[#allocation181_spill] sm:$0xff]  ;;  %v13299_v23 = vpop.permute.xlu0 %3491  ;;  %vm7269_vm7 = vcmask 1045509  }
 0x42f   :  { %v6477_v11 = vmax.f32 %v6475_v12, %v6476_v38  ;;  %2481 = vperm.xlu1 %9086, %v9461_v7   ;;  %8580 = vmatprep.mubr.msk.bf16.mxu0 %vm13262_vm4, %v15268_v0  ;;  %vm824_vm10 = vcmp.eq.s32.totalorder %v15559_v2, %v10839_v60  ;;  %vm2797_vm4 = vcmp.eq.s32.totalorder %v13081_v42, %v10839_v60 }
 0x430   :  { %v13279_v22 = vsel %vm7267_vm5, %v7185_v52, %v13165_v45  ;;  %v6128_v27 = vmax.f32 %v5968_v17, 0.0  ;;  %v5969_v14 = vadd.f32 %v12743_v62, %v5362_v54  ;;  %8686 = vmatmul.mubr.msk.bf16.gmra.mrb[96].mxu1 %vm8685_vm8, %v15268_v0  ;;  %8941 = vmatpush3.bf16.msra.mxu0 %v9236_v59  ;;  %v9237_v45 = vld [vmem:[%s14951_s3 + $0x30] sm:$0xff]   ;;  %v15561_v52 = vld [vmem:[#allocation62_spill] sm:$0xff]  ;;  %v15562_v17 = vld [vmem:[#allocation63_spill] sm:$0xff] }
 0x431   :  { %v6478_v5 = vrot.slane %v6477_v11, 1  ;;  %v3462_v12 = vpop.permute.xlu1 %3461  ;;  %v13285_v7 = vpop.f32.mrb[204].mxu0  ;;  %8942 = vmatprep.subr.bf16.mxu0 %v15537_v4  ;;  %3671 = vperm.xlu0 %9145, %v9462_v44   ;;  %vm1865_vm14 = vcmp.eq.s32.totalorder %v15561_v52, %v10839_v60  ;;  %vm1866_vm2 = vcmp.eq.s32.totalorder %v15562_v17, %v10839_v60  ;;  %vm8581_vm15 = vmpackc.low %vm824_vm10, %vm823_vm11  ;;  %v15565_v52 = vld [vmem:[#allocation52_spill] sm:$0xff] }
 0x432   :  { %15558 = vst [vmem:[#allocation117_spill] sm:$0xff] %v13285_v7  ;;  %v6129_v38 = vmax.f32 %v5969_v14, 0.0  ;;  %vm3838_vm12 = vcmp.eq.s32.totalorder %v3462_v12, %v10839_v60  ;;  %v5047_v10 = vpop.f32.mrb[205].mxu0  ;;  %8971 = vmatprep.subr.bf16.mxu1 %v15537_v4  ;;  %v6290_v1 = vadd.f32 %v12773_v25, %v6128_v27  ;;  %v9463_v12 = vld [vmem:[%s14948_s0 + $0x240] sm:$0xff]  ;;  %vm8583_vm6 = vmpackc.low %vm1866_vm2, %vm1865_vm14 }
 0x433   :  { %v6479_v36 = vmax.f32 %v6477_v11, %v6478_v5  ;;  %vm8687_vm3 = vmpackc.low %vm3838_vm12, %vm3837_vm9  ;;  %9087 = vset.pattern.permute.xlu1 %v15285_v20  ;;  %v13310_v54 = vpop.f32.mrb[206].mxu0  ;;  %8979 = vmatpush3.bf16.msra.mxu1 %v9236_v59  ;;  %v15564_v59 = vld [vmem:[#allocation47_spill] sm:$0xff]  ;;  %vm3840_vm12 = vcmp.eq.s32.totalorder %v13033_v24, %v10839_v60 }
 0x434   :  { %15563 = vst [vmem:[#allocation118_spill] sm:$0xff] %v13310_v54  ;;  %v6291_v14 = vadd.f32 %v12778_v63, %v6129_v38  ;;  %3524 = vperm.xlu1 %9087, %v9463_v12   ;;  %v5050_v44 = vpop.f32.mrb[207].mxu0  ;;  %v5366_v11 = vpop.f32.mrb[28].mxu1  ;;  %8688 = vmatprep.mubr.msk.bf16.mxu1 %vm8687_vm3, %v15268_v0  ;;  %v9464_v38 = vld [vmem:[%s14948_s0 + $0x3d0] sm:$0xff] }
 0x435   :  { %v7003_v28 = vpack.c.bf16 %v6479_v36, %v6479_v36  ;;  %v5367_v27 = vadd.f32 %v5366_v11, %v15564_v59  ;;  %v5368_v5 = vpop.f32.mrb[29].mxu1  ;;  %8943 = vmatpush3.bf16.msra.mxu0 %v9237_v45  ;;  %3674 = vperm.xlu0 %9145, %v9464_v38   ;;  %v9238_v36 = vld [vmem:[%s14951_s3 + $0x38] sm:$0xff]  }
 0x436   :  { %v6480_v2 = vmax.f32 %v6290_v1, %v6291_v14  ;;  %v2422_v16 = vpop.permute.xlu1 %2421  ;;  %8582 = vmatmul.mubr.msk.bf16.gmra.mrb[56].mxu0 %vm8581_vm15, %v15268_v0  ;;  %v5369_v10 = vpop.f32.mrb[30].mxu1  ;;  %8944 = vmatprep.subr.bf16.mxu0 %v15537_v4  ;;  %v15566_v14 = vld [vmem:[#allocation183_spill] sm:$0xff]  ;;  %vm9595_vm15 = vmmov 0  }
 0x437   :  { %v7186_v44 = vunpack.c.l.b16 %v7003_v28  ;;  %v5970_v11 = vadd.f32 %v12743_v62, %v5367_v27  ;;  %vm2798_vm8 = vcmp.eq.s32.totalorder %v2422_v16, %v10839_v60  ;;  %v5370_v17 = vadd.f32 %v5369_v10, %v15565_v52  ;;  %8584 = vmatprep.mubr.msk.bf16.mxu0 %vm8583_vm6, %v15268_v0  ;;  %v5371_v1 = vpop.f32.mrb[31].mxu1  ;;  %8972 = vmatprep.subr.bf16.mxu1 %v15537_v4  ;;  %v13352_v28 = vpop.permute.xlu0 %2442  ;;  %v15567_v27 = vld [vmem:[#allocation184_spill] sm:$0xff] }
 0x438   :  { %vm826_vm9 = vcmp.eq.s32.totalorder %v15566_v14, %v10839_v60  ;;  %v6481_v59 = vrot.slane %v6480_v2, 4  ;;  %vm8689_vm10 = vmpackc.low %vm2798_vm8, %vm2797_vm4  ;;  %9088 = vset.pattern.permute.xlu1 %v15296_v48  ;;  %8980 = vmatpush3.bf16.msra.mxu1 %v9237_v45  ;;  %vm825_vm11 = vcmp.eq.s32.totalorder %v15567_v27, %v10839_v60  ;;  %v9465_v1 = vld [vmem:[%s14948_s0 + $0x3e8] sm:$0xff]  ;;  %vm7271_vm4 = vcmask 1046534  }
 0x439   :  { %v13358_v5 = vsel %vm7269_vm7, %v7186_v44, %v13279_v22  ;;  %v6130_v16 = vmax.f32 %v5970_v11, 0.0  ;;  %v5971_v10 = vadd.f32 %v12743_v62, %v5370_v17  ;;  %2484 = vperm.xlu1 %9088, %v9463_v12   ;;  %v13361_v52 = vpop.f32.mrb[208].mxu0  ;;  %8690 = vmatmul.mubr.msk.bf16.gmra.mrb[100].mxu1 %vm8689_vm10, %v15268_v0  ;;  %vm8585_vm14 = vmpackc.low %vm826_vm9, %vm825_vm11  ;;  %v9466_v14 = vld [vmem:[%s14948_s0 + $0x248] sm:$0xff]  ;;  %vm3841_vm10 = vcmp.eq.s32.totalorder %v13173_v15, %v10839_v60  ;;  %v13438_v15 = vld [vmem:[%s14953_s5] sm:$0xff] }
 0x43a   :  { %15568 = vst [vmem:[#allocation119_spill] sm:$0xff] %v13361_v52  ;;  %v6482_v42 = vmax.f32 %v6480_v2, %v6481_v59  ;;  %v5055_v45 = vpop.f32.mrb[209].mxu0  ;;  %8945 = vmatpush3.bf16.msra.mxu0 %v9238_v36  ;;  %3683 = vperm.xlu0 %9145, %v9465_v1  }
 0x43b   :  { %v6131_v22 = vmax.f32 %v5971_v10, 0.0  ;;  %v3465_v44 = vpop.permute.xlu1 %3464  ;;  %v13369_v11 = vpop.f32.mrb[210].mxu0  ;;  %8973 = vmatprep.subr.bf16.mxu1 %v15537_v4  ;;  %v6292_v17 = vadd.f32 %v12773_v25, %v6130_v16 }
 0x43c   :  { %15569 = vst [vmem:[#allocation120_spill] sm:$0xff] %v13369_v11  ;;  %v6483_v62 = vrot.slane %v6482_v42, 2  ;;  %vm3839_vm2 = vcmp.eq.s32.totalorder %v3465_v44, %v10839_v60  ;;  %v5058_v12 = vpop.f32.mrb[211].mxu0  ;;  %v13379_v2 = vpop.permute.xlu0 %2454  ;;  %8981 = vmatpush3.bf16.msra.mxu1 %v9238_v36 }
 0x43d   :  { %v6293_v59 = vadd.f32 %v12778_v63, %v6131_v22  ;;  %vm8691_vm3 = vmpackc.low %vm3840_vm12, %vm3839_vm2  ;;  %2487 = vperm.xlu1 %9088, %v9466_v14   ;;  %vm7273_vm2 = vcmask 1047559  }
 0x43e   :  { %v6484_v27 = vmax.f32 %v6482_v42, %v6483_v62  ;;  %8586 = vmatmul.mubr.msk.bf16.gmra.mrb[60].mxu0 %vm8585_vm14, %v15268_v0  ;;  %8692 = vmatprep.mubr.msk.bf16.mxu1 %vm8691_vm3, %v15268_v0  ;;  %v9467_v42 = vld [vmem:[%s14948_s0 + $0x258] sm:$0xff]  ;;  %vm2801_vm14 = vcmp.eq.s32.totalorder %v13118_v29, %v10839_v60  ;;  %v9474_v29 = vld [vmem:[%s14948_s0 + $0x410] sm:$0xff] }
 0x43f   :  { %v6487_v10 = vmax.f32 %v6292_v17, %v6293_v59  ;;  %8946 = vmatprep.mubr.msk.bf16.mxu0 %vm9595_vm15, %v15537_v4  ;;  %9152 = vset.pattern.permute.xlu0 %v15296_v48 }
 0x440   :  { %v6485_v25 = vrot.slane %v6484_v27, 1  ;;  %v2425_v63 = vpop.permute.xlu1 %2424  ;;  %2634 = vperm.xlu0 %9152, %v9464_v38   ;;  %v13400_v1 = vpop.permute.xlu0 %3494  ;;  %v15572_v38 = vld [vmem:[#allocation26_spill] sm:$0xff] }
 0x441   :  { %v6488_v24 = vrot.slane %v6487_v10, 4  ;;  %9089 = vset.pattern.permute.xlu1 %v15285_v20  ;;  %v13395_v36 = vpop.f32.mrb[212].mxu0  ;;  %vm2799_vm6 = vcmp.eq.s32.totalorder %v2425_v63, %v10839_v60 }
 0x442   :  { %15570 = vst [vmem:[#allocation121_spill] sm:$0xff] %v13395_v36  ;;  %v6486_v16 = vmax.f32 %v6484_v27, %v6485_v25  ;;  %3533 = vperm.xlu1 %9089, %v9467_v42   ;;  %v5063_v45 = vpop.f32.mrb[213].mxu0  ;;  %v9468_v27 = vld [vmem:[%s14948_s0 + $0x3f0] sm:$0xff] }
 0x443   :  { %v6489_v22 = vmax.f32 %v6487_v10, %v6488_v24  ;;  %v5374_v44 = vpop.f32.mrb[32].mxu1  ;;  %v13402_v62 = vpop.f32.mrb[214].mxu0 }
 0x444   :  { %15571 = vst [vmem:[#allocation122_spill] sm:$0xff] %v13402_v62  ;;  %v7004_v12 = vpack.c.bf16 %v6486_v16, %v6486_v16  ;;  %v5375_v17 = vadd.f32 %v5374_v44, %v15572_v38  ;;  %v5376_v59 = vpop.f32.mrb[33].mxu1  ;;  %v2428_v14 = vpop.permute.xlu1 %2427  ;;  %2646 = vperm.xlu0 %9152, %v9468_v27   ;;  %v13413_v16 = vld [vmem:[%s14950_s2] ss:$0 sm:$0xff] }
 0x445   :  { %v6490_v25 = vrot.slane %v6489_v22, 2  ;;  %vm2800_vm8 = vcmp.eq.s32.totalorder %v2428_v14, %v10839_v60  ;;  %v5066_v10 = vpop.f32.mrb[215].mxu0  ;;  %v5377_v24 = vpop.f32.mrb[34].mxu1  ;;  %v15573_v38 = vld [vmem:[#allocation55_spill] sm:$0xff] }
 0x446   :  { %v7187_v45 = vunpack.c.l.b16 %v7004_v12  ;;  %v5972_v44 = vadd.f32 %v13413_v16, %v5375_v17  ;;  %vm8693_vm9 = vmpackc.low %vm2800_vm8, %vm2799_vm6  ;;  %v5378_v59 = vadd.f32 %v5377_v24, %v15573_v38  ;;  %v5379_v62 = vpop.f32.mrb[35].mxu1  ;;  %9090 = vset.pattern.permute.xlu1 %v15296_v48  ;;  %v13418_v36 = vpop.permute.xlu0 %3503  ;;  %vm3844_vm8 = vcmp.eq.s32.totalorder %v13211_v41, %v10839_v60  ;;  %v9475_v41 = vld [vmem:[%s14948_s0 + $0x268] sm:$0xff] }
 0x447   :  { %v6491_v63 = vmax.f32 %v6489_v22, %v6490_v25  ;;  %2493 = vperm.xlu1 %9090, %v9467_v42   ;;  %8694 = vmatmul.mubr.msk.bf16.gmra.mrb[104].mxu1 %vm8693_vm9, %v15268_v0 }
 0x448   :  { %v7272_v12 = vsel %vm7271_vm4, %v7187_v45, %v13358_v5  ;;  %v6132_v14 = vmax.f32 %v5972_v44, 0.0  ;;  %v5973_v10 = vadd.f32 %v13413_v16, %v5378_v59  ;;  %9155 = vset.pattern.permute.xlu0 %v15285_v20  ;;  %v9472_v59 = vld [vmem:[%s14948_s0 + $0x260] sm:$0xff] }
 0x449   :  { %v6492_v62 = vrot.slane %v6491_v63, 1  ;;  %v3474_v17 = vpop.permute.xlu1 %3473  ;;  %v13427_v24 = vpop.f32.mrb[216].mxu0  ;;  %3686 = vperm.xlu0 %9155, %v9468_v27   ;;  %v13444_v27 = vld [vmem:[%s14953_s5 + $0x8] sm:$0xff] }
 0x44a   :  { %15574 = vst [vmem:[#allocation123_spill] sm:$0xff] %v13427_v24  ;;  %v6133_v22 = vmax.f32 %v5973_v10, 0.0  ;;  %vm3842_vm11 = vcmp.eq.s32.totalorder %v3474_v17, %v10839_v60  ;;  %v5071_v42 = vpop.f32.mrb[217].mxu0  ;;  %v13430_v25 = vpop.permute.xlu0 %3506  ;;  %v6294_v44 = vadd.f32 %v13438_v15, %v6132_v14  ;;  %v15576_v14 = vld [vmem:[#allocation30_spill] sm:$0xff] }
 0x44b   :  { %v6493_v5 = vmax.f32 %v6491_v63, %v6492_v62  ;;  %vm8695_vm12 = vmpackc.low %vm3842_vm11, %vm3841_vm10  ;;  %9091 = vset.pattern.permute.xlu1 %v15285_v20  ;;  %v13433_v45 = vpop.f32.mrb[218].mxu0 }
 0x44c   :  { %15575 = vst [vmem:[#allocation124_spill] sm:$0xff] %v13433_v45  ;;  %v6295_v38 = vadd.f32 %v13444_v27, %v6133_v22  ;;  %3536 = vperm.xlu1 %9091, %v9472_v59   ;;  %v5074_v63 = vpop.f32.mrb[219].mxu0  ;;  %v5382_v10 = vpop.f32.mrb[36].mxu1  ;;  %8696 = vmatprep.mubr.msk.bf16.mxu1 %vm8695_vm12, %v15268_v0  ;;  %v9473_v22 = vld [vmem:[%s14948_s0 + $0x408] sm:$0xff] }
 0x44d   :  { %v7005_v62 = vpack.c.bf16 %v6493_v5, %v6493_v5  ;;  %v5383_v17 = vadd.f32 %v5382_v10, %v15576_v14  ;;  %v5384_v42 = vpop.f32.mrb[37].mxu1  ;;  %3695 = vperm.xlu0 %9155, %v9473_v22   ;;  %v15577_v5 = vld [vmem:[#allocation34_spill] sm:$0xff]  ;;  %v9476_v22 = vld [vmem:[%s14948_s0 + $0x428] sm:$0xff] }
 0x44e   :  { %v6494_v45 = vmax.f32 %v6294_v44, %v6295_v38  ;;  %v2434_v24 = vpop.permute.xlu1 %2433  ;;  %v5385_v11 = vpop.f32.mrb[38].mxu1 }
 0x44f   :  { %v7188_v63 = vunpack.c.l.b16 %v7005_v62  ;;  %v5974_v52 = vadd.f32 %v13413_v16, %v5383_v17  ;;  %vm2802_vm3 = vcmp.eq.s32.totalorder %v2434_v24, %v10839_v60  ;;  %v5386_v54 = vadd.f32 %v5385_v11, %v15577_v5  ;;  %v5387_v7 = vpop.f32.mrb[39].mxu1  ;;  %v13464_v10 = vpop.permute.xlu0 %3515 }
 0x450   :  { %v6495_v46 = vrot.slane %v6494_v45, 4  ;;  %vm8697_vm6 = vmpackc.low %vm2802_vm3, %vm2801_vm14  ;;  %9093 = vset.pattern.permute.xlu1 %v15296_v48  ;;  %vm3845_vm3 = vcmp.eq.s32.totalorder %v13235_v19, %v10839_v60 }
 0x451   :  { %v13467_v44 = vsel %vm7273_vm2, %v7188_v63, %v7272_v12  ;;  %v6134_v38 = vmax.f32 %v5974_v52, 0.0  ;;  %v5975_v62 = vadd.f32 %v13413_v16, %v5386_v54  ;;  %2496 = vperm.xlu1 %9093, %v9472_v59   ;;  %v13470_v24 = vpop.f32.mrb[220].mxu0  ;;  %8698 = vmatmul.mubr.msk.bf16.gmra.mrb[108].mxu1 %vm8697_vm6, %v15268_v0 }
 0x452   :  { %15578 = vst [vmem:[#allocation125_spill] sm:$0xff] %v13470_v24  ;;  %v6496_v7 = vmax.f32 %v6494_v45, %v6495_v46  ;;  %v5079_v11 = vpop.f32.mrb[221].mxu0  ;;  %3698 = vperm.xlu0 %9155, %v9474_v29  }
 0x453   :  { %v6135_v12 = vmax.f32 %v5975_v62, 0.0  ;;  %v3477_v14 = vpop.permute.xlu1 %3476  ;;  %v13478_v52 = vpop.f32.mrb[222].mxu0  ;;  %v6296_v17 = vadd.f32 %v13438_v15, %v6134_v38 }
 0x454   :  { %15579 = vst [vmem:[#allocation126_spill] sm:$0xff] %v13478_v52  ;;  %v6497_v54 = vrot.slane %v6496_v7, 2  ;;  %vm3843_vm9 = vcmp.eq.s32.totalorder %v3477_v14, %v10839_v60  ;;  %v5082_v59 = vpop.f32.mrb[223].mxu0  ;;  %v13487_v42 = vpop.permute.xlu0 %2466 }
 0x455   :  { %v6297_v46 = vadd.f32 %v13444_v27, %v6135_v12  ;;  %vm8699_vm10 = vmpackc.low %vm3844_vm8, %vm3843_vm9  ;;  %2499 = vperm.xlu1 %9093, %v9475_v41   ;;  %vm2805_vm9 = vcmp.eq.s32.totalorder %v13352_v28, %v10839_v60 }
 0x456   :  { %v6498_v45 = vmax.f32 %v6496_v7, %v6497_v54  ;;  %8700 = vmatprep.mubr.msk.bf16.mxu1 %vm8699_vm10, %v15268_v0  ;;  %3707 = vperm.xlu0 %9155, %v9476_v22   ;;  %v9477_v7 = vld [vmem:[%s14948_s0 + $0x278] sm:$0xff] }
 0x457   :  { %v6501_v63 = vmax.f32 %v6296_v17, %v6297_v46  ;;  %v15582_v46 = vld [vmem:[#allocation41_spill] sm:$0xff] }
 0x458   :  { %v2437_v5 = vpop.permute.xlu1 %2436  ;;  %v6499_v11 = vrot.slane %v6498_v45, 1  ;;  %v13498_v14 = vpop.permute.xlu0 %2478 }
 0x459   :  { %v6502_v38 = vrot.slane %v6501_v63, 4  ;;  %9094 = vset.pattern.permute.xlu1 %v15285_v20  ;;  %v13493_v62 = vpop.f32.mrb[224].mxu0  ;;  %vm2803_vm11 = vcmp.eq.s32.totalorder %v2437_v5, %v10839_v60 }
 0x45a   :  { %15580 = vst [vmem:[#allocation127_spill] sm:$0xff] %v13493_v62  ;;  %3545 = vperm.xlu1 %9094, %v9477_v7   ;;  %v5087_v12 = vpop.f32.mrb[225].mxu0  ;;  %9162 = vset.pattern.permute.xlu0 %v15296_v48  ;;  %v6500_v55 = vmax.f32 %v6498_v45, %v6499_v11  ;;  %v9478_v45 = vld [vmem:[%s14948_s0 + $0x430] sm:$0xff] }
 0x45b   :  { %v6503_v54 = vmax.f32 %v6501_v63, %v6502_v38  ;;  %v5390_v59 = vpop.f32.mrb[40].mxu1  ;;  %v13501_v17 = vpop.f32.mrb[226].mxu0  ;;  %2658 = vperm.xlu0 %9162, %v9474_v29   ;;  %v15583_v63 = vld [vmem:[#allocation42_spill] sm:$0xff] }
 0x45c   :  { %15581 = vst [vmem:[#allocation128_spill] sm:$0xff] %v13501_v17  ;;  %v5391_v41 = vadd.f32 %v5390_v59, %v15582_v46  ;;  %v5392_v22 = vpop.f32.mrb[41].mxu1  ;;  %v2440_v62 = vpop.permute.xlu1 %2439 }
 0x45d   :  { %v6504_v52 = vrot.slane %v6503_v54, 2  ;;  %vm2804_vm12 = vcmp.eq.s32.totalorder %v2440_v62, %v10839_v60  ;;  %v5090_v24 = vpop.f32.mrb[227].mxu0  ;;  %v5393_v12 = vpop.f32.mrb[42].mxu1  ;;  %v9479_v22 = vld [vmem:[%s14948_s0 + $0x280] sm:$0xff] }
 0x45e   :  { %v5976_v58 = vadd.f32 %v13413_v16, %v5391_v41  ;;  %vm8701_vm14 = vmpackc.low %vm2804_vm12, %vm2803_vm11  ;;  %v5394_v38 = vadd.f32 %v5393_v12, %v15583_v63  ;;  %v5395_v50 = vpop.f32.mrb[43].mxu1  ;;  %9096 = vset.pattern.permute.xlu1 %v15296_v48  ;;  %v13513_v24 = vpop.permute.xlu0 %3518  ;;  %vm3848_vm12 = vcmp.eq.s32.totalorder %v13299_v23, %v10839_v60 }
 0x45f   :  { %v6505_v29 = vmax.f32 %v6503_v54, %v6504_v52  ;;  %2505 = vperm.xlu1 %9096, %v9477_v7   ;;  %8702 = vmatmul.mubr.msk.bf16.gmra.mrb[112].mxu1 %vm8701_vm14, %v15268_v0  ;;  %v7006_v52 = vpack.c.bf16 %v6500_v55, %v6500_v55 }
 0x460   :  { %v6136_v59 = vmax.f32 %v5976_v58, 0.0  ;;  %v5977_v5 = vadd.f32 %v13413_v16, %v5394_v38  ;;  %2670 = vperm.xlu0 %9162, %v9478_v45   ;;  %v15586_v38 = vld [vmem:[#allocation45_spill] sm:$0xff] }
 0x461   :  { %v6506_v50 = vrot.slane %v6505_v29, 1  ;;  %v3486_v62 = vpop.permute.xlu1 %3485  ;;  %v13518_v11 = vpop.f32.mrb[228].mxu0 }
 0x462   :  { %15584 = vst [vmem:[#allocation129_spill] sm:$0xff] %v13518_v11  ;;  %v6137_v7 = vmax.f32 %v5977_v5, 0.0  ;;  %vm3846_vm6 = vcmp.eq.s32.totalorder %v3486_v62, %v10839_v60  ;;  %v5095_v58 = vpop.f32.mrb[229].mxu0  ;;  %v6298_v46 = vadd.f32 %v13438_v15, %v6136_v59  ;;  %v7189_v59 = vunpack.c.l.b16 %v7006_v52 }
 0x463   :  { %v6507_v54 = vmax.f32 %v6505_v29, %v6506_v50  ;;  %vm8703_vm8 = vmpackc.low %vm3846_vm6, %vm3845_vm3  ;;  %9097 = vset.pattern.permute.xlu1 %v15285_v20  ;;  %v13522_v19 = vpop.f32.mrb[230].mxu0  ;;  %v13533_v50 = vpop.permute.xlu0 %3527 }
 0x464   :  { %15585 = vst [vmem:[#allocation130_spill] sm:$0xff] %v13522_v19  ;;  %v6299_v41 = vadd.f32 %v13444_v27, %v6137_v7  ;;  %3548 = vperm.xlu1 %9097, %v9479_v22   ;;  %v5098_v55 = vpop.f32.mrb[231].mxu0  ;;  %v5398_v12 = vpop.f32.mrb[44].mxu1  ;;  %8704 = vmatprep.mubr.msk.bf16.mxu1 %vm8703_vm8, %v15268_v0 }
 0x465   :  { %v7007_v63 = vpack.c.bf16 %v6507_v54, %v6507_v54  ;;  %v5399_v29 = vadd.f32 %v5398_v12, %v15586_v38  ;;  %v5400_v5 = vpop.f32.mrb[45].mxu1  ;;  %9165 = vset.pattern.permute.xlu0 %v15285_v20  ;;  %v15587_v54 = vld [vmem:[#allocation50_spill] sm:$0xff] }
 0x466   :  { %v6508_v62 = vmax.f32 %v6298_v46, %v6299_v41  ;;  %v2446_v7 = vpop.permute.xlu1 %2445  ;;  %v5401_v58 = vpop.f32.mrb[46].mxu1  ;;  %3710 = vperm.xlu0 %9165, %v9478_v45  }
 0x467   :  { %v7190_v55 = vunpack.c.l.b16 %v7007_v63  ;;  %v5978_v19 = vadd.f32 %v13413_v16, %v5399_v29  ;;  %vm2806_vm10 = vcmp.eq.s32.totalorder %v2446_v7, %v10839_v60  ;;  %v5402_v12 = vadd.f32 %v5401_v58, %v15587_v54  ;;  %v5403_v38 = vpop.f32.mrb[47].mxu1  ;;  %v13549_v29 = vpop.permute.xlu0 %3530  ;;  %v9481_v54 = vld [vmem:[%s14948_s0 + $0x288] sm:$0xff] }
 0x468   :  { %v6509_v5 = vrot.slane %v6508_v62, 4  ;;  %vm8705_vm11 = vmpackc.low %vm2806_vm10, %vm2805_vm9  ;;  %9098 = vset.pattern.permute.xlu1 %v15296_v48  ;;  %v9482_v38 = vld [vmem:[%s14948_s0 + $0x450] sm:$0xff]  ;;  %vm3849_vm10 = vcmp.eq.s32.totalorder %v13400_v1, %v10839_v60 }
 0x469   :  { %v13541_v28 = vsel %vm7261_vm13, %v7190_v55, %v7189_v59  ;;  %v6138_v52 = vmax.f32 %v5978_v19, 0.0  ;;  %v5979_v46 = vadd.f32 %v13413_v16, %v5402_v12  ;;  %2508 = vperm.xlu1 %9098, %v9479_v22   ;;  %v13544_v45 = vpop.f32.mrb[232].mxu0  ;;  %8706 = vmatmul.mubr.msk.bf16.gmra.mrb[116].mxu1 %vm8705_vm11, %v15268_v0  ;;  %v9480_v59 = vld [vmem:[%s14948_s0 + $0x448] sm:$0xff] }
 0x46a   :  { %15588 = vst [vmem:[#allocation131_spill] sm:$0xff] %v13544_v45  ;;  %v6510_v41 = vmax.f32 %v6508_v62, %v6509_v5  ;;  %v5103_v63 = vpop.f32.mrb[233].mxu0  ;;  %3719 = vperm.xlu0 %9165, %v9480_v59  }
 0x46b   :  { %v6139_v19 = vmax.f32 %v5979_v46, 0.0  ;;  %v3489_v7 = vpop.permute.xlu1 %3488  ;;  %v13554_v58 = vpop.f32.mrb[234].mxu0  ;;  %v6300_v62 = vadd.f32 %v13438_v15, %v6138_v52 }
 0x46c   :  { %15589 = vst [vmem:[#allocation132_spill] sm:$0xff] %v13554_v58  ;;  %v6511_v22 = vrot.slane %v6510_v41, 2  ;;  %vm3847_vm14 = vcmp.eq.s32.totalorder %v3489_v7, %v10839_v60  ;;  %v5106_v55 = vpop.f32.mrb[235].mxu0 }
 0x46d   :  { %v6301_v23 = vadd.f32 %v13444_v27, %v6139_v19  ;;  %vm8707_vm3 = vmpackc.low %vm3848_vm12, %vm3847_vm14  ;;  %2511 = vperm.xlu1 %9098, %v9481_v54   ;;  %v13569_v19 = vpop.permute.xlu0 %3539  ;;  %v9484_v55 = vld [vmem:[%s14948_s0 + $0x468] sm:$0xff]  ;;  %vm2809_vm14 = vcmp.eq.s32.totalorder %v13379_v2, %v10839_v60 }
 0x46e   :  { %v6512_v12 = vmax.f32 %v6510_v41, %v6511_v22  ;;  %8708 = vmatprep.mubr.msk.bf16.mxu1 %vm8707_vm3, %v15268_v0  ;;  %3722 = vperm.xlu0 %9165, %v9482_v38   ;;  %v9483_v41 = vld [vmem:[%s14948_s0 + $0x298] sm:$0xff] }
 0x46f   :  { %v6515_v5 = vmax.f32 %v6300_v62, %v6301_v23 }
 0x470   :  { %v6513_v46 = vrot.slane %v6512_v12, 1  ;;  %v2449_v63 = vpop.permute.xlu1 %2448 }
 0x471   :  { %v6516_v52 = vrot.slane %v6515_v5, 4  ;;  %9099 = vset.pattern.permute.xlu1 %v15285_v20  ;;  %v13567_v59 = vpop.f32.mrb[236].mxu0  ;;  %vm2807_vm6 = vcmp.eq.s32.totalorder %v2449_v63, %v10839_v60  ;;  %v13587_v63 = vpop.permute.xlu0 %2490 }
 0x472   :  { %15590 = vst [vmem:[#allocation7_spill] sm:$0xff] %v13567_v59  ;;  %v6514_v7 = vmax.f32 %v6512_v12, %v6513_v46  ;;  %3557 = vperm.xlu1 %9099, %v9483_v41   ;;  %v5111_v22 = vpop.f32.mrb[237].mxu0  ;;  %3731 = vperm.xlu0 %9165, %v9484_v55   ;;  %v15591_v59 = vld [vmem:[#allocation57_spill] sm:$0xff] }
 0x473   :  { %v6517_v62 = vmax.f32 %v6515_v5, %v6516_v52  ;;  %v5406_v23 = vpop.f32.mrb[48].mxu1  ;;  %v13577_v54 = vpop.f32.mrb[238].mxu0  ;;  %v15592_v5 = vld [vmem:[#allocation61_spill] sm:$0xff] }
 0x474   :  { %v7008_v58 = vpack.c.bf16 %v6514_v7, %v6514_v7  ;;  %v5407_v45 = vadd.f32 %v5406_v23, %v15591_v59  ;;  %v5408_v11 = vpop.f32.mrb[49].mxu1  ;;  %v2452_v12 = vpop.permute.xlu1 %2451 }
 0x475   :  { %v6518_v46 = vrot.slane %v6517_v62, 2  ;;  %vm2808_vm8 = vcmp.eq.s32.totalorder %v2452_v12, %v10839_v60  ;;  %v5114_v22 = vpop.f32.mrb[239].mxu0  ;;  %v5409_v17 = vpop.f32.mrb[50].mxu1 }
 0x476   :  { %v7191_v40 = vunpack.c.l.b16 %v7008_v58  ;;  %v5980_v8 = vadd.f32 %v13413_v16, %v5407_v45  ;;  %vm8709_vm9 = vmpackc.low %vm2808_vm8, %vm2807_vm6  ;;  %v5410_v52 = vadd.f32 %v5409_v17, %v15592_v5  ;;  %v5411_v55 = vpop.f32.mrb[51].mxu1  ;;  %9100 = vset.pattern.permute.xlu1 %v15296_v48  ;;  %9172 = vset.pattern.permute.xlu0 %v15296_v48  ;;  %vm3852_vm8 = vcmp.eq.s32.totalorder %v13418_v36, %v10839_v60  ;;  %v9487_v36 = vld [vmem:[%s14948_s0 + $0x2a8] sm:$0xff] }
 0x477   :  { %v6519_v11 = vmax.f32 %v6517_v62, %v6518_v46  ;;  %2517 = vperm.xlu1 %9100, %v9483_v41   ;;  %8710 = vmatmul.mubr.msk.bf16.gmra.mrb[120].mxu1 %vm8709_vm9, %v15268_v0 }
 0x478   :  { %v7276_v59 = vsel %vm7263_vm1, %v7191_v40, %v13541_v28  ;;  %v6140_v58 = vmax.f32 %v5980_v8, 0.0  ;;  %v5981_v45 = vadd.f32 %v13413_v16, %v5410_v52  ;;  %2682 = vperm.xlu0 %9172, %v9482_v38   ;;  %v13600_v8 = vpop.permute.xlu0 %2502  ;;  %v9485_v38 = vld [vmem:[%s14948_s0 + $0x2a0] sm:$0xff] }
 0x479   :  { %v6520_v17 = vrot.slane %v6519_v11, 1  ;;  %v3498_v7 = vpop.permute.xlu1 %3497  ;;  %v13594_v23 = vpop.f32.mrb[240].mxu0 }
 0x47a   :  { %v6141_v62 = vmax.f32 %v5981_v45, 0.0  ;;  %vm3850_vm11 = vcmp.eq.s32.totalorder %v3498_v7, %v10839_v60  ;;  %v5119_v41 = vpop.f32.mrb[241].mxu0  ;;  %v6302_v28 = vadd.f32 %v13438_v15, %v6140_v58 }
 0x47b   :  { %v6521_v12 = vmax.f32 %v6519_v11, %v6520_v17  ;;  %vm8711_vm12 = vmpackc.low %vm3850_vm11, %vm3849_vm10  ;;  %9101 = vset.pattern.permute.xlu1 %v15285_v20  ;;  %v13598_v40 = vpop.f32.mrb[242].mxu0  ;;  %v9486_v11 = vld [vmem:[%s14948_s0 + $0x470] sm:$0xff] }
 0x47c   :  { %v6303_v1 = vadd.f32 %v13444_v27, %v6141_v62  ;;  %3560 = vperm.xlu1 %9101, %v9485_v38   ;;  %v5122_v46 = vpop.f32.mrb[243].mxu0  ;;  %v5414_v22 = vpop.f32.mrb[52].mxu1  ;;  %8712 = vmatprep.mubr.msk.bf16.mxu1 %vm8711_vm12, %v15268_v0 }
 0x47d   :  { %v7009_v5 = vpack.c.bf16 %v6521_v12, %v6521_v12  ;;  %v5415_v52 = vadd.f32 %v5414_v22, %v12002_v6  ;;  %v5416_v55 = vpop.f32.mrb[53].mxu1  ;;  %2694 = vperm.xlu0 %9172, %v9486_v11  }
 0x47e   :  { %v6522_v58 = vmax.f32 %v6302_v28, %v6303_v1  ;;  %v2458_v45 = vpop.permute.xlu1 %2457  ;;  %v5417_v17 = vpop.f32.mrb[54].mxu1 }
 0x47f   :  { %v7192_v7 = vunpack.c.l.b16 %v7009_v5  ;;  %v5982_v62 = vadd.f32 %v13413_v16, %v5415_v52  ;;  %vm2810_vm3 = vcmp.eq.s32.totalorder %v2458_v45, %v10839_v60  ;;  %v5418_v41 = vadd.f32 %v5417_v17, %v12008_v39  ;;  %v5419_v12 = vpop.f32.mrb[55].mxu1  ;;  %v13627_v39 = vpop.permute.xlu0 %3542 }
 0x480   :  { %v6523_v2 = vrot.slane %v6522_v58, 4  ;;  %vm8713_vm6 = vmpackc.low %vm2810_vm3, %vm2809_vm14  ;;  %9103 = vset.pattern.permute.xlu1 %v15296_v48  ;;  %vm3853_vm3 = vcmp.eq.s32.totalorder %v13430_v25, %v10839_v60 }
 0x481   :  { %v13619_v6 = vsel %vm7265_vm0, %v7192_v7, %v7276_v59  ;;  %v6142_v46 = vmax.f32 %v5982_v62, 0.0  ;;  %v5983_v28 = vadd.f32 %v13413_v16, %v5418_v41  ;;  %2520 = vperm.xlu1 %9103, %v9485_v38   ;;  %v13622_v1 = vpop.f32.mrb[244].mxu0  ;;  %8714 = vmatmul.mubr.msk.bf16.gmra.mrb[124].mxu1 %vm8713_vm6, %v15268_v0  ;;  %v9488_v41 = vld [vmem:[%s14948_s0 + $0x488] sm:$0xff] }
 0x482   :  { %15593 = vst [vmem:[#allocation12_spill] sm:$0xff] %v13622_v1  ;;  %v6524_v22 = vmax.f32 %v6522_v58, %v6523_v2  ;;  %v5127_v5 = vpop.f32.mrb[245].mxu0  ;;  %9175 = vset.pattern.permute.xlu0 %v15285_v20 }
 0x483   :  { %v6143_v52 = vmax.f32 %v5983_v28, 0.0  ;;  %v3501_v59 = vpop.permute.xlu1 %3500  ;;  %v13630_v55 = vpop.f32.mrb[246].mxu0  ;;  %3734 = vperm.xlu0 %9175, %v9486_v11   ;;  %v6304_v17 = vadd.f32 %v13438_v15, %v6142_v46 }
 0x484   :  { %15594 = vst [vmem:[#allocation133_spill] sm:$0xff] %v13630_v55  ;;  %v6525_v45 = vrot.slane %v6524_v22, 2  ;;  %vm3851_vm9 = vcmp.eq.s32.totalorder %v3501_v59, %v10839_v60  ;;  %v5130_v38 = vpop.f32.mrb[247].mxu0  ;;  %v13639_v62 = vpop.permute.xlu0 %3551 }
 0x485   :  { %v6305_v58 = vadd.f32 %v13444_v27, %v6143_v52  ;;  %vm8715_vm10 = vmpackc.low %vm3852_vm8, %vm3851_vm9  ;;  %2523 = vperm.xlu1 %9103, %v9487_v36   ;;  %vm2813_vm9 = vcmp.eq.s32.totalorder %v13487_v42, %v10839_v60 }
 0x486   :  { %v6526_v7 = vmax.f32 %v6524_v22, %v6525_v45  ;;  %8716 = vmatprep.mubr.msk.bf16.mxu1 %vm8715_vm10, %v15268_v0  ;;  %v9489_v22 = vld [vmem:[%s14948_s0 + $0x2b8] sm:$0xff] }
 0x487   :  { %v6529_v11 = vmax.f32 %v6304_v17, %v6305_v58  ;;  %3743 = vperm.xlu0 %9175, %v9488_v41   ;;  %v9490_v58 = vld [vmem:[%s14948_s0 + $0x490] sm:$0xff] }
 0x488   :  { %v6527_v12 = vrot.slane %v6526_v7, 1  ;;  %v2461_v2 = vpop.permute.xlu1 %2460  ;;  %v13650_v59 = vpop.permute.xlu0 %3554 }
 0x489   :  { %v6530_v46 = vrot.slane %v6529_v11, 4  ;;  %9104 = vset.pattern.permute.xlu1 %v15285_v20  ;;  %v13645_v28 = vpop.f32.mrb[248].mxu0  ;;  %vm2811_vm11 = vcmp.eq.s32.totalorder %v2461_v2, %v10839_v60 }
 0x48a   :  { %15595 = vst [vmem:[#allocation134_spill] sm:$0xff] %v13645_v28  ;;  %v6528_v5 = vmax.f32 %v6526_v7, %v6527_v12  ;;  %3569 = vperm.xlu1 %9104, %v9489_v22   ;;  %v5135_v52 = vpop.f32.mrb[249].mxu0 }
 0x48b   :  { %v6531_v45 = vmax.f32 %v6529_v11, %v6530_v46  ;;  %v5422_v38 = vpop.f32.mrb[56].mxu1  ;;  %v13652_v17 = vpop.f32.mrb[250].mxu0  ;;  %3746 = vperm.xlu0 %9175, %v9490_v58  }
 0x48c   :  { %15596 = vst [vmem:[#allocation5_spill] sm:$0xff] %v13652_v17  ;;  %v7010_v36 = vpack.c.bf16 %v6528_v5, %v6528_v5  ;;  %v5423_v7 = vadd.f32 %v5422_v38, %v12024_v13  ;;  %v5424_v41 = vpop.f32.mrb[57].mxu1  ;;  %v2464_v12 = vpop.permute.xlu1 %2463 }
 0x48d   :  { %v6532_v28 = vrot.slane %v6531_v45, 2  ;;  %vm2812_vm12 = vcmp.eq.s32.totalorder %v2464_v12, %v10839_v60  ;;  %v5138_v52 = vpop.f32.mrb[251].mxu0  ;;  %v5425_v11 = vpop.f32.mrb[58].mxu1  ;;  %v9492_v41 = vld [vmem:[%s14948_s0 + $0x2c0] sm:$0xff] }
 0x48e   :  { %v7193_v46 = vunpack.c.l.b16 %v7010_v36  ;;  %v5984_v17 = vadd.f32 %v13413_v16, %v5423_v7  ;;  %vm8717_vm14 = vmpackc.low %vm2812_vm12, %vm2811_vm11  ;;  %v5426_v55 = vadd.f32 %v5425_v11, %v12034_v37  ;;  %v5427_v1 = vpop.f32.mrb[59].mxu1  ;;  %9106 = vset.pattern.permute.xlu1 %v15296_v48  ;;  %v9491_v37 = vld [vmem:[%s14948_s0 + $0x4a8] sm:$0xff]  ;;  %vm3856_vm12 = vcmp.eq.s32.totalorder %v13464_v10, %v10839_v60 }
 0x48f   :  { %v6533_v5 = vmax.f32 %v6531_v45, %v6532_v28  ;;  %2529 = vperm.xlu1 %9106, %v9489_v22   ;;  %8718 = vmatmul.mubr.msk.bf16.gmra.mrb[128].mxu1 %vm8717_vm14, %v15268_v0 }
 0x490   :  { %v7278_v13 = vsel %vm7267_vm5, %v7193_v46, %v13619_v6  ;;  %v6144_v2 = vmax.f32 %v5984_v17, 0.0  ;;  %v5985_v38 = vadd.f32 %v13413_v16, %v5426_v55  ;;  %3755 = vperm.xlu0 %9175, %v9491_v37   ;;  %v13675_v6 = vpop.permute.xlu0 %3563 }
 0x491   :  { %v6534_v1 = vrot.slane %v6533_v5, 1  ;;  %v3510_v36 = vpop.permute.xlu1 %3509  ;;  %v13672_v28 = vpop.f32.mrb[252].mxu0 }
 0x492   :  { %v6145_v22 = vmax.f32 %v5985_v38, 0.0  ;;  %vm3854_vm6 = vcmp.eq.s32.totalorder %v3510_v36, %v10839_v60  ;;  %v5143_v45 = vpop.f32.mrb[253].mxu0  ;;  %v6306_v55 = vadd.f32 %v13438_v15, %v6144_v2 }
 0x493   :  { %v6535_v17 = vmax.f32 %v6533_v5, %v6534_v1  ;;  %vm8719_vm8 = vmpackc.low %vm3854_vm6, %vm3853_vm3  ;;  %9107 = vset.pattern.permute.xlu1 %v15285_v20  ;;  %v13678_v25 = vpop.f32.mrb[254].mxu0 }
 0x494   :  { %v6307_v7 = vadd.f32 %v13444_v27, %v6145_v22  ;;  %3572 = vperm.xlu1 %9107, %v9492_v41   ;;  %v5146_v12 = vpop.f32.mrb[255].mxu0  ;;  %v5430_v52 = vpop.f32.mrb[60].mxu1  ;;  %8720 = vmatprep.mubr.msk.bf16.mxu1 %vm8719_vm8, %v15268_v0 }
 0x495   :  { %v7011_v11 = vpack.c.bf16 %v6535_v17, %v6535_v17  ;;  %v5431_v46 = vadd.f32 %v5430_v52, %v12049_v57  ;;  %v5432_v5 = vpop.f32.mrb[61].mxu1  ;;  %9182 = vset.pattern.permute.xlu0 %v15296_v48  ;;  %v13694_v57 = vpop.permute.xlu0 %2514  ;;  %v9493_v52 = vld [vmem:[%s14948_s0 + $0x4b0] sm:$0xff] }
 0x496   :  { %v6536_v2 = vmax.f32 %v6306_v55, %v6307_v7  ;;  %v2470_v38 = vpop.permute.xlu1 %2469  ;;  %v5433_v37 = vpop.f32.mrb[62].mxu1  ;;  %2706 = vperm.xlu0 %9182, %v9490_v58  }
 0x497   :  { %v7194_v1 = vunpack.c.l.b16 %v7011_v11  ;;  %v5986_v36 = vadd.f32 %v13413_v16, %v5431_v46  ;;  %vm2814_vm10 = vcmp.eq.s32.totalorder %v2470_v38, %v10839_v60  ;;  %v5434_v22 = vadd.f32 %v5433_v37, %v12061_v43  ;;  %v5435_v45 = vpop.f32.mrb[63].mxu1  ;;  %v9494_v37 = vld [vmem:[%s14948_s0 + $0x2c8] sm:$0xff] }
 0x498   :  { %v6537_v17 = vrot.slane %v6536_v2, 4  ;;  %vm8721_vm11 = vmpackc.low %vm2814_vm10, %vm2813_vm9  ;;  %9108 = vset.pattern.permute.xlu1 %v15296_v48  ;;  %vm3857_vm10 = vcmp.eq.s32.totalorder %v13513_v24, %v10839_v60 }
 0x499   :  { %v13697_v42 = vsel %vm7269_vm7, %v7194_v1, %v7278_v13  ;;  %v6146_v55 = vmax.f32 %v5986_v36, 0.0  ;;  %v5987_v58 = vadd.f32 %v13413_v16, %v5434_v22  ;;  %2532 = vperm.xlu1 %9108, %v9492_v41   ;;  %v13700_v7 = vpop.f32.mrb[0].mxu0  ;;  %8722 = vmatmul.mubr.msk.bf16.gmra.mrb[132].mxu1 %vm8721_vm11, %v15268_v0  ;;  %v13711_v38 = vpop.permute.xlu0 %2526 }
 0x49a   :  { %v6538_v12 = vmax.f32 %v6536_v2, %v6537_v17  ;;  %v5151_v43 = vpop.f32.mrb[1].mxu0  ;;  %2718 = vperm.xlu0 %9182, %v9493_v52  }
 0x49b   :  { %v6147_v13 = vmax.f32 %v5987_v58, 0.0  ;;  %v3513_v11 = vpop.permute.xlu1 %3512  ;;  %v13708_v46 = vpop.f32.mrb[2].mxu0  ;;  %v6308_v2 = vadd.f32 %v13438_v15, %v6146_v55  ;;  %v9495_v43 = vld [vmem:[%s14948_s0 + $0x2d8] sm:$0xff] }
 0x49c   :  { %15597 = vst [vmem:[#allocation6_spill] sm:$0xff] %v13708_v46  ;;  %v6539_v5 = vrot.slane %v6538_v12, 2  ;;  %vm3855_vm14 = vcmp.eq.s32.totalorder %v3513_v11, %v10839_v60  ;;  %v5154_v41 = vpop.f32.mrb[3].mxu0 }
 0x49d   :  { %v6309_v10 = vadd.f32 %v13444_v27, %v6147_v13  ;;  %vm8723_vm3 = vmpackc.low %vm3856_vm12, %vm3855_vm14  ;;  %2535 = vperm.xlu1 %9108, %v9494_v37   ;;  %v13726_v13 = vpop.permute.xlu0 %3566  ;;  %vm2817_vm14 = vcmp.eq.s32.totalorder %v13498_v14, %v10839_v60 }
 0x49e   :  { %v6540_v1 = vmax.f32 %v6538_v12, %v6539_v5  ;;  %8724 = vmatprep.mubr.msk.bf16.mxu1 %vm8723_vm3, %v15268_v0  ;;  %9185 = vset.pattern.permute.xlu0 %v15285_v20 }
 0x49f   :  { %v6543_v36 = vmax.f32 %v6308_v2, %v6309_v10  ;;  %3758 = vperm.xlu0 %9185, %v9493_v52   ;;  %v9496_v52 = vld [vmem:[%s14948_s0 + $0x4c8] sm:$0xff] }
 0x4a0   :  { %v6541_v22 = vrot.slane %v6540_v1, 1  ;;  %v2473_v45 = vpop.permute.xlu1 %2472 }
 0x4a1   :  { %v6544_v17 = vrot.slane %v6543_v36, 4  ;;  %9109 = vset.pattern.permute.xlu1 %v15285_v20  ;;  %v13721_v55 = vpop.f32.mrb[4].mxu0  ;;  %vm2815_vm6 = vcmp.eq.s32.totalorder %v2473_v45, %v10839_v60 }
 0x4a2   :  { %15598 = vst [vmem:[#allocation135_spill] sm:$0xff] %v13721_v55  ;;  %v6542_v58 = vmax.f32 %v6540_v1, %v6541_v22  ;;  %3581 = vperm.xlu1 %9109, %v9495_v43   ;;  %v5159_v12 = vpop.f32.mrb[5].mxu0 }
 0x4a3   :  { %v6545_v11 = vmax.f32 %v6543_v36, %v6544_v17  ;;  %v5438_v5 = vpop.f32.mrb[64].mxu1  ;;  %v13728_v41 = vpop.f32.mrb[6].mxu0  ;;  %3767 = vperm.xlu0 %9185, %v9496_v52  }
 0x4a4   :  { %15599 = vst [vmem:[#allocation136_spill] sm:$0xff] %v13728_v41  ;;  %v7012_v2 = vpack.c.bf16 %v6542_v58, %v6542_v58  ;;  %v5439_v10 = vadd.f32 %v5438_v5, %v12079_v56  ;;  %v5440_v37 = vpop.f32.mrb[65].mxu1  ;;  %v2476_v1 = vpop.permute.xlu1 %2475 }
 0x4a5   :  { %v6546_v22 = vrot.slane %v6545_v11, 2  ;;  %vm2816_vm8 = vcmp.eq.s32.totalorder %v2476_v1, %v10839_v60  ;;  %v5162_v12 = vpop.f32.mrb[7].mxu0  ;;  %v5441_v36 = vpop.f32.mrb[66].mxu1  ;;  %v9498_v1 = vld [vmem:[%s14948_s0 + $0x2e0] sm:$0xff] }
 0x4a6   :  { %v7195_v17 = vunpack.c.l.b16 %v7012_v2  ;;  %v5988_v41 = vadd.f32 %v13413_v16, %v5439_v10  ;;  %vm8725_vm9 = vmpackc.low %vm2816_vm8, %vm2815_vm6  ;;  %v5442_v55 = vadd.f32 %v5441_v36, %v12093_v51  ;;  %v5443_v46 = vpop.f32.mrb[67].mxu1  ;;  %9110 = vset.pattern.permute.xlu1 %v15296_v48  ;;  %v13739_v58 = vpop.permute.xlu0 %3575  ;;  %v9497_v51 = vld [vmem:[%s14948_s0 + $0x4d0] sm:$0xff]  ;;  %vm3860_vm8 = vcmp.eq.s32.totalorder %v13533_v50, %v10839_v60 }
 0x4a7   :  { %v6547_v56 = vmax.f32 %v6545_v11, %v6546_v22  ;;  %2541 = vperm.xlu1 %9110, %v9495_v43   ;;  %8726 = vmatmul.mubr.msk.bf16.gmra.mrb[136].mxu1 %vm8725_vm9, %v15268_v0 }
 0x4a8   :  { %v7280_v45 = vsel %vm7271_vm4, %v7195_v17, %v13697_v42  ;;  %v6148_v5 = vmax.f32 %v5988_v41, 0.0  ;;  %v5989_v52 = vadd.f32 %v13413_v16, %v5442_v55  ;;  %3770 = vperm.xlu0 %9185, %v9497_v51  }
 0x4a9   :  { %v6548_v46 = vrot.slane %v6547_v56, 1  ;;  %v3522_v2 = vpop.permute.xlu1 %3521  ;;  %v13750_v11 = vpop.f32.mrb[8].mxu0 }
 0x4aa   :  { %v6149_v43 = vmax.f32 %v5989_v52, 0.0  ;;  %vm3858_vm11 = vcmp.eq.s32.totalorder %v3522_v2, %v10839_v60  ;;  %v5167_v10 = vpop.f32.mrb[9].mxu0  ;;  %v13753_v42 = vpop.permute.xlu0 %3578  ;;  %v6310_v55 = vadd.f32 %v13438_v15, %v6148_v5 }
 0x4ab   :  { %v6549_v41 = vmax.f32 %v6547_v56, %v6548_v46  ;;  %vm8727_vm12 = vmpackc.low %vm3858_vm11, %vm3857_vm10  ;;  %9111 = vset.pattern.permute.xlu1 %v15285_v20  ;;  %v13756_v24 = vpop.f32.mrb[10].mxu0 }
 0x4ac   :  { %v6311_v37 = vadd.f32 %v13444_v27, %v6149_v43  ;;  %3584 = vperm.xlu1 %9111, %v9498_v1   ;;  %v5170_v22 = vpop.f32.mrb[11].mxu0  ;;  %v5446_v12 = vpop.f32.mrb[68].mxu1  ;;  %8728 = vmatprep.mubr.msk.bf16.mxu1 %vm8727_vm12, %v15268_v0 }
 0x4ad   :  { %v7013_v36 = vpack.c.bf16 %v6549_v41, %v6549_v41  ;;  %v5447_v17 = vadd.f32 %v5446_v12, %v12106_v61  ;;  %v5448_v56 = vpop.f32.mrb[69].mxu1  ;;  %9190 = vset.pattern.permute.xlu0 %v15296_v48 }
 0x4ae   :  { %v6550_v5 = vmax.f32 %v6310_v55, %v6311_v37  ;;  %v2482_v52 = vpop.permute.xlu1 %2481  ;;  %v5449_v46 = vpop.f32.mrb[70].mxu1  ;;  %2730 = vperm.xlu0 %9190, %v9497_v51  }
 0x4af   :  { %v7196_v2 = vunpack.c.l.b16 %v7013_v36  ;;  %v5990_v43 = vadd.f32 %v13413_v16, %v5447_v17  ;;  %vm2818_vm3 = vcmp.eq.s32.totalorder %v2482_v52, %v10839_v60  ;;  %v5450_v10 = vadd.f32 %v5449_v46, %v12115_v53  ;;  %v5451_v41 = vpop.f32.mrb[71].mxu1  ;;  %v13772_v61 = vpop.permute.xlu0 %3587  ;;  %v9500_v46 = vld [vmem:[%s14948_s0 + $0x2e8] sm:$0xff] }
 0x4b0   :  { %v6551_v22 = vrot.slane %v6550_v5, 4  ;;  %vm8729_vm6 = vmpackc.low %vm2818_vm3, %vm2817_vm14  ;;  %9113 = vset.pattern.permute.xlu1 %v15296_v48  ;;  %v9501_v41 = vld [vmem:[%s14948_s0 + $0x4f0] sm:$0xff]  ;;  %vm3861_vm3 = vcmp.eq.s32.totalorder %v13549_v29, %v10839_v60 }
 0x4b1   :  { %v7281_v14 = vsel %vm7273_vm2, %v7196_v2, %v7280_v45  ;;  %v6150_v55 = vmax.f32 %v5990_v43, 0.0  ;;  %v5991_v37 = vadd.f32 %v13413_v16, %v5450_v10  ;;  %2544 = vperm.xlu1 %9113, %v9498_v1   ;;  %v13776_v51 = vpop.f32.mrb[12].mxu0  ;;  %8730 = vmatmul.mubr.msk.bf16.gmra.mrb[140].mxu1 %vm8729_vm6, %v15268_v0  ;;  %v9499_v1 = vld [vmem:[%s14948_s0 + $0x4e8] sm:$0xff] }
 0x4b2   :  { %v7338_v12 = vpack.c.b16 %v7281_v14, %v13467_v44  ;;  %v6552_v53 = vmax.f32 %v6550_v5, %v6551_v22  ;;  %v5175_v36 = vpop.f32.mrb[13].mxu0  ;;  %9193 = vset.pattern.permute.xlu0 %v15285_v20 }
 0x4b3   :  { %v6151_v17 = vmax.f32 %v5991_v37, 0.0  ;;  %v3525_v56 = vpop.permute.xlu1 %3524  ;;  %v13783_v45 = vpop.f32.mrb[14].mxu0  ;;  %3779 = vperm.xlu0 %9193, %v9499_v1   ;;  %v6312_v5 = vadd.f32 %v13438_v15, %v6150_v55 }
 0x4b4   :  { %v6553_v52 = vrot.slane %v6552_v53, 2  ;;  %vm3859_vm9 = vcmp.eq.s32.totalorder %v3525_v56, %v10839_v60  ;;  %v5178_v44 = vpop.f32.mrb[15].mxu0  ;;  %8947 = vmatmul.mubr.bf16.vlgmr.msra.gmra.mrb[64].mxu0 %v7338_v12  ;;  %v13797_v43 = vpop.permute.xlu0 %2538  ;;  %v9502_v12 = vld [vmem:[%s14948_s0 + $0x2f8] sm:$0xff] }
 0x4b5   :  { %v6313_v50 = vadd.f32 %v13444_v27, %v6151_v17  ;;  %vm8731_vm10 = vmpackc.low %vm3860_vm8, %vm3859_vm9  ;;  %2547 = vperm.xlu1 %9113, %v9500_v46   ;;  %8950 = vmatprep.mubr.msk.bf16.mxu0 %vm9595_vm15, %v15537_v4  ;;  %vm2821_vm9 = vcmp.eq.s32.totalorder %v13587_v63, %v10839_v60 }
 0x4b6   :  { %v6554_v2 = vmax.f32 %v6552_v53, %v6553_v52  ;;  %8732 = vmatprep.mubr.msk.bf16.mxu1 %vm8731_vm10, %v15268_v0 }
 0x4b7   :  { %v6557_v10 = vmax.f32 %v6312_v5, %v6313_v50  ;;  %3782 = vperm.xlu0 %9193, %v9501_v41  }
 0x4b8   :  { %v2485_v22 = vpop.permute.xlu1 %2484  ;;  %v6555_v37 = vrot.slane %v6554_v2, 1  ;;  %v13808_v36 = vpop.permute.xlu0 %2550 }
 0x4b9   :  { %v6558_v14 = vrot.slane %v6557_v10, 4  ;;  %9114 = vset.pattern.permute.xlu1 %v15285_v20  ;;  %v13803_v55 = vpop.f32.mrb[16].mxu0  ;;  %vm2819_vm11 = vcmp.eq.s32.totalorder %v2485_v22, %v10839_v60 }
 0x4ba   :  { %15600 = vst [vmem:[#allocation15_spill] sm:$0xff] %v13803_v55  ;;  %3593 = vperm.xlu1 %9114, %v9502_v12   ;;  %v5183_v53 = vpop.f32.mrb[17].mxu0  ;;  %v6556_v55 = vmax.f32 %v6554_v2, %v6555_v37 }
 0x4bb   :  { %v6559_v17 = vmax.f32 %v6557_v10, %v6558_v14  ;;  %v5454_v56 = vpop.f32.mrb[72].mxu1  ;;  %v13810_v1 = vpop.f32.mrb[18].mxu0  ;;  %9196 = vset.pattern.permute.xlu0 %v15296_v48 }
 0x4bc   :  { %15601 = vst [vmem:[#allocation137_spill] sm:$0xff] %v13810_v1  ;;  %v5455_v52 = vadd.f32 %v5454_v56, %v12128_v34  ;;  %v5456_v44 = vpop.f32.mrb[73].mxu1  ;;  %v2488_v5 = vpop.permute.xlu1 %2487  ;;  %2742 = vperm.xlu0 %9196, %v9501_v41  }
 0x4bd   :  { %v6560_v50 = vrot.slane %v6559_v17, 2  ;;  %vm2820_vm12 = vcmp.eq.s32.totalorder %v2488_v5, %v10839_v60  ;;  %v5186_v46 = vpop.f32.mrb[19].mxu0  ;;  %v5457_v53 = vpop.f32.mrb[74].mxu1  ;;  %v9503_v44 = vld [vmem:[%s14948_s0 + $0x300] sm:$0xff] }
 0x4be   :  { %v5992_v10 = vadd.f32 %v13413_v16, %v5455_v52  ;;  %vm8733_vm14 = vmpackc.low %vm2820_vm12, %vm2819_vm11  ;;  %v5458_v14 = vadd.f32 %v5457_v53, %v12140_v3  ;;  %v5459_v1 = vpop.f32.mrb[75].mxu1  ;;  %9116 = vset.pattern.permute.xlu1 %v15296_v48  ;;  %v7014_v3 = vpack.c.bf16 %v6556_v55, %v6556_v55  ;;  %vm3864_vm12 = vcmp.eq.s32.totalorder %v13569_v19, %v10839_v60  ;;  %v13867_v19 = vld [vmem:[%s14953_s5 + $0x8] sm:$0xff] }
 0x4bf   :  { %v6561_v34 = vmax.f32 %v6559_v17, %v6560_v50  ;;  %2553 = vperm.xlu1 %9116, %v9502_v12   ;;  %8734 = vmatmul.mubr.msk.bf16.gmra.mrb[144].mxu1 %vm8733_vm14, %v15268_v0 }
 0x4c0   :  { %v6152_v41 = vmax.f32 %v5992_v10, 0.0  ;;  %v5993_v22 = vadd.f32 %v13413_v16, %v5458_v14  ;;  %9198 = vset.pattern.permute.xlu0 %v15285_v20  ;;  %v7197_v10 = vunpack.c.l.b16 %v7014_v3 }
 0x4c1   :  { %v6562_v2 = vrot.slane %v6561_v34, 1  ;;  %v3534_v37 = vpop.permute.xlu1 %3533  ;;  %v13824_v56 = vpop.f32.mrb[20].mxu0 }
 0x4c2   :  { %v6153_v1 = vmax.f32 %v5993_v22, 0.0  ;;  %vm3862_vm6 = vcmp.eq.s32.totalorder %v3534_v37, %v10839_v60  ;;  %v5191_v17 = vpop.f32.mrb[21].mxu0  ;;  %v6314_v16 = vadd.f32 %v13438_v15, %v6152_v41  ;;  %v13842_v41 = vld [vmem:[%s14950_s2] ss:$0 sm:$0xff] }
 0x4c3   :  { %v6563_v12 = vmax.f32 %v6561_v34, %v6562_v2  ;;  %vm8735_vm8 = vmpackc.low %vm3862_vm6, %vm3861_vm3  ;;  %9117 = vset.pattern.permute.xlu1 %v15285_v20  ;;  %v13828_v52 = vpop.f32.mrb[22].mxu0  ;;  %v15602_v2 = vld [vmem:[#allocation64_spill] sm:$0xff] }
 0x4c4   :  { %v6315_v29 = vadd.f32 %v13444_v27, %v6153_v1  ;;  %3596 = vperm.xlu1 %9117, %v9503_v44   ;;  %v5194_v55 = vpop.f32.mrb[23].mxu0  ;;  %v5462_v5 = vpop.f32.mrb[76].mxu1  ;;  %8736 = vmatprep.mubr.msk.bf16.mxu1 %vm8735_vm8, %v15268_v0 }
 0x4c5   :  { %v7015_v50 = vpack.c.bf16 %v6563_v12, %v6563_v12  ;;  %v5463_v46 = vadd.f32 %v5462_v5, %v12161_v32  ;;  %v5464_v53 = vpop.f32.mrb[77].mxu1 }
 0x4c6   :  { %v6564_v15 = vmax.f32 %v6314_v16, %v6315_v29  ;;  %v2494_v14 = vpop.permute.xlu1 %2493  ;;  %v5465_v27 = vpop.f32.mrb[78].mxu1 }
 0x4c7   :  { %v7198_v34 = vunpack.c.l.b16 %v7015_v50  ;;  %v5994_v22 = vadd.f32 %v13842_v41, %v5463_v46  ;;  %vm2822_vm10 = vcmp.eq.s32.totalorder %v2494_v14, %v10839_v60  ;;  %v5466_v32 = vadd.f32 %v5465_v27, %v15602_v2  ;;  %v5467_v37 = vpop.f32.mrb[79].mxu1  ;;  %v9507_v14 = vld [vmem:[%s14948_s0 + $0x308] sm:$0xff] }
 0x4c8   :  { %v6565_v1 = vrot.slane %v6564_v15, 4  ;;  %vm8737_vm11 = vmpackc.low %vm2822_vm10, %vm2821_vm9  ;;  %9118 = vset.pattern.permute.xlu1 %v15296_v48  ;;  %vm3865_vm10 = vcmp.eq.s32.totalorder %v13627_v39, %v10839_v60  ;;  %v9509_v39 = vld [vmem:[%s14948_s0 + $0x320] sm:$0xff] }
 0x4c9   :  { %v7282_v63 = vsel %vm7261_vm13, %v7198_v34, %v7197_v10  ;;  %v6154_v3 = vmax.f32 %v5994_v22, 0.0  ;;  %v5995_v17 = vadd.f32 %v13842_v41, %v5466_v32  ;;  %2556 = vperm.xlu1 %9118, %v9503_v44   ;;  %v13850_v12 = vpop.f32.mrb[24].mxu0  ;;  %8738 = vmatmul.mubr.msk.bf16.gmra.mrb[148].mxu1 %vm8737_vm11, %v15268_v0  ;;  %v13861_v44 = vld [vmem:[%s14953_s5] sm:$0xff] }
 0x4ca   :  { %v6566_v16 = vmax.f32 %v6564_v15, %v6565_v1  ;;  %v5199_v29 = vpop.f32.mrb[25].mxu0 }
 0x4cb   :  { %v6155_v55 = vmax.f32 %v5995_v17, 0.0  ;;  %v3537_v5 = vpop.permute.xlu1 %3536  ;;  %v13855_v50 = vpop.f32.mrb[26].mxu0  ;;  %v6316_v10 = vadd.f32 %v13861_v44, %v6154_v3  ;;  %v9508_v3 = vld [vmem:[%s14948_s0 + $0x318] sm:$0xff] }
 0x4cc   :  { %15603 = vst [vmem:[#allocation138_spill] sm:$0xff] %v13855_v50  ;;  %v6567_v46 = vrot.slane %v6566_v16, 2  ;;  %vm3863_vm14 = vcmp.eq.s32.totalorder %v3537_v5, %v10839_v60  ;;  %v5202_v53 = vpop.f32.mrb[27].mxu0 }
 0x4cd   :  { %v6317_v15 = vadd.f32 %v13867_v19, %v6155_v55  ;;  %vm8739_vm3 = vmpackc.low %vm3864_vm12, %vm3863_vm14  ;;  %2559 = vperm.xlu1 %9118, %v9507_v14   ;;  %vm2825_vm14 = vcmp.eq.s32.totalorder %v13600_v8, %v10839_v60 }
 0x4ce   :  { %v6568_v27 = vmax.f32 %v6566_v16, %v6567_v46  ;;  %8740 = vmatprep.mubr.msk.bf16.mxu1 %vm8739_vm3, %v15268_v0  ;;  %v15605_v46 = vld [vmem:[#allocation65_spill] sm:$0xff] }
 0x4cf   :  { %v6571_v34 = vmax.f32 %v6316_v10, %v6317_v15 }
 0x4d0   :  { %v6569_v22 = vrot.slane %v6568_v27, 1  ;;  %v2497_v2 = vpop.permute.xlu1 %2496 }
 0x4d1   :  { %v6572_v32 = vrot.slane %v6571_v34, 4  ;;  %9119 = vset.pattern.permute.xlu1 %v15285_v20  ;;  %v13875_v37 = vpop.f32.mrb[28].mxu0  ;;  %vm2823_vm6 = vcmp.eq.s32.totalorder %v2497_v2, %v10839_v60 }
 0x4d2   :  { %15604 = vst [vmem:[#allocation19_spill] sm:$0xff] %v13875_v37  ;;  %v6570_v1 = vmax.f32 %v6568_v27, %v6569_v22  ;;  %3605 = vperm.xlu1 %9119, %v9508_v3   ;;  %v5207_v17 = vpop.f32.mrb[29].mxu0 }
 0x4d3   :  { %v6573_v29 = vmax.f32 %v6571_v34, %v6572_v32  ;;  %v5470_v55 = vpop.f32.mrb[80].mxu1  ;;  %v13880_v16 = vpop.f32.mrb[30].mxu0 }
 0x4d4   :  { %v7016_v5 = vpack.c.bf16 %v6570_v1, %v6570_v1  ;;  %v5471_v53 = vadd.f32 %v5470_v55, %v15605_v46  ;;  %v5472_v10 = vpop.f32.mrb[81].mxu1  ;;  %v2500_v15 = vpop.permute.xlu1 %2499 }
 0x4d5   :  { %v6574_v14 = vrot.slane %v6573_v29, 2  ;;  %vm2824_vm8 = vcmp.eq.s32.totalorder %v2500_v15, %v10839_v60  ;;  %v5210_v27 = vpop.f32.mrb[31].mxu0  ;;  %v5473_v22 = vpop.f32.mrb[82].mxu1 }
 0x4d6   :  { %v7199_v37 = vunpack.c.l.b16 %v7016_v5  ;;  %v5996_v50 = vadd.f32 %v13842_v41, %v5471_v53  ;;  %vm8741_vm9 = vmpackc.low %vm2824_vm8, %vm2823_vm6  ;;  %v5474_v34 = vadd.f32 %v5473_v22, %v12199_v35  ;;  %v5475_v32 = vpop.f32.mrb[83].mxu1  ;;  %9120 = vset.pattern.permute.xlu1 %v15296_v48  ;;  %vm3868_vm8 = vcmp.eq.s32.totalorder %v13639_v62, %v10839_v60 }
 0x4d7   :  { %v6575_v1 = vmax.f32 %v6573_v29, %v6574_v14  ;;  %2565 = vperm.xlu1 %9120, %v9508_v3   ;;  %8742 = vmatmul.mubr.msk.bf16.gmra.mrb[152].mxu1 %vm8741_vm9, %v15268_v0 }
 0x4d8   :  { %v7283_v17 = vsel %vm7263_vm1, %v7199_v37, %v7282_v63  ;;  %v6156_v2 = vmax.f32 %v5996_v50, 0.0  ;;  %v5997_v55 = vadd.f32 %v13842_v41, %v5474_v34 }
 0x4d9   :  { %v6576_v5 = vrot.slane %v6575_v1, 1  ;;  %v3546_v46 = vpop.permute.xlu1 %3545  ;;  %v13893_v53 = vpop.f32.mrb[32].mxu0 }
 0x4da   :  { %v6157_v35 = vmax.f32 %v5997_v55, 0.0  ;;  %vm3866_vm11 = vcmp.eq.s32.totalorder %v3546_v46, %v10839_v60  ;;  %v5215_v10 = vpop.f32.mrb[33].mxu0  ;;  %v6318_v63 = vadd.f32 %v13861_v44, %v6156_v2 }
 0x4db   :  { %v6577_v29 = vmax.f32 %v6575_v1, %v6576_v5  ;;  %vm8743_vm12 = vmpackc.low %vm3866_vm11, %vm3865_vm10  ;;  %9121 = vset.pattern.permute.xlu1 %v15285_v20  ;;  %v13897_v3 = vpop.f32.mrb[34].mxu0 }
 0x4dc   :  { %v6319_v50 = vadd.f32 %v13867_v19, %v6157_v35  ;;  %3608 = vperm.xlu1 %9121, %v9509_v39   ;;  %v5218_v37 = vpop.f32.mrb[35].mxu0  ;;  %v5478_v15 = vpop.f32.mrb[84].mxu1  ;;  %8744 = vmatprep.mubr.msk.bf16.mxu1 %vm8743_vm12, %v15268_v0 }
 0x4dd   :  { %v7017_v14 = vpack.c.bf16 %v6577_v29, %v6577_v29  ;;  %v5479_v27 = vadd.f32 %v5478_v15, %v12212_v9  ;;  %v5480_v22 = vpop.f32.mrb[85].mxu1 }
 0x4de   :  { %v6578_v34 = vmax.f32 %v6318_v63, %v6319_v50  ;;  %v2506_v32 = vpop.permute.xlu1 %2505  ;;  %v5481_v1 = vpop.f32.mrb[86].mxu1  ;;  %v9510_v22 = vld [vmem:[%s14948_s0 + $0x328] sm:$0xff] }
 0x4df   :  { %v7200_v2 = vunpack.c.l.b16 %v7017_v14  ;;  %v5998_v55 = vadd.f32 %v13842_v41, %v5479_v27  ;;  %vm2826_vm3 = vcmp.eq.s32.totalorder %v2506_v32, %v10839_v60  ;;  %v5482_v5 = vadd.f32 %v5481_v1, %v12224_v30  ;;  %v5483_v46 = vpop.f32.mrb[87].mxu1 }
 0x4e0   :  { %v6579_v35 = vrot.slane %v6578_v34, 4  ;;  %vm8745_vm6 = vmpackc.low %vm2826_vm3, %vm2825_vm14  ;;  %9123 = vset.pattern.permute.xlu1 %v15296_v48  ;;  %v9511_v46 = vld [vmem:[%s14948_s0 + $0x338] sm:$0xff]  ;;  %vm3869_vm3 = vcmp.eq.s32.totalorder %v13650_v59, %v10839_v60  ;;  %v9512_v59 = vld [vmem:[%s14948_s0 + $0x340] sm:$0xff] }
 0x4e1   :  { %v7284_v8 = vsel %vm7265_vm0, %v7200_v2, %v7283_v17  ;;  %v6158_v10 = vmax.f32 %v5998_v55, 0.0  ;;  %v5999_v9 = vadd.f32 %v13842_v41, %v5482_v5  ;;  %2568 = vperm.xlu1 %9123, %v9509_v39   ;;  %v13914_v29 = vpop.f32.mrb[36].mxu0  ;;  %8746 = vmatmul.mubr.msk.bf16.gmra.mrb[156].mxu1 %vm8745_vm6, %v15268_v0 }
 0x4e2   :  { %v6580_v63 = vmax.f32 %v6578_v34, %v6579_v35  ;;  %v5223_v50 = vpop.f32.mrb[37].mxu0 }
 0x4e3   :  { %v6159_v30 = vmax.f32 %v5999_v9, 0.0  ;;  %v3549_v37 = vpop.permute.xlu1 %3548  ;;  %v13919_v15 = vpop.f32.mrb[38].mxu0  ;;  %v6320_v27 = vadd.f32 %v13861_v44, %v6158_v10 }
 0x4e4   :  { %v6581_v14 = vrot.slane %v6580_v63, 2  ;;  %vm3867_vm9 = vcmp.eq.s32.totalorder %v3549_v37, %v10839_v60  ;;  %v5226_v17 = vpop.f32.mrb[39].mxu0 }
 0x4e5   :  { %v6321_v39 = vadd.f32 %v13867_v19, %v6159_v30  ;;  %vm8747_vm10 = vmpackc.low %vm3868_vm8, %vm3867_vm9  ;;  %2571 = vperm.xlu1 %9123, %v9510_v22   ;;  %vm2829_vm9 = vcmp.eq.s32.totalorder %v13694_v57, %v10839_v60 }
 0x4e6   :  { %v6582_v34 = vmax.f32 %v6580_v63, %v6581_v14  ;;  %8748 = vmatprep.mubr.msk.bf16.mxu1 %vm8747_vm10, %v15268_v0 }
 0x4e7   :  { %v6585_v62 = vmax.f32 %v6320_v27, %v6321_v39 }
 0x4e8   :  { %v6583_v32 = vrot.slane %v6582_v34, 1  ;;  %v2509_v1 = vpop.permute.xlu1 %2508 }
 0x4e9   :  { %v6586_v2 = vrot.slane %v6585_v62, 4  ;;  %9124 = vset.pattern.permute.xlu1 %v15285_v20  ;;  %v13929_v55 = vpop.f32.mrb[40].mxu0  ;;  %vm2827_vm11 = vcmp.eq.s32.totalorder %v2509_v1, %v10839_v60 }
 0x4ea   :  { %v6584_v5 = vmax.f32 %v6582_v34, %v6583_v32  ;;  %3617 = vperm.xlu1 %9124, %v9511_v46   ;;  %v5231_v35 = vpop.f32.mrb[41].mxu0 }
 0x4eb   :  { %v6587_v10 = vmax.f32 %v6585_v62, %v6586_v2  ;;  %v5486_v9 = vpop.f32.mrb[88].mxu1  ;;  %v13934_v63 = vpop.f32.mrb[42].mxu0 }
 0x4ec   :  { %v7018_v50 = vpack.c.bf16 %v6584_v5, %v6584_v5  ;;  %v5487_v30 = vadd.f32 %v5486_v9, %v12240_v31  ;;  %v5488_v37 = vpop.f32.mrb[89].mxu1  ;;  %v2512_v14 = vpop.permute.xlu1 %2511 }
 0x4ed   :  { %v6588_v17 = vrot.slane %v6587_v10, 2  ;;  %vm2828_vm12 = vcmp.eq.s32.totalorder %v2512_v14, %v10839_v60  ;;  %v5234_v27 = vpop.f32.mrb[43].mxu0  ;;  %v5489_v39 = vpop.f32.mrb[90].mxu1 }
 0x4ee   :  { %v7201_v22 = vunpack.c.l.b16 %v7018_v50  ;;  %v6000_v34 = vadd.f32 %v13842_v41, %v5487_v30  ;;  %vm8749_vm14 = vmpackc.low %vm2828_vm12, %vm2827_vm11  ;;  %v5490_v62 = vadd.f32 %v5489_v39, %v12254_v33  ;;  %v5491_v32 = vpop.f32.mrb[91].mxu1  ;;  %9126 = vset.pattern.permute.xlu1 %v15296_v48  ;;  %vm3872_vm12 = vcmp.eq.s32.totalorder %v13675_v6, %v10839_v60 }
 0x4ef   :  { %v6589_v2 = vmax.f32 %v6587_v10, %v6588_v17  ;;  %2577 = vperm.xlu1 %9126, %v9511_v46   ;;  %8750 = vmatmul.mubr.msk.bf16.gmra.mrb[160].mxu1 %vm8749_vm14, %v15268_v0 }
 0x4f0   :  { %v7285_v31 = vsel %vm7267_vm5, %v7201_v22, %v7284_v8  ;;  %v6160_v1 = vmax.f32 %v6000_v34, 0.0  ;;  %v6001_v5 = vadd.f32 %v13842_v41, %v5490_v62 }
 0x4f1   :  { %v6590_v35 = vrot.slane %v6589_v2, 1  ;;  %v3558_v9 = vpop.permute.xlu1 %3557  ;;  %v13947_v50 = vpop.f32.mrb[44].mxu0 }
 0x4f2   :  { %v6161_v33 = vmax.f32 %v6001_v5, 0.0  ;;  %vm3870_vm6 = vcmp.eq.s32.totalorder %v3558_v9, %v10839_v60  ;;  %v5239_v30 = vpop.f32.mrb[45].mxu0  ;;  %v6322_v8 = vadd.f32 %v13861_v44, %v6160_v1 }
 0x4f3   :  { %v6591_v10 = vmax.f32 %v6589_v2, %v6590_v35  ;;  %vm8751_vm8 = vmpackc.low %vm3870_vm6, %vm3869_vm3  ;;  %9127 = vset.pattern.permute.xlu1 %v15285_v20  ;;  %v13951_v46 = vpop.f32.mrb[46].mxu0 }
 0x4f4   :  { %v6323_v37 = vadd.f32 %v13867_v19, %v6161_v33  ;;  %3620 = vperm.xlu1 %9127, %v9512_v59   ;;  %v5242_v14 = vpop.f32.mrb[47].mxu0  ;;  %8752 = vmatprep.mubr.msk.bf16.mxu1 %vm8751_vm8, %v15268_v0 }
 0x4f5   :  { %v5494_v17 = vpop.f32.mrb[92].mxu1  ;;  %v7019_v27 = vpack.c.bf16 %v6591_v10, %v6591_v10 }
 0x4f6   :  { %v5495_v39 = vadd.f32 %v5494_v17, %v12269_v18  ;;  %v5496_v22 = vpop.f32.mrb[93].mxu1  ;;  %v6592_v34 = vmax.f32 %v6322_v8, %v6323_v37  ;;  %v2518_v62 = vpop.permute.xlu1 %2517 }
 0x4f7   :  { %v5497_v32 = vpop.f32.mrb[94].mxu1  ;;  %v7202_v2 = vunpack.c.l.b16 %v7019_v27  ;;  %vm2830_vm10 = vcmp.eq.s32.totalorder %v2518_v62, %v10839_v60 }
 0x4f8   :  { %v6002_v1 = vadd.f32 %v13842_v41, %v5495_v39  ;;  %v5498_v5 = vadd.f32 %v5497_v32, %v12278_v26  ;;  %v5499_v35 = vpop.f32.mrb[95].mxu1  ;;  %v6593_v9 = vrot.slane %v6592_v34, 4  ;;  %vm8753_vm11 = vmpackc.low %vm2830_vm10, %vm2829_vm9  ;;  %9128 = vset.pattern.permute.xlu1 %v15296_v48  ;;  %v9513_v39 = vld [vmem:[%s14948_s0 + $0x348] sm:$0xff]  ;;  %vm3873_vm10 = vcmp.eq.s32.totalorder %v13726_v13, %v10839_v60  ;;  %v9515_v13 = vld [vmem:[%s14948_s0 + $0x360] sm:$0xff] }
 0x4f9   :  { %v7286_v18 = vsel %vm7269_vm7, %v7202_v2, %v7285_v31  ;;  %2580 = vperm.xlu1 %9128, %v9512_v59   ;;  %v13968_v30 = vpop.f32.mrb[48].mxu0  ;;  %8754 = vmatmul.mubr.msk.bf16.gmra.mrb[164].mxu1 %vm8753_vm11, %v15268_v0 }
 0x4fa   :  { %v6162_v33 = vmax.f32 %v6002_v1, 0.0  ;;  %v6003_v57 = vadd.f32 %v13842_v41, %v5498_v5  ;;  %v6594_v10 = vmax.f32 %v6592_v34, %v6593_v9  ;;  %v5247_v26 = vpop.f32.mrb[49].mxu0  ;;  %v9514_v5 = vld [vmem:[%s14948_s0 + $0x358] sm:$0xff] }
 0x4fb   :  { %v3561_v37 = vpop.permute.xlu1 %3560  ;;  %v13973_v14 = vpop.f32.mrb[50].mxu0 }
 0x4fc   :  { %v6163_v8 = vmax.f32 %v6003_v57, 0.0  ;;  %v6595_v17 = vrot.slane %v6594_v10, 2  ;;  %vm3871_vm14 = vcmp.eq.s32.totalorder %v3561_v37, %v10839_v60  ;;  %v5250_v31 = vpop.f32.mrb[51].mxu0  ;;  %v6324_v27 = vadd.f32 %v13861_v44, %v6162_v33 }
 0x4fd   :  { %vm8755_vm3 = vmpackc.low %vm3872_vm12, %vm3871_vm14  ;;  %2583 = vperm.xlu1 %9128, %v9513_v39   ;;  %vm2833_vm14 = vcmp.eq.s32.totalorder %v13711_v38, %v10839_v60 }
 0x4fe   :  { %v6325_v59 = vadd.f32 %v13867_v19, %v6163_v8  ;;  %v6596_v6 = vmax.f32 %v6594_v10, %v6595_v17  ;;  %8756 = vmatprep.mubr.msk.bf16.mxu1 %vm8755_vm3, %v15268_v0 }
 0x500   :  { %v6599_v22 = vmax.f32 %v6324_v27, %v6325_v59  ;;  %v6597_v34 = vrot.slane %v6596_v6, 1  ;;  %v2521_v62 = vpop.permute.xlu1 %2520 }
 0x501   :  { %9129 = vset.pattern.permute.xlu1 %v15285_v20  ;;  %v13983_v2 = vpop.f32.mrb[52].mxu0  ;;  %vm2831_vm6 = vcmp.eq.s32.totalorder %v2521_v62, %v10839_v60 }
 0x502   :  { %v6600_v32 = vrot.slane %v6599_v22, 4  ;;  %v6598_v1 = vmax.f32 %v6596_v6, %v6597_v34  ;;  %3629 = vperm.xlu1 %9129, %v9514_v5   ;;  %v5255_v35 = vpop.f32.mrb[53].mxu0 }
 0x503   :  { %v5502_v33 = vpop.f32.mrb[96].mxu1  ;;  %v13988_v57 = vpop.f32.mrb[54].mxu0 }
 0x504   :  { %v6601_v9 = vmax.f32 %v6599_v22, %v6600_v32  ;;  %v7020_v10 = vpack.c.bf16 %v6598_v1, %v6598_v1  ;;  %v5503_v26 = vadd.f32 %v5502_v33, %v12291_v49  ;;  %v5504_v8 = vpop.f32.mrb[97].mxu1  ;;  %v2524_v37 = vpop.permute.xlu1 %2523 }
 0x505   :  { %vm2832_vm8 = vcmp.eq.s32.totalorder %v2524_v37, %v10839_v60  ;;  %v5258_v31 = vpop.f32.mrb[55].mxu0  ;;  %v5505_v27 = vpop.f32.mrb[98].mxu1 }
 0x506   :  { %v6602_v17 = vrot.slane %v6601_v9, 2  ;;  %v7203_v59 = vunpack.c.l.b16 %v7020_v10  ;;  %v6004_v39 = vadd.f32 %v13842_v41, %v5503_v26  ;;  %vm8757_vm9 = vmpackc.low %vm2832_vm8, %vm2831_vm6  ;;  %v5506_v6 = vadd.f32 %v5505_v27, %v12303_v21  ;;  %v5507_v22 = vpop.f32.mrb[99].mxu1  ;;  %9130 = vset.pattern.permute.xlu1 %v15296_v48 }
 0x507   :  { %2589 = vperm.xlu1 %9130, %v9514_v5   ;;  %8758 = vmatmul.mubr.msk.bf16.gmra.mrb[168].mxu1 %vm8757_vm9, %v15268_v0  ;;  %vm3876_vm8 = vcmp.eq.s32.totalorder %v13739_v58, %v10839_v60 }
 0x508   :  { %v6603_v34 = vmax.f32 %v6601_v9, %v6602_v17  ;;  %v7287_v49 = vsel %vm7271_vm4, %v7203_v59, %v7286_v18  ;;  %v6164_v62 = vmax.f32 %v6004_v39, 0.0  ;;  %v6005_v32 = vadd.f32 %v13842_v41, %v5506_v6 }
 0x509   :  { %v3570_v35 = vpop.permute.xlu1 %3569  ;;  %v14001_v33 = vpop.f32.mrb[56].mxu0 }
 0x50a   :  { %v6604_v1 = vrot.slane %v6603_v34, 1  ;;  %v6165_v21 = vmax.f32 %v6005_v32, 0.0  ;;  %vm3874_vm11 = vcmp.eq.s32.totalorder %v3570_v35, %v10839_v60  ;;  %v5263_v10 = vpop.f32.mrb[57].mxu0  ;;  %v6326_v18 = vadd.f32 %v13861_v44, %v6164_v62  ;;  %v15606_v62 = vld [vmem:[#allocation66_spill] sm:$0xff] }
 0x50b   :  { %vm8759_vm12 = vmpackc.low %vm3874_vm11, %vm3873_vm10  ;;  %9131 = vset.pattern.permute.xlu1 %v15285_v20  ;;  %v14005_v5 = vpop.f32.mrb[58].mxu0 }
 0x50c   :  { %v6605_v9 = vmax.f32 %v6603_v34, %v6604_v1  ;;  %v6327_v26 = vadd.f32 %v13867_v19, %v6165_v21  ;;  %3632 = vperm.xlu1 %9131, %v9515_v13   ;;  %v5266_v8 = vpop.f32.mrb[59].mxu0  ;;  %v5510_v37 = vpop.f32.mrb[100].mxu1  ;;  %8760 = vmatprep.mubr.msk.bf16.mxu1 %vm8759_vm12, %v15268_v0 }
 0x50d   :  { %v5511_v31 = vadd.f32 %v5510_v37, %v12321_v47  ;;  %v5512_v27 = vpop.f32.mrb[101].mxu1 }
 0x50e   :  { %v7021_v17 = vpack.c.bf16 %v6605_v9, %v6605_v9  ;;  %v6606_v59 = vmax.f32 %v6326_v18, %v6327_v26  ;;  %v2530_v39 = vpop.permute.xlu1 %2529  ;;  %v5513_v6 = vpop.f32.mrb[102].mxu1  ;;  %v9516_v27 = vld [vmem:[%s14948_s0 + $0x368] sm:$0xff] }
 0x50f   :  { %v6006_v34 = vadd.f32 %v13842_v41, %v5511_v31  ;;  %vm2834_vm3 = vcmp.eq.s32.totalorder %v2530_v39, %v10839_v60  ;;  %v5514_v32 = vadd.f32 %v5513_v6, %v15606_v62  ;;  %v5515_v1 = vpop.f32.mrb[103].mxu1 }
 0x510   :  { %v7204_v22 = vunpack.c.l.b16 %v7021_v17  ;;  %v6607_v35 = vrot.slane %v6606_v59, 4  ;;  %vm8761_vm6 = vmpackc.low %vm2834_vm3, %vm2833_vm14  ;;  %9133 = vset.pattern.permute.xlu1 %v15296_v48  ;;  %v15607_v1 = vld [vmem:[#allocation67_spill] sm:$0xff]  ;;  %vm3877_vm3 = vcmp.eq.s32.totalorder %v13753_v42, %v10839_v60 }
 0x511   :  { %v6166_v47 = vmax.f32 %v6006_v34, 0.0  ;;  %v6007_v21 = vadd.f32 %v13842_v41, %v5514_v32  ;;  %2592 = vperm.xlu1 %9133, %v9515_v13   ;;  %v14024_v10 = vpop.f32.mrb[60].mxu0  ;;  %8762 = vmatmul.mubr.msk.bf16.gmra.mrb[172].mxu1 %vm8761_vm6, %v15268_v0  ;;  %v9517_v34 = vld [vmem:[%s14948_s0 + $0x378] sm:$0xff] }
 0x512   :  { %v14021_v38 = vsel %vm7273_vm2, %v7204_v22, %v7287_v49  ;;  %v6608_v9 = vmax.f32 %v6606_v59, %v6607_v35  ;;  %v5271_v18 = vpop.f32.mrb[61].mxu0 }
 0x513   :  { %v6167_v26 = vmax.f32 %v6007_v21, 0.0  ;;  %v3573_v8 = vpop.permute.xlu1 %3572  ;;  %v14029_v37 = vpop.f32.mrb[62].mxu0  ;;  %v6328_v31 = vadd.f32 %v13861_v44, %v6166_v47 }
 0x514   :  { %v6609_v17 = vrot.slane %v6608_v9, 2  ;;  %vm3875_vm9 = vcmp.eq.s32.totalorder %v3573_v8, %v10839_v60  ;;  %v5274_v49 = vpop.f32.mrb[63].mxu0  ;;  %v15608_v8 = vld [vmem:[#allocation68_spill] sm:$0xff] }
 0x515   :  { %v6329_v13 = vadd.f32 %v13867_v19, %v6167_v26  ;;  %vm8763_vm10 = vmpackc.low %vm3876_vm8, %vm3875_vm9  ;;  %2595 = vperm.xlu1 %9133, %v9516_v27   ;;  %vm2837_vm9 = vcmp.eq.s32.totalorder %v13797_v43, %v10839_v60 }
 0x516   :  { %v6610_v59 = vmax.f32 %v6608_v9, %v6609_v17  ;;  %8764 = vmatprep.mubr.msk.bf16.mxu1 %vm8763_vm10, %v15268_v0 }
 0x517   :  { %v6613_v58 = vmax.f32 %v6328_v31, %v6329_v13 }
 0x518   :  { %v2533_v39 = vpop.permute.xlu1 %2532  ;;  %v6611_v22 = vrot.slane %v6610_v59, 1 }
 0x519   :  { %v6614_v6 = vrot.slane %v6613_v58, 4  ;;  %9134 = vset.pattern.permute.xlu1 %v15285_v20  ;;  %vm2835_vm11 = vcmp.eq.s32.totalorder %v2533_v39, %v10839_v60 }
 0x51a   :  { %3641 = vperm.xlu1 %9134, %v9517_v34   ;;  %v5518_v62 = vpop.f32.mrb[104].mxu1  ;;  %v6612_v31 = vmax.f32 %v6610_v59, %v6611_v22 }
 0x51b   :  { %v6615_v32 = vmax.f32 %v6613_v58, %v6614_v6  ;;  %v5519_v35 = vadd.f32 %v5518_v62, %v15607_v1  ;;  %v5520_v47 = vpop.f32.mrb[105].mxu1 }
 0x51c   :  { %v2536_v21 = vpop.permute.xlu1 %2535  ;;  %v5521_v9 = vpop.f32.mrb[106].mxu1  ;;  %v7022_v1 = vpack.c.bf16 %v6612_v31, %v6612_v31 }
 0x51d   :  { %v6616_v18 = vrot.slane %v6615_v32, 2  ;;  %v6008_v26 = vadd.f32 %v13842_v41, %v5519_v35  ;;  %vm2836_vm12 = vcmp.eq.s32.totalorder %v2536_v21, %v10839_v60  ;;  %v5522_v17 = vadd.f32 %v5521_v9, %v15608_v8  ;;  %v5523_v49 = vpop.f32.mrb[107].mxu1  ;;  %v15609_v21 = vld [vmem:[#allocation69_spill] sm:$0xff] }
 0x51e   :  { %vm8765_vm14 = vmpackc.low %vm2836_vm12, %vm2835_vm11  ;;  %9136 = vset.pattern.permute.xlu1 %v15296_v48  ;;  %vm3880_vm12 = vcmp.eq.s32.totalorder %v13772_v61, %v10839_v60 }
 0x51f   :  { %v6617_v13 = vmax.f32 %v6615_v32, %v6616_v18  ;;  %v6168_v27 = vmax.f32 %v6008_v26, 0.0  ;;  %v6009_v58 = vadd.f32 %v13842_v41, %v5522_v17  ;;  %2601 = vperm.xlu1 %9136, %v9517_v34   ;;  %8766 = vmatmul.mubr.msk.bf16.gmra.mrb[176].mxu1 %vm8765_vm14, %v15268_v0  ;;  %v9518_v34 = vld [vmem:[%s14948_s0 + $0x380] sm:$0xff]  ;;  %v7205_v26 = vunpack.c.l.b16 %v7022_v1 }
 0x521   :  { %v6618_v39 = vrot.slane %v6617_v13, 1  ;;  %v6169_v6 = vmax.f32 %v6009_v58, 0.0  ;;  %v3582_v62 = vpop.permute.xlu1 %3581  ;;  %v6330_v22 = vadd.f32 %v13861_v44, %v6168_v27  ;;  %v15610_v58 = vld [vmem:[#allocation70_spill] sm:$0xff] }
 0x522   :  { %vm3878_vm6 = vcmp.eq.s32.totalorder %v3582_v62, %v10839_v60 }
 0x523   :  { %v6619_v59 = vmax.f32 %v6617_v13, %v6618_v39  ;;  %v6331_v32 = vadd.f32 %v13867_v19, %v6169_v6  ;;  %vm8767_vm8 = vmpackc.low %vm3878_vm6, %vm3877_vm3  ;;  %9137 = vset.pattern.permute.xlu1 %v15285_v20 }
 0x524   :  { %3644 = vperm.xlu1 %9137, %v9518_v34   ;;  %v5526_v42 = vpop.f32.mrb[108].mxu1  ;;  %8768 = vmatprep.mubr.msk.bf16.mxu1 %vm8767_vm8, %v15268_v0 }
 0x525   :  { %v7023_v35 = vpack.c.bf16 %v6619_v59, %v6619_v59  ;;  %v6620_v47 = vmax.f32 %v6330_v22, %v6331_v32  ;;  %v5527_v9 = vadd.f32 %v5526_v42, %v15609_v21  ;;  %v5528_v18 = vpop.f32.mrb[109].mxu1 }
 0x526   :  { %v2542_v8 = vpop.permute.xlu1 %2541  ;;  %v5529_v17 = vpop.f32.mrb[110].mxu1 }
 0x527   :  { %v7206_v49 = vunpack.c.l.b16 %v7023_v35  ;;  %v6621_v31 = vrot.slane %v6620_v47, 4  ;;  %v6010_v13 = vadd.f32 %v13842_v41, %v5527_v9  ;;  %vm2838_vm10 = vcmp.eq.s32.totalorder %v2542_v8, %v10839_v60  ;;  %v5531_v27 = vpop.f32.mrb[111].mxu1  ;;  %v9519_v35 = vld [vmem:[%s14948_s0 + $0x388] sm:$0xff]  ;;  %v9520_v8 = vld [vmem:[%s14948_s0 + $0x398] sm:$0xff] }
 0x528   :  { %v5530_v39 = vadd.f32 %v5529_v17, %v15610_v58  ;;  %vm8769_vm11 = vmpackc.low %vm2838_vm10, %vm2837_vm9  ;;  %9138 = vset.pattern.permute.xlu1 %v15296_v48 }
 0x529   :  { %v7289_v6 = vsel %vm7261_vm13, %v7206_v49, %v7205_v26  ;;  %v6622_v62 = vmax.f32 %v6620_v47, %v6621_v31  ;;  %2604 = vperm.xlu1 %9138, %v9518_v34   ;;  %8770 = vmatmul.mubr.msk.bf16.gmra.mrb[180].mxu1 %vm8769_vm11, %v15268_v0  ;;  %v6170_v43 = vmax.f32 %v6010_v13, 0.0  ;;  %v15611_v31 = vld [vmem:[#allocation71_spill] sm:$0xff] }
 0x52a   :  { %v6011_v1 = vadd.f32 %v13842_v41, %v5530_v39 }
 0x52b   :  { %v6623_v59 = vrot.slane %v6622_v62, 2  ;;  %v3585_v22 = vpop.permute.xlu1 %3584  ;;  %v6332_v34 = vadd.f32 %v13861_v44, %v6170_v43 }
 0x52c   :  { %v6171_v32 = vmax.f32 %v6011_v1, 0.0  ;;  %vm3879_vm14 = vcmp.eq.s32.totalorder %v3585_v22, %v10839_v60 }
 0x52d   :  { %v6624_v42 = vmax.f32 %v6622_v62, %v6623_v59  ;;  %vm8771_vm3 = vmpackc.low %vm3880_vm12, %vm3879_vm14  ;;  %2607 = vperm.xlu1 %9138, %v9519_v35   ;;  %v15612_v59 = vld [vmem:[#allocation72_spill] sm:$0xff]  ;;  %vm2841_vm14 = vcmp.eq.s32.totalorder %v13808_v36, %v10839_v60 }
 0x52e   :  { %v6333_v47 = vadd.f32 %v13867_v19, %v6171_v32  ;;  %8772 = vmatprep.mubr.msk.bf16.mxu1 %vm8771_vm3, %v15268_v0 }
 0x52f   :  { %v6625_v61 = vrot.slane %v6624_v42, 1 }
 0x530   :  { %v6627_v21 = vmax.f32 %v6332_v34, %v6333_v47  ;;  %v2545_v9 = vpop.permute.xlu1 %2544 }
 0x531   :  { %v6626_v18 = vmax.f32 %v6624_v42, %v6625_v61  ;;  %9139 = vset.pattern.permute.xlu1 %v15285_v20  ;;  %vm2839_vm6 = vcmp.eq.s32.totalorder %v2545_v9, %v10839_v60  ;;  %v3591_v42 = vpop.permute.xlu0 %3590 }
 0x532   :  { %v6628_v26 = vrot.slane %v6627_v21, 4  ;;  %3653 = vperm.xlu1 %9139, %v9520_v8   ;;  %v5534_v17 = vpop.f32.mrb[112].mxu1  ;;  %vm3881_vm10 = vcmp.eq.s32.totalorder %v3591_v42, %v10839_v60 }
 0x533   :  { %v7024_v49 = vpack.c.bf16 %v6626_v18, %v6626_v18  ;;  %v5535_v13 = vadd.f32 %v5534_v17, %v15611_v31  ;;  %v5536_v27 = vpop.f32.mrb[113].mxu1 }
 0x534   :  { %v6629_v58 = vmax.f32 %v6627_v21, %v6628_v26  ;;  %v2548_v39 = vpop.permute.xlu1 %2547  ;;  %v5537_v62 = vpop.f32.mrb[114].mxu1  ;;  %v15613_v27 = vld [vmem:[#allocation73_spill] sm:$0xff] }
 0x535   :  { %v7207_v43 = vunpack.c.l.b16 %v7024_v49  ;;  %v6012_v1 = vadd.f32 %v13842_v41, %v5535_v13  ;;  %vm2840_vm8 = vcmp.eq.s32.totalorder %v2548_v39, %v10839_v60  ;;  %v5538_v22 = vadd.f32 %v5537_v62, %v15612_v59  ;;  %v5539_v32 = vpop.f32.mrb[115].mxu1 }
 0x536   :  { %v6630_v35 = vrot.slane %v6629_v58, 2  ;;  %vm8773_vm9 = vmpackc.low %vm2840_vm8, %vm2839_vm6  ;;  %9140 = vset.pattern.permute.xlu1 %v15296_v48  ;;  %v15614_v32 = vld [vmem:[#allocation74_spill] sm:$0xff] }
 0x537   :  { %v7290_v34 = vsel %vm7263_vm1, %v7207_v43, %v7289_v6  ;;  %v6172_v47 = vmax.f32 %v6012_v1, 0.0  ;;  %v6013_v61 = vadd.f32 %v13842_v41, %v5538_v22  ;;  %2613 = vperm.xlu1 %9140, %v9520_v8   ;;  %8774 = vmatmul.mubr.msk.bf16.gmra.mrb[184].mxu1 %vm8773_vm9, %v15268_v0  ;;  %v9521_v8 = vld [vmem:[%s14948_s0 + $0x3a0] sm:$0xff] }
 0x538   :  { %v6631_v21 = vmax.f32 %v6629_v58, %v6630_v35 }
 0x539   :  { %v6173_v9 = vmax.f32 %v6013_v61, 0.0  ;;  %v3594_v18 = vpop.permute.xlu1 %3593  ;;  %v6334_v17 = vadd.f32 %v13861_v44, %v6172_v47  ;;  %v3600_v47 = vpop.permute.xlu0 %3599 }
 0x53a   :  { %v6632_v26 = vrot.slane %v6631_v21, 1  ;;  %vm3882_vm11 = vcmp.eq.s32.totalorder %v3594_v18, %v10839_v60  ;;  %vm3884_vm8 = vcmp.eq.s32.totalorder %v3600_v47, %v10839_v60 }
 0x53b   :  { %v6335_v49 = vadd.f32 %v13867_v19, %v6173_v9  ;;  %vm8775_vm12 = vmpackc.low %vm3882_vm11, %vm3881_vm10  ;;  %9141 = vset.pattern.permute.xlu1 %v15285_v20 }
 0x53c   :  { %v6633_v6 = vmax.f32 %v6631_v21, %v6632_v26  ;;  %3656 = vperm.xlu1 %9141, %v9521_v8   ;;  %v5542_v31 = vpop.f32.mrb[116].mxu1  ;;  %8776 = vmatprep.mubr.msk.bf16.mxu1 %vm8775_vm12, %v15268_v0 }
 0x53d   :  { %v6634_v13 = vmax.f32 %v6334_v17, %v6335_v49  ;;  %v5543_v58 = vadd.f32 %v5542_v31, %v15613_v27  ;;  %v5544_v39 = vpop.f32.mrb[117].mxu1  ;;  %v3603_v27 = vpop.permute.xlu0 %3602 }
 0x53e   :  { %v7025_v62 = vpack.c.bf16 %v6633_v6, %v6633_v6  ;;  %v2554_v43 = vpop.permute.xlu1 %2553  ;;  %v5545_v1 = vpop.f32.mrb[118].mxu1 }
 0x53f   :  { %v6635_v59 = vrot.slane %v6634_v13, 4  ;;  %v6014_v22 = vadd.f32 %v13842_v41, %v5543_v58  ;;  %vm2842_vm3 = vcmp.eq.s32.totalorder %v2554_v43, %v10839_v60  ;;  %v5546_v42 = vadd.f32 %v5545_v1, %v15614_v32  ;;  %v5547_v35 = vpop.f32.mrb[119].mxu1  ;;  %v9523_v1 = vld [vmem:[%s14948_s0 + $0x3b8] sm:$0xff] }
 0x540   :  { %v7208_v61 = vunpack.c.l.b16 %v7025_v62  ;;  %vm8777_vm6 = vmpackc.low %vm2842_vm3, %vm2841_vm14  ;;  %9143 = vset.pattern.permute.xlu1 %v15296_v48  ;;  %vm3885_vm3 = vcmp.eq.s32.totalorder %v3603_v27, %v10839_v60 }
 0x541   :  { %v6636_v36 = vmax.f32 %v6634_v13, %v6635_v59  ;;  %v6174_v21 = vmax.f32 %v6014_v22, 0.0  ;;  %v6015_v9 = vadd.f32 %v13842_v41, %v5546_v42  ;;  %2616 = vperm.xlu1 %9143, %v9521_v8   ;;  %8778 = vmatmul.mubr.msk.bf16.gmra.mrb[188].mxu1 %vm8777_vm6, %v15268_v0  ;;  %v9522_v8 = vld [vmem:[%s14948_s0 + $0x3a8] sm:$0xff]  ;;  %v15615_v42 = vld [vmem:[#allocation75_spill] sm:$0xff] }
 0x542   :  { %v7291_v18 = vsel %vm7265_vm0, %v7208_v61, %v7290_v34  ;;  %v3612_v61 = vpop.permute.xlu0 %3611 }
 0x543   :  { %v6637_v26 = vrot.slane %v6636_v36, 2  ;;  %v6175_v17 = vmax.f32 %v6015_v9, 0.0  ;;  %v3597_v49 = vpop.permute.xlu1 %3596  ;;  %v6336_v31 = vadd.f32 %v13861_v44, %v6174_v21 }
 0x544   :  { %vm3883_vm9 = vcmp.eq.s32.totalorder %v3597_v49, %v10839_v60 }
 0x545   :  { %v6638_v6 = vmax.f32 %v6636_v36, %v6637_v26  ;;  %v6337_v13 = vadd.f32 %v13867_v19, %v6175_v17  ;;  %vm8779_vm10 = vmpackc.low %vm3884_vm8, %vm3883_vm9  ;;  %2619 = vperm.xlu1 %9143, %v9522_v8  }
 0x546   :  { %8780 = vmatprep.mubr.msk.bf16.mxu1 %vm8779_vm10, %v15268_v0 }
 0x547   :  { %v6639_v34 = vrot.slane %v6638_v6, 1  ;;  %v6641_v58 = vmax.f32 %v6336_v31, %v6337_v13 }
 0x548   :  { %v2557_v39 = vpop.permute.xlu1 %2556 }
 0x549   :  { %v6640_v62 = vmax.f32 %v6638_v6, %v6639_v34  ;;  %v6642_v43 = vrot.slane %v6641_v58, 4  ;;  %9144 = vset.pattern.permute.xlu1 %v15285_v20  ;;  %vm2843_vm11 = vcmp.eq.s32.totalorder %v2557_v39, %v10839_v60  ;;  %v15616_v6 = vld [vmem:[#allocation76_spill] sm:$0xff] }
 0x54a   :  { %3665 = vperm.xlu1 %9144, %v9523_v1   ;;  %v5550_v59 = vpop.f32.mrb[120].mxu1 }
 0x54b   :  { %v7026_v22 = vpack.c.bf16 %v6640_v62, %v6640_v62  ;;  %v6643_v32 = vmax.f32 %v6641_v58, %v6642_v43  ;;  %v5551_v35 = vadd.f32 %v5550_v59, %v15615_v42  ;;  %v5552_v47 = vpop.f32.mrb[121].mxu1  ;;  %v2563_v59 = vpop.permute.xlu0 %2562 }
 0x54c   :  { %v2560_v36 = vpop.permute.xlu1 %2559  ;;  %v5553_v21 = vpop.f32.mrb[122].mxu1  ;;  %vm2845_vm9 = vcmp.eq.s32.totalorder %v2563_v59, %v10839_v60 }
 0x54d   :  { %v7209_v9 = vunpack.c.l.b16 %v7026_v22  ;;  %v6644_v26 = vrot.slane %v6643_v32, 2  ;;  %v6016_v17 = vadd.f32 %v13842_v41, %v5551_v35  ;;  %vm2844_vm12 = vcmp.eq.s32.totalorder %v2560_v36, %v10839_v60  ;;  %v5555_v49 = vpop.f32.mrb[123].mxu1  ;;  %v15617_v35 = vld [vmem:[#allocation77_spill] sm:$0xff] }
 0x54e   :  { %vm8781_vm14 = vmpackc.low %vm2844_vm12, %vm2843_vm11  ;;  %v5554_v31 = vadd.f32 %v5553_v21, %v15616_v6  ;;  %9146 = vset.pattern.permute.xlu1 %v15296_v48  ;;  %v15618_v6 = vld [vmem:[#allocation78_spill] sm:$0xff]  ;;  %vm3888_vm12 = vcmp.eq.s32.totalorder %v3612_v61, %v10839_v60 }
 0x54f   :  { %v7292_v13 = vsel %vm7267_vm5, %v7209_v9, %v7291_v18  ;;  %v6645_v8 = vmax.f32 %v6643_v32, %v6644_v26  ;;  %2625 = vperm.xlu1 %9146, %v9523_v1   ;;  %8782 = vmatmul.mubr.msk.bf16.gmra.mrb[192].mxu1 %vm8781_vm14, %v15268_v0  ;;  %v6176_v34 = vmax.f32 %v6016_v17, 0.0  ;;  %v9524_v32 = vld [vmem:[%s14948_s0 + $0x3c0] sm:$0xff]  ;;  %v2575_v61 = vpop.permute.xlu0 %2574 }
 0x550   :  { %v6017_v58 = vadd.f32 %v13842_v41, %v5554_v31 }
 0x551   :  { %v6646_v39 = vrot.slane %v6645_v8, 1  ;;  %v3606_v62 = vpop.permute.xlu1 %3605  ;;  %v6338_v18 = vadd.f32 %v13861_v44, %v6176_v34 }
 0x552   :  { %v6177_v43 = vmax.f32 %v6017_v58, 0.0  ;;  %vm3886_vm6 = vcmp.eq.s32.totalorder %v3606_v62, %v10839_v60 }
 0x553   :  { %v6647_v22 = vmax.f32 %v6645_v8, %v6646_v39  ;;  %vm8783_vm8 = vmpackc.low %vm3886_vm6, %vm3885_vm3  ;;  %9147 = vset.pattern.permute.xlu1 %v15285_v20 }
 0x554   :  { %v6339_v1 = vadd.f32 %v13867_v19, %v6177_v43  ;;  %3668 = vperm.xlu1 %9147, %v9524_v32   ;;  %v5558_v27 = vpop.f32.mrb[124].mxu1  ;;  %8784 = vmatprep.mubr.msk.bf16.mxu1 %vm8783_vm8, %v15268_v0 }
 0x555   :  { %v7027_v42 = vpack.c.bf16 %v6647_v22, %v6647_v22  ;;  %v5559_v47 = vadd.f32 %v5558_v27, %v15617_v35  ;;  %v5560_v36 = vpop.f32.mrb[125].mxu1 }
 0x556   :  { %v6648_v21 = vmax.f32 %v6338_v18, %v6339_v1  ;;  %v2566_v9 = vpop.permute.xlu1 %2565  ;;  %v5561_v26 = vpop.f32.mrb[126].mxu1 }
 0x557   :  { %v7210_v17 = vunpack.c.l.b16 %v7027_v42  ;;  %v6018_v49 = vadd.f32 %v13842_v41, %v5559_v47  ;;  %vm2846_vm10 = vcmp.eq.s32.totalorder %v2566_v9, %v10839_v60  ;;  %v5562_v31 = vadd.f32 %v5561_v26, %v15618_v6  ;;  %v5563_v8 = vpop.f32.mrb[127].mxu1  ;;  %v15619_v9 = vld [vmem:[#allocation79_spill] sm:$0xff] }
 0x558   :  { %v6649_v34 = vrot.slane %v6648_v21, 4  ;;  %vm8785_vm11 = vmpackc.low %vm2846_vm10, %vm2845_vm9  ;;  %9148 = vset.pattern.permute.xlu1 %v15296_v48 }
 0x559   :  { %v7293_v58 = vsel %vm7269_vm7, %v7210_v17, %v7292_v13  ;;  %v6178_v39 = vmax.f32 %v6018_v49, 0.0  ;;  %v6019_v62 = vadd.f32 %v13842_v41, %v5562_v31  ;;  %2628 = vperm.xlu1 %9148, %v9524_v32   ;;  %8786 = vmatmul.mubr.msk.bf16.gmra.mrb[196].mxu1 %vm8785_vm11, %v15268_v0  ;;  %v9525_v41 = vld [vmem:[%s14948_s0 + $0x3c8] sm:$0xff] }
 0x55a   :  { %v6650_v43 = vmax.f32 %v6648_v21, %v6649_v34  ;;  %v14167_v34 = vld [vmem:[%s14950_s2] ss:$0 sm:$0xff] }
 0x55b   :  { %v6179_v59 = vmax.f32 %v6019_v62, 0.0  ;;  %v3609_v22 = vpop.permute.xlu1 %3608  ;;  %v6340_v1 = vadd.f32 %v13861_v44, %v6178_v39  ;;  %v9526_v44 = vld [vmem:[%s14948_s0 + $0x3d8] sm:$0xff]  ;;  %v15620_v62 = vld [vmem:[#allocation80_spill] sm:$0xff] }
 0x55c   :  { %v6651_v18 = vrot.slane %v6650_v43, 2  ;;  %vm3887_vm14 = vcmp.eq.s32.totalorder %v3609_v22, %v10839_v60  ;;  %v3615_v22 = vpop.permute.xlu0 %3614 }
 0x55d   :  { %v6341_v27 = vadd.f32 %v13867_v19, %v6179_v59  ;;  %vm8787_vm3 = vmpackc.low %vm3888_vm12, %vm3887_vm14  ;;  %2631 = vperm.xlu1 %9148, %v9525_v41   ;;  %vm3889_vm10 = vcmp.eq.s32.totalorder %v3615_v22, %v10839_v60  ;;  %vm2849_vm14 = vcmp.eq.s32.totalorder %v2575_v61, %v10839_v60 }
 0x55e   :  { %v6652_v13 = vmax.f32 %v6650_v43, %v6651_v18  ;;  %8788 = vmatprep.mubr.msk.bf16.mxu1 %vm8787_vm3, %v15268_v0 }
 0x55f   :  { %v6655_v32 = vmax.f32 %v6340_v1, %v6341_v27 }
 0x560   :  { %v6653_v42 = vrot.slane %v6652_v13, 1  ;;  %v2569_v35 = vpop.permute.xlu1 %2568 }
 0x561   :  { %v6656_v47 = vrot.slane %v6655_v32, 4  ;;  %9149 = vset.pattern.permute.xlu1 %v15285_v20  ;;  %vm2847_vm6 = vcmp.eq.s32.totalorder %v2569_v35, %v10839_v60 }
 0x562   :  { %v6654_v36 = vmax.f32 %v6652_v13, %v6653_v42  ;;  %3677 = vperm.xlu1 %9149, %v9526_v44   ;;  %v5566_v19 = vpop.f32.mrb[128].mxu1 }
 0x563   :  { %v6657_v21 = vmax.f32 %v6655_v32, %v6656_v47  ;;  %v5567_v26 = vadd.f32 %v5566_v19, %v15619_v9  ;;  %v5568_v17 = vpop.f32.mrb[129].mxu1 }
 0x564   :  { %v7028_v49 = vpack.c.bf16 %v6654_v36, %v6654_v36  ;;  %v2572_v6 = vpop.permute.xlu1 %2571  ;;  %v5569_v31 = vpop.f32.mrb[130].mxu1  ;;  %v14181_v36 = vld [vmem:[%s14953_s5] sm:$0xff] }
 0x565   :  { %v6658_v8 = vrot.slane %v6657_v21, 2  ;;  %v6020_v39 = vadd.f32 %v14167_v34, %v5567_v26  ;;  %vm2848_vm8 = vcmp.eq.s32.totalorder %v2572_v6, %v10839_v60  ;;  %v5570_v43 = vadd.f32 %v5569_v31, %v15620_v62  ;;  %v5571_v59 = vpop.f32.mrb[131].mxu1 }
 0x566   :  { %v7211_v18 = vunpack.c.l.b16 %v7028_v49  ;;  %vm8789_vm9 = vmpackc.low %vm2848_vm8, %vm2847_vm6  ;;  %9150 = vset.pattern.permute.xlu1 %v15296_v48  ;;  %v15621_v49 = vld [vmem:[#allocation81_spill] sm:$0xff] }
 0x567   :  { %v6659_v1 = vmax.f32 %v6657_v21, %v6658_v8  ;;  %v6180_v27 = vmax.f32 %v6020_v39, 0.0  ;;  %v6021_v41 = vadd.f32 %v14167_v34, %v5570_v43  ;;  %2637 = vperm.xlu1 %9150, %v9526_v44   ;;  %8790 = vmatmul.mubr.msk.bf16.gmra.mrb[200].mxu1 %vm8789_vm9, %v15268_v0  ;;  %v14187_v44 = vld [vmem:[%s14953_s5 + $0x8] sm:$0xff]  ;;  %v9530_v21 = vld [vmem:[%s14948_s0 + $0x3e0] sm:$0xff] }
 0x568   :  { %v7294_v13 = vsel %vm7271_vm4, %v7211_v18, %v7293_v58  ;;  %v15622_v18 = vld [vmem:[#allocation82_spill] sm:$0xff] }
 0x569   :  { %v6660_v32 = vrot.slane %v6659_v1, 1  ;;  %v6181_v42 = vmax.f32 %v6021_v41, 0.0  ;;  %v3618_v35 = vpop.permute.xlu1 %3617  ;;  %v6342_v19 = vadd.f32 %v14181_v36, %v6180_v27  ;;  %v3624_v41 = vpop.permute.xlu0 %3623 }
 0x56a   :  { %vm3890_vm11 = vcmp.eq.s32.totalorder %v3618_v35, %v10839_v60  ;;  %vm3892_vm8 = vcmp.eq.s32.totalorder %v3624_v41, %v10839_v60 }
 0x56b   :  { %v6661_v47 = vmax.f32 %v6659_v1, %v6660_v32  ;;  %v6343_v58 = vadd.f32 %v14187_v44, %v6181_v42  ;;  %vm8791_vm12 = vmpackc.low %vm3890_vm11, %vm3889_vm10  ;;  %9151 = vset.pattern.permute.xlu1 %v15285_v20 }
 0x56c   :  { %3680 = vperm.xlu1 %9151, %v9530_v21   ;;  %v5574_v9 = vpop.f32.mrb[132].mxu1  ;;  %8792 = vmatprep.mubr.msk.bf16.mxu1 %vm8791_vm12, %v15268_v0 }
 0x56d   :  { %v7029_v26 = vpack.c.bf16 %v6661_v47, %v6661_v47  ;;  %v6662_v17 = vmax.f32 %v6342_v19, %v6343_v58  ;;  %v5575_v6 = vadd.f32 %v5574_v9, %v15621_v49  ;;  %v5576_v31 = vpop.f32.mrb[133].mxu1 }
 0x56e   :  { %v2578_v8 = vpop.permute.xlu1 %2577  ;;  %v5577_v39 = vpop.f32.mrb[134].mxu1  ;;  %v9532_v31 = vld [vmem:[%s14948_s0 + $0x3f8] sm:$0xff] }
 0x56f   :  { %v7212_v62 = vunpack.c.l.b16 %v7029_v26  ;;  %v6663_v43 = vrot.slane %v6662_v17, 4  ;;  %v6022_v59 = vadd.f32 %v14167_v34, %v5575_v6  ;;  %vm2850_vm3 = vcmp.eq.s32.totalorder %v2578_v8, %v10839_v60  ;;  %v5579_v22 = vpop.f32.mrb[135].mxu1 }
 0x570   :  { %vm8793_vm6 = vmpackc.low %vm2850_vm3, %vm2849_vm14  ;;  %v5578_v1 = vadd.f32 %v5577_v39, %v15622_v18  ;;  %9153 = vset.pattern.permute.xlu1 %v15296_v48  ;;  %v15623_v39 = vld [vmem:[#allocation83_spill] sm:$0xff] }
 0x571   :  { %v7295_v27 = vsel %vm7273_vm2, %v7212_v62, %v7294_v13  ;;  %v6664_v61 = vmax.f32 %v6662_v17, %v6663_v43  ;;  %2640 = vperm.xlu1 %9153, %v9530_v21   ;;  %8794 = vmatmul.mubr.msk.bf16.gmra.mrb[204].mxu1 %vm8793_vm6, %v15268_v0  ;;  %v6182_v42 = vmax.f32 %v6022_v59, 0.0  ;;  %v9531_v13 = vld [vmem:[%s14948_s0 + $0x3e8] sm:$0xff]  ;;  %v3627_v17 = vpop.permute.xlu0 %3626 }
 0x572   :  { %v7339_v32 = vpack.c.b16 %v7295_v27, %v14021_v38  ;;  %v6023_v35 = vadd.f32 %v14167_v34, %v5578_v1  ;;  %vm3893_vm3 = vcmp.eq.s32.totalorder %v3627_v17, %v10839_v60 }
 0x573   :  { %v3621_v47 = vpop.permute.xlu1 %3620  ;;  %v6665_v19 = vrot.slane %v6664_v61, 2  ;;  %v6344_v38 = vadd.f32 %v14181_v36, %v6182_v42 }
 0x574   :  { %v6183_v58 = vmax.f32 %v6023_v35, 0.0  ;;  %vm3891_vm9 = vcmp.eq.s32.totalorder %v3621_v47, %v10839_v60  ;;  %8951 = vmatmul.mubr.bf16.gmra.mrb[68].mxu0 %v7339_v32 }
 0x575   :  { %vm8795_vm10 = vmpackc.low %vm3892_vm8, %vm3891_vm9  ;;  %2643 = vperm.xlu1 %9153, %v9531_v13   ;;  %8954 = vmatprep.mubr.msk.bf16.mxu0 %vm9595_vm15, %v15537_v4  ;;  %v6666_v9 = vmax.f32 %v6664_v61, %v6665_v19  ;;  %v15624_v61 = vld [vmem:[#allocation84_spill] sm:$0xff]  ;;  %v3636_v35 = vpop.permute.xlu0 %3635 }
 0x576   :  { %v6345_v21 = vadd.f32 %v14187_v44, %v6183_v58  ;;  %8796 = vmatprep.mubr.msk.bf16.mxu1 %vm8795_vm10, %v15268_v0 }
 0x577   :  { %v6667_v59 = vrot.slane %v6666_v9, 1 }
 0x578   :  { %v6669_v26 = vmax.f32 %v6344_v38, %v6345_v21  ;;  %v2581_v49 = vpop.permute.xlu1 %2580 }
 0x579   :  { %9154 = vset.pattern.permute.xlu1 %v15285_v20  ;;  %vm2851_vm11 = vcmp.eq.s32.totalorder %v2581_v49, %v10839_v60  ;;  %v6668_v58 = vmax.f32 %v6666_v9, %v6667_v59  ;;  %v9533_v9 = vld [vmem:[%s14948_s0 + $0x400] sm:$0xff] }
 0x57a   :  { %v6670_v6 = vrot.slane %v6669_v26, 4  ;;  %3689 = vperm.xlu1 %9154, %v9532_v31   ;;  %v5582_v8 = vpop.f32.mrb[136].mxu1 }
 0x57b   :  { %v5583_v62 = vadd.f32 %v5582_v8, %v15623_v39  ;;  %v5584_v43 = vpop.f32.mrb[137].mxu1  ;;  %v7030_v8 = vpack.c.bf16 %v6668_v58, %v6668_v58  ;;  %v2587_v39 = vpop.permute.xlu0 %2586 }
 0x57c   :  { %v6671_v22 = vmax.f32 %v6669_v26, %v6670_v6  ;;  %v2584_v18 = vpop.permute.xlu1 %2583  ;;  %v5585_v1 = vpop.f32.mrb[138].mxu1  ;;  %vm2853_vm9 = vcmp.eq.s32.totalorder %v2587_v39, %v10839_v60  ;;  %v15625_v43 = vld [vmem:[#allocation85_spill] sm:$0xff] }
 0x57d   :  { %v6024_v27 = vadd.f32 %v14167_v34, %v5583_v62  ;;  %vm2852_vm12 = vcmp.eq.s32.totalorder %v2584_v18, %v10839_v60  ;;  %v5586_v41 = vadd.f32 %v5585_v1, %v15624_v61  ;;  %v5587_v32 = vpop.f32.mrb[139].mxu1  ;;  %v7213_v58 = vunpack.c.l.b16 %v7030_v8 }
 0x57e   :  { %v6672_v42 = vrot.slane %v6671_v22, 2  ;;  %vm8797_vm14 = vmpackc.low %vm2852_vm12, %vm2851_vm11  ;;  %9156 = vset.pattern.permute.xlu1 %v15296_v48  ;;  %v15626_v32 = vld [vmem:[#allocation86_spill] sm:$0xff]  ;;  %vm3896_vm12 = vcmp.eq.s32.totalorder %v3636_v35, %v10839_v60  ;;  %v9534_v35 = vld [vmem:[%s14948_s0 + $0x408] sm:$0xff] }
 0x57f   :  { %v6184_v47 = vmax.f32 %v6024_v27, 0.0  ;;  %v6025_v19 = vadd.f32 %v14167_v34, %v5586_v41  ;;  %2649 = vperm.xlu1 %9156, %v9532_v31   ;;  %8798 = vmatmul.mubr.msk.bf16.gmra.mrb[208].mxu1 %vm8797_vm14, %v15268_v0 }
 0x580   :  { %v6673_v13 = vmax.f32 %v6671_v22, %v6672_v42 }
 0x581   :  { %v6185_v38 = vmax.f32 %v6025_v19, 0.0  ;;  %v3630_v21 = vpop.permute.xlu1 %3629  ;;  %v6346_v49 = vadd.f32 %v14181_v36, %v6184_v47 }
 0x582   :  { %v6674_v26 = vrot.slane %v6673_v13, 1  ;;  %vm3894_vm6 = vcmp.eq.s32.totalorder %v3630_v21, %v10839_v60 }
 0x583   :  { %v6347_v6 = vadd.f32 %v14187_v44, %v6185_v38  ;;  %vm8799_vm8 = vmpackc.low %vm3894_vm6, %vm3893_vm3  ;;  %9157 = vset.pattern.permute.xlu1 %v15285_v20 }
 0x584   :  { %v6675_v31 = vmax.f32 %v6673_v13, %v6674_v26  ;;  %3692 = vperm.xlu1 %9157, %v9533_v9   ;;  %v5590_v17 = vpop.f32.mrb[140].mxu1  ;;  %8800 = vmatprep.mubr.msk.bf16.mxu1 %vm8799_vm8, %v15268_v0 }
 0x585   :  { %v6676_v62 = vmax.f32 %v6346_v49, %v6347_v6  ;;  %v5591_v59 = vadd.f32 %v5590_v17, %v15625_v43  ;;  %v5592_v22 = vpop.f32.mrb[141].mxu1  ;;  %v8908_v6 = vld [vmem:[%s14952_s4] ss:$0 sm:$0xff] }
 0x586   :  { %v7031_v18 = vpack.c.bf16 %v6675_v31, %v6675_v31  ;;  %v2590_v1 = vpop.permute.xlu1 %2589  ;;  %v5593_v27 = vpop.f32.mrb[142].mxu1 }
 0x587   :  { %v6677_v61 = vrot.slane %v6676_v62, 4  ;;  %v6026_v41 = vadd.f32 %v14167_v34, %v5591_v59  ;;  %vm2854_vm10 = vcmp.eq.s32.totalorder %v2590_v1, %v10839_v60  ;;  %v5594_v42 = vadd.f32 %v5593_v27, %v15626_v32  ;;  %v5595_v47 = vpop.f32.mrb[143].mxu1  ;;  %v14241_v19 = vpop.f32.mrb[64].mxu0 }
 0x588   :  { %v7214_v13 = vunpack.c.l.b16 %v7031_v18  ;;  %vm8801_vm11 = vmpackc.low %vm2854_vm10, %vm2853_vm9  ;;  %9158 = vset.pattern.permute.xlu1 %v15296_v48  ;;  %v8948_v38 = vpop.f32.mrb[65].mxu0  ;;  %v2599_v32 = vpop.permute.xlu0 %2598  ;;  %v9535_v47 = vld [vmem:[%s14948_s0 + $0x418] sm:$0xff] }
 0x589   :  { %v6678_v21 = vmax.f32 %v6676_v62, %v6677_v61  ;;  %v6186_v26 = vmax.f32 %v6026_v41, 0.0  ;;  %v6027_v49 = vadd.f32 %v14167_v34, %v5594_v42  ;;  %2652 = vperm.xlu1 %9158, %v9533_v9   ;;  %8802 = vmatmul.mubr.msk.bf16.gmra.mrb[212].mxu1 %vm8801_vm11, %v15268_v0  ;;  %v7433_v31 = vpop.f32.mrb[66].mxu0 }
 0x58a   :  { %v7296_v39 = vsel %vm7261_vm13, %v7214_v13, %v7213_v58  ;;  %v14251_v8 = vadd.f32 %v8908_v6, %v7433_v31  ;;  %v8949_v17 = vpop.f32.mrb[67].mxu0 }
 0x58b   :  { %v6679_v43 = vrot.slane %v6678_v21, 2  ;;  %v6187_v62 = vmax.f32 %v6027_v49, 0.0  ;;  %v3633_v59 = vpop.permute.xlu1 %3632  ;;  %v6348_v9 = vadd.f32 %v14181_v36, %v6186_v26 }
 0x58c   :  { %vm3895_vm14 = vcmp.eq.s32.totalorder %v3633_v59, %v10839_v60  ;;  %7471 = vmax.xlane.f32.xlu0 %v14251_v8 }
 0x58d   :  { %v6680_v22 = vmax.f32 %v6678_v21, %v6679_v43  ;;  %v6349_v18 = vadd.f32 %v14187_v44, %v6187_v62  ;;  %vm8803_vm3 = vmpackc.low %vm3896_vm12, %vm3895_vm14  ;;  %2655 = vperm.xlu1 %9158, %v9534_v35   ;;  %v15627_v21 = vld [vmem:[#allocation87_spill] sm:$0xff]  ;;  %v3639_v35 = vpop.permute.xlu0 %3638  ;;  %vm2857_vm14 = vcmp.eq.s32.totalorder %v2599_v32, %v10839_v60 }
 0x58e   :  { %8804 = vmatprep.mubr.msk.bf16.mxu1 %vm8803_vm3, %v15268_v0  ;;  %vm3897_vm10 = vcmp.eq.s32.totalorder %v3639_v35, %v10839_v60 }
 0x58f   :  { %v6681_v1 = vrot.slane %v6680_v22, 1  ;;  %v6683_v27 = vmax.f32 %v6348_v9, %v6349_v18 }
 0x590   :  { %v2593_v61 = vpop.permute.xlu1 %2592 }
 0x591   :  { %v6682_v41 = vmax.f32 %v6680_v22, %v6681_v1  ;;  %v6684_v42 = vrot.slane %v6683_v27, 4  ;;  %9159 = vset.pattern.permute.xlu1 %v15285_v20  ;;  %vm2855_vm6 = vcmp.eq.s32.totalorder %v2593_v61, %v10839_v60  ;;  %v15628_v22 = vld [vmem:[#allocation88_spill] sm:$0xff] }
 0x592   :  { %3701 = vperm.xlu1 %9159, %v9535_v47   ;;  %v5598_v58 = vpop.f32.mrb[144].mxu1 }
 0x593   :  { %v7032_v13 = vpack.c.bf16 %v6682_v41, %v6682_v41  ;;  %v6685_v38 = vmax.f32 %v6683_v27, %v6684_v42  ;;  %v5599_v26 = vadd.f32 %v5598_v58, %v15627_v21  ;;  %v5600_v49 = vpop.f32.mrb[145].mxu1 }
 0x594   :  { %v2596_v6 = vpop.permute.xlu1 %2595  ;;  %v5601_v31 = vpop.f32.mrb[146].mxu1  ;;  %v15629_v49 = vld [vmem:[#allocation89_spill] sm:$0xff] }
 0x595   :  { %v7215_v17 = vunpack.c.l.b16 %v7032_v13  ;;  %v6686_v43 = vrot.slane %v6685_v38, 2  ;;  %v6028_v62 = vadd.f32 %v14167_v34, %v5599_v26  ;;  %vm2856_vm8 = vcmp.eq.s32.totalorder %v2596_v6, %v10839_v60  ;;  %v5603_v59 = vpop.f32.mrb[147].mxu1 }
 0x596   :  { %vm8805_vm9 = vmpackc.low %vm2856_vm8, %vm2855_vm6  ;;  %v5602_v9 = vadd.f32 %v5601_v31, %v15628_v22  ;;  %9160 = vset.pattern.permute.xlu1 %v15296_v48 }
 0x597   :  { %v7297_v18 = vsel %vm7263_vm1, %v7215_v17, %v7296_v39  ;;  %v6687_v1 = vmax.f32 %v6685_v38, %v6686_v43  ;;  %2661 = vperm.xlu1 %9160, %v9535_v47   ;;  %8806 = vmatmul.mubr.msk.bf16.gmra.mrb[216].mxu1 %vm8805_vm9, %v15268_v0  ;;  %v6188_v27 = vmax.f32 %v6028_v62, 0.0  ;;  %v9536_v38 = vld [vmem:[%s14948_s0 + $0x420] sm:$0xff] }
 0x598   :  { %v6029_v61 = vadd.f32 %v14167_v34, %v5602_v9  ;;  %v15630_v9 = vld [vmem:[#allocation90_spill] sm:$0xff] }
 0x599   :  { %v6688_v41 = vrot.slane %v6687_v1, 1  ;;  %v3642_v42 = vpop.permute.xlu1 %3641  ;;  %v6350_v39 = vadd.f32 %v14181_v36, %v6188_v27 }
 0x59a   :  { %v6189_v58 = vmax.f32 %v6029_v61, 0.0  ;;  %vm3898_vm11 = vcmp.eq.s32.totalorder %v3642_v42, %v10839_v60  ;;  %v3648_v61 = vpop.permute.xlu0 %3647 }
 0x59b   :  { %v6689_v13 = vmax.f32 %v6687_v1, %v6688_v41  ;;  %vm8807_vm12 = vmpackc.low %vm3898_vm11, %vm3897_vm10  ;;  %9161 = vset.pattern.permute.xlu1 %v15285_v20  ;;  %vm3900_vm8 = vcmp.eq.s32.totalorder %v3648_v61, %v10839_v60 }
 0x59c   :  { %v6351_v47 = vadd.f32 %v14187_v44, %v6189_v58  ;;  %3704 = vperm.xlu1 %9161, %v9536_v38   ;;  %v5606_v21 = vpop.f32.mrb[148].mxu1  ;;  %8808 = vmatprep.mubr.msk.bf16.mxu1 %vm8807_vm12, %v15268_v0 }
 0x59d   :  { %v7033_v26 = vpack.c.bf16 %v6689_v13, %v6689_v13  ;;  %v5607_v6 = vadd.f32 %v5606_v21, %v15629_v49  ;;  %v5608_v31 = vpop.f32.mrb[149].mxu1 }
 0x59e   :  { %v6690_v17 = vmax.f32 %v6350_v39, %v6351_v47  ;;  %v2602_v43 = vpop.permute.xlu1 %2601  ;;  %v5609_v62 = vpop.f32.mrb[150].mxu1 }
 0x59f   :  { %v7216_v59 = vunpack.c.l.b16 %v7033_v26  ;;  %v6030_v22 = vadd.f32 %v14167_v34, %v5607_v6  ;;  %vm2858_vm3 = vcmp.eq.s32.totalorder %v2602_v43, %v10839_v60  ;;  %v5610_v35 = vadd.f32 %v5609_v62, %v15630_v9  ;;  %v5611_v1 = vpop.f32.mrb[151].mxu1  ;;  %v3651_v6 = vpop.permute.xlu0 %3650 }
 0x5a0   :  { %v6691_v27 = vrot.slane %v6690_v17, 4  ;;  %vm8809_vm6 = vmpackc.low %vm2858_vm3, %vm2857_vm14  ;;  %9163 = vset.pattern.permute.xlu1 %v15296_v48  ;;  %vm3901_vm3 = vcmp.eq.s32.totalorder %v3651_v6, %v10839_v60  ;;  %v9539_v6 = vld [vmem:[%s14948_s0 + $0x440] sm:$0xff] }
 0x5a1   :  { %v7298_v32 = vsel %vm7265_vm0, %v7216_v59, %v7297_v18  ;;  %v6190_v41 = vmax.f32 %v6030_v22, 0.0  ;;  %v6031_v42 = vadd.f32 %v14167_v34, %v5610_v35  ;;  %2664 = vperm.xlu1 %9163, %v9536_v38   ;;  %8810 = vmatmul.mubr.msk.bf16.gmra.mrb[220].mxu1 %vm8809_vm6, %v15268_v0  ;;  %v9537_v18 = vld [vmem:[%s14948_s0 + $0x428] sm:$0xff]  ;;  %v9538_v59 = vld [vmem:[%s14948_s0 + $0x438] sm:$0xff]  ;;  %v15631_v35 = vld [vmem:[#allocation91_spill] sm:$0xff] }
 0x5a2   :  { %v6692_v58 = vmax.f32 %v6690_v17, %v6691_v27 }
 0x5a3   :  { %v6191_v13 = vmax.f32 %v6031_v42, 0.0  ;;  %v3645_v39 = vpop.permute.xlu1 %3644  ;;  %v6352_v21 = vadd.f32 %v14181_v36, %v6190_v41 }
 0x5a4   :  { %v6693_v47 = vrot.slane %v6692_v58, 2  ;;  %vm3899_vm9 = vcmp.eq.s32.totalorder %v3645_v39, %v10839_v60  ;;  %v15632_v39 = vld [vmem:[#allocation92_spill] sm:$0xff] }
 0x5a5   :  { %v6353_v26 = vadd.f32 %v14187_v44, %v6191_v13  ;;  %vm8811_vm10 = vmpackc.low %vm3900_vm8, %vm3899_vm9  ;;  %2667 = vperm.xlu1 %9163, %v9537_v18  }
 0x5a6   :  { %v6694_v38 = vmax.f32 %v6692_v58, %v6693_v47  ;;  %8812 = vmatprep.mubr.msk.bf16.mxu1 %vm8811_vm10, %v15268_v0 }
 0x5a7   :  { %v6697_v49 = vmax.f32 %v6352_v21, %v6353_v26  ;;  %v3660_v26 = vpop.permute.xlu0 %3659 }
 0x5a8   :  { %v6695_v31 = vrot.slane %v6694_v38, 1  ;;  %v2605_v17 = vpop.permute.xlu1 %2604 }
 0x5a9   :  { %v6698_v43 = vrot.slane %v6697_v49, 4  ;;  %9164 = vset.pattern.permute.xlu1 %v15285_v20  ;;  %vm2859_vm11 = vcmp.eq.s32.totalorder %v2605_v17, %v10839_v60 }
 0x5aa   :  { %v6696_v62 = vmax.f32 %v6694_v38, %v6695_v31  ;;  %3713 = vperm.xlu1 %9164, %v9538_v59   ;;  %v5614_v22 = vpop.f32.mrb[152].mxu1 }
 0x5ab   :  { %v6699_v9 = vmax.f32 %v6697_v49, %v6698_v43  ;;  %v5615_v1 = vadd.f32 %v5614_v22, %v15631_v35  ;;  %v5616_v27 = vpop.f32.mrb[153].mxu1 }
 0x5ac   :  { %v7034_v61 = vpack.c.bf16 %v6696_v62, %v6696_v62  ;;  %v2608_v41 = vpop.permute.xlu1 %2607  ;;  %v5617_v42 = vpop.f32.mrb[154].mxu1 }
 0x5ad   :  { %v6700_v58 = vrot.slane %v6699_v9, 2  ;;  %v6032_v13 = vadd.f32 %v14167_v34, %v5615_v1  ;;  %vm2860_vm12 = vcmp.eq.s32.totalorder %v2608_v41, %v10839_v60  ;;  %v5618_v47 = vadd.f32 %v5617_v42, %v15632_v39  ;;  %v5619_v21 = vpop.f32.mrb[155].mxu1  ;;  %v15633_v41 = vld [vmem:[#allocation93_spill] sm:$0xff] }
 0x5ae   :  { %v7217_v18 = vunpack.c.l.b16 %v7034_v61  ;;  %vm8813_vm14 = vmpackc.low %vm2860_vm12, %vm2859_vm11  ;;  %9166 = vset.pattern.permute.xlu1 %v15296_v48  ;;  %vm3904_vm12 = vcmp.eq.s32.totalorder %v3660_v26, %v10839_v60 }
 0x5af   :  { %v6701_v38 = vmax.f32 %v6699_v9, %v6700_v58  ;;  %v6192_v49 = vmax.f32 %v6032_v13, 0.0  ;;  %v6033_v31 = vadd.f32 %v14167_v34, %v5618_v47  ;;  %2673 = vperm.xlu1 %9166, %v9538_v59   ;;  %8814 = vmatmul.mubr.msk.bf16.gmra.mrb[224].mxu1 %vm8813_vm14, %v15268_v0  ;;  %v2611_v59 = vpop.permute.xlu0 %2610 }
 0x5b0   :  { %v7299_v17 = vsel %vm7267_vm5, %v7217_v18, %v7298_v32  ;;  %vm2861_vm9 = vcmp.eq.s32.totalorder %v2611_v59, %v10839_v60 }
 0x5b1   :  { %v6702_v43 = vrot.slane %v6701_v38, 1  ;;  %v6193_v62 = vmax.f32 %v6033_v31, 0.0  ;;  %v3654_v22 = vpop.permute.xlu1 %3653  ;;  %v6354_v1 = vadd.f32 %v14181_v36, %v6192_v49  ;;  %v15634_v49 = vld [vmem:[#allocation94_spill] sm:$0xff] }
 0x5b2   :  { %vm3902_vm6 = vcmp.eq.s32.totalorder %v3654_v22, %v10839_v60 }
 0x5b3   :  { %v6703_v35 = vmax.f32 %v6701_v38, %v6702_v43  ;;  %v6355_v9 = vadd.f32 %v14187_v44, %v6193_v62  ;;  %vm8815_vm8 = vmpackc.low %vm3902_vm6, %vm3901_vm3  ;;  %9167 = vset.pattern.permute.xlu1 %v15285_v20 }
 0x5b4   :  { %3716 = vperm.xlu1 %9167, %v9539_v6   ;;  %v5622_v32 = vpop.f32.mrb[156].mxu1  ;;  %8816 = vmatprep.mubr.msk.bf16.mxu1 %vm8815_vm8, %v15268_v0 }
 0x5b5   :  { %v7035_v27 = vpack.c.bf16 %v6703_v35, %v6703_v35  ;;  %v6704_v61 = vmax.f32 %v6354_v1, %v6355_v9  ;;  %v5623_v42 = vadd.f32 %v5622_v32, %v15633_v41  ;;  %v5624_v58 = vpop.f32.mrb[157].mxu1 }
 0x5b6   :  { %v2614_v13 = vpop.permute.xlu1 %2613  ;;  %v5625_v39 = vpop.f32.mrb[158].mxu1 }
 0x5b7   :  { %v7218_v47 = vunpack.c.l.b16 %v7035_v27  ;;  %v6705_v21 = vrot.slane %v6704_v61, 4  ;;  %v6034_v18 = vadd.f32 %v14167_v34, %v5623_v42  ;;  %vm2862_vm10 = vcmp.eq.s32.totalorder %v2614_v13, %v10839_v60  ;;  %v5627_v38 = vpop.f32.mrb[159].mxu1  ;;  %v2623_v42 = vpop.permute.xlu0 %2622 }
 0x5b8   :  { %vm8817_vm11 = vmpackc.low %vm2862_vm10, %vm2861_vm9  ;;  %v5626_v31 = vadd.f32 %v5625_v39, %v15634_v49  ;;  %9168 = vset.pattern.permute.xlu1 %v15296_v48  ;;  %v9541_v39 = vld [vmem:[%s14948_s0 + $0x458] sm:$0xff] }
 0x5b9   :  { %v7300_v43 = vsel %vm7269_vm7, %v7218_v47, %v7299_v17  ;;  %v6706_v62 = vmax.f32 %v6704_v61, %v6705_v21  ;;  %2676 = vperm.xlu1 %9168, %v9539_v6   ;;  %8818 = vmatmul.mubr.msk.bf16.gmra.mrb[228].mxu1 %vm8817_vm11, %v15268_v0  ;;  %v6194_v22 = vmax.f32 %v6034_v18, 0.0  ;;  %v9540_v17 = vld [vmem:[%s14948_s0 + $0x448] sm:$0xff]  ;;  %v15635_v18 = vld [vmem:[#allocation95_spill] sm:$0xff] }
 0x5ba   :  { %v6035_v35 = vadd.f32 %v14167_v34, %v5626_v31 }
 0x5bb   :  { %v6707_v1 = vrot.slane %v6706_v62, 2  ;;  %v3657_v9 = vpop.permute.xlu1 %3656  ;;  %v6356_v6 = vadd.f32 %v14181_v36, %v6194_v22 }
 0x5bc   :  { %v6195_v59 = vmax.f32 %v6035_v35, 0.0  ;;  %vm3903_vm14 = vcmp.eq.s32.totalorder %v3657_v9, %v10839_v60  ;;  %v15636_v9 = vld [vmem:[#allocation96_spill] sm:$0xff] }
 0x5bd   :  { %v6708_v32 = vmax.f32 %v6706_v62, %v6707_v1  ;;  %vm8819_vm3 = vmpackc.low %vm3904_vm12, %vm3903_vm14  ;;  %2679 = vperm.xlu1 %9168, %v9540_v17   ;;  %vm2865_vm14 = vcmp.eq.s32.totalorder %v2623_v42, %v10839_v60 }
 0x5be   :  { %v6357_v27 = vadd.f32 %v14187_v44, %v6195_v59  ;;  %8820 = vmatprep.mubr.msk.bf16.mxu1 %vm8819_vm3, %v15268_v0 }
 0x5bf   :  { %v6709_v26 = vrot.slane %v6708_v32, 1 }
 0x5c0   :  { %v6711_v61 = vmax.f32 %v6356_v6, %v6357_v27  ;;  %v2617_v41 = vpop.permute.xlu1 %2616  ;;  %v3663_v6 = vpop.permute.xlu0 %3662 }
 0x5c1   :  { %v6710_v58 = vmax.f32 %v6708_v32, %v6709_v26  ;;  %9169 = vset.pattern.permute.xlu1 %v15285_v20  ;;  %vm2863_vm6 = vcmp.eq.s32.totalorder %v2617_v41, %v10839_v60  ;;  %vm3905_vm10 = vcmp.eq.s32.totalorder %v3663_v6, %v10839_v60 }
 0x5c2   :  { %v6712_v13 = vrot.slane %v6711_v61, 4  ;;  %3725 = vperm.xlu1 %9169, %v9541_v39   ;;  %v5630_v47 = vpop.f32.mrb[160].mxu1 }
 0x5c3   :  { %v7036_v21 = vpack.c.bf16 %v6710_v58, %v6710_v58  ;;  %v5631_v38 = vadd.f32 %v5630_v47, %v15635_v18  ;;  %v5632_v49 = vpop.f32.mrb[161].mxu1 }
 0x5c4   :  { %v6713_v31 = vmax.f32 %v6711_v61, %v6712_v13  ;;  %v2620_v62 = vpop.permute.xlu1 %2619  ;;  %v5633_v22 = vpop.f32.mrb[162].mxu1 }
 0x5c5   :  { %v7219_v35 = vunpack.c.l.b16 %v7036_v21  ;;  %v6036_v1 = vadd.f32 %v14167_v34, %v5631_v38  ;;  %vm2864_vm8 = vcmp.eq.s32.totalorder %v2620_v62, %v10839_v60  ;;  %v5634_v59 = vadd.f32 %v5633_v22, %v15636_v9  ;;  %v5635_v32 = vpop.f32.mrb[163].mxu1  ;;  %v3672_v42 = vpop.permute.xlu0 %3671 }
 0x5c6   :  { %v6714_v17 = vrot.slane %v6713_v31, 2  ;;  %vm8821_vm9 = vmpackc.low %vm2864_vm8, %vm2863_vm6  ;;  %9170 = vset.pattern.permute.xlu1 %v15296_v48  ;;  %vm3908_vm8 = vcmp.eq.s32.totalorder %v3672_v42, %v10839_v60 }
 0x5c7   :  { %v7301_v27 = vsel %vm7271_vm4, %v7219_v35, %v7300_v43  ;;  %v6196_v26 = vmax.f32 %v6036_v1, 0.0  ;;  %v6037_v61 = vadd.f32 %v14167_v34, %v5634_v59  ;;  %2685 = vperm.xlu1 %9170, %v9541_v39   ;;  %8822 = vmatmul.mubr.msk.bf16.gmra.mrb[232].mxu1 %vm8821_vm9, %v15268_v0  ;;  %v9542_v39 = vld [vmem:[%s14948_s0 + $0x460] sm:$0xff] }
 0x5c8   :  { %v6715_v41 = vmax.f32 %v6713_v31, %v6714_v17  ;;  %v15637_v31 = vld [vmem:[#allocation97_spill] sm:$0xff]  ;;  %v15638_v17 = vld [vmem:[#allocation98_spill] sm:$0xff] }
 0x5c9   :  { %v6197_v58 = vmax.f32 %v6037_v61, 0.0  ;;  %v3666_v13 = vpop.permute.xlu1 %3665  ;;  %v6358_v21 = vadd.f32 %v14181_v36, %v6196_v26 }
 0x5ca   :  { %v6716_v47 = vrot.slane %v6715_v41, 1  ;;  %vm3906_vm11 = vcmp.eq.s32.totalorder %v3666_v13, %v10839_v60 }
 0x5cb   :  { %v6359_v18 = vadd.f32 %v14187_v44, %v6197_v58  ;;  %vm8823_vm12 = vmpackc.low %vm3906_vm11, %vm3905_vm10  ;;  %9171 = vset.pattern.permute.xlu1 %v15285_v20 }
 0x5cc   :  { %v6717_v43 = vmax.f32 %v6715_v41, %v6716_v47  ;;  %3728 = vperm.xlu1 %9171, %v9542_v39   ;;  %v5638_v38 = vpop.f32.mrb[164].mxu1  ;;  %8824 = vmatprep.mubr.msk.bf16.mxu1 %vm8823_vm12, %v15268_v0 }
 0x5cd   :  { %v6718_v49 = vmax.f32 %v6358_v21, %v6359_v18  ;;  %v5639_v62 = vadd.f32 %v5638_v38, %v15637_v31  ;;  %v5640_v22 = vpop.f32.mrb[165].mxu1 }
 0x5ce   :  { %v7037_v35 = vpack.c.bf16 %v6717_v43, %v6717_v43  ;;  %v2626_v1 = vpop.permute.xlu1 %2625  ;;  %v5641_v9 = vpop.f32.mrb[166].mxu1 }
 0x5cf   :  { %v6719_v59 = vrot.slane %v6718_v49, 4  ;;  %v6038_v32 = vadd.f32 %v14167_v34, %v5639_v62  ;;  %vm2866_vm3 = vcmp.eq.s32.totalorder %v2626_v1, %v10839_v60  ;;  %v5642_v6 = vadd.f32 %v5641_v9, %v15638_v17  ;;  %v5643_v26 = vpop.f32.mrb[167].mxu1  ;;  %v3675_v62 = vpop.permute.xlu0 %3674  ;;  %v9544_v9 = vld [vmem:[%s14948_s0 + $0x478] sm:$0xff]  ;;  %v15639_v17 = vld [vmem:[#allocation99_spill] sm:$0xff] }
 0x5d0   :  { %v7220_v61 = vunpack.c.l.b16 %v7037_v35  ;;  %vm8825_vm6 = vmpackc.low %vm2866_vm3, %vm2865_vm14  ;;  %9173 = vset.pattern.permute.xlu1 %v15296_v48  ;;  %vm3909_vm3 = vcmp.eq.s32.totalorder %v3675_v62, %v10839_v60  ;;  %v9545_v62 = vld [vmem:[%s14948_s0 + $0x480] sm:$0xff] }
 0x5d1   :  { %v6720_v41 = vmax.f32 %v6718_v49, %v6719_v59  ;;  %v6198_v58 = vmax.f32 %v6038_v32, 0.0  ;;  %v6039_v13 = vadd.f32 %v14167_v34, %v5642_v6  ;;  %2688 = vperm.xlu1 %9173, %v9542_v39   ;;  %8826 = vmatmul.mubr.msk.bf16.gmra.mrb[236].mxu1 %vm8825_vm6, %v15268_v0  ;;  %v9543_v39 = vld [vmem:[%s14948_s0 + $0x468] sm:$0xff] }
 0x5d2   :  { %v14371_v47 = vsel %vm7273_vm2, %v7220_v61, %v7301_v27 }
 0x5d3   :  { %v6721_v21 = vrot.slane %v6720_v41, 2  ;;  %v6199_v18 = vmax.f32 %v6039_v13, 0.0  ;;  %v3669_v43 = vpop.permute.xlu1 %3668  ;;  %v6360_v38 = vadd.f32 %v14181_v36, %v6198_v58 }
 0x5d4   :  { %vm3907_vm9 = vcmp.eq.s32.totalorder %v3669_v43, %v10839_v60  ;;  %v15640_v43 = vld [vmem:[#allocation100_spill] sm:$0xff] }
 0x5d5   :  { %v6361_v49 = vadd.f32 %v14187_v44, %v6199_v18  ;;  %vm8827_vm10 = vmpackc.low %vm3908_vm8, %vm3907_vm9  ;;  %2691 = vperm.xlu1 %9173, %v9543_v39   ;;  %v6722_v31 = vmax.f32 %v6720_v41, %v6721_v21  ;;  %v3684_v21 = vpop.permute.xlu0 %3683 }
 0x5d6   :  { %8828 = vmatprep.mubr.msk.bf16.mxu1 %vm8827_vm10, %v15268_v0 }
 0x5d7   :  { %v6725_v27 = vmax.f32 %v6360_v38, %v6361_v49  ;;  %v6723_v1 = vrot.slane %v6722_v31, 1 }
 0x5d8   :  { %v2629_v22 = vpop.permute.xlu1 %2628 }
 0x5d9   :  { %v6726_v35 = vrot.slane %v6725_v27, 4  ;;  %9174 = vset.pattern.permute.xlu1 %v15285_v20  ;;  %vm2867_vm11 = vcmp.eq.s32.totalorder %v2629_v22, %v10839_v60  ;;  %v6724_v18 = vmax.f32 %v6722_v31, %v6723_v1  ;;  %v2635_v1 = vpop.permute.xlu0 %2634 }
 0x5da   :  { %3737 = vperm.xlu1 %9174, %v9544_v9   ;;  %v5646_v59 = vpop.f32.mrb[168].mxu1  ;;  %vm2869_vm9 = vcmp.eq.s32.totalorder %v2635_v1, %v10839_v60 }
 0x5db   :  { %v6727_v32 = vmax.f32 %v6725_v27, %v6726_v35  ;;  %v5647_v6 = vadd.f32 %v5646_v59, %v15639_v17  ;;  %v5648_v26 = vpop.f32.mrb[169].mxu1  ;;  %v7038_v59 = vpack.c.bf16 %v6724_v18, %v6724_v18 }
 0x5dc   :  { %v2632_v61 = vpop.permute.xlu1 %2631  ;;  %v5649_v42 = vpop.f32.mrb[170].mxu1 }
 0x5dd   :  { %v6728_v41 = vrot.slane %v6727_v32, 2  ;;  %v6040_v58 = vadd.f32 %v14167_v34, %v5647_v6  ;;  %vm2868_vm12 = vcmp.eq.s32.totalorder %v2632_v61, %v10839_v60  ;;  %v5651_v13 = vpop.f32.mrb[171].mxu1  ;;  %v5650_v38 = vadd.f32 %v5649_v42, %v15640_v43  ;;  %v15641_v61 = vld [vmem:[#allocation101_spill] sm:$0xff] }
 0x5de   :  { %vm8829_vm14 = vmpackc.low %vm2868_vm12, %vm2867_vm11  ;;  %9176 = vset.pattern.permute.xlu1 %v15296_v48  ;;  %vm3912_vm12 = vcmp.eq.s32.totalorder %v3684_v21, %v10839_v60 }
 0x5df   :  { %v6729_v49 = vmax.f32 %v6727_v32, %v6728_v41  ;;  %2697 = vperm.xlu1 %9176, %v9544_v9   ;;  %8830 = vmatmul.mubr.msk.bf16.gmra.mrb[240].mxu1 %vm8829_vm14, %v15268_v0  ;;  %v6200_v39 = vmax.f32 %v6040_v58, 0.0  ;;  %v6041_v27 = vadd.f32 %v14167_v34, %v5650_v38  ;;  %v7221_v58 = vunpack.c.l.b16 %v7038_v59 }
 0x5e1   :  { %v6730_v22 = vrot.slane %v6729_v49, 1  ;;  %v3678_v35 = vpop.permute.xlu1 %3677  ;;  %v6201_v17 = vmax.f32 %v6041_v27, 0.0  ;;  %v6362_v9 = vadd.f32 %v14181_v36, %v6200_v39  ;;  %v15642_v39 = vld [vmem:[#allocation102_spill] sm:$0xff] }
 0x5e2   :  { %vm3910_vm6 = vcmp.eq.s32.totalorder %v3678_v35, %v10839_v60 }
 0x5e3   :  { %v6731_v31 = vmax.f32 %v6729_v49, %v6730_v22  ;;  %vm8831_vm8 = vmpackc.low %vm3910_vm6, %vm3909_vm3  ;;  %9177 = vset.pattern.permute.xlu1 %v15285_v20  ;;  %v6363_v32 = vadd.f32 %v14187_v44, %v6201_v17 }
 0x5e4   :  { %3740 = vperm.xlu1 %9177, %v9545_v62   ;;  %v5654_v6 = vpop.f32.mrb[172].mxu1  ;;  %8832 = vmatprep.mubr.msk.bf16.mxu1 %vm8831_vm8, %v15268_v0 }
 0x5e5   :  { %v7039_v26 = vpack.c.bf16 %v6731_v31, %v6731_v31  ;;  %v5655_v42 = vadd.f32 %v5654_v6, %v15641_v61  ;;  %v5656_v41 = vpop.f32.mrb[173].mxu1  ;;  %v6732_v13 = vmax.f32 %v6362_v9, %v6363_v32 }
 0x5e6   :  { %v2638_v18 = vpop.permute.xlu1 %2637  ;;  %v5657_v43 = vpop.f32.mrb[174].mxu1 }
 0x5e7   :  { %v7222_v38 = vunpack.c.l.b16 %v7039_v26  ;;  %v6042_v49 = vadd.f32 %v14167_v34, %v5655_v42  ;;  %vm2870_vm10 = vcmp.eq.s32.totalorder %v2638_v18, %v10839_v60  ;;  %v5658_v27 = vadd.f32 %v5657_v43, %v15642_v39  ;;  %v5659_v22 = vpop.f32.mrb[175].mxu1  ;;  %v9546_v42 = vld [vmem:[%s14948_s0 + $0x488] sm:$0xff] }
 0x5e8   :  { %v6733_v35 = vrot.slane %v6732_v13, 4  ;;  %vm8833_vm11 = vmpackc.low %vm2870_vm10, %vm2869_vm9  ;;  %9178 = vset.pattern.permute.xlu1 %v15296_v48 }
 0x5e9   :  { %v7303_v17 = vsel %vm7261_vm13, %v7222_v38, %v7221_v58  ;;  %v6202_v31 = vmax.f32 %v6042_v49, 0.0  ;;  %v6043_v59 = vadd.f32 %v14167_v34, %v5658_v27  ;;  %2700 = vperm.xlu1 %9178, %v9545_v62   ;;  %8834 = vmatmul.mubr.msk.bf16.gmra.mrb[244].mxu1 %vm8833_vm11, %v15268_v0  ;;  %v9547_v38 = vld [vmem:[%s14948_s0 + $0x498] sm:$0xff]  ;;  %v15643_v27 = vld [vmem:[#allocation103_spill] sm:$0xff] }
 0x5ea   :  { %v6734_v1 = vmax.f32 %v6732_v13, %v6733_v35  ;;  %v2647_v13 = vpop.permute.xlu0 %2646 }
 0x5eb   :  { %v6203_v9 = vmax.f32 %v6043_v59, 0.0  ;;  %v3681_v32 = vpop.permute.xlu1 %3680  ;;  %v6364_v26 = vadd.f32 %v14181_v36, %v6202_v31 }
 0x5ec   :  { %v6735_v6 = vrot.slane %v6734_v1, 2  ;;  %vm3911_vm14 = vcmp.eq.s32.totalorder %v3681_v32, %v10839_v60 }
 0x5ed   :  { %v6365_v61 = vadd.f32 %v14187_v44, %v6203_v9  ;;  %vm8835_vm3 = vmpackc.low %vm3912_vm12, %vm3911_vm14  ;;  %2703 = vperm.xlu1 %9178, %v9546_v42   ;;  %vm2873_vm14 = vcmp.eq.s32.totalorder %v2647_v13, %v10839_v60 }
 0x5ee   :  { %v6736_v62 = vmax.f32 %v6734_v1, %v6735_v6  ;;  %8836 = vmatprep.mubr.msk.bf16.mxu1 %vm8835_vm3, %v15268_v0  ;;  %v15644_v6 = vld [vmem:[#allocation104_spill] sm:$0xff] }
 0x5ef   :  { %v6739_v21 = vmax.f32 %v6364_v26, %v6365_v61 }
 0x5f0   :  { %v6737_v41 = vrot.slane %v6736_v62, 1  ;;  %v2641_v58 = vpop.permute.xlu1 %2640 }
 0x5f1   :  { %v6740_v18 = vrot.slane %v6739_v21, 4  ;;  %9179 = vset.pattern.permute.xlu1 %v15285_v20  ;;  %vm2871_vm6 = vcmp.eq.s32.totalorder %v2641_v58, %v10839_v60 }
 0x5f2   :  { %v6738_v43 = vmax.f32 %v6736_v62, %v6737_v41  ;;  %3749 = vperm.xlu1 %9179, %v9547_v38   ;;  %v5662_v49 = vpop.f32.mrb[176].mxu1  ;;  %v3687_v62 = vpop.permute.xlu0 %3686 }
 0x5f3   :  { %v6741_v39 = vmax.f32 %v6739_v21, %v6740_v18  ;;  %v5663_v22 = vadd.f32 %v5662_v49, %v15643_v27  ;;  %v5664_v35 = vpop.f32.mrb[177].mxu1  ;;  %vm3913_vm10 = vcmp.eq.s32.totalorder %v3687_v62, %v10839_v60 }
 0x5f4   :  { %v7040_v31 = vpack.c.bf16 %v6738_v43, %v6738_v43  ;;  %v2644_v59 = vpop.permute.xlu1 %2643  ;;  %v5665_v1 = vpop.f32.mrb[178].mxu1 }
 0x5f5   :  { %v6742_v9 = vrot.slane %v6741_v39, 2  ;;  %v6044_v32 = vadd.f32 %v14167_v34, %v5663_v22  ;;  %vm2872_vm8 = vcmp.eq.s32.totalorder %v2644_v59, %v10839_v60  ;;  %v5666_v26 = vadd.f32 %v5665_v1, %v15644_v6  ;;  %v5667_v61 = vpop.f32.mrb[179].mxu1  ;;  %v15645_v1 = vld [vmem:[#allocation105_spill] sm:$0xff] }
 0x5f6   :  { %v7223_v42 = vunpack.c.l.b16 %v7040_v31  ;;  %vm8837_vm9 = vmpackc.low %vm2872_vm8, %vm2871_vm6  ;;  %9180 = vset.pattern.permute.xlu1 %v15296_v48  ;;  %v3696_v13 = vpop.permute.xlu0 %3695 }
 0x5f7   :  { %v6743_v21 = vmax.f32 %v6741_v39, %v6742_v9  ;;  %v6204_v41 = vmax.f32 %v6044_v32, 0.0  ;;  %v6045_v18 = vadd.f32 %v14167_v34, %v5666_v26  ;;  %2709 = vperm.xlu1 %9180, %v9547_v38   ;;  %8838 = vmatmul.mubr.msk.bf16.gmra.mrb[248].mxu1 %vm8837_vm9, %v15268_v0  ;;  %v9548_v38 = vld [vmem:[%s14948_s0 + $0x4a0] sm:$0xff]  ;;  %vm3916_vm8 = vcmp.eq.s32.totalorder %v3696_v13, %v10839_v60 }
 0x5f8   :  { %v7304_v58 = vsel %vm7263_vm1, %v7223_v42, %v7303_v17 }
 0x5f9   :  { %v6744_v43 = vrot.slane %v6743_v21, 1  ;;  %v6205_v49 = vmax.f32 %v6045_v18, 0.0  ;;  %v3690_v27 = vpop.permute.xlu1 %3689  ;;  %v6366_v35 = vadd.f32 %v14181_v36, %v6204_v41  ;;  %v15646_v41 = vld [vmem:[#allocation106_spill] sm:$0xff] }
 0x5fa   :  { %vm3914_vm11 = vcmp.eq.s32.totalorder %v3690_v27, %v10839_v60 }
 0x5fb   :  { %v6745_v22 = vmax.f32 %v6743_v21, %v6744_v43  ;;  %v6367_v39 = vadd.f32 %v14187_v44, %v6205_v49  ;;  %vm8839_vm12 = vmpackc.low %vm3914_vm11, %vm3913_vm10  ;;  %9181 = vset.pattern.permute.xlu1 %v15285_v20 }
 0x5fc   :  { %3752 = vperm.xlu1 %9181, %v9548_v38   ;;  %v5670_v31 = vpop.f32.mrb[180].mxu1  ;;  %8840 = vmatprep.mubr.msk.bf16.mxu1 %vm8839_vm12, %v15268_v0 }
 0x5fd   :  { %v7041_v17 = vpack.c.bf16 %v6745_v22, %v6745_v22  ;;  %v6746_v59 = vmax.f32 %v6366_v35, %v6367_v39  ;;  %v5671_v9 = vadd.f32 %v5670_v31, %v15645_v1  ;;  %v5672_v32 = vpop.f32.mrb[181].mxu1 }
 0x5fe   :  { %v2650_v6 = vpop.permute.xlu1 %2649  ;;  %v5673_v26 = vpop.f32.mrb[182].mxu1 }
 0x5ff   :  { %v7224_v61 = vunpack.c.l.b16 %v7041_v17  ;;  %v6747_v42 = vrot.slane %v6746_v59, 4  ;;  %v6046_v62 = vadd.f32 %v14167_v34, %v5671_v9  ;;  %vm2874_vm3 = vcmp.eq.s32.totalorder %v2650_v6, %v10839_v60  ;;  %v5675_v21 = vpop.f32.mrb[183].mxu1  ;;  %v14452_v34 = vld [vmem:[%s14950_s2] ss:$0 sm:$0xff]  ;;  %v3699_v9 = vpop.permute.xlu0 %3698 }
 0x600   :  { %vm8841_vm6 = vmpackc.low %vm2874_vm3, %vm2873_vm14  ;;  %v5674_v18 = vadd.f32 %v5673_v26, %v15646_v41  ;;  %9183 = vset.pattern.permute.xlu1 %v15296_v48  ;;  %vm3917_vm3 = vcmp.eq.s32.totalorder %v3699_v9, %v10839_v60 }
 0x601   :  { %v7305_v43 = vsel %vm7265_vm0, %v7224_v61, %v7304_v58  ;;  %v6748_v49 = vmax.f32 %v6746_v59, %v6747_v42  ;;  %2712 = vperm.xlu1 %9183, %v9548_v38   ;;  %8842 = vmatmul.mubr.msk.bf16.gmra.mrb[252].mxu1 %vm8841_vm6, %v15268_v0  ;;  %v6206_v27 = vmax.f32 %v6046_v62, 0.0  ;;  %v9550_v38 = vld [vmem:[%s14948_s0 + $0x4a8] sm:$0xff]  ;;  %v9551_v42 = vld [vmem:[%s14948_s0 + $0x4b8] sm:$0xff] }
 0x602   :  { %v6047_v22 = vadd.f32 %v14452_v34, %v5674_v18 }
 0x603   :  { %v6749_v35 = vrot.slane %v6748_v49, 2  ;;  %v3693_v39 = vpop.permute.xlu1 %3692  ;;  %v6368_v17 = vadd.f32 %v14181_v36, %v6206_v27  ;;  %v15647_v36 = vld [vmem:[#allocation107_spill] sm:$0xff] }
 0x604   :  { %v6207_v31 = vmax.f32 %v6047_v22, 0.0  ;;  %vm3915_vm9 = vcmp.eq.s32.totalorder %v3693_v39, %v10839_v60 }
 0x605   :  { %v6750_v58 = vmax.f32 %v6748_v49, %v6749_v35  ;;  %vm8843_vm10 = vmpackc.low %vm3916_vm8, %vm3915_vm9  ;;  %2715 = vperm.xlu1 %9183, %v9550_v38   ;;  %v15648_v35 = vld [vmem:[#allocation108_spill] sm:$0xff] }
 0x606   :  { %v6369_v59 = vadd.f32 %v14187_v44, %v6207_v31  ;;  %8844 = vmatprep.mubr.msk.bf16.mxu1 %vm8843_vm10, %v15268_v0 }
 0x607   :  { %v6751_v1 = vrot.slane %v6750_v58, 1 }
 0x608   :  { %v6753_v32 = vmax.f32 %v6368_v17, %v6369_v59  ;;  %v2653_v6 = vpop.permute.xlu1 %2652 }
 0x609   :  { %v6752_v26 = vmax.f32 %v6750_v58, %v6751_v1  ;;  %9184 = vset.pattern.permute.xlu1 %v15285_v20  ;;  %vm2875_vm11 = vcmp.eq.s32.totalorder %v2653_v6, %v10839_v60  ;;  %v3708_v58 = vpop.permute.xlu0 %3707 }
 0x60a   :  { %v6754_v61 = vrot.slane %v6753_v32, 4  ;;  %3761 = vperm.xlu1 %9184, %v9551_v42   ;;  %v5678_v62 = vpop.f32.mrb[184].mxu1 }
 0x60b   :  { %v7042_v21 = vpack.c.bf16 %v6752_v26, %v6752_v26  ;;  %v5679_v41 = vadd.f32 %v5678_v62, %v15647_v36  ;;  %v5680_v44 = vpop.f32.mrb[185].mxu1  ;;  %v14480_v62 = vld [vmem:[%s14953_s5] sm:$0xff] }
 0x60c   :  { %v6755_v18 = vmax.f32 %v6753_v32, %v6754_v61  ;;  %v2656_v13 = vpop.permute.xlu1 %2655  ;;  %v5681_v49 = vpop.f32.mrb[186].mxu1 }
 0x60d   :  { %v7225_v27 = vunpack.c.l.b16 %v7042_v21  ;;  %v6048_v22 = vadd.f32 %v14452_v34, %v5679_v41  ;;  %vm2876_vm12 = vcmp.eq.s32.totalorder %v2656_v13, %v10839_v60  ;;  %v5682_v39 = vadd.f32 %v5681_v49, %v15648_v35  ;;  %v5683_v31 = vpop.f32.mrb[187].mxu1  ;;  %v2659_v21 = vpop.permute.xlu0 %2658  ;;  %v9554_v41 = vld [vmem:[%s14948_s0 + $0x4c0] sm:$0xff]  ;;  %v15649_v13 = vld [vmem:[#allocation109_spill] sm:$0xff] }
 0x60e   :  { %v6756_v38 = vrot.slane %v6755_v18, 2  ;;  %vm8845_vm14 = vmpackc.low %vm2876_vm12, %vm2875_vm11  ;;  %9186 = vset.pattern.permute.xlu1 %v15296_v48  ;;  %vm2877_vm9 = vcmp.eq.s32.totalorder %v2659_v21, %v10839_v60  ;;  %vm3920_vm12 = vcmp.eq.s32.totalorder %v3708_v58, %v10839_v60 }
 0x60f   :  { %v7306_v17 = vsel %vm7267_vm5, %v7225_v27, %v7305_v43  ;;  %v6208_v59 = vmax.f32 %v6048_v22, 0.0  ;;  %v6049_v1 = vadd.f32 %v14452_v34, %v5682_v39  ;;  %2721 = vperm.xlu1 %9186, %v9551_v42   ;;  %8846 = vmatmul.mubr.msk.bf16.gmra.mrb[0].mxu1 %vm8845_vm14, %v15268_v0  ;;  %v14486_v42 = vld [vmem:[%s14953_s5 + $0x8] sm:$0xff] }
 0x610   :  { %v6757_v32 = vmax.f32 %v6755_v18, %v6756_v38 }
 0x611   :  { %v6209_v6 = vmax.f32 %v6049_v1, 0.0  ;;  %v3702_v26 = vpop.permute.xlu1 %3701  ;;  %v6370_v43 = vadd.f32 %v14480_v62, %v6208_v59  ;;  %v15650_v59 = vld [vmem:[#allocation110_spill] sm:$0xff] }
 0x612   :  { %v6758_v61 = vrot.slane %v6757_v32, 1  ;;  %vm3918_vm6 = vcmp.eq.s32.totalorder %v3702_v26, %v10839_v60 }
 0x613   :  { %v6371_v9 = vadd.f32 %v14486_v42, %v6209_v6  ;;  %vm8847_vm8 = vmpackc.low %vm3918_vm6, %vm3917_vm3  ;;  %9187 = vset.pattern.permute.xlu1 %v15285_v20 }
 0x614   :  { %v6759_v36 = vmax.f32 %v6757_v32, %v6758_v61  ;;  %3764 = vperm.xlu1 %9187, %v9554_v41   ;;  %v5686_v44 = vpop.f32.mrb[188].mxu1  ;;  %8848 = vmatprep.mubr.msk.bf16.mxu1 %vm8847_vm8, %v15268_v0 }
 0x615   :  { %v6760_v18 = vmax.f32 %v6370_v43, %v6371_v9  ;;  %v5687_v49 = vadd.f32 %v5686_v44, %v15649_v13  ;;  %v5688_v27 = vpop.f32.mrb[189].mxu1 }
 0x616   :  { %v7043_v22 = vpack.c.bf16 %v6759_v36, %v6759_v36  ;;  %v2662_v35 = vpop.permute.xlu1 %2661  ;;  %v5689_v39 = vpop.f32.mrb[190].mxu1 }
 0x617   :  { %v6761_v31 = vrot.slane %v6760_v18, 4  ;;  %v6050_v38 = vadd.f32 %v14452_v34, %v5687_v49  ;;  %vm2878_vm10 = vcmp.eq.s32.totalorder %v2662_v35, %v10839_v60  ;;  %v5690_v1 = vadd.f32 %v5689_v39, %v15650_v59  ;;  %v5691_v32 = vpop.f32.mrb[191].mxu1 }
 0x618   :  { %v7226_v6 = vunpack.c.l.b16 %v7043_v22  ;;  %vm8849_vm11 = vmpackc.low %vm2878_vm10, %vm2877_vm9  ;;  %9188 = vset.pattern.permute.xlu1 %v15296_v48  ;;  %v2671_v22 = vpop.permute.xlu0 %2670  ;;  %v15651_v32 = vld [vmem:[#allocation111_spill] sm:$0xff] }
 0x619   :  { %v6762_v26 = vmax.f32 %v6760_v18, %v6761_v31  ;;  %v6210_v61 = vmax.f32 %v6050_v38, 0.0  ;;  %v6051_v43 = vadd.f32 %v14452_v34, %v5690_v1  ;;  %2724 = vperm.xlu1 %9188, %v9554_v41   ;;  %8850 = vmatmul.mubr.msk.bf16.gmra.mrb[4].mxu1 %vm8849_vm11, %v15268_v0  ;;  %v9555_v41 = vld [vmem:[%s14948_s0 + $0x4c8] sm:$0xff]  ;;  %v9556_v31 = vld [vmem:[%s14948_s0 + $0x4d8] sm:$0xff] }
 0x61a   :  { %v7307_v9 = vsel %vm7269_vm7, %v7226_v6, %v7306_v17 }
 0x61b   :  { %v6763_v21 = vrot.slane %v6762_v26, 2  ;;  %v6211_v36 = vmax.f32 %v6051_v43, 0.0  ;;  %v3705_v44 = vpop.permute.xlu1 %3704  ;;  %v6372_v49 = vadd.f32 %v14480_v62, %v6210_v61 }
 0x61c   :  { %vm3919_vm14 = vcmp.eq.s32.totalorder %v3705_v44, %v10839_v60 }
 0x61d   :  { %v6764_v13 = vmax.f32 %v6762_v26, %v6763_v21  ;;  %v6373_v18 = vadd.f32 %v14486_v42, %v6211_v36  ;;  %vm8851_vm3 = vmpackc.low %vm3920_vm12, %vm3919_vm14  ;;  %2727 = vperm.xlu1 %9188, %v9555_v41   ;;  %v3711_v41 = vpop.permute.xlu0 %3710  ;;  %vm2881_vm14 = vcmp.eq.s32.totalorder %v2671_v22, %v10839_v60 }
 0x61e   :  { %8852 = vmatprep.mubr.msk.bf16.mxu1 %vm8851_vm3, %v15268_v0  ;;  %vm3921_vm10 = vcmp.eq.s32.totalorder %v3711_v41, %v10839_v60  ;;  %v15654_v41 = vld [vmem:[#allocation114_spill] sm:$0xff] }
 0x61f   :  { %v6765_v58 = vrot.slane %v6764_v13, 1  ;;  %v6767_v17 = vmax.f32 %v6372_v49, %v6373_v18  ;;  %v15652_v49 = vld [vmem:[#allocation112_spill] sm:$0xff] }
 0x620   :  { %v2665_v27 = vpop.permute.xlu1 %2664 }
 0x621   :  { %v6766_v35 = vmax.f32 %v6764_v13, %v6765_v58  ;;  %v6768_v39 = vrot.slane %v6767_v17, 4  ;;  %9189 = vset.pattern.permute.xlu1 %v15285_v20  ;;  %vm2879_vm6 = vcmp.eq.s32.totalorder %v2665_v27, %v10839_v60  ;;  %v3720_v22 = vpop.permute.xlu0 %3719 }
 0x622   :  { %3773 = vperm.xlu1 %9189, %v9556_v31   ;;  %v5694_v38 = vpop.f32.mrb[192].mxu1 }
 0x623   :  { %v7044_v59 = vpack.c.bf16 %v6766_v35, %v6766_v35  ;;  %v6769_v1 = vmax.f32 %v6767_v17, %v6768_v39  ;;  %v5695_v6 = vadd.f32 %v5694_v38, %v15651_v32  ;;  %v5696_v26 = vpop.f32.mrb[193].mxu1 }
 0x624   :  { %v2668_v61 = vpop.permute.xlu1 %2667  ;;  %v5697_v43 = vpop.f32.mrb[194].mxu1 }
 0x625   :  { %v7227_v21 = vunpack.c.l.b16 %v7044_v59  ;;  %v6770_v36 = vrot.slane %v6769_v1, 2  ;;  %v6052_v44 = vadd.f32 %v14452_v34, %v5695_v6  ;;  %vm2880_vm8 = vcmp.eq.s32.totalorder %v2668_v61, %v10839_v60  ;;  %v5699_v13 = vpop.f32.mrb[195].mxu1  ;;  %v15653_v61 = vld [vmem:[#allocation113_spill] sm:$0xff] }
 0x626   :  { %vm8853_vm9 = vmpackc.low %vm2880_vm8, %vm2879_vm6  ;;  %v5698_v18 = vadd.f32 %v5697_v43, %v15652_v49  ;;  %9191 = vset.pattern.permute.xlu1 %v15296_v48  ;;  %vm3924_vm8 = vcmp.eq.s32.totalorder %v3720_v22, %v10839_v60 }
 0x627   :  { %v7308_v58 = vsel %vm7271_vm4, %v7227_v21, %v7307_v9  ;;  %v6771_v17 = vmax.f32 %v6769_v1, %v6770_v36  ;;  %2733 = vperm.xlu1 %9191, %v9556_v31   ;;  %8854 = vmatmul.mubr.msk.bf16.gmra.mrb[8].mxu1 %vm8853_vm9, %v15268_v0  ;;  %v6212_v27 = vmax.f32 %v6052_v44, 0.0  ;;  %v9557_v1 = vld [vmem:[%s14948_s0 + $0x4e0] sm:$0xff] }
 0x628   :  { %v6053_v35 = vadd.f32 %v14452_v34, %v5698_v18 }
 0x629   :  { %v6772_v39 = vrot.slane %v6771_v17, 1  ;;  %v3714_v38 = vpop.permute.xlu1 %3713  ;;  %v6374_v9 = vadd.f32 %v14480_v62, %v6212_v27 }
 0x62a   :  { %v6213_v59 = vmax.f32 %v6053_v35, 0.0  ;;  %vm3922_vm11 = vcmp.eq.s32.totalorder %v3714_v38, %v10839_v60 }
 0x62b   :  { %v6773_v32 = vmax.f32 %v6771_v17, %v6772_v39  ;;  %vm8855_vm12 = vmpackc.low %vm3922_vm11, %vm3921_vm10  ;;  %9192 = vset.pattern.permute.xlu1 %v15285_v20 }
 0x62c   :  { %v6375_v31 = vadd.f32 %v14486_v42, %v6213_v59  ;;  %3776 = vperm.xlu1 %9192, %v9557_v1   ;;  %v5702_v6 = vpop.f32.mrb[196].mxu1  ;;  %8856 = vmatprep.mubr.msk.bf16.mxu1 %vm8855_vm12, %v15268_v0 }
 0x62d   :  { %v7045_v26 = vpack.c.bf16 %v6773_v32, %v6773_v32  ;;  %v5703_v43 = vadd.f32 %v5702_v6, %v15653_v61  ;;  %v5704_v21 = vpop.f32.mrb[197].mxu1 }
 0x62e   :  { %v6774_v36 = vmax.f32 %v6374_v9, %v6375_v31  ;;  %v2674_v44 = vpop.permute.xlu1 %2673  ;;  %v5705_v13 = vpop.f32.mrb[198].mxu1 }
 0x62f   :  { %v7228_v49 = vunpack.c.l.b16 %v7045_v26  ;;  %v6054_v18 = vadd.f32 %v14452_v34, %v5703_v43  ;;  %vm2882_vm3 = vcmp.eq.s32.totalorder %v2674_v44, %v10839_v60  ;;  %v5706_v17 = vadd.f32 %v5705_v13, %v15654_v41  ;;  %v5707_v27 = vpop.f32.mrb[199].mxu1  ;;  %v3723_v21 = vpop.permute.xlu0 %3722 }
 0x630   :  { %v6775_v35 = vrot.slane %v6774_v36, 4  ;;  %vm8857_vm6 = vmpackc.low %vm2882_vm3, %vm2881_vm14  ;;  %9194 = vset.pattern.permute.xlu1 %v15296_v48  ;;  %vm3925_vm3 = vcmp.eq.s32.totalorder %v3723_v21, %v10839_v60 }
 0x631   :  { %v7309_v39 = vsel %vm7273_vm2, %v7228_v49, %v7308_v58  ;;  %v6214_v38 = vmax.f32 %v6054_v18, 0.0  ;;  %v6055_v59 = vadd.f32 %v14452_v34, %v5706_v17  ;;  %2736 = vperm.xlu1 %9194, %v9557_v1   ;;  %8858 = vmatmul.mubr.msk.bf16.gmra.mrb[12].mxu1 %vm8857_vm6, %v15268_v0  ;;  %v9558_v1 = vld [vmem:[%s14948_s0 + $0x4e8] sm:$0xff]  ;;  %v9559_v49 = vld [vmem:[%s14948_s0 + $0x4f8] sm:$0xff]  ;;  %v15655_v17 = vld [vmem:[#allocation115_spill] sm:$0xff] }
 0x632   :  { %v7340_v32 = vpack.c.b16 %v7309_v39, %v14371_v47  ;;  %v6776_v9 = vmax.f32 %v6774_v36, %v6775_v35 }
 0x633   :  { %v6215_v31 = vmax.f32 %v6055_v59, 0.0  ;;  %v3717_v6 = vpop.permute.xlu1 %3716  ;;  %v6376_v61 = vadd.f32 %v14480_v62, %v6214_v38 }
 0x634   :  { %v6777_v26 = vrot.slane %v6776_v9, 2  ;;  %vm3923_vm9 = vcmp.eq.s32.totalorder %v3717_v6, %v10839_v60  ;;  %8955 = vmatmul.mubr.bf16.gmra.mrb[72].mxu0 %v7340_v32 }
 0x635   :  { %v6377_v58 = vadd.f32 %v14486_v42, %v6215_v31  ;;  %vm8859_vm10 = vmpackc.low %vm3924_vm8, %vm3923_vm9  ;;  %2739 = vperm.xlu1 %9194, %v9558_v1   ;;  %v3732_v31 = vpop.permute.xlu0 %3731 }
 0x636   :  { %v6778_v43 = vmax.f32 %v6776_v9, %v6777_v26  ;;  %8860 = vmatprep.mubr.msk.bf16.mxu1 %vm8859_vm10, %v15268_v0 }
 0x637   :  { %v6781_v47 = vmax.f32 %v6376_v61, %v6377_v58 }
 0x638   :  { %v2677_v36 = vpop.permute.xlu1 %2676  ;;  %v6779_v13 = vrot.slane %v6778_v43, 1 }
 0x639   :  { %v6782_v44 = vrot.slane %v6781_v47, 4  ;;  %9195 = vset.pattern.permute.xlu1 %v15285_v20  ;;  %vm2883_vm11 = vcmp.eq.s32.totalorder %v2677_v36, %v10839_v60  ;;  %v15656_v20 = vld [vmem:[#allocation116_spill] sm:$0xff] }
 0x63a   :  { %3785 = vperm.xlu1 %9195, %v9559_v49   ;;  %v5710_v18 = vpop.f32.mrb[200].mxu1  ;;  %v6780_v6 = vmax.f32 %v6778_v43, %v6779_v13  ;;  %v2683_v13 = vpop.permute.xlu0 %2682 }
 0x63b   :  { %v6783_v41 = vmax.f32 %v6781_v47, %v6782_v44  ;;  %v5711_v27 = vadd.f32 %v5710_v18, %v15655_v17  ;;  %v5712_v35 = vpop.f32.mrb[201].mxu1  ;;  %vm2885_vm9 = vcmp.eq.s32.totalorder %v2683_v13, %v10839_v60  ;;  %v15657_v17 = vld [vmem:[#allocation117_spill] sm:$0xff] }
 0x63c   :  { %v2680_v22 = vpop.permute.xlu1 %2679  ;;  %v5713_v39 = vpop.f32.mrb[202].mxu1  ;;  %v7046_v44 = vpack.c.bf16 %v6780_v6, %v6780_v6 }
 0x63d   :  { %v6784_v38 = vrot.slane %v6783_v41, 2  ;;  %v6056_v59 = vadd.f32 %v14452_v34, %v5711_v27  ;;  %vm2884_vm12 = vcmp.eq.s32.totalorder %v2680_v22, %v10839_v60  ;;  %v5714_v32 = vadd.f32 %v5713_v39, %v15656_v20  ;;  %v5715_v9 = vpop.f32.mrb[203].mxu1 }
 0x63e   :  { %vm8861_vm14 = vmpackc.low %vm2884_vm12, %vm2883_vm11  ;;  %9197 = vset.pattern.permute.xlu1 %v15296_v48  ;;  %v7229_v22 = vunpack.c.l.b16 %v7046_v44  ;;  %vm3928_vm12 = vcmp.eq.s32.totalorder %v3732_v31, %v10839_v60 }
 0x63f   :  { %v6785_v26 = vmax.f32 %v6783_v41, %v6784_v38  ;;  %v6216_v61 = vmax.f32 %v6056_v59, 0.0  ;;  %v6057_v58 = vadd.f32 %v14452_v34, %v5714_v32  ;;  %2745 = vperm.xlu1 %9197, %v9559_v49   ;;  %8862 = vmatmul.mubr.msk.bf16.gmra.mrb[16].mxu1 %vm8861_vm14, %v15268_v0 }
 0x641   :  { %v6786_v1 = vrot.slane %v6785_v26, 1  ;;  %v6217_v47 = vmax.f32 %v6057_v58, 0.0  ;;  %v3726_v36 = vpop.permute.xlu1 %3725  ;;  %v6378_v43 = vadd.f32 %v14480_v62, %v6216_v61  ;;  %v14576_v58 = vld [vmem:[%s14952_s4] ss:$0 sm:$0xff] }
 0x642   :  { %vm3926_vm6 = vcmp.eq.s32.totalorder %v3726_v36, %v10839_v60 }
 0x643   :  { %v6787_v18 = vmax.f32 %v6785_v26, %v6786_v1  ;;  %v6379_v48 = vadd.f32 %v14486_v42, %v6217_v47  ;;  %vm8863_vm8 = vmpackc.low %vm3926_vm6, %vm3925_vm3  ;;  %v15658_v26 = vld [vmem:[#allocation118_spill] sm:$0xff] }
 0x644   :  { %v5718_v41 = vpop.f32.mrb[204].mxu1  ;;  %8864 = vmatprep.mubr.msk.bf16.mxu1 %vm8863_vm8, %v15268_v0 }
 0x645   :  { %v7047_v49 = vpack.c.bf16 %v6787_v18, %v6787_v18  ;;  %v6788_v21 = vmax.f32 %v6378_v43, %v6379_v48  ;;  %v5719_v27 = vadd.f32 %v5718_v41, %v15657_v17  ;;  %v5720_v35 = vpop.f32.mrb[205].mxu1 }
 0x646   :  { %v2686_v39 = vpop.permute.xlu1 %2685  ;;  %v5721_v38 = vpop.f32.mrb[206].mxu1 }
 0x647   :  { %v7230_v59 = vunpack.c.l.b16 %v7047_v49  ;;  %v6789_v20 = vrot.slane %v6788_v21, 4  ;;  %v6058_v32 = vadd.f32 %v14452_v34, %v5719_v27  ;;  %vm2886_vm10 = vcmp.eq.s32.totalorder %v2686_v39, %v10839_v60  ;;  %v5723_v9 = vpop.f32.mrb[207].mxu1  ;;  %v7438_v6 = vpop.f32.mrb[68].mxu0 }
 0x648   :  { %vm8865_vm11 = vmpackc.low %vm2886_vm10, %vm2885_vm9  ;;  %v5722_v61 = vadd.f32 %v5721_v38, %v15658_v26  ;;  %v14579_v1 = vadd.f32 %v14576_v58, %v7438_v6  ;;  %v8952_v47 = vpop.f32.mrb[69].mxu0  ;;  %v2695_v38 = vpop.permute.xlu0 %2694  ;;  %v15659_v6 = vld [vmem:[#allocation119_spill] sm:$0xff] }
 0x649   :  { %v7310_v36 = vsel %vm7261_vm13, %v7230_v59, %v7229_v22  ;;  %v6790_v44 = vmax.f32 %v6788_v21, %v6789_v20  ;;  %8866 = vmatmul.mubr.msk.bf16.gmra.mrb[20].mxu1 %vm8865_vm11, %v15268_v0  ;;  %v14583_v18 = vpop.f32.mrb[70].mxu0  ;;  %v6218_v43 = vmax.f32 %v6058_v32, 0.0 }
 0x64a   :  { %v6059_v48 = vadd.f32 %v14452_v34, %v5722_v61  ;;  %v8953_v13 = vpop.f32.mrb[71].mxu0  ;;  %7473 = vmax.xlane.f32.xlu0 %v14579_v1 }
 0x64b   :  { %v6791_v41 = vrot.slane %v6790_v44, 2  ;;  %v3729_v49 = vpop.permute.xlu1 %3728  ;;  %v6380_v21 = vadd.f32 %v14480_v62, %v6218_v43 }
 0x64c   :  { %v6219_v17 = vmax.f32 %v6059_v48, 0.0  ;;  %vm3927_vm14 = vcmp.eq.s32.totalorder %v3729_v49, %v10839_v60 }
 0x64d   :  { %v6792_v27 = vmax.f32 %v6790_v44, %v6791_v41  ;;  %vm8867_vm3 = vmpackc.low %vm3928_vm12, %vm3927_vm14  ;;  %v15660_v41 = vld [vmem:[#allocation120_spill] sm:$0xff]  ;;  %vm2889_vm14 = vcmp.eq.s32.totalorder %v2695_v38, %v10839_v60  ;;  %v14612_v38 = vadd.f32 %v14576_v58, %v14241_v19  ;;  %v14622_v19 = vadd.f32 %v14576_v58, %v14583_v18 }
 0x64e   :  { %v6381_v35 = vadd.f32 %v14486_v42, %v6219_v17  ;;  %8868 = vmatprep.mubr.msk.bf16.mxu1 %vm8867_vm3, %v15268_v0 }
 0x64f   :  { %v6793_v31 = vrot.slane %v6792_v27, 1 }
 0x650   :  { %v6795_v22 = vmax.f32 %v6380_v21, %v6381_v35  ;;  %v2689_v39 = vpop.permute.xlu1 %2688  ;;  %v3735_v21 = vpop.permute.xlu0 %3734 }
 0x651   :  { %v6794_v59 = vmax.f32 %v6792_v27, %v6793_v31  ;;  %vm2887_vm6 = vcmp.eq.s32.totalorder %v2689_v39, %v10839_v60  ;;  %vm3929_vm10 = vcmp.eq.s32.totalorder %v3735_v21, %v10839_v60 }
 0x652   :  { %v6796_v20 = vrot.slane %v6795_v22, 4  ;;  %v5726_v32 = vpop.f32.mrb[208].mxu1 }
 0x653   :  { %v7048_v9 = vpack.c.bf16 %v6794_v59, %v6794_v59  ;;  %v5727_v26 = vadd.f32 %v5726_v32, %v15659_v6  ;;  %v5728_v61 = vpop.f32.mrb[209].mxu1 }
 0x654   :  { %v6797_v47 = vmax.f32 %v6795_v22, %v6796_v20  ;;  %v2692_v44 = vpop.permute.xlu1 %2691  ;;  %v5729_v43 = vpop.f32.mrb[210].mxu1 }
 0x655   :  { %v7231_v48 = vunpack.c.l.b16 %v7048_v9  ;;  %v6060_v13 = vadd.f32 %v14452_v34, %v5727_v26  ;;  %vm2888_vm8 = vcmp.eq.s32.totalorder %v2692_v44, %v10839_v60  ;;  %v5730_v49 = vadd.f32 %v5729_v43, %v15660_v41  ;;  %v5731_v17 = vpop.f32.mrb[211].mxu1  ;;  %v15661_v44 = vld [vmem:[#allocation121_spill] sm:$0xff] }
 0x656   :  { %v6798_v27 = vrot.slane %v6797_v47, 2  ;;  %vm8869_vm9 = vmpackc.low %vm2888_vm8, %vm2887_vm6 }
 0x657   :  { %v7311_v35 = vsel %vm7263_vm1, %v7231_v48, %v7310_v36  ;;  %v6220_v31 = vmax.f32 %v6060_v13, 0.0  ;;  %v6061_v22 = vadd.f32 %v14452_v34, %v5730_v49  ;;  %8870 = vmatmul.mubr.msk.bf16.gmra.mrb[24].mxu1 %vm8869_vm9, %v15268_v0 }
 0x658   :  { %v6799_v39 = vmax.f32 %v6797_v47, %v6798_v27  ;;  %v15662_v27 = vld [vmem:[#allocation122_spill] sm:$0xff] }
 0x659   :  { %v6221_v59 = vmax.f32 %v6061_v22, 0.0  ;;  %v3738_v20 = vpop.permute.xlu1 %3737  ;;  %v6382_v9 = vadd.f32 %v14480_v62, %v6220_v31 }
 0x65a   :  { %v6800_v32 = vrot.slane %v6799_v39, 1  ;;  %vm3930_vm11 = vcmp.eq.s32.totalorder %v3738_v20, %v10839_v60 }
 0x65b   :  { %v6383_v6 = vadd.f32 %v14486_v42, %v6221_v59  ;;  %vm8871_vm12 = vmpackc.low %vm3930_vm11, %vm3929_vm10 }
 0x65c   :  { %v6801_v26 = vmax.f32 %v6799_v39, %v6800_v32  ;;  %v5734_v36 = vpop.f32.mrb[212].mxu1  ;;  %8872 = vmatprep.mubr.msk.bf16.mxu1 %vm8871_vm12, %v15268_v0  ;;  %v3744_v39 = vpop.permute.xlu0 %3743 }
 0x65d   :  { %v6802_v61 = vmax.f32 %v6382_v9, %v6383_v6  ;;  %v5735_v43 = vadd.f32 %v5734_v36, %v15661_v44  ;;  %v5736_v47 = vpop.f32.mrb[213].mxu1  ;;  %vm3932_vm8 = vcmp.eq.s32.totalorder %v3744_v39, %v10839_v60 }
 0x65e   :  { %v7049_v48 = vpack.c.bf16 %v6801_v26, %v6801_v26  ;;  %v2698_v13 = vpop.permute.xlu1 %2697  ;;  %v5737_v41 = vpop.f32.mrb[214].mxu1 }
 0x65f   :  { %v6803_v49 = vrot.slane %v6802_v61, 4  ;;  %v6062_v17 = vadd.f32 %v14452_v34, %v5735_v43  ;;  %vm2890_vm3 = vcmp.eq.s32.totalorder %v2698_v13, %v10839_v60  ;;  %v5738_v21 = vadd.f32 %v5737_v41, %v15662_v27  ;;  %v5739_v31 = vpop.f32.mrb[215].mxu1 }
 0x660   :  { %v7232_v22 = vunpack.c.l.b16 %v7049_v48  ;;  %vm8873_vm6 = vmpackc.low %vm2890_vm3, %vm2889_vm14  ;;  %v3747_v48 = vpop.permute.xlu0 %3746 }
 0x661   :  { %v6804_v59 = vmax.f32 %v6802_v61, %v6803_v49  ;;  %v6222_v20 = vmax.f32 %v6062_v17, 0.0  ;;  %v6063_v32 = vadd.f32 %v14452_v34, %v5738_v21  ;;  %8874 = vmatmul.mubr.msk.bf16.gmra.mrb[28].mxu1 %vm8873_vm6, %v15268_v0  ;;  %v15663_v21 = vld [vmem:[#allocation123_spill] sm:$0xff]  ;;  %vm3933_vm3 = vcmp.eq.s32.totalorder %v3747_v48, %v10839_v60 }
 0x662   :  { %v7312_v9 = vsel %vm7265_vm0, %v7232_v22, %v7311_v35 }
 0x663   :  { %v6805_v6 = vrot.slane %v6804_v59, 2  ;;  %v6223_v26 = vmax.f32 %v6063_v32, 0.0  ;;  %v3741_v36 = vpop.permute.xlu1 %3740  ;;  %7469 = vmax.xlane.f32.xlu1 %v14612_v38  ;;  %v6384_v44 = vadd.f32 %v14480_v62, %v6222_v20 }
 0x664   :  { %vm3931_vm9 = vcmp.eq.s32.totalorder %v3741_v36, %v10839_v60  ;;  %v3756_v36 = vpop.permute.xlu0 %3755 }
 0x665   :  { %v6806_v61 = vmax.f32 %v6804_v59, %v6805_v6  ;;  %v6385_v43 = vadd.f32 %v14486_v42, %v6223_v26  ;;  %vm8875_vm10 = vmpackc.low %vm3932_vm8, %vm3931_vm9 }
 0x666   :  { %8876 = vmatprep.mubr.msk.bf16.mxu1 %vm8875_vm10, %v15268_v0 }
 0x667   :  { %v6807_v35 = vrot.slane %v6806_v61, 1  ;;  %v6809_v47 = vmax.f32 %v6384_v44, %v6385_v43  ;;  %7475 = vmax.xlane.f32.xlu1 %v14622_v19 }
 0x668   :  { %v2701_v13 = vpop.permute.xlu1 %2700 }
 0x669   :  { %v6808_v41 = vmax.f32 %v6806_v61, %v6807_v35  ;;  %v6810_v49 = vrot.slane %v6809_v47, 4  ;;  %vm2891_vm11 = vcmp.eq.s32.totalorder %v2701_v13, %v10839_v60  ;;  %v15664_v61 = vld [vmem:[#allocation124_spill] sm:$0xff] }
 0x66a   :  { %v5742_v17 = vpop.f32.mrb[216].mxu1 }
 0x66b   :  { %v7050_v27 = vpack.c.bf16 %v6808_v41, %v6808_v41  ;;  %v6811_v18 = vmax.f32 %v6809_v47, %v6810_v49  ;;  %v5743_v31 = vadd.f32 %v5742_v17, %v15663_v21  ;;  %v5744_v22 = vpop.f32.mrb[217].mxu1  ;;  %v2707_v21 = vpop.permute.xlu0 %2706 }
 0x66c   :  { %v2704_v39 = vpop.permute.xlu1 %2703  ;;  %v5745_v59 = vpop.f32.mrb[218].mxu1  ;;  %vm2893_vm9 = vcmp.eq.s32.totalorder %v2707_v21, %v10839_v60  ;;  %v15665_v22 = vld [vmem:[#allocation125_spill] sm:$0xff] }
 0x66d   :  { %v7233_v20 = vunpack.c.l.b16 %v7050_v27  ;;  %v6812_v32 = vrot.slane %v6811_v18, 2  ;;  %v6064_v6 = vadd.f32 %v14452_v34, %v5743_v31  ;;  %vm2892_vm12 = vcmp.eq.s32.totalorder %v2704_v39, %v10839_v60  ;;  %v5747_v26 = vpop.f32.mrb[219].mxu1 }
 0x66e   :  { %vm8877_vm14 = vmpackc.low %vm2892_vm12, %vm2891_vm11  ;;  %v5746_v44 = vadd.f32 %v5745_v59, %v15664_v61  ;;  %vm3936_vm12 = vcmp.eq.s32.totalorder %v3756_v36, %v10839_v60 }
 0x66f   :  { %v7313_v43 = vsel %vm7267_vm5, %v7233_v20, %v7312_v9  ;;  %v6813_v35 = vmax.f32 %v6811_v18, %v6812_v32  ;;  %8878 = vmatmul.mubr.msk.bf16.gmra.mrb[32].mxu1 %vm8877_vm14, %v15268_v0  ;;  %v6224_v47 = vmax.f32 %v6064_v6, 0.0 }
 0x670   :  { %v6065_v13 = vadd.f32 %v14452_v34, %v5746_v44  ;;  %v15666_v44 = vld [vmem:[#allocation126_spill] sm:$0xff] }
 0x671   :  { %v6814_v41 = vrot.slane %v6813_v35, 1  ;;  %v3750_v49 = vpop.permute.xlu1 %3749  ;;  %v6386_v31 = vadd.f32 %v14480_v62, %v6224_v47 }
 0x672   :  { %v6225_v17 = vmax.f32 %v6065_v13, 0.0  ;;  %vm3934_vm6 = vcmp.eq.s32.totalorder %v3750_v49, %v10839_v60 }
 0x673   :  { %v6815_v27 = vmax.f32 %v6813_v35, %v6814_v41  ;;  %vm8879_vm8 = vmpackc.low %vm3934_vm6, %vm3933_vm3 }
 0x674   :  { %v6387_v9 = vadd.f32 %v14486_v42, %v6225_v17  ;;  %v5750_v18 = vpop.f32.mrb[220].mxu1  ;;  %8880 = vmatprep.mubr.msk.bf16.mxu1 %vm8879_vm8, %v15268_v0 }
 0x675   :  { %v7051_v48 = vpack.c.bf16 %v6815_v27, %v6815_v27  ;;  %v5751_v39 = vadd.f32 %v5750_v18, %v15665_v22  ;;  %v5752_v59 = vpop.f32.mrb[221].mxu1 }
 0x676   :  { %v6816_v20 = vmax.f32 %v6386_v31, %v6387_v9  ;;  %v2710_v32 = vpop.permute.xlu1 %2709  ;;  %v5753_v6 = vpop.f32.mrb[222].mxu1 }
 0x677   :  { %v7234_v26 = vunpack.c.l.b16 %v7051_v48  ;;  %v6066_v61 = vadd.f32 %v14452_v34, %v5751_v39  ;;  %vm2894_vm10 = vcmp.eq.s32.totalorder %v2710_v32, %v10839_v60  ;;  %v5754_v35 = vadd.f32 %v5753_v6, %v15666_v44  ;;  %v5755_v47 = vpop.f32.mrb[223].mxu1  ;;  %v2719_v32 = vpop.permute.xlu0 %2718 }
 0x678   :  { %v6817_v13 = vrot.slane %v6816_v20, 4  ;;  %vm8881_vm11 = vmpackc.low %vm2894_vm10, %vm2893_vm9 }
 0x679   :  { %v7314_v41 = vsel %vm7269_vm7, %v7234_v26, %v7313_v43  ;;  %v6226_v49 = vmax.f32 %v6066_v61, 0.0  ;;  %v6067_v17 = vadd.f32 %v14452_v34, %v5754_v35  ;;  %8882 = vmatmul.mubr.msk.bf16.gmra.mrb[36].mxu1 %vm8881_vm11, %v15268_v0  ;;  %v15667_v61 = vld [vmem:[#allocation127_spill] sm:$0xff] }
 0x67a   :  { %v6818_v27 = vmax.f32 %v6816_v20, %v6817_v13 }
 0x67b   :  { %v6227_v21 = vmax.f32 %v6067_v17, 0.0  ;;  %v3753_v31 = vpop.permute.xlu1 %3752  ;;  %v6388_v18 = vadd.f32 %v14480_v62, %v6226_v49 }
 0x67c   :  { %v6819_v9 = vrot.slane %v6818_v27, 2  ;;  %vm3935_vm14 = vcmp.eq.s32.totalorder %v3753_v31, %v10839_v60 }
 0x67d   :  { %v6389_v48 = vadd.f32 %v14486_v42, %v6227_v21  ;;  %vm8883_vm3 = vmpackc.low %vm3936_vm12, %vm3935_vm14  ;;  %v15668_v21 = vld [vmem:[#allocation128_spill] sm:$0xff]  ;;  %vm2897_vm14 = vcmp.eq.s32.totalorder %v2719_v32, %v10839_v60 }
 0x67e   :  { %v6820_v22 = vmax.f32 %v6818_v27, %v6819_v9  ;;  %8884 = vmatprep.mubr.msk.bf16.mxu1 %vm8883_vm3, %v15268_v0 }
 0x67f   :  { %v6823_v43 = vmax.f32 %v6388_v18, %v6389_v48  ;;  %v3759_v48 = vpop.permute.xlu0 %3758 }
 0x680   :  { %v6821_v39 = vrot.slane %v6820_v22, 1  ;;  %v2713_v59 = vpop.permute.xlu1 %2712  ;;  %vm3937_vm10 = vcmp.eq.s32.totalorder %v3759_v48, %v10839_v60 }
 0x681   :  { %v6824_v6 = vrot.slane %v6823_v43, 4  ;;  %vm2895_vm6 = vcmp.eq.s32.totalorder %v2713_v59, %v10839_v60 }
 0x682   :  { %v6822_v36 = vmax.f32 %v6820_v22, %v6821_v39  ;;  %v5758_v20 = vpop.f32.mrb[224].mxu1 }
 0x683   :  { %v6825_v26 = vmax.f32 %v6823_v43, %v6824_v6  ;;  %v5759_v44 = vadd.f32 %v5758_v20, %v15667_v61  ;;  %v5760_v35 = vpop.f32.mrb[225].mxu1 }
 0x684   :  { %v7052_v47 = vpack.c.bf16 %v6822_v36, %v6822_v36  ;;  %v2716_v13 = vpop.permute.xlu1 %2715  ;;  %v5761_v49 = vpop.f32.mrb[226].mxu1 }
 0x685   :  { %v6826_v17 = vrot.slane %v6825_v26, 2  ;;  %v6068_v27 = vadd.f32 %v14452_v34, %v5759_v44  ;;  %vm2896_vm8 = vcmp.eq.s32.totalorder %v2716_v13, %v10839_v60  ;;  %v5762_v31 = vadd.f32 %v5761_v49, %v15668_v21  ;;  %v5763_v9 = vpop.f32.mrb[227].mxu1  ;;  %v15669_v49 = vld [vmem:[#allocation129_spill] sm:$0xff] }
 0x686   :  { %v7235_v18 = vunpack.c.l.b16 %v7052_v47  ;;  %vm8885_vm9 = vmpackc.low %vm2896_vm8, %vm2895_vm6 }
 0x687   :  { %v6827_v22 = vmax.f32 %v6825_v26, %v6826_v17  ;;  %v6228_v43 = vmax.f32 %v6068_v27, 0.0  ;;  %v6069_v39 = vadd.f32 %v14452_v34, %v5762_v31  ;;  %8886 = vmatmul.mubr.msk.bf16.gmra.mrb[40].mxu1 %vm8885_vm9, %v15268_v0 }
 0x688   :  { %v7315_v59 = vsel %vm7271_vm4, %v7235_v18, %v7314_v41 }
 0x689   :  { %v6828_v6 = vrot.slane %v6827_v22, 1  ;;  %v6229_v36 = vmax.f32 %v6069_v39, 0.0  ;;  %v3762_v20 = vpop.permute.xlu1 %3761  ;;  %v6390_v44 = vadd.f32 %v14480_v62, %v6228_v43  ;;  %v3768_v39 = vpop.permute.xlu0 %3767 }
 0x68a   :  { %vm3938_vm11 = vcmp.eq.s32.totalorder %v3762_v20, %v10839_v60  ;;  %vm3940_vm8 = vcmp.eq.s32.totalorder %v3768_v39, %v10839_v60 }
 0x68b   :  { %v6829_v61 = vmax.f32 %v6827_v22, %v6828_v6  ;;  %v6391_v35 = vadd.f32 %v14486_v42, %v6229_v36  ;;  %vm8887_vm12 = vmpackc.low %vm3938_vm11, %vm3937_vm10  ;;  %v15670_v22 = vld [vmem:[#allocation130_spill] sm:$0xff] }
 0x68c   :  { %v5766_v26 = vpop.f32.mrb[228].mxu1  ;;  %8888 = vmatprep.mubr.msk.bf16.mxu1 %vm8887_vm12, %v15268_v0 }
 0x68d   :  { %v7053_v47 = vpack.c.bf16 %v6829_v61, %v6829_v61  ;;  %v6830_v13 = vmax.f32 %v6390_v44, %v6391_v35  ;;  %v5767_v41 = vadd.f32 %v5766_v26, %v15669_v49  ;;  %v5768_v17 = vpop.f32.mrb[229].mxu1 }
 0x68e   :  { %v2722_v27 = vpop.permute.xlu1 %2721  ;;  %v5769_v21 = vpop.f32.mrb[230].mxu1 }
 0x68f   :  { %v7236_v31 = vunpack.c.l.b16 %v7053_v47  ;;  %v6831_v9 = vrot.slane %v6830_v13, 4  ;;  %v6070_v18 = vadd.f32 %v14452_v34, %v5767_v41  ;;  %vm2898_vm3 = vcmp.eq.s32.totalorder %v2722_v27, %v10839_v60  ;;  %v5771_v48 = vpop.f32.mrb[231].mxu1  ;;  %v15671_v27 = vld [vmem:[#allocation131_spill] sm:$0xff] }
 0x690   :  { %vm8889_vm6 = vmpackc.low %vm2898_vm3, %vm2897_vm14  ;;  %v5770_v43 = vadd.f32 %v5769_v21, %v15670_v22 }
 0x691   :  { %v14673_v32 = vsel %vm7273_vm2, %v7236_v31, %v7315_v59  ;;  %v6832_v6 = vmax.f32 %v6830_v13, %v6831_v9  ;;  %8890 = vmatmul.mubr.msk.bf16.gmra.mrb[44].mxu1 %vm8889_vm6, %v15268_v0  ;;  %v6230_v36 = vmax.f32 %v6070_v18, 0.0 }
 0x692   :  { %v6071_v20 = vadd.f32 %v14452_v34, %v5770_v43  ;;  %v3771_v43 = vpop.permute.xlu0 %3770 }
 0x693   :  { %v3765_v61 = vpop.permute.xlu1 %3764  ;;  %v6833_v44 = vrot.slane %v6832_v6, 2  ;;  %v6392_v26 = vadd.f32 %v14480_v62, %v6230_v36  ;;  %v15672_v36 = vld [vmem:[#allocation132_spill] sm:$0xff]  ;;  %vm3941_vm3 = vcmp.eq.s32.totalorder %v3771_v43, %v10839_v60 }
 0x694   :  { %v6231_v35 = vmax.f32 %v6071_v20, 0.0  ;;  %vm3939_vm9 = vcmp.eq.s32.totalorder %v3765_v61, %v10839_v60 }
 0x695   :  { %vm8891_vm10 = vmpackc.low %vm3940_vm8, %vm3939_vm9  ;;  %v6834_v59 = vmax.f32 %v6832_v6, %v6833_v44 }
 0x696   :  { %v6393_v47 = vadd.f32 %v14486_v42, %v6231_v35  ;;  %8892 = vmatprep.mubr.msk.bf16.mxu1 %vm8891_vm10, %v15268_v0 }
 0x697   :  { %v6835_v9 = vrot.slane %v6834_v59, 1 }
 0x698   :  { %v6837_v13 = vmax.f32 %v6392_v26, %v6393_v47  ;;  %v2725_v49 = vpop.permute.xlu1 %2724 }
 0x699   :  { %vm2899_vm11 = vcmp.eq.s32.totalorder %v2725_v49, %v10839_v60  ;;  %v6836_v26 = vmax.f32 %v6834_v59, %v6835_v9  ;;  %v15673_v9 = vld [vmem:[#allocation7_spill] sm:$0xff] }
 0x69a   :  { %v6838_v41 = vrot.slane %v6837_v13, 4  ;;  %v5774_v17 = vpop.f32.mrb[232].mxu1 }
 0x69b   :  { %v5775_v21 = vadd.f32 %v5774_v17, %v15671_v27  ;;  %v5776_v31 = vpop.f32.mrb[233].mxu1  ;;  %v2731_v17 = vpop.permute.xlu0 %2730 }
 0x69c   :  { %v6839_v18 = vmax.f32 %v6837_v13, %v6838_v41  ;;  %v2728_v48 = vpop.permute.xlu1 %2727  ;;  %v5777_v22 = vpop.f32.mrb[234].mxu1  ;;  %v7054_v31 = vpack.c.bf16 %v6836_v26, %v6836_v26  ;;  %vm2901_vm9 = vcmp.eq.s32.totalorder %v2731_v17, %v10839_v60 }
 0x69d   :  { %v6072_v39 = vadd.f32 %v14452_v34, %v5775_v21  ;;  %vm2900_vm12 = vcmp.eq.s32.totalorder %v2728_v48, %v10839_v60  ;;  %v5778_v6 = vadd.f32 %v5777_v22, %v15672_v36  ;;  %v5779_v20 = vpop.f32.mrb[235].mxu1 }
 0x69e   :  { %v6840_v61 = vrot.slane %v6839_v18, 2  ;;  %vm8893_vm14 = vmpackc.low %vm2900_vm12, %vm2899_vm11  ;;  %v7237_v26 = vunpack.c.l.b16 %v7054_v31 }
 0x69f   :  { %v6232_v44 = vmax.f32 %v6072_v39, 0.0  ;;  %v6073_v35 = vadd.f32 %v14452_v34, %v5778_v6  ;;  %8894 = vmatmul.mubr.msk.bf16.gmra.mrb[48].mxu1 %vm8893_vm14, %v15268_v0 }
 0x6a0   :  { %v6841_v47 = vmax.f32 %v6839_v18, %v6840_v61 }
 0x6a1   :  { %v6233_v13 = vmax.f32 %v6073_v35, 0.0  ;;  %v3774_v41 = vpop.permute.xlu1 %3773  ;;  %v6394_v27 = vadd.f32 %v14480_v62, %v6232_v44 }
 0x6a2   :  { %v6842_v49 = vrot.slane %v6841_v47, 1  ;;  %vm3942_vm6 = vcmp.eq.s32.totalorder %v3774_v41, %v10839_v60 }
 0x6a3   :  { %v6395_v21 = vadd.f32 %v14486_v42, %v6233_v13  ;;  %vm8895_vm8 = vmpackc.low %vm3942_vm6, %vm3941_vm3  ;;  %v3780_v13 = vpop.permute.xlu0 %3779 }
 0x6a4   :  { %v6843_v48 = vmax.f32 %v6841_v47, %v6842_v49  ;;  %v5782_v22 = vpop.f32.mrb[236].mxu1  ;;  %8896 = vmatprep.mubr.msk.bf16.mxu1 %vm8895_vm8, %v15268_v0  ;;  %vm3944_vm12 = vcmp.eq.s32.totalorder %v3780_v13, %v10839_v60 }
 0x6a5   :  { %v6844_v59 = vmax.f32 %v6394_v27, %v6395_v21  ;;  %v5783_v18 = vadd.f32 %v5782_v22, %v15673_v9  ;;  %v5784_v43 = vpop.f32.mrb[237].mxu1 }
 0x6a6   :  { %v7055_v39 = vpack.c.bf16 %v6843_v48, %v6843_v48  ;;  %v2734_v36 = vpop.permute.xlu1 %2733  ;;  %v5785_v6 = vpop.f32.mrb[238].mxu1 }
 0x6a7   :  { %v6845_v20 = vrot.slane %v6844_v59, 4  ;;  %v6074_v61 = vadd.f32 %v14452_v34, %v5783_v18  ;;  %vm2902_vm10 = vcmp.eq.s32.totalorder %v2734_v36, %v10839_v60  ;;  %v5786_v44 = vadd.f32 %v5785_v6, %v13577_v54  ;;  %v5787_v35 = vpop.f32.mrb[239].mxu1 }
 0x6a8   :  { %v7238_v47 = vunpack.c.l.b16 %v7055_v39  ;;  %vm8897_vm11 = vmpackc.low %vm2902_vm10, %vm2901_vm9 }
 0x6a9   :  { %v6846_v41 = vmax.f32 %v6844_v59, %v6845_v20  ;;  %v6234_v49 = vmax.f32 %v6074_v61, 0.0  ;;  %v6075_v17 = vadd.f32 %v14452_v34, %v5786_v44  ;;  %8898 = vmatmul.mubr.msk.bf16.gmra.mrb[52].mxu1 %vm8897_vm11, %v15268_v0 }
 0x6aa   :  { %v7317_v27 = vsel %vm7261_vm13, %v7238_v47, %v7237_v26 }
 0x6ab   :  { %v6847_v21 = vrot.slane %v6846_v41, 2  ;;  %v6235_v48 = vmax.f32 %v6075_v17, 0.0  ;;  %v3777_v22 = vpop.permute.xlu1 %3776  ;;  %v6396_v31 = vadd.f32 %v14480_v62, %v6234_v49 }
 0x6ac   :  { %vm3943_vm14 = vcmp.eq.s32.totalorder %v3777_v22, %v10839_v60 }
 0x6ad   :  { %v6848_v54 = vmax.f32 %v6846_v41, %v6847_v21  ;;  %v6397_v9 = vadd.f32 %v14486_v42, %v6235_v48  ;;  %vm8899_vm3 = vmpackc.low %vm3944_vm12, %vm3943_vm14  ;;  %v14712_v41 = vld [vmem:[%s14950_s2] ss:$0 sm:$0xff]  ;;  %v3783_v21 = vpop.permute.xlu0 %3782 }
 0x6ae   :  { %8900 = vmatprep.mubr.msk.bf16.mxu1 %vm8899_vm3, %v15268_v0  ;;  %vm3945_vm10 = vcmp.eq.s32.totalorder %v3783_v21, %v10839_v60 }
 0x6af   :  { %v6849_v34 = vrot.slane %v6848_v54, 1  ;;  %v6851_v59 = vmax.f32 %v6396_v31, %v6397_v9 }
 0x6b0   :  { %v2737_v18 = vpop.permute.xlu1 %2736 }
 0x6b1   :  { %v6850_v43 = vmax.f32 %v6848_v54, %v6849_v34  ;;  %v6852_v39 = vrot.slane %v6851_v59, 4  ;;  %vm2903_vm6 = vcmp.eq.s32.totalorder %v2737_v18, %v10839_v60 }
 0x6b2   :  { %v5790_v36 = vpop.f32.mrb[240].mxu1 }
 0x6b3   :  { %v7056_v6 = vpack.c.bf16 %v6850_v43, %v6850_v43  ;;  %v6853_v20 = vmax.f32 %v6851_v59, %v6852_v39  ;;  %v5791_v61 = vadd.f32 %v5790_v36, %v13594_v23  ;;  %v5792_v44 = vpop.f32.mrb[241].mxu1  ;;  %v2743_v43 = vpop.permute.xlu0 %2742 }
 0x6b4   :  { %v2740_v35 = vpop.permute.xlu1 %2739  ;;  %v5793_v26 = vpop.f32.mrb[242].mxu1  ;;  %vm2905_vm14 = vcmp.eq.s32.totalorder %v2743_v43, %v10839_v60 }
 0x6b5   :  { %v7239_v47 = vunpack.c.l.b16 %v7056_v6  ;;  %v6854_v13 = vrot.slane %v6853_v20, 2  ;;  %v6076_v49 = vadd.f32 %v14712_v41, %v5791_v61  ;;  %vm2904_vm8 = vcmp.eq.s32.totalorder %v2740_v35, %v10839_v60  ;;  %v5795_v17 = vpop.f32.mrb[243].mxu1  ;;  %v15674_v6 = vld [vmem:[#allocation12_spill] sm:$0xff] }
 0x6b6   :  { %vm8901_vm9 = vmpackc.low %vm2904_vm8, %vm2903_vm6  ;;  %v5794_v23 = vadd.f32 %v5793_v26, %v13598_v40 }
 0x6b7   :  { %v7318_v48 = vsel %vm7263_vm1, %v7239_v47, %v7317_v27  ;;  %v6855_v22 = vmax.f32 %v6853_v20, %v6854_v13  ;;  %8902 = vmatmul.mubr.msk.bf16.gmra.mrb[56].mxu1 %vm8901_vm9, %v15268_v0  ;;  %v6236_v54 = vmax.f32 %v6076_v49, 0.0 }
 0x6b8   :  { %v6077_v31 = vadd.f32 %v14712_v41, %v5794_v23 }
 0x6b9   :  { %v6856_v9 = vrot.slane %v6855_v22, 1  ;;  %v3786_v34 = vpop.permute.xlu1 %3785  ;;  %v6398_v40 = vadd.f32 %v14480_v62, %v6236_v54  ;;  %v15675_v62 = vld [vmem:[#allocation133_spill] sm:$0xff] }
 0x6ba   :  { %v6237_v59 = vmax.f32 %v6077_v31, 0.0  ;;  %vm3946_vm11 = vcmp.eq.s32.totalorder %v3786_v34, %v10839_v60 }
 0x6bb   :  { %v6857_v18 = vmax.f32 %v6855_v22, %v6856_v9  ;;  %vm8903_vm12 = vmpackc.low %vm3946_vm11, %vm3945_vm10 }
 0x6bc   :  { %v6399_v27 = vadd.f32 %v14486_v42, %v6237_v59  ;;  %v5798_v39 = vpop.f32.mrb[244].mxu1  ;;  %8904 = vmatprep.mubr.msk.bf16.mxu1 %vm8903_vm12, %v15268_v0 }
 0x6bd   :  { %v7057_v36 = vpack.c.bf16 %v6857_v18, %v6857_v18  ;;  %v5799_v20 = vadd.f32 %v5798_v39, %v15674_v6  ;;  %v5800_v61 = vpop.f32.mrb[245].mxu1  ;;  %v15676_v6 = vld [vmem:[#allocation134_spill] sm:$0xff] }
 0x6be   :  { %v6858_v44 = vmax.f32 %v6398_v40, %v6399_v27  ;;  %v2746_v35 = vpop.permute.xlu1 %2745  ;;  %v5801_v26 = vpop.f32.mrb[246].mxu1 }
 0x6bf   :  { %v7240_v47 = vunpack.c.l.b16 %v7057_v36  ;;  %v6078_v13 = vadd.f32 %v14712_v41, %v5799_v20  ;;  %vm2906_vm3 = vcmp.eq.s32.totalorder %v2746_v35, %v10839_v60  ;;  %v5802_v49 = vadd.f32 %v5801_v26, %v15675_v62  ;;  %v5803_v42 = vpop.f32.mrb[247].mxu1  ;;  %v14738_v60 = vld [vmem:[%s14953_s5] sm:$0xff] }
 0x6c0   :  { %v6859_v17 = vrot.slane %v6858_v44, 4  ;;  %vm8905_vm6 = vmpackc.low %vm2906_vm3, %vm2905_vm14 }
 0x6c1   :  { %v7319_v21 = vsel %vm7265_vm0, %v7240_v47, %v7318_v48  ;;  %v6238_v23 = vmax.f32 %v6078_v13, 0.0  ;;  %v6079_v22 = vadd.f32 %v14712_v41, %v5802_v49  ;;  %8906 = vmatmul.mubr.msk.bf16.gmra.mrb[60].mxu1 %vm8905_vm6, %v15268_v0  ;;  %v14744_v48 = vld [vmem:[%s14953_s5 + $0x8] sm:$0xff]  ;;  %v15677_v13 = vld [vmem:[#allocation5_spill] sm:$0xff] }
 0x6c2   :  { %v6860_v54 = vmax.f32 %v6858_v44, %v6859_v17  ;;  %8958 = vmatprep.mubr.msk.bf16.mxu1 %vm9595_vm15, %v15537_v4 }
 0x6c3   :  { %v6239_v31 = vmax.f32 %v6079_v22, 0.0  ;;  %v6400_v34 = vadd.f32 %v14738_v60, %v6238_v23 }
 0x6c4   :  { %v6861_v9 = vrot.slane %v6860_v54, 2 }
 0x6c5   :  { %v6401_v0 = vadd.f32 %v14744_v48, %v6239_v31 }
 0x6c6   :  { %v6862_v59 = vmax.f32 %v6860_v54, %v6861_v9 }
 0x6c7   :  { %v6865_v18 = vmax.f32 %v6400_v34, %v6401_v0 }
 0x6c8   :  { %v6863_v43 = vrot.slane %v6862_v59, 1 }
 0x6c9   :  { %v6866_v40 = vrot.slane %v6865_v18, 4 }
 0x6ca   :  { %v6864_v27 = vmax.f32 %v6862_v59, %v6863_v43  ;;  %v5806_v39 = vpop.f32.mrb[248].mxu1 }
 0x6cb   :  { %v6867_v36 = vmax.f32 %v6865_v18, %v6866_v40  ;;  %v5807_v20 = vadd.f32 %v5806_v39, %v15676_v6  ;;  %v5808_v61 = vpop.f32.mrb[249].mxu1 }
 0x6cc   :  { %v7058_v44 = vpack.c.bf16 %v6864_v27, %v6864_v27  ;;  %v5809_v35 = vpop.f32.mrb[250].mxu1 }
 0x6cd   :  { %v6868_v26 = vrot.slane %v6867_v36, 2  ;;  %v6080_v47 = vadd.f32 %v14712_v41, %v5807_v20  ;;  %v5810_v62 = vadd.f32 %v5809_v35, %v15677_v13  ;;  %v5811_v49 = vpop.f32.mrb[251].mxu1 }
 0x6ce   :  { %v7241_v42 = vunpack.c.l.b16 %v7058_v44 }
 0x6cf   :  { %v6869_v17 = vmax.f32 %v6867_v36, %v6868_v26  ;;  %v6240_v23 = vmax.f32 %v6080_v47, 0.0  ;;  %v6081_v22 = vadd.f32 %v14712_v41, %v5810_v62 }
 0x6d0   :  { %v7320_v54 = vsel %vm7267_vm5, %v7241_v42, %v7319_v21 }
 0x6d1   :  { %v6870_v31 = vrot.slane %v6869_v17, 1  ;;  %v6241_v9 = vmax.f32 %v6081_v22, 0.0  ;;  %v6402_v0 = vadd.f32 %v14738_v60, %v6240_v23 }
 0x6d3   :  { %v6871_v34 = vmax.f32 %v6869_v17, %v6870_v31  ;;  %v6403_v59 = vadd.f32 %v14744_v48, %v6241_v9 }
 0x6d4   :  { %v5814_v18 = vpop.f32.mrb[252].mxu1 }
 0x6d5   :  { %v7059_v43 = vpack.c.bf16 %v6871_v34, %v6871_v34  ;;  %v6872_v40 = vmax.f32 %v6402_v0, %v6403_v59  ;;  %v5815_v27 = vadd.f32 %v5814_v18, %v13672_v28  ;;  %v5816_v39 = vpop.f32.mrb[253].mxu1 }
 0x6d6   :  { %v5817_v6 = vpop.f32.mrb[254].mxu1  ;;  %v15678_v39 = vld [vmem:[#allocation6_spill] sm:$0xff] }
 0x6d7   :  { %v7242_v36 = vunpack.c.l.b16 %v7059_v43  ;;  %v6873_v20 = vrot.slane %v6872_v40, 4  ;;  %v6082_v61 = vadd.f32 %v14712_v41, %v5815_v27  ;;  %v5818_v21 = vadd.f32 %v5817_v6, %v13678_v25  ;;  %v5819_v44 = vpop.f32.mrb[255].mxu1 }
 0x6d9   :  { %v7321_v35 = vsel %vm7269_vm7, %v7242_v36, %v7320_v54  ;;  %v6874_v26 = vmax.f32 %v6872_v40, %v6873_v20  ;;  %v6242_v47 = vmax.f32 %v6082_v61, 0.0  ;;  %v6083_v13 = vadd.f32 %v14712_v41, %v5818_v21 }
 0x6db   :  { %v6875_v62 = vrot.slane %v6874_v26, 2  ;;  %v6243_v49 = vmax.f32 %v6083_v13, 0.0  ;;  %v6404_v28 = vadd.f32 %v14738_v60, %v6242_v47 }
 0x6dd   :  { %v6876_v42 = vmax.f32 %v6874_v26, %v6875_v62  ;;  %v6405_v17 = vadd.f32 %v14744_v48, %v6243_v49 }
 0x6df   :  { %v6877_v23 = vrot.slane %v6876_v42, 1  ;;  %v6879_v22 = vmax.f32 %v6404_v28, %v6405_v17  ;;  %v15679_v17 = vld [vmem:[#allocation135_spill] sm:$0xff] }
 0x6e1   :  { %v6878_v31 = vmax.f32 %v6876_v42, %v6877_v23  ;;  %v6880_v9 = vrot.slane %v6879_v22, 4 }
 0x6e2   :  { %v5822_v34 = vpop.f32.mrb[0].mxu1 }
 0x6e3   :  { %v7060_v25 = vpack.c.bf16 %v6878_v31, %v6878_v31  ;;  %v6881_v0 = vmax.f32 %v6879_v22, %v6880_v9  ;;  %v5823_v54 = vadd.f32 %v5822_v34, %v13700_v7  ;;  %v5824_v59 = vpop.f32.mrb[1].mxu1 }
 0x6e4   :  { %v5825_v18 = vpop.f32.mrb[2].mxu1 }
 0x6e5   :  { %v7243_v43 = vunpack.c.l.b16 %v7060_v25  ;;  %v6882_v40 = vrot.slane %v6881_v0, 2  ;;  %v6084_v27 = vadd.f32 %v14712_v41, %v5823_v54  ;;  %v5826_v6 = vadd.f32 %v5825_v18, %v15678_v39  ;;  %v5827_v36 = vpop.f32.mrb[3].mxu1  ;;  %v15680_v25 = vld [vmem:[#allocation136_spill] sm:$0xff] }
 0x6e7   :  { %v7322_v20 = vsel %vm7271_vm4, %v7243_v43, %v7321_v35  ;;  %v6883_v61 = vmax.f32 %v6881_v0, %v6882_v40  ;;  %v6244_v21 = vmax.f32 %v6084_v27, 0.0  ;;  %v6085_v44 = vadd.f32 %v14712_v41, %v5826_v6 }
 0x6e9   :  { %v6884_v26 = vrot.slane %v6883_v61, 1  ;;  %v6245_v47 = vmax.f32 %v6085_v44, 0.0  ;;  %v6406_v7 = vadd.f32 %v14738_v60, %v6244_v21 }
 0x6eb   :  { %v6885_v13 = vmax.f32 %v6883_v61, %v6884_v26  ;;  %v6407_v62 = vadd.f32 %v14744_v48, %v6245_v47 }
 0x6ec   :  { %v5830_v49 = vpop.f32.mrb[4].mxu1 }
 0x6ed   :  { %v7061_v42 = vpack.c.bf16 %v6885_v13, %v6885_v13  ;;  %v6886_v28 = vmax.f32 %v6406_v7, %v6407_v62  ;;  %v5831_v23 = vadd.f32 %v5830_v49, %v15679_v17  ;;  %v5832_v22 = vpop.f32.mrb[5].mxu1 }
 0x6ee   :  { %v5833_v31 = vpop.f32.mrb[6].mxu1 }
 0x6ef   :  { %v7244_v9 = vunpack.c.l.b16 %v7061_v42  ;;  %v6887_v35 = vrot.slane %v6886_v28, 4  ;;  %v6086_v34 = vadd.f32 %v14712_v41, %v5831_v23  ;;  %v5834_v0 = vadd.f32 %v5833_v31, %v15680_v25  ;;  %v5835_v54 = vpop.f32.mrb[7].mxu1 }
 0x6f1   :  { %v7323_v59 = vsel %vm7273_vm2, %v7244_v9, %v7322_v20  ;;  %v6888_v18 = vmax.f32 %v6886_v28, %v6887_v35  ;;  %v6246_v43 = vmax.f32 %v6086_v34, 0.0  ;;  %v6087_v40 = vadd.f32 %v14712_v41, %v5834_v0 }
 0x6f2   :  { %v7341_v27 = vpack.c.b16 %v7323_v59, %v14673_v32 }
 0x6f3   :  { %v6889_v39 = vrot.slane %v6888_v18, 2  ;;  %v6247_v6 = vmax.f32 %v6087_v40, 0.0  ;;  %v6408_v36 = vadd.f32 %v14738_v60, %v6246_v43 }
 0x6f4   :  { %8959 = vmatmul.mubr.bf16.vlgmr.msra.gmra.mrb[64].mxu1 %v7341_v27 }
 0x6f5   :  { %v6409_v61 = vadd.f32 %v14744_v48, %v6247_v6  ;;  %8962 = vmatprep.mubr.msk.bf16.mxu1 %vm9595_vm15, %v15537_v4  ;;  %v6890_v21 = vmax.f32 %v6888_v18, %v6889_v39 }
 0x6f7   :  { %v6893_v44 = vmax.f32 %v6408_v36, %v6409_v61  ;;  %v6891_v20 = vrot.slane %v6890_v21, 1 }
 0x6f9   :  { %v6894_v26 = vrot.slane %v6893_v44, 4  ;;  %v6892_v23 = vmax.f32 %v6890_v21, %v6891_v20 }
 0x6fa   :  { %v5838_v47 = vpop.f32.mrb[8].mxu1 }
 0x6fb   :  { %v6895_v13 = vmax.f32 %v6893_v44, %v6894_v26  ;;  %v5839_v7 = vadd.f32 %v5838_v47, %v13750_v11  ;;  %v5840_v62 = vpop.f32.mrb[9].mxu1  ;;  %v7062_v34 = vpack.c.bf16 %v6892_v23, %v6892_v23 }
 0x6fc   :  { %v5841_v32 = vpop.f32.mrb[10].mxu1 }
 0x6fd   :  { %v6896_v49 = vrot.slane %v6895_v13, 2  ;;  %v6088_v42 = vadd.f32 %v14712_v41, %v5839_v7  ;;  %v5842_v28 = vadd.f32 %v5841_v32, %v13756_v24  ;;  %v5843_v17 = vpop.f32.mrb[11].mxu1  ;;  %v7245_v40 = vunpack.c.l.b16 %v7062_v34 }
 0x6ff   :  { %v6897_v22 = vmax.f32 %v6895_v13, %v6896_v49  ;;  %v6248_v31 = vmax.f32 %v6088_v42, 0.0  ;;  %v6089_v4 = vadd.f32 %v14712_v41, %v5842_v28 }
 0x701   :  { %v6898_v9 = vrot.slane %v6897_v22, 1  ;;  %v6249_v35 = vmax.f32 %v6089_v4, 0.0  ;;  %v6410_v0 = vadd.f32 %v14738_v60, %v6248_v31 }
 0x703   :  { %v6899_v25 = vmax.f32 %v6897_v22, %v6898_v9  ;;  %v6411_v11 = vadd.f32 %v14744_v48, %v6249_v35 }
 0x704   :  { %v5846_v54 = vpop.f32.mrb[12].mxu1 }
 0x705   :  { %v7063_v59 = vpack.c.bf16 %v6899_v25, %v6899_v25  ;;  %v6900_v18 = vmax.f32 %v6410_v0, %v6411_v11  ;;  %v5847_v43 = vadd.f32 %v5846_v54, %v13776_v51  ;;  %v5848_v24 = vpop.f32.mrb[13].mxu1  ;;  %v15681_v25 = vld [vmem:[#allocation15_spill] sm:$0xff] }
 0x706   :  { %v5849_v27 = vpop.f32.mrb[14].mxu1  ;;  %v15682_v24 = vld [vmem:[#allocation137_spill] sm:$0xff] }
 0x707   :  { %v7246_v39 = vunpack.c.l.b16 %v7063_v59  ;;  %v6901_v6 = vrot.slane %v6900_v18, 4  ;;  %v6090_v36 = vadd.f32 %v14712_v41, %v5847_v43  ;;  %v5850_v61 = vadd.f32 %v5849_v27, %v13783_v45  ;;  %v5851_v21 = vpop.f32.mrb[15].mxu1  ;;  %v7446_v44 = vpop.f32.mrb[72].mxu0 }
 0x708   :  { %v14788_v26 = vadd.f32 %v14576_v58, %v7446_v44  ;;  %v8956_v20 = vpop.f32.mrb[73].mxu0 }
 0x709   :  { %v7324_v47 = vsel %vm7261_vm13, %v7246_v39, %v7245_v40  ;;  %v6902_v13 = vmax.f32 %v6900_v18, %v6901_v6  ;;  %v6250_v7 = vmax.f32 %v6090_v36, 0.0  ;;  %v6091_v51 = vadd.f32 %v14712_v41, %v5850_v61  ;;  %v7449_v62 = vpop.f32.mrb[74].mxu0 }
 0x70a   :  { %v14793_v32 = vadd.f32 %v14576_v58, %v7449_v62  ;;  %v8957_v49 = vpop.f32.mrb[75].mxu0  ;;  %7477 = vmax.xlane.f32.xlu0 %v14788_v26 }
 0x70b   :  { %v6903_v45 = vrot.slane %v6902_v13, 2  ;;  %v6251_v42 = vmax.f32 %v6091_v51, 0.0  ;;  %v6412_v17 = vadd.f32 %v14738_v60, %v6250_v7 }
 0x70c   :  { %7479 = vmax.xlane.f32.xlu1 %v14793_v32 }
 0x70d   :  { %v6904_v28 = vmax.f32 %v6902_v13, %v6903_v45  ;;  %v6413_v23 = vadd.f32 %v14744_v48, %v6251_v42 }
 0x70f   :  { %v6905_v22 = vrot.slane %v6904_v28, 1  ;;  %v6907_v31 = vmax.f32 %v6412_v17, %v6413_v23 }
 0x711   :  { %v6906_v4 = vmax.f32 %v6904_v28, %v6905_v22  ;;  %v6908_v9 = vrot.slane %v6907_v31, 4 }
 0x712   :  { %v5854_v35 = vpop.f32.mrb[16].mxu1 }
 0x713   :  { %v7064_v34 = vpack.c.bf16 %v6906_v4, %v6906_v4  ;;  %v6909_v58 = vmax.f32 %v6907_v31, %v6908_v9  ;;  %v5855_v0 = vadd.f32 %v5854_v35, %v15681_v25  ;;  %v5856_v11 = vpop.f32.mrb[17].mxu1 }
 0x714   :  { %v5857_v54 = vpop.f32.mrb[18].mxu1 }
 0x715   :  { %v7247_v59 = vunpack.c.l.b16 %v7064_v34  ;;  %v6910_v18 = vrot.slane %v6909_v58, 2  ;;  %v6092_v43 = vadd.f32 %v14712_v41, %v5855_v0  ;;  %v5858_v40 = vadd.f32 %v5857_v54, %v15682_v24  ;;  %v5859_v27 = vpop.f32.mrb[19].mxu1 }
 0x717   :  { %v7325_v39 = vsel %vm7263_vm1, %v7247_v59, %v7324_v47  ;;  %v6911_v6 = vmax.f32 %v6909_v58, %v6910_v18  ;;  %v6252_v36 = vmax.f32 %v6092_v43, 0.0  ;;  %v6093_v61 = vadd.f32 %v14712_v41, %v5858_v40 }
 0x719   :  { %v6912_v21 = vrot.slane %v6911_v6, 1  ;;  %v6253_v44 = vmax.f32 %v6093_v61, 0.0  ;;  %v6414_v13 = vadd.f32 %v14738_v60, %v6252_v36 }
 0x71b   :  { %v6913_v20 = vmax.f32 %v6911_v6, %v6912_v21  ;;  %v6415_v7 = vadd.f32 %v14744_v48, %v6253_v44  ;;  %v15683_v44 = vld [vmem:[#allocation138_spill] sm:$0xff] }
 0x71c   :  { %v5862_v51 = vpop.f32.mrb[20].mxu1 }
 0x71d   :  { %v7065_v62 = vpack.c.bf16 %v6913_v20, %v6913_v20  ;;  %v6914_v49 = vmax.f32 %v6414_v13, %v6415_v7  ;;  %v5863_v45 = vadd.f32 %v5862_v51, %v13824_v56  ;;  %v5864_v42 = vpop.f32.mrb[21].mxu1 }
 0x71e   :  { %v5865_v28 = vpop.f32.mrb[22].mxu1 }
 0x71f   :  { %v7248_v17 = vunpack.c.l.b16 %v7065_v62  ;;  %v6915_v47 = vrot.slane %v6914_v49, 4  ;;  %v6094_v23 = vadd.f32 %v14712_v41, %v5863_v45  ;;  %v5866_v22 = vadd.f32 %v5865_v28, %v13828_v52  ;;  %v5867_v31 = vpop.f32.mrb[23].mxu1 }
 0x720   :  { %v15684_v31 = vld [vmem:[#allocation19_spill] sm:$0xff] }
 0x721   :  { %v7326_v4 = vsel %vm7265_vm0, %v7248_v17, %v7325_v39  ;;  %v6916_v9 = vmax.f32 %v6914_v49, %v6915_v47  ;;  %v6254_v35 = vmax.f32 %v6094_v23, 0.0  ;;  %v6095_v34 = vadd.f32 %v14712_v41, %v5866_v22 }
 0x723   :  { %v6917_v58 = vrot.slane %v6916_v9, 2  ;;  %v6255_v25 = vmax.f32 %v6095_v34, 0.0  ;;  %v6416_v56 = vadd.f32 %v14738_v60, %v6254_v35 }
 0x725   :  { %v6918_v0 = vmax.f32 %v6916_v9, %v6917_v58  ;;  %v6417_v11 = vadd.f32 %v14744_v48, %v6255_v25 }
 0x727   :  { %v6919_v54 = vrot.slane %v6918_v0, 1  ;;  %v6921_v59 = vmax.f32 %v6416_v56, %v6417_v11 }
 0x729   :  { %v6920_v18 = vmax.f32 %v6918_v0, %v6919_v54  ;;  %v6922_v43 = vrot.slane %v6921_v59, 4 }
 0x72a   :  { %v5870_v24 = vpop.f32.mrb[24].mxu1 }
 0x72b   :  { %v7066_v52 = vpack.c.bf16 %v6920_v18, %v6920_v18  ;;  %v6923_v40 = vmax.f32 %v6921_v59, %v6922_v43  ;;  %v5871_v27 = vadd.f32 %v5870_v24, %v13850_v12  ;;  %v5872_v39 = vpop.f32.mrb[25].mxu1 }
 0x72c   :  { %v5873_v6 = vpop.f32.mrb[26].mxu1 }
 0x72d   :  { %v7249_v36 = vunpack.c.l.b16 %v7066_v52  ;;  %v6924_v61 = vrot.slane %v6923_v40, 2  ;;  %v6096_v21 = vadd.f32 %v14712_v41, %v5871_v27  ;;  %v5874_v20 = vadd.f32 %v5873_v6, %v15683_v44  ;;  %v5875_v13 = vpop.f32.mrb[27].mxu1 }
 0x72f   :  { %v7327_v7 = vsel %vm7267_vm5, %v7249_v36, %v7326_v4  ;;  %v6925_v51 = vmax.f32 %v6923_v40, %v6924_v61  ;;  %v6256_v62 = vmax.f32 %v6096_v21, 0.0  ;;  %v6097_v49 = vadd.f32 %v14712_v41, %v5874_v20 }
 0x731   :  { %v6926_v45 = vrot.slane %v6925_v51, 1  ;;  %v6257_v42 = vmax.f32 %v6097_v49, 0.0  ;;  %v6418_v12 = vadd.f32 %v14738_v60, %v6256_v62 }
 0x733   :  { %v6927_v28 = vmax.f32 %v6925_v51, %v6926_v45  ;;  %v6419_v17 = vadd.f32 %v14744_v48, %v6257_v42 }
 0x734   :  { %v5878_v47 = vpop.f32.mrb[28].mxu1 }
 0x735   :  { %v7067_v23 = vpack.c.bf16 %v6927_v28, %v6927_v28  ;;  %v6928_v22 = vmax.f32 %v6418_v12, %v6419_v17  ;;  %v5879_v9 = vadd.f32 %v5878_v47, %v15684_v31  ;;  %v5880_v35 = vpop.f32.mrb[29].mxu1 }
 0x736   :  { %v5881_v34 = vpop.f32.mrb[30].mxu1 }
 0x737   :  { %v7250_v58 = vunpack.c.l.b16 %v7067_v23  ;;  %v6929_v4 = vrot.slane %v6928_v22, 4  ;;  %v6098_v25 = vadd.f32 %v14712_v41, %v5879_v9  ;;  %v5882_v0 = vadd.f32 %v5881_v34, %v13880_v16  ;;  %v5883_v56 = vpop.f32.mrb[31].mxu1 }
 0x739   :  { %v7328_v11 = vsel %vm7269_vm7, %v7250_v58, %v7327_v7  ;;  %v6930_v54 = vmax.f32 %v6928_v22, %v6929_v4  ;;  %v6258_v59 = vmax.f32 %v6098_v25, 0.0  ;;  %v6099_v18 = vadd.f32 %v14712_v41, %v5882_v0 }
 0x73b   :  { %v6931_v43 = vrot.slane %v6930_v54, 2  ;;  %v6259_v24 = vmax.f32 %v6099_v18, 0.0  ;;  %v6420_v40 = vadd.f32 %v14738_v60, %v6258_v59 }
 0x73d   :  { %v6932_v52 = vmax.f32 %v6930_v54, %v6931_v43  ;;  %v6421_v27 = vadd.f32 %v14744_v48, %v6259_v24 }
 0x73f   :  { %v6933_v39 = vrot.slane %v6932_v52, 1  ;;  %v6935_v6 = vmax.f32 %v6420_v40, %v6421_v27 }
 0x741   :  { %v6934_v36 = vmax.f32 %v6932_v52, %v6933_v39  ;;  %v6936_v61 = vrot.slane %v6935_v6, 4 }
 0x742   :  { %v5886_v21 = vpop.f32.mrb[32].mxu1 }
 0x743   :  { %v7068_v16 = vpack.c.bf16 %v6934_v36, %v6934_v36  ;;  %v6937_v44 = vmax.f32 %v6935_v6, %v6936_v61  ;;  %v5887_v20 = vadd.f32 %v5886_v21, %v13893_v53  ;;  %v5888_v13 = vpop.f32.mrb[33].mxu1 }
 0x744   :  { %v5889_v7 = vpop.f32.mrb[34].mxu1 }
 0x745   :  { %v7251_v51 = vunpack.c.l.b16 %v7068_v16  ;;  %v6938_v62 = vrot.slane %v6937_v44, 2  ;;  %v6100_v49 = vadd.f32 %v14712_v41, %v5887_v20  ;;  %v5890_v45 = vadd.f32 %v5889_v7, %v13897_v3  ;;  %v5891_v42 = vpop.f32.mrb[35].mxu1 }
 0x747   :  { %v7329_v28 = vsel %vm7271_vm4, %v7251_v51, %v7328_v11  ;;  %v6939_v12 = vmax.f32 %v6937_v44, %v6938_v62  ;;  %v6260_v17 = vmax.f32 %v6100_v49, 0.0  ;;  %v6101_v47 = vadd.f32 %v14712_v41, %v5890_v45 }
 0x749   :  { %v6940_v23 = vrot.slane %v6939_v12, 1  ;;  %v6261_v22 = vmax.f32 %v6101_v47, 0.0  ;;  %v6422_v53 = vadd.f32 %v14738_v60, %v6260_v17 }
 0x74b   :  { %v6941_v31 = vmax.f32 %v6939_v12, %v6940_v23  ;;  %v6423_v9 = vadd.f32 %v14744_v48, %v6261_v22 }
 0x74c   :  { %v5894_v35 = vpop.f32.mrb[36].mxu1 }
 0x74d   :  { %v7069_v34 = vpack.c.bf16 %v6941_v31, %v6941_v31  ;;  %v6942_v58 = vmax.f32 %v6422_v53, %v6423_v9  ;;  %v5895_v4 = vadd.f32 %v5894_v35, %v13914_v29  ;;  %v5896_v3 = vpop.f32.mrb[37].mxu1 }
 0x74e   :  { %v5897_v25 = vpop.f32.mrb[38].mxu1 }
 0x74f   :  { %v7252_v0 = vunpack.c.l.b16 %v7069_v34  ;;  %v6943_v56 = vrot.slane %v6942_v58, 4  ;;  %v6102_v11 = vadd.f32 %v14712_v41, %v5895_v4  ;;  %v5898_v54 = vadd.f32 %v5897_v25, %v13919_v15  ;;  %v5899_v59 = vpop.f32.mrb[39].mxu1 }
 0x751   :  { %v14838_v18 = vsel %vm7273_vm2, %v7252_v0, %v7329_v28  ;;  %v6944_v43 = vmax.f32 %v6942_v58, %v6943_v56  ;;  %v6262_v24 = vmax.f32 %v6102_v11, 0.0  ;;  %v6103_v52 = vadd.f32 %v14712_v41, %v5898_v54 }
 0x753   :  { %v6945_v40 = vrot.slane %v6944_v43, 2  ;;  %v6263_v27 = vmax.f32 %v6103_v52, 0.0  ;;  %v6424_v29 = vadd.f32 %v14738_v60, %v6262_v24 }
 0x755   :  { %v6425_v39 = vadd.f32 %v14744_v48, %v6263_v27  ;;  %v6946_v6 = vmax.f32 %v6944_v43, %v6945_v40 }
 0x757   :  { %v6949_v36 = vmax.f32 %v6424_v29, %v6425_v39  ;;  %v6947_v21 = vrot.slane %v6946_v6, 1 }
 0x759   :  { %v6950_v61 = vrot.slane %v6949_v36, 4  ;;  %v6948_v45 = vmax.f32 %v6946_v6, %v6947_v21 }
 0x75a   :  { %v5902_v16 = vpop.f32.mrb[40].mxu1 }
 0x75b   :  { %v6951_v15 = vmax.f32 %v6949_v36, %v6950_v61  ;;  %v5903_v44 = vadd.f32 %v5902_v16, %v13929_v55  ;;  %v5904_v20 = vpop.f32.mrb[41].mxu1  ;;  %v7070_v23 = vpack.c.bf16 %v6948_v45, %v6948_v45 }
 0x75c   :  { %v5905_v13 = vpop.f32.mrb[42].mxu1 }
 0x75d   :  { %v6952_v7 = vrot.slane %v6951_v15, 2  ;;  %v6104_v51 = vadd.f32 %v14712_v41, %v5903_v44  ;;  %v5906_v62 = vadd.f32 %v5905_v13, %v13934_v63  ;;  %v5907_v49 = vpop.f32.mrb[43].mxu1  ;;  %v7253_v58 = vunpack.c.l.b16 %v7070_v23 }
 0x75f   :  { %v6953_v42 = vmax.f32 %v6951_v15, %v6952_v7  ;;  %v6264_v28 = vmax.f32 %v6104_v51, 0.0  ;;  %v6105_v12 = vadd.f32 %v14712_v41, %v5906_v62 }
 0x761   :  { %v6954_v17 = vrot.slane %v6953_v42, 1  ;;  %v6265_v47 = vmax.f32 %v6105_v12, 0.0  ;;  %v6426_v31 = vadd.f32 %v14738_v60, %v6264_v28 }
 0x763   :  { %v6955_v22 = vmax.f32 %v6953_v42, %v6954_v17  ;;  %v6427_v55 = vadd.f32 %v14744_v48, %v6265_v47 }
 0x764   :  { %v5910_v53 = vpop.f32.mrb[44].mxu1 }
 0x765   :  { %v7071_v9 = vpack.c.bf16 %v6955_v22, %v6955_v22  ;;  %v6956_v35 = vmax.f32 %v6426_v31, %v6427_v55  ;;  %v5911_v34 = vadd.f32 %v5910_v53, %v13947_v50  ;;  %v5912_v63 = vpop.f32.mrb[45].mxu1 }
 0x766   :  { %v5913_v4 = vpop.f32.mrb[46].mxu1 }
 0x767   :  { %v7254_v3 = vunpack.c.l.b16 %v7071_v9  ;;  %v6957_v25 = vrot.slane %v6956_v35, 4  ;;  %v6106_v0 = vadd.f32 %v14712_v41, %v5911_v34  ;;  %v5914_v56 = vadd.f32 %v5913_v4, %v13951_v46  ;;  %v5915_v11 = vpop.f32.mrb[47].mxu1 }
 0x769   :  { %v7331_v54 = vsel %vm7261_vm13, %v7254_v3, %v7253_v58  ;;  %v6958_v59 = vmax.f32 %v6956_v35, %v6957_v25  ;;  %v6266_v43 = vmax.f32 %v6106_v0, 0.0  ;;  %v6107_v24 = vadd.f32 %v14712_v41, %v5914_v56 }
 0x76b   :  { %v6959_v52 = vrot.slane %v6958_v59, 2  ;;  %v6267_v40 = vmax.f32 %v6107_v24, 0.0  ;;  %v6428_v50 = vadd.f32 %v14738_v60, %v6266_v43 }
 0x76d   :  { %v6960_v27 = vmax.f32 %v6958_v59, %v6959_v52  ;;  %v6429_v29 = vadd.f32 %v14744_v48, %v6267_v40 }
 0x76f   :  { %v6961_v39 = vrot.slane %v6960_v27, 1  ;;  %v6963_v6 = vmax.f32 %v6428_v50, %v6429_v29 }
 0x771   :  { %v6962_v36 = vmax.f32 %v6960_v27, %v6961_v39  ;;  %v6964_v61 = vrot.slane %v6963_v6, 4 }
 0x772   :  { %v5918_v21 = vpop.f32.mrb[48].mxu1 }
 0x773   :  { %v7072_v46 = vpack.c.bf16 %v6962_v36, %v6962_v36  ;;  %v6965_v16 = vmax.f32 %v6963_v6, %v6964_v61  ;;  %v5919_v15 = vadd.f32 %v5918_v21, %v13968_v30  ;;  %v5920_v44 = vpop.f32.mrb[49].mxu1 }
 0x774   :  { %v5921_v20 = vpop.f32.mrb[50].mxu1 }
 0x775   :  { %v7255_v13 = vunpack.c.l.b16 %v7072_v46  ;;  %v6966_v7 = vrot.slane %v6965_v16, 2  ;;  %v6108_v51 = vadd.f32 %v14712_v41, %v5919_v15  ;;  %v5922_v62 = vadd.f32 %v5921_v20, %v13973_v14  ;;  %v5923_v49 = vpop.f32.mrb[51].mxu1 }
 0x777   :  { %v7332_v45 = vsel %vm7263_vm1, %v7255_v13, %v7331_v54  ;;  %v6967_v42 = vmax.f32 %v6965_v16, %v6966_v7  ;;  %v6268_v28 = vmax.f32 %v6108_v51, 0.0  ;;  %v6109_v12 = vadd.f32 %v14712_v41, %v5922_v62 }
 0x779   :  { %v6968_v17 = vrot.slane %v6967_v42, 1  ;;  %v6269_v47 = vmax.f32 %v6109_v12, 0.0  ;;  %v6430_v30 = vadd.f32 %v14738_v60, %v6268_v28 }
 0x77b   :  { %v6969_v23 = vmax.f32 %v6967_v42, %v6968_v17  ;;  %v6431_v22 = vadd.f32 %v14744_v48, %v6269_v47 }
 0x77c   :  { %v5926_v31 = vpop.f32.mrb[52].mxu1 }
 0x77d   :  { %v7073_v55 = vpack.c.bf16 %v6969_v23, %v6969_v23  ;;  %v6970_v53 = vmax.f32 %v6430_v30, %v6431_v22  ;;  %v5927_v9 = vadd.f32 %v5926_v31, %v13983_v2  ;;  %v5928_v14 = vpop.f32.mrb[53].mxu1 }
 0x77e   :  { %v5929_v35 = vpop.f32.mrb[54].mxu1 }
 0x77f   :  { %v7256_v34 = vunpack.c.l.b16 %v7073_v55  ;;  %v6971_v63 = vrot.slane %v6970_v53, 4  ;;  %v6110_v58 = vadd.f32 %v14712_v41, %v5927_v9  ;;  %v5930_v4 = vadd.f32 %v5929_v35, %v13988_v57  ;;  %v5931_v3 = vpop.f32.mrb[55].mxu1 }
 0x781   :  { %v7333_v25 = vsel %vm7265_vm0, %v7256_v34, %v7332_v45  ;;  %v6972_v0 = vmax.f32 %v6970_v53, %v6971_v63  ;;  %v6270_v56 = vmax.f32 %v6110_v58, 0.0  ;;  %v6111_v11 = vadd.f32 %v14712_v41, %v5930_v4 }
 0x783   :  { %v6973_v54 = vrot.slane %v6972_v0, 2  ;;  %v6271_v59 = vmax.f32 %v6111_v11, 0.0  ;;  %v6432_v2 = vadd.f32 %v14738_v60, %v6270_v56 }
 0x785   :  { %v6974_v43 = vmax.f32 %v6972_v0, %v6973_v54  ;;  %v6433_v24 = vadd.f32 %v14744_v48, %v6271_v59 }
 0x787   :  { %v6975_v52 = vrot.slane %v6974_v43, 1  ;;  %v6977_v40 = vmax.f32 %v6432_v2, %v6433_v24 }
 0x789   :  { %v6976_v27 = vmax.f32 %v6974_v43, %v6975_v52  ;;  %v6978_v50 = vrot.slane %v6977_v40, 4 }
 0x78a   :  { %v5934_v29 = vpop.f32.mrb[56].mxu1 }
 0x78b   :  { %v7074_v57 = vpack.c.bf16 %v6976_v27, %v6976_v27  ;;  %v6979_v39 = vmax.f32 %v6977_v40, %v6978_v50  ;;  %v5935_v6 = vadd.f32 %v5934_v29, %v14001_v33  ;;  %v5936_v36 = vpop.f32.mrb[57].mxu1  ;;  %v9564_v29 = vld [vmem:[%s14952_s4] ss:$0 sm:$0xff]  ;;  %s9596_s4 = smov [#allocation2]  }
 0x78c   :  { %v5937_v61 = vpop.f32.mrb[58].mxu1  ;;  %s7584_s13 = sshll.u32 %s9596_s4, 4  ;;  %s7585_s13 = int_to_ptr.vmem [resolvable:$true] %s7584_s13 }
 0x78d   :  { %v7257_v21 = vunpack.c.l.b16 %v7074_v57  ;;  %v6980_v46 = vrot.slane %v6979_v39, 2  ;;  %v6112_v16 = vadd.f32 %v14712_v41, %v5935_v6  ;;  %v5938_v15 = vadd.f32 %v5937_v61, %v14005_v5  ;;  %v5939_v44 = vpop.f32.mrb[59].mxu1  ;;  %s9565_s14 = scalar_lea.vmem %s7585_s13, 1280  ;;  %p9570_p1 = scmp.lt.s32.totalorder %s7585_s13, %s7585_s13 }
 0x78e   :  { %p9566_p0 = scmp.ne.s32.totalorder %s7585_s13, %s9565_s14  ;;  %p9571_p2 = scmp.lt.s32.totalorder %s9565_s14, %s9565_s14 }
 0x78f   :  { %v7334_v20 = vsel %vm7267_vm5, %v7257_v21, %v7333_v25  ;;  %v6981_v13 = vmax.f32 %v6979_v39, %v6980_v46  ;;  %v6272_v7 = vmax.f32 %v6112_v16, 0.0  ;;  %v6113_v51 = vadd.f32 %v14712_v41, %v5938_v15  ;;  %v7472_v21 = vpop.xlane.xlu0 %7471  ;;  %v7470_v46 = vpop.xlane.xlu1 %7469 }
 0x790   :  { %v14891_v16 = vsub.f32 %v14612_v38, %v7470_v46  ;;  %p9572_p3 = por %p9571_p2, %p9570_p1 }
 0x791   :  { %v6982_v62 = vrot.slane %v6981_v13, 1  ;;  %v6273_v49 = vmax.f32 %v6113_v51, 0.0  ;;  %v6434_v33 = vadd.f32 %v14738_v60, %v6272_v7 }
 0x792   :  { %p9573_p4 = pnand %p9572_p3, %p9566_p0 }
 0x793   :  { %v6983_v45 = vmax.f32 %v6981_v13, %v6982_v62  ;;  %v6435_v42 = vadd.f32 %v14744_v48, %v6273_v49  ;;  %v7474_v15 = vpop.xlane.xlu0 %7473  ;;  %v7476_v44 = vpop.xlane.xlu1 %7475  ;;  %v7499_v13 = vmul.f32 1.442695, %v14891_v16 }
 0x794   :  { %v5942_v28 = vpop.f32.mrb[60].mxu1  ;;  %v14902_v62 = vsub.f32 %v14622_v19, %v7476_v44 }
 0x795   :  { %v7075_v12 = vpack.c.bf16 %v6983_v45, %v6983_v45  ;;  %v6984_v17 = vmax.f32 %v6434_v33, %v6435_v42  ;;  %v5943_v47 = vadd.f32 %v5942_v28, %v14024_v10  ;;  %v5944_v5 = vpop.f32.mrb[61].mxu1  ;;  %9239 = vpow2.f32 %v7499_v13 }
 0x796   :  { %v5945_v23 = vpop.f32.mrb[62].mxu1 }
 0x797   :  { %v7258_v30 = vunpack.c.l.b16 %v7075_v12  ;;  %v6985_v22 = vrot.slane %v6984_v17, 4  ;;  %v6114_v31 = vadd.f32 %v14712_v41, %v5943_v47  ;;  %v5946_v55 = vadd.f32 %v5945_v23, %v14029_v37  ;;  %v5947_v53 = vpop.f32.mrb[63].mxu1  ;;  %v7478_v7 = vpop.xlane.xlu0 %7477 }
 0x798   :  { %v14906_v45 = vsub.f32 %v14788_v26, %v7478_v7 }
 0x799   :  { %v7335_v9 = vsel %vm7269_vm7, %v7258_v30, %v7334_v20  ;;  %v6986_v14 = vmax.f32 %v6984_v17, %v6985_v22  ;;  %v6274_v35 = vmax.f32 %v6114_v31, 0.0  ;;  %v6115_v34 = vadd.f32 %v14712_v41, %v5946_v55  ;;  %v7480_v49 = vpop.xlane.xlu1 %7479 }
 0x79a   :  { %v14897_v20 = vsub.f32 %v14579_v1, %v7474_v15  ;;  %v7505_v1 = vmul.f32 1.442695, %v14902_v62  ;;  %v14910_v33 = vsub.f32 %v14793_v32, %v7480_v49  ;;  %v7507_v28 = vmul.f32 1.442695, %v14906_v45 }
 0x79b   :  { %v6987_v63 = vrot.slane %v6986_v14, 2  ;;  %v6275_v58 = vmax.f32 %v6115_v34, 0.0  ;;  %v6436_v10 = vadd.f32 %v14738_v60, %v6274_v35 }
 0x79c   :  { %v7503_v38 = vmul.f32 1.442695, %v14897_v20  ;;  %v7509_v26 = vmul.f32 1.442695, %v14910_v33 }
 0x79d   :  { %v6988_v4 = vmax.f32 %v6986_v14, %v6987_v63  ;;  %v6437_v3 = vadd.f32 %v14744_v48, %v6275_v58 }
 0x79f   :  { %v6989_v25 = vrot.slane %v6988_v4, 1  ;;  %v6991_v0 = vmax.f32 %v6436_v10, %v6437_v3  ;;  %v9240_v31 = vpop.eup %9239 }
 0x7a1   :  { %v6990_v56 = vmax.f32 %v6988_v4, %v6989_v25  ;;  %v6992_v11 = vrot.slane %v6991_v0, 4 }
 0x7a3   :  { %v7076_v54 = vpack.c.bf16 %v6990_v56, %v6990_v56  ;;  %v6993_v37 = vmax.f32 %v6991_v0, %v6992_v11 }
 0x7a5   :  { %v7259_v59 = vunpack.c.l.b16 %v7076_v54  ;;  %v6994_v43 = vrot.slane %v6993_v37, 2 }
 0x7a7   :  { %v7336_v2 = vsel %vm7271_vm4, %v7259_v59, %v7335_v9  ;;  %v6995_v24 = vmax.f32 %v6993_v37, %v6994_v43 }
 0x7a9   :  { %v6996_v52 = vrot.slane %v6995_v24, 1 }
 0x7ab   :  { %v6997_v41 = vmax.f32 %v6995_v24, %v6996_v52 }
 0x7ad   :  { %v7077_v40 = vpack.c.bf16 %v6997_v41, %v6997_v41 }
 0x7af   :  { %v7260_v27 = vunpack.c.l.b16 %v7077_v40 }
 0x7b1   :  { %v7337_v50 = vsel %vm7273_vm2, %v7260_v27, %v7336_v2 }
 0x7b2   :  { %v7342_v60 = vpack.c.b16 %v7337_v50, %v14838_v18  ;;  %v14894_v18 = vsub.f32 %v14251_v8, %v7472_v21 }
 0x7b4   :  { %8963 = vmatmul.mubr.bf16.gmra.mrb[68].mxu1 %v7342_v60  ;;  %v7501_v51 = vmul.f32 1.442695, %v14894_v18 }
 0x7b6   :  { %9241 = vpow2.f32 %v7501_v51 }
 0x7b7   :  { %9243 = vpow2.f32 %v7503_v38 }
 0x7b8   :  { %9245 = vpow2.f32 %v7505_v1 }
 0x7b9   :  { %9247 = vpow2.f32 %v7507_v28 }
 0x7ba   :  { %9249 = vpow2.f32 %v7509_v26 }
 0x7c0   :  { %v9242_v53 = vpop.eup %9241 }
 0x7c1   :  { %v9244_v9 = vpop.eup %9243 }
 0x7c2   :  { %v9246_v14 = vpop.eup %9245 }
 0x7c3   :  { %v9248_v35 = vpop.eup %9247 }
 0x7c4   :  { %v9250_v34 = vpop.eup %9249 }
 0x7c7   :  { %v7454_v48 = vpop.f32.mrb[64].mxu1 }
 0x7c8   :  { %v7455_v57 = vadd.f32 %v9564_v29, %v7454_v48  ;;  %v8960_v39 = vpop.f32.mrb[65].mxu1 }
 0x7c9   :  { %v7457_v6 = vpop.f32.mrb[66].mxu1 }
 0x7ca   :  { %v7458_v36 = vadd.f32 %v9564_v29, %v7457_v6  ;;  %7481 = vmax.xlane.f32.xlu0 %v7455_v57  ;;  %v8961_v61 = vpop.f32.mrb[67].mxu1 }
 0x7cc   :  { %7483 = vmax.xlane.f32.xlu1 %v7458_v36 }
 0x857   :  { %v7482_v8 = vpop.xlane.xlu0 %7481 }
 0x858   :  { %v14913_v19 = vsub.f32 %v7455_v57, %v7482_v8 }
 0x859   :  { %v7484_v42 = vpop.xlane.xlu1 %7483 }
 0x85a   :  { %v14916_v5 = vsub.f32 %v7458_v36, %v7484_v42  ;;  %v7511_v32 = vmul.f32 1.442695, %v14913_v19 }
 0x85c   :  { %v7513_v55 = vmul.f32 1.442695, %v14916_v5  ;;  %9251 = vpow2.f32 %v7511_v32 }
 0x85e   :  { %9253 = vpow2.f32 %v7513_v55 }
 0x866   :  { %v9252_v63 = vpop.eup %9251 }
 0x868   :  { %v9254_v58 = vpop.eup %9253 }
 0x887   :  { %v7462_v12 = vpop.f32.mrb[68].mxu1 }
 0x888   :  { %v7463_v17 = vadd.f32 %v9564_v29, %v7462_v12  ;;  %v8964_v47 = vpop.f32.mrb[69].mxu1 }
 0x889   :  { %v7465_v23 = vpop.f32.mrb[70].mxu1 }
 0x88a   :  { %v7466_v30 = vadd.f32 %v9564_v29, %v7465_v23  ;;  %7485 = vmax.xlane.f32.xlu0 %v7463_v17  ;;  %v8965_v22 = vpop.f32.mrb[71].mxu1 }
 0x88c   :  { %7487 = vmax.xlane.f32.xlu1 %v7466_v30 }
 0x88e   :  { %7519 = vadd.xlane.f32.xlu0 %v9240_v31 }
 0x890   :  { %7521 = vadd.xlane.f32.xlu1 %v9242_v53 }
 0x892   :  { %7523 = vadd.xlane.f32.xlu0 %v9244_v9 }
 0x894   :  { %7525 = vadd.xlane.f32.xlu1 %v9246_v14 }
 0x896   :  { %7527 = vadd.xlane.f32.xlu0 %v9248_v35 }
 0x898   :  { %7529 = vadd.xlane.f32.xlu1 %v9250_v34 }
 0x89a   :  { %7531 = vadd.xlane.f32.xlu0 %v9252_v63 }
 0x89c   :  { %7533 = vadd.xlane.f32.xlu1 %v9254_v58 }
 0x917   :  { %v7486_v4 = vpop.xlane.xlu0 %7485 }
 0x918   :  { %v14920_v10 = vsub.f32 %v7463_v17, %v7486_v4 }
 0x919   :  { %v7488_v3 = vpop.xlane.xlu1 %7487 }
 0x91a   :  { %v7515_v25 = vmul.f32 1.442695, %v14920_v10  ;;  %v14923_v0 = vsub.f32 %v7466_v30, %v7488_v3 }
 0x91b   :  { %v7520_v56 = vpop.xlane.xlu0 %7519 }
 0x91c   :  { %9255 = vpow2.f32 %v7515_v25  ;;  %v7517_v11 = vmul.f32 1.442695, %v14923_v0 }
 0x91d   :  { %9257 = vlog2.f32 %v7520_v56  ;;  %v7522_v54 = vpop.xlane.xlu1 %7521 }
 0x91e   :  { %9259 = vpow2.f32 %v7517_v11 }
 0x91f   :  { %9261 = vlog2.f32 %v7522_v54  ;;  %v7524_v37 = vpop.xlane.xlu0 %7523 }
 0x920   :  { %9263 = vlog2.f32 %v7524_v37 }
 0x921   :  { %v7526_v59 = vpop.xlane.xlu1 %7525 }
 0x922   :  { %9265 = vlog2.f32 %v7526_v59 }
 0x923   :  { %v7528_v43 = vpop.xlane.xlu0 %7527 }
 0x924   :  { %9267 = vlog2.f32 %v7528_v43 }
 0x925   :  { %v7530_v2 = vpop.xlane.xlu1 %7529 }
 0x926   :  { %v9256_v24 = vpop.eup %9255  ;;  %9269 = vlog2.f32 %v7530_v2 }
 0x927   :  { %v9258_v52 = vpop.eup %9257  ;;  %7535 = vadd.xlane.f32.xlu0 %v9256_v24  ;;  %v7532_v41 = vpop.xlane.xlu0 %7531 }
 0x928   :  { %v9260_v40 = vpop.eup %9259  ;;  %v7540_v27 = vmul.f32 0.6931472, %v9258_v52  ;;  %9271 = vlog2.f32 %v7532_v41 }
 0x929   :  { %v9262_v50 = vpop.eup %9261  ;;  %7537 = vadd.xlane.f32.xlu1 %v9260_v40  ;;  %v7534_v60 = vpop.xlane.xlu1 %7533 }
 0x92a   :  { %v9264_v48 = vpop.eup %9263  ;;  %v7559_v29 = vsub.f32 %v14891_v16, %v7540_v27  ;;  %v7542_v57 = vmul.f32 0.6931472, %v9262_v50  ;;  %9273 = vlog2.f32 %v7534_v60 }
 0x92b   :  { %v7544_v39 = vmul.f32 0.6931472, %v9264_v48 }
 0x92c   :  { %v9266_v6 = vpop.eup %9265  ;;  %7569 = vst [vmem:[#allocation2] sm:$0xff] %v7559_v29  ;;  %v7560_v36 = vsub.f32 %v14894_v18, %v7542_v57 }
 0x92d   :  { %v7561_v61 = vsub.f32 %v14897_v20, %v7544_v39  ;;  %v7546_v21 = vmul.f32 0.6931472, %v9266_v6 }
 0x92e   :  { %v9268_v46 = vpop.eup %9267  ;;  %7570 = vst [vmem:[#allocation2 + $0x8] sm:$0xff] %v7560_v36 }
 0x92f   :  { %7571 = vst [vmem:[#allocation2 + $0x10] sm:$0xff] %v7561_v61  ;;  %v7562_v15 = vsub.f32 %v14902_v62, %v7546_v21  ;;  %v7548_v44 = vmul.f32 0.6931472, %v9268_v46 }
 0x930   :  { %v9270_v13 = vpop.eup %9269 }
 0x931   :  { %7572 = vst [vmem:[#allocation2 + $0x18] sm:$0xff] %v7562_v15  ;;  %v7563_v16 = vsub.f32 %v14906_v45, %v7548_v44  ;;  %v7550_v7 = vmul.f32 0.6931472, %v9270_v13 }
 0x932   :  { %v9272_v51 = vpop.eup %9271 }
 0x933   :  { %7573 = vst [vmem:[#allocation2 + $0x20] sm:$0xff] %v7563_v16  ;;  %v7564_v49 = vsub.f32 %v14910_v33, %v7550_v7  ;;  %v7552_v38 = vmul.f32 0.6931472, %v9272_v51 }
 0x934   :  { %v9274_v18 = vpop.eup %9273 }
 0x935   :  { %7574 = vst [vmem:[#allocation2 + $0x28] sm:$0xff] %v7564_v49  ;;  %v7565_v20 = vsub.f32 %v14913_v19, %v7552_v38  ;;  %v7554_v8 = vmul.f32 0.6931472, %v9274_v18 }
 0x937   :  { %7575 = vst [vmem:[#allocation2 + $0x30] sm:$0xff] %v7565_v20  ;;  %v7566_v1 = vsub.f32 %v14916_v5, %v7554_v8 }
 0x939   :  { %7576 = vst [vmem:[#allocation2 + $0x38] sm:$0xff] %v7566_v1 }
 0x9b4   :  { %v7536_v62 = vpop.xlane.xlu0 %7535 }
 0x9b5   :  { %9275 = vlog2.f32 %v7536_v62 }
 0x9b6   :  { %v7538_v42 = vpop.xlane.xlu1 %7537 }
 0x9b7   :  { %9277 = vlog2.f32 %v7538_v42 }
 0x9bf   :  { %v9276_v45 = vpop.eup %9275 }
 0x9c0   :  { %v7556_v28 = vmul.f32 0.6931472, %v9276_v45 }
 0x9c1   :  { %v9278_v12 = vpop.eup %9277 }
 0x9c2   :  { %v7567_v33 = vsub.f32 %v14920_v10, %v7556_v28  ;;  %v7558_v17 = vmul.f32 0.6931472, %v9278_v12 }
 0x9c4   :  { %7577 = vst [vmem:[#allocation2 + $0x40] sm:$0xff] %v7567_v33  ;;  %v7568_v19 = vsub.f32 %v14923_v0, %v7558_v17 }
 0x9c6   :  { %7578 = vst [vmem:[#allocation2 + $0x48] sm:$0xff] %v7568_v19 }
 0x9c7   :  { %9576 = shalt.err (!%p9573_p4)
}
 0x9c8   :  { %s9577_s17 = scalar_lea.hbm %s14954_s6, 1280 }
 0x9c9   :  { %p9578_p5 = scmp.ne.s32.totalorder %s14954_s6, %s9577_s17  ;;  %p9581_p6 = scmp.lt.u32.totalorder %s9577_s17, %s14954_s6 }
 0x9cb   :  { %p9583_p7 = pnand %p9581_p6, %p9578_p5 }
 0x9cd   :  { %9586 = shalt.err (!%p9583_p7)
}
 0x9ce   :  { %s9597_s3 = smov 128   ;;  %s9598_s22 = smov 8  }
 0x9cf   :  { %7590 = dma.vmem_to_hbm [thread:$0]  %s7585_s13, 1280, %s14954_s6, [#allocation3], %s9597_s3, %s9597_s3, %s9598_s22  }
 0x9d0   :  { %9587 = dma.done.wait [#allocation3], 1280  }
 0x9d1   :  { %9588 = vsyncadd [#allocation3], 4294966016 }
 0x9d2   :  { %7594 = vsyncpa [#allocation3], 1 }

</bundles_post_ra>
